<compile_context>
chip_gen: v7x
topology: tpu7x:2x2x1
jax: 0.10.0
libtpu: 0.0.40
codegen_flags: <defaults>
</compile_context>

<pallas_src>
import jax
import jax.numpy as jnp
from jax.experimental import pallas as pl
from jax.experimental.pallas import tpu as pltpu

# ---------------- model hyper-parameters (small, consistent with the module) -------------
VOCAB = 50          # synthetic BERT vocab
HB = 64             # synthetic BERT hidden_size (embedding_dim)
IMG = 16            # image spatial size (NCHW: (B, 3, 16, 16))
T_TXT = 8           # text sequence length
T_J = 8             # lstm sequence length
D_J = 8             # lstm_input_dim
H_L = 32            # lstm_hidden_dim
NUM_LAYERS = 4      # lstm num_layers
E_ATT = 512         # attention embed dim (hard-coded in the module)
OUT_DIM = 512       # lstm_linear output dim (must be 512 so torch.stack works)
NUM_HEADS = 4       # (unused at L=1: head split + 1/sqrt(d) scaling cancel under softmax)

F32 = jnp.float32
BF16 = jnp.bfloat16


# =========================================================================================
# Fused forward kernel.  Single invocation (no grid); every array is a whole-block VMEM
# resident.  All matmuls accumulate in f32 (preferred_element_type); big weights are bf16.
# =========================================================================================
def fused_forward_kernel(
    pooled_ref, pool_w_ref, pool_b_ref,                 # synthetic BERT pooler
    fc_w_ref, fc_b_ref,                                 # fc -> 512 (+ relu)
    imgs_ref, bb_w_ref, bb_b_ref,                       # both image backbones, batched M=2
    xj_ref, wih0_ref, wihr_ref, whh_ref, blstm_ref,     # LSTM (blstm = b_ih + b_hh folded)
    llin_w_ref, llin_b_ref,                             # lstm_linear
    wv_ref, bv_ref, wo_ref, bo_ref,                     # MHA (L=1 -> V-proj + out-proj only)
    fin_w_ref, fin_b_ref,                               # final_fc weight reshaped (4, 512)
    out_ref,                                            # (1, 1) output
):
    # ---- text branch: tanh pooler (tiny, f32), then fc + relu (bf16 MXU, f32 acc) ----
    pooled = pooled_ref[...]                                                    # (1, HB)
    te = jnp.tanh(
        jnp.dot(pooled, pool_w_ref[...], preferred_element_type=F32) + pool_b_ref[...]
    )                                                                           # (1, HB)
    text_out = jnp.maximum(
        jnp.dot(te.astype(BF16), fc_w_ref[...], preferred_element_type=F32) + fc_b_ref[...],
        0.0,
    )                                                                           # (1, 512)

    # ---- image branch: first+last images in ONE M=2 matmul against the shared weight ----
    img_feats = jnp.maximum(
        jnp.dot(imgs_ref[...].astype(BF16), bb_w_ref[...], preferred_element_type=F32)
        + bb_b_ref[...],
        0.0,
    )                                                                           # (2, 512)

    # ---- LSTM: fully unrolled (layers x timesteps), h/c carried in vregs, PyTorch
    #      gate order [i, f, g, o], zero initial state (as in the module) ----
    x = xj_ref[...]                                                             # (T, D)
    layer_in = [x[t:t + 1, :] for t in range(T_J)]                              # list of (1, D)
    hn_rows = []
    for layer in range(NUM_LAYERS):
        wih = wih0_ref[...] if layer == 0 else wihr_ref[layer - 1]              # hoisted loads
        whh = whh_ref[layer]
        b = blstm_ref[layer:layer + 1, :]                                       # (1, 4H)
        h = jnp.zeros((1, H_L), F32)
        c = jnp.zeros((1, H_L), F32)
        outs = []
        for t in range(T_J):
            gates = (jnp.dot(layer_in[t], wih, preferred_element_type=F32)
                     + jnp.dot(h, whh, preferred_element_type=F32) + b)         # (1, 4H)
            i_g = jax.nn.sigmoid(gates[:, 0:H_L])
            f_g = jax.nn.sigmoid(gates[:, H_L:2 * H_L])
            g_g = jnp.tanh(gates[:, 2 * H_L:3 * H_L])
            o_g = jax.nn.sigmoid(gates[:, 3 * H_L:4 * H_L])
            c = f_g * c + i_g * g_g
            h = o_g * jnp.tanh(c)
            outs.append(h)
        layer_in = outs                                                         # feeds next layer
        hn_rows.append(h)                                                       # final h of layer
    # hn.view(-1, hidden*num_layers) == [h_l0 | h_l1 | h_l2 | h_l3] along features
    hn = jnp.concatenate(hn_rows, axis=-1)                                      # (1, L*H) = (1, 128)
    lstm_out = (jnp.dot(hn.astype(BF16), llin_w_ref[...], preferred_element_type=F32)
                + llin_b_ref[...])                                              # (1, 512)

    # ---- stack [text, first, last, lstm] and run the multi-head attention.
    #      With batch_first=False and B=1, MHA sees (L=1, N=4, E=512); softmax over a
    #      single key is identically 1, so attention == out_proj(v_proj(x)) exactly. ----
    x4 = jnp.concatenate([text_out, img_feats, lstm_out], axis=0)               # (4, 512)
    v = jnp.dot(x4.astype(BF16), wv_ref[...], preferred_element_type=F32) + bv_ref[...]
    attn = jnp.dot(v.astype(BF16), wo_ref[...], preferred_element_type=F32) + bo_ref[...]

    # ---- final_fc on flatten(attn): (1,2048)x(2048,1) done as VPU multiply + reduce ----
    partial = jnp.sum(attn * fin_w_ref[...], axis=1, keepdims=True)             # (4, 1) lane reduce
    logit = jnp.sum(partial, axis=0, keepdims=True) + fin_b_ref[...]            # (1, 1)
    out_ref[...] = jax.nn.sigmoid(logit)


def fused_forward(pooled, imgs, xj, p):
    """Single pallas_call for the whole forward pass (B = 1)."""
    # MHA specialization (exact for L=1): only the V columns of in_proj are needed.
    wv = p["mha_win"][:, 2 * E_ATT:]
    bv = p["mha_bin"][:, 2 * E_ATT:]
    # Pre-fold b_ih + b_hh (constant under jit — folded once, not per timestep in-kernel).
    lstm_b = p["bih"] + p["bhh"]
    # final_fc weight (2048, 1) reshaped to (4, 512) so the kernel can do mult+reduce.
    fin_w2d = p["final_w"].reshape(4, E_ATT)
    return pl.pallas_call(
        fused_forward_kernel,
        out_shape=jax.ShapeDtypeStruct((1, 1), jnp.float32),
    )(
        pooled, p["pool_w"], p["pool_b"],
        p["fc_w"], p["fc_b"],
        imgs, p["bb_w"], p["bb_b"],
        xj, p["wih0"], p["wihr"], p["whh"], lstm_b,
        p["lstm_lin_w"], p["lstm_lin_b"],
        wv, bv, p["mha_wo"], p["mha_bo"],
        fin_w2d, p["final_b"],
    )


# =========================================================================================
# Parameters (deterministic synthetic init — this is not a checkpoint load).
# Big MXU weights stored in bf16 (f32 accumulation in-kernel); biases / tiny weights f32.
# =========================================================================================
def init_params(key):
    ks = jax.random.split(key, 16)

    def w(k, shape, scale=0.05, dtype=F32):
        return (jax.random.normal(k, shape, F32) * scale).astype(dtype)

    p = {}
    p["emb"] = w(ks[0], (VOCAB, HB), 0.1)
    p["pool_w"] = w(ks[1], (HB, HB));                          p["pool_b"] = jnp.zeros((1, HB), F32)
    p["fc_w"] = w(ks[2], (HB, E_ATT), dtype=BF16);             p["fc_b"] = jnp.zeros((1, E_ATT), F32)
    p["bb_w"] = w(ks[3], (3 * IMG * IMG, E_ATT), 0.02, BF16);  p["bb_b"] = jnp.zeros((1, E_ATT), F32)
    p["wih0"] = w(ks[4], (D_J, 4 * H_L))
    p["wihr"] = w(ks[5], (NUM_LAYERS - 1, H_L, 4 * H_L))
    p["whh"] = w(ks[6], (NUM_LAYERS, H_L, 4 * H_L))
    p["bih"] = jnp.zeros((NUM_LAYERS, 4 * H_L), F32)
    p["bhh"] = jnp.zeros((NUM_LAYERS, 4 * H_L), F32)
    p["lstm_lin_w"] = w(ks[7], (NUM_LAYERS * H_L, OUT_DIM), dtype=BF16)
    p["lstm_lin_b"] = jnp.zeros((1, OUT_DIM), F32)
    p["mha_win"] = w(ks[8], (E_ATT, 3 * E_ATT), dtype=BF16);   p["mha_bin"] = jnp.zeros((1, 3 * E_ATT), F32)
    p["mha_wo"] = w(ks[9], (E_ATT, E_ATT), dtype=BF16);        p["mha_bo"] = jnp.zeros((1, E_ATT), F32)
    p["final_w"] = w(ks[10], (4 * E_ATT, 1));                  p["final_b"] = jnp.zeros((1, 1), F32)
    return p


# =========================================================================================
# Forward pass.  Only the (data-dependent) embedding gather / masked mean pool and the
# image flattening are plain-JAX glue; everything else runs inside the fused kernel.
# =========================================================================================
def forward(p, input_ids, attention_mask, first_image_batch, last_image_batch,
            joints_and_endpos_batch):
    B = input_ids.shape[0]
    assert B == 1, "module hard-codes LSTM hidden state batch=1; forward only supports B=1"

    # ---- synthetic BERT: token embedding gather + masked mean pool (glue) ----
    emb = p["emb"][input_ids]                                 # (B, T, HB)
    mask = attention_mask.astype(jnp.float32)                 # (B, T)
    pooled = (emb * mask[..., None]).sum(axis=1) / jnp.maximum(
        mask.sum(axis=1, keepdims=True), 1.0)                 # (B, HB)

    # ---- flatten both NCHW images and batch them into one (2, C*H*W) slab ----
    imgs = jnp.concatenate(
        [first_image_batch.reshape(B, -1), last_image_batch.reshape(B, -1)], axis=0)

    # ---- everything else is one fused Pallas kernel ----
    return fused_forward(pooled, imgs, joints_and_endpos_batch[0], p)   # (1, 1)


if __name__ == "__main__":
    key = jax.random.PRNGKey(0)
    kids = jax.random.split(key, 5)
    B = 1
    input_ids = jax.random.randint(kids[0], (B, T_TXT), 0, VOCAB, dtype=jnp.int32)
    attention_mask = jnp.ones((B, T_TXT), dtype=jnp.int32)
    first_image_batch = jax.random.normal(kids[1], (B, 3, IMG, IMG), jnp.float32)
    last_image_batch = jax.random.normal(kids[2], (B, 3, IMG, IMG), jnp.float32)
    joints_and_endpos_batch = jax.random.normal(kids[3], (B, T_J, D_J), jnp.float32)

    params = init_params(jax.random.PRNGKey(1))

    fwd = jax.jit(forward)
    out = fwd(params, input_ids, attention_mask, first_image_batch,
              last_image_batch, joints_and_endpos_batch)
    out = jax.block_until_ready(out)
    assert out.shape == (B, 1)
    assert bool(jnp.all(jnp.isfinite(out)))
    print("KERNEL_OK")
</pallas_src>

<mosaic_0001>
module attributes {stable_mosaic.version = 11 : i64} {
  func.func @fused_forward_kernel(%arg0: memref<1x64xf32, #tpu.memory_space<vmem>>, %arg1: memref<64x64xf32, #tpu.memory_space<vmem>>, %arg2: memref<1x64xf32, #tpu.memory_space<vmem>>, %arg3: memref<64x512xbf16, #tpu.memory_space<vmem>>, %arg4: memref<1x512xf32, #tpu.memory_space<vmem>>, %arg5: memref<2x768xf32, #tpu.memory_space<vmem>>, %arg6: memref<768x512xbf16, #tpu.memory_space<vmem>>, %arg7: memref<1x512xf32, #tpu.memory_space<vmem>>, %arg8: memref<8x8xf32, #tpu.memory_space<vmem>>, %arg9: memref<8x128xf32, #tpu.memory_space<vmem>>, %arg10: memref<3x32x128xf32, #tpu.memory_space<vmem>>, %arg11: memref<4x32x128xf32, #tpu.memory_space<vmem>>, %arg12: memref<4x128xf32, #tpu.memory_space<vmem>>, %arg13: memref<128x512xbf16, #tpu.memory_space<vmem>>, %arg14: memref<1x512xf32, #tpu.memory_space<vmem>>, %arg15: memref<512x512xbf16, #tpu.memory_space<vmem>>, %arg16: memref<1x512xf32, #tpu.memory_space<vmem>>, %arg17: memref<512x512xbf16, #tpu.memory_space<vmem>>, %arg18: memref<1x512xf32, #tpu.memory_space<vmem>>, %arg19: memref<4x512xf32, #tpu.memory_space<vmem>>, %arg20: memref<1x1xf32, #tpu.memory_space<vmem>>, %arg21: memref<1x1xf32, #tpu.memory_space<vmem>>) attributes {dimension_semantics = [], scalar_prefetch = 0 : i64, scratch_operands = 0 : i64, tpu.core_type = #tpu.core_type<tc>} {
    %c0 = arith.constant 0 : index
    %c0_0 = arith.constant 0 : index
    %0 = vector.load %arg0[%c0, %c0_0] : memref<1x64xf32, #tpu.memory_space<vmem>>, vector<1x64xf32>
    %c0_1 = arith.constant 0 : index
    %c0_2 = arith.constant 0 : index
    %1 = vector.load %arg1[%c0_1, %c0_2] : memref<64x64xf32, #tpu.memory_space<vmem>>, vector<64x64xf32>
    %cst = arith.constant dense<0.000000e+00> : vector<1x64xf32>
    %2 = tpu.matmul %0, %1, %cst {dimension_numbers = #tpu.dot_dimension_numbers<[1], [0], [0], [1], [0, 0, 1, 1], [], []>} : vector<1x64xf32>, vector<64x64xf32>, vector<1x64xf32> -> vector<1x64xf32>
    %c0_3 = arith.constant 0 : index
    %c0_4 = arith.constant 0 : index
    %3 = vector.load %arg2[%c0_3, %c0_4] : memref<1x64xf32, #tpu.memory_space<vmem>>, vector<1x64xf32>
    %4 = arith.addf %2, %3 : vector<1x64xf32>
    %5 = math.tanh %4 : vector<1x64xf32>
    %6 = arith.truncf %5 : vector<1x64xf32> to vector<1x64xbf16>
    %c0_5 = arith.constant 0 : index
    %c0_6 = arith.constant 0 : index
    %7 = vector.load %arg3[%c0_5, %c0_6] : memref<64x512xbf16, #tpu.memory_space<vmem>>, vector<64x512xbf16>
    %cst_7 = arith.constant dense<0.000000e+00> : vector<1x512xf32>
    %8 = tpu.matmul %6, %7, %cst_7 {dimension_numbers = #tpu.dot_dimension_numbers<[1], [0], [0], [1], [0, 0, 1, 1], [], []>} : vector<1x64xbf16>, vector<64x512xbf16>, vector<1x512xf32> -> vector<1x512xf32>
    %c0_8 = arith.constant 0 : index
    %c0_9 = arith.constant 0 : index
    %9 = vector.load %arg4[%c0_8, %c0_9] : memref<1x512xf32, #tpu.memory_space<vmem>>, vector<1x512xf32>
    %10 = arith.addf %8, %9 : vector<1x512xf32>
    %cst_10 = arith.constant 0.000000e+00 : f32
    %11 = vector.broadcast %cst_10 : f32 to vector<1x512xf32>
    %12 = arith.maximumf %10, %11 : vector<1x512xf32>
    %c0_11 = arith.constant 0 : index
    %c0_12 = arith.constant 0 : index
    %13 = vector.load %arg5[%c0_11, %c0_12] : memref<2x768xf32, #tpu.memory_space<vmem>>, vector<2x768xf32>
    %14 = arith.truncf %13 : vector<2x768xf32> to vector<2x768xbf16>
    %c0_13 = arith.constant 0 : index
    %c0_14 = arith.constant 0 : index
    %15 = vector.load %arg6[%c0_13, %c0_14] : memref<768x512xbf16, #tpu.memory_space<vmem>>, vector<768x512xbf16>
    %cst_15 = arith.constant dense<0.000000e+00> : vector<2x512xf32>
    %16 = tpu.matmul %14, %15, %cst_15 {dimension_numbers = #tpu.dot_dimension_numbers<[1], [0], [0], [1], [0, 0, 1, 1], [], []>} : vector<2x768xbf16>, vector<768x512xbf16>, vector<2x512xf32> -> vector<2x512xf32>
    %c0_16 = arith.constant 0 : index
    %c0_17 = arith.constant 0 : index
    %17 = vector.load %arg7[%c0_16, %c0_17] : memref<1x512xf32, #tpu.memory_space<vmem>>, vector<1x512xf32>
    %18 = vector.broadcast %17 : vector<1x512xf32> to vector<2x512xf32>
    %19 = arith.addf %16, %18 : vector<2x512xf32>
    %cst_18 = arith.constant 0.000000e+00 : f32
    %20 = vector.broadcast %cst_18 : f32 to vector<2x512xf32>
    %21 = arith.maximumf %19, %20 : vector<2x512xf32>
    %c0_19 = arith.constant 0 : index
    %c0_20 = arith.constant 0 : index
    %22 = vector.load %arg8[%c0_19, %c0_20] : memref<8x8xf32, #tpu.memory_space<vmem>>, vector<8x8xf32>
    %23 = vector.extract_strided_slice %22 {offsets = [0, 0], sizes = [1, 8], strides = [1, 1]} : vector<8x8xf32> to vector<1x8xf32>
    %24 = vector.extract_strided_slice %22 {offsets = [1, 0], sizes = [1, 8], strides = [1, 1]} : vector<8x8xf32> to vector<1x8xf32>
    %25 = vector.extract_strided_slice %22 {offsets = [2, 0], sizes = [1, 8], strides = [1, 1]} : vector<8x8xf32> to vector<1x8xf32>
    %26 = vector.extract_strided_slice %22 {offsets = [3, 0], sizes = [1, 8], strides = [1, 1]} : vector<8x8xf32> to vector<1x8xf32>
    %27 = vector.extract_strided_slice %22 {offsets = [4, 0], sizes = [1, 8], strides = [1, 1]} : vector<8x8xf32> to vector<1x8xf32>
    %28 = vector.extract_strided_slice %22 {offsets = [5, 0], sizes = [1, 8], strides = [1, 1]} : vector<8x8xf32> to vector<1x8xf32>
    %29 = vector.extract_strided_slice %22 {offsets = [6, 0], sizes = [1, 8], strides = [1, 1]} : vector<8x8xf32> to vector<1x8xf32>
    %30 = vector.extract_strided_slice %22 {offsets = [7, 0], sizes = [1, 8], strides = [1, 1]} : vector<8x8xf32> to vector<1x8xf32>
    %c0_21 = arith.constant 0 : index
    %c0_22 = arith.constant 0 : index
    %31 = vector.load %arg9[%c0_21, %c0_22] : memref<8x128xf32, #tpu.memory_space<vmem>>, vector<8x128xf32>
    %c0_23 = arith.constant 0 : index
    %c0_24 = arith.constant 0 : index
    %c0_25 = arith.constant 0 : index
    %32 = vector.load %arg11[%c0_23, %c0_24, %c0_25] : memref<4x32x128xf32, #tpu.memory_space<vmem>>, vector<1x32x128xf32>
    %33 = vector.shape_cast %32 : vector<1x32x128xf32> to vector<32x128xf32>
    %c0_26 = arith.constant 0 : index
    %c0_27 = arith.constant 0 : index
    %34 = vector.load %arg12[%c0_26, %c0_27] : memref<4x128xf32, #tpu.memory_space<vmem>>, vector<1x128xf32>
    %cst_28 = arith.constant 0.000000e+00 : f32
    %35 = vector.broadcast %cst_28 : f32 to vector<1x32xf32>
    %cst_29 = arith.constant 0.000000e+00 : f32
    %36 = vector.broadcast %cst_29 : f32 to vector<1x32xf32>
    %cst_30 = arith.constant dense<0.000000e+00> : vector<1x128xf32>
    %37 = tpu.matmul %23, %31, %cst_30 {dimension_numbers = #tpu.dot_dimension_numbers<[1], [0], [0], [1], [0, 0, 1, 1], [], []>} : vector<1x8xf32>, vector<8x128xf32>, vector<1x128xf32> -> vector<1x128xf32>
    %cst_31 = arith.constant dense<0.000000e+00> : vector<1x128xf32>
    %38 = tpu.matmul %35, %33, %cst_31 {dimension_numbers = #tpu.dot_dimension_numbers<[1], [0], [0], [1], [0, 0, 1, 1], [], []>} : vector<1x32xf32>, vector<32x128xf32>, vector<1x128xf32> -> vector<1x128xf32>
    %39 = arith.addf %37, %38 : vector<1x128xf32>
    %40 = arith.addf %39, %34 : vector<1x128xf32>
    %41 = vector.extract_strided_slice %40 {offsets = [0, 0], sizes = [1, 32], strides = [1, 1]} : vector<1x128xf32> to vector<1x32xf32>
    %42 = arith.negf %41 : vector<1x32xf32>
    %43 = math.exp %42 : vector<1x32xf32>
    %cst_32 = arith.constant 1.000000e+00 : f32
    %44 = vector.broadcast %cst_32 : f32 to vector<1x32xf32>
    %45 = arith.addf %44, %43 : vector<1x32xf32>
    %46 = arith.divf %44, %45 : vector<1x32xf32>
    %47 = vector.extract_strided_slice %40 {offsets = [0, 32], sizes = [1, 32], strides = [1, 1]} : vector<1x128xf32> to vector<1x32xf32>
    %48 = arith.negf %47 : vector<1x32xf32>
    %49 = math.exp %48 : vector<1x32xf32>
    %cst_33 = arith.constant 1.000000e+00 : f32
    %50 = vector.broadcast %cst_33 : f32 to vector<1x32xf32>
    %51 = arith.addf %50, %49 : vector<1x32xf32>
    %52 = arith.divf %50, %51 : vector<1x32xf32>
    %53 = vector.extract_strided_slice %40 {offsets = [0, 64], sizes = [1, 32], strides = [1, 1]} : vector<1x128xf32> to vector<1x32xf32>
    %54 = math.tanh %53 : vector<1x32xf32>
    %55 = vector.extract_strided_slice %40 {offsets = [0, 96], sizes = [1, 32], strides = [1, 1]} : vector<1x128xf32> to vector<1x32xf32>
    %56 = arith.negf %55 : vector<1x32xf32>
    %57 = math.exp %56 : vector<1x32xf32>
    %cst_34 = arith.constant 1.000000e+00 : f32
    %58 = vector.broadcast %cst_34 : f32 to vector<1x32xf32>
    %59 = arith.addf %58, %57 : vector<1x32xf32>
    %60 = arith.divf %58, %59 : vector<1x32xf32>
    %61 = arith.mulf %52, %36 : vector<1x32xf32>
    %62 = arith.mulf %46, %54 : vector<1x32xf32>
    %63 = arith.addf %61, %62 : vector<1x32xf32>
    %64 = math.tanh %63 : vector<1x32xf32>
    %65 = arith.mulf %60, %64 : vector<1x32xf32>
    %cst_35 = arith.constant dense<0.000000e+00> : vector<1x128xf32>
    %66 = tpu.matmul %24, %31, %cst_35 {dimension_numbers = #tpu.dot_dimension_numbers<[1], [0], [0], [1], [0, 0, 1, 1], [], []>} : vector<1x8xf32>, vector<8x128xf32>, vector<1x128xf32> -> vector<1x128xf32>
    %cst_36 = arith.constant dense<0.000000e+00> : vector<1x128xf32>
    %67 = tpu.matmul %65, %33, %cst_36 {dimension_numbers = #tpu.dot_dimension_numbers<[1], [0], [0], [1], [0, 0, 1, 1], [], []>} : vector<1x32xf32>, vector<32x128xf32>, vector<1x128xf32> -> vector<1x128xf32>
    %68 = arith.addf %66, %67 : vector<1x128xf32>
    %69 = arith.addf %68, %34 : vector<1x128xf32>
    %70 = vector.extract_strided_slice %69 {offsets = [0, 0], sizes = [1, 32], strides = [1, 1]} : vector<1x128xf32> to vector<1x32xf32>
    %71 = arith.negf %70 : vector<1x32xf32>
    %72 = math.exp %71 : vector<1x32xf32>
    %cst_37 = arith.constant 1.000000e+00 : f32
    %73 = vector.broadcast %cst_37 : f32 to vector<1x32xf32>
    %74 = arith.addf %73, %72 : vector<1x32xf32>
    %75 = arith.divf %73, %74 : vector<1x32xf32>
    %76 = vector.extract_strided_slice %69 {offsets = [0, 32], sizes = [1, 32], strides = [1, 1]} : vector<1x128xf32> to vector<1x32xf32>
    %77 = arith.negf %76 : vector<1x32xf32>
    %78 = math.exp %77 : vector<1x32xf32>
    %cst_38 = arith.constant 1.000000e+00 : f32
    %79 = vector.broadcast %cst_38 : f32 to vector<1x32xf32>
    %80 = arith.addf %79, %78 : vector<1x32xf32>
    %81 = arith.divf %79, %80 : vector<1x32xf32>
    %82 = vector.extract_strided_slice %69 {offsets = [0, 64], sizes = [1, 32], strides = [1, 1]} : vector<1x128xf32> to vector<1x32xf32>
    %83 = math.tanh %82 : vector<1x32xf32>
    %84 = vector.extract_strided_slice %69 {offsets = [0, 96], sizes = [1, 32], strides = [1, 1]} : vector<1x128xf32> to vector<1x32xf32>
    %85 = arith.negf %84 : vector<1x32xf32>
    %86 = math.exp %85 : vector<1x32xf32>
    %cst_39 = arith.constant 1.000000e+00 : f32
    %87 = vector.broadcast %cst_39 : f32 to vector<1x32xf32>
    %88 = arith.addf %87, %86 : vector<1x32xf32>
    %89 = arith.divf %87, %88 : vector<1x32xf32>
    %90 = arith.mulf %81, %63 : vector<1x32xf32>
    %91 = arith.mulf %75, %83 : vector<1x32xf32>
    %92 = arith.addf %90, %91 : vector<1x32xf32>
    %93 = math.tanh %92 : vector<1x32xf32>
    %94 = arith.mulf %89, %93 : vector<1x32xf32>
    %cst_40 = arith.constant dense<0.000000e+00> : vector<1x128xf32>
    %95 = tpu.matmul %25, %31, %cst_40 {dimension_numbers = #tpu.dot_dimension_numbers<[1], [0], [0], [1], [0, 0, 1, 1], [], []>} : vector<1x8xf32>, vector<8x128xf32>, vector<1x128xf32> -> vector<1x128xf32>
    %cst_41 = arith.constant dense<0.000000e+00> : vector<1x128xf32>
    %96 = tpu.matmul %94, %33, %cst_41 {dimension_numbers = #tpu.dot_dimension_numbers<[1], [0], [0], [1], [0, 0, 1, 1], [], []>} : vector<1x32xf32>, vector<32x128xf32>, vector<1x128xf32> -> vector<1x128xf32>
    %97 = arith.addf %95, %96 : vector<1x128xf32>
    %98 = arith.addf %97, %34 : vector<1x128xf32>
    %99 = vector.extract_strided_slice %98 {offsets = [0, 0], sizes = [1, 32], strides = [1, 1]} : vector<1x128xf32> to vector<1x32xf32>
    %100 = arith.negf %99 : vector<1x32xf32>
    %101 = math.exp %100 : vector<1x32xf32>
    %cst_42 = arith.constant 1.000000e+00 : f32
    %102 = vector.broadcast %cst_42 : f32 to vector<1x32xf32>
    %103 = arith.addf %102, %101 : vector<1x32xf32>
    %104 = arith.divf %102, %103 : vector<1x32xf32>
    %105 = vector.extract_strided_slice %98 {offsets = [0, 32], sizes = [1, 32], strides = [1, 1]} : vector<1x128xf32> to vector<1x32xf32>
    %106 = arith.negf %105 : vector<1x32xf32>
    %107 = math.exp %106 : vector<1x32xf32>
    %cst_43 = arith.constant 1.000000e+00 : f32
    %108 = vector.broadcast %cst_43 : f32 to vector<1x32xf32>
    %109 = arith.addf %108, %107 : vector<1x32xf32>
    %110 = arith.divf %108, %109 : vector<1x32xf32>
    %111 = vector.extract_strided_slice %98 {offsets = [0, 64], sizes = [1, 32], strides = [1, 1]} : vector<1x128xf32> to vector<1x32xf32>
    %112 = math.tanh %111 : vector<1x32xf32>
    %113 = vector.extract_strided_slice %98 {offsets = [0, 96], sizes = [1, 32], strides = [1, 1]} : vector<1x128xf32> to vector<1x32xf32>
    %114 = arith.negf %113 : vector<1x32xf32>
    %115 = math.exp %114 : vector<1x32xf32>
    %cst_44 = arith.constant 1.000000e+00 : f32
    %116 = vector.broadcast %cst_44 : f32 to vector<1x32xf32>
    %117 = arith.addf %116, %115 : vector<1x32xf32>
    %118 = arith.divf %116, %117 : vector<1x32xf32>
    %119 = arith.mulf %110, %92 : vector<1x32xf32>
    %120 = arith.mulf %104, %112 : vector<1x32xf32>
    %121 = arith.addf %119, %120 : vector<1x32xf32>
    %122 = math.tanh %121 : vector<1x32xf32>
    %123 = arith.mulf %118, %122 : vector<1x32xf32>
    %cst_45 = arith.constant dense<0.000000e+00> : vector<1x128xf32>
    %124 = tpu.matmul %26, %31, %cst_45 {dimension_numbers = #tpu.dot_dimension_numbers<[1], [0], [0], [1], [0, 0, 1, 1], [], []>} : vector<1x8xf32>, vector<8x128xf32>, vector<1x128xf32> -> vector<1x128xf32>
    %cst_46 = arith.constant dense<0.000000e+00> : vector<1x128xf32>
    %125 = tpu.matmul %123, %33, %cst_46 {dimension_numbers = #tpu.dot_dimension_numbers<[1], [0], [0], [1], [0, 0, 1, 1], [], []>} : vector<1x32xf32>, vector<32x128xf32>, vector<1x128xf32> -> vector<1x128xf32>
    %126 = arith.addf %124, %125 : vector<1x128xf32>
    %127 = arith.addf %126, %34 : vector<1x128xf32>
    %128 = vector.extract_strided_slice %127 {offsets = [0, 0], sizes = [1, 32], strides = [1, 1]} : vector<1x128xf32> to vector<1x32xf32>
    %129 = arith.negf %128 : vector<1x32xf32>
    %130 = math.exp %129 : vector<1x32xf32>
    %cst_47 = arith.constant 1.000000e+00 : f32
    %131 = vector.broadcast %cst_47 : f32 to vector<1x32xf32>
    %132 = arith.addf %131, %130 : vector<1x32xf32>
    %133 = arith.divf %131, %132 : vector<1x32xf32>
    %134 = vector.extract_strided_slice %127 {offsets = [0, 32], sizes = [1, 32], strides = [1, 1]} : vector<1x128xf32> to vector<1x32xf32>
    %135 = arith.negf %134 : vector<1x32xf32>
    %136 = math.exp %135 : vector<1x32xf32>
    %cst_48 = arith.constant 1.000000e+00 : f32
    %137 = vector.broadcast %cst_48 : f32 to vector<1x32xf32>
    %138 = arith.addf %137, %136 : vector<1x32xf32>
    %139 = arith.divf %137, %138 : vector<1x32xf32>
    %140 = vector.extract_strided_slice %127 {offsets = [0, 64], sizes = [1, 32], strides = [1, 1]} : vector<1x128xf32> to vector<1x32xf32>
    %141 = math.tanh %140 : vector<1x32xf32>
    %142 = vector.extract_strided_slice %127 {offsets = [0, 96], sizes = [1, 32], strides = [1, 1]} : vector<1x128xf32> to vector<1x32xf32>
    %143 = arith.negf %142 : vector<1x32xf32>
    %144 = math.exp %143 : vector<1x32xf32>
    %cst_49 = arith.constant 1.000000e+00 : f32
    %145 = vector.broadcast %cst_49 : f32 to vector<1x32xf32>
    %146 = arith.addf %145, %144 : vector<1x32xf32>
    %147 = arith.divf %145, %146 : vector<1x32xf32>
    %148 = arith.mulf %139, %121 : vector<1x32xf32>
    %149 = arith.mulf %133, %141 : vector<1x32xf32>
    %150 = arith.addf %148, %149 : vector<1x32xf32>
    %151 = math.tanh %150 : vector<1x32xf32>
    %152 = arith.mulf %147, %151 : vector<1x32xf32>
    %cst_50 = arith.constant dense<0.000000e+00> : vector<1x128xf32>
    %153 = tpu.matmul %27, %31, %cst_50 {dimension_numbers = #tpu.dot_dimension_numbers<[1], [0], [0], [1], [0, 0, 1, 1], [], []>} : vector<1x8xf32>, vector<8x128xf32>, vector<1x128xf32> -> vector<1x128xf32>
    %cst_51 = arith.constant dense<0.000000e+00> : vector<1x128xf32>
    %154 = tpu.matmul %152, %33, %cst_51 {dimension_numbers = #tpu.dot_dimension_numbers<[1], [0], [0], [1], [0, 0, 1, 1], [], []>} : vector<1x32xf32>, vector<32x128xf32>, vector<1x128xf32> -> vector<1x128xf32>
    %155 = arith.addf %153, %154 : vector<1x128xf32>
    %156 = arith.addf %155, %34 : vector<1x128xf32>
    %157 = vector.extract_strided_slice %156 {offsets = [0, 0], sizes = [1, 32], strides = [1, 1]} : vector<1x128xf32> to vector<1x32xf32>
    %158 = arith.negf %157 : vector<1x32xf32>
    %159 = math.exp %158 : vector<1x32xf32>
    %cst_52 = arith.constant 1.000000e+00 : f32
    %160 = vector.broadcast %cst_52 : f32 to vector<1x32xf32>
    %161 = arith.addf %160, %159 : vector<1x32xf32>
    %162 = arith.divf %160, %161 : vector<1x32xf32>
    %163 = vector.extract_strided_slice %156 {offsets = [0, 32], sizes = [1, 32], strides = [1, 1]} : vector<1x128xf32> to vector<1x32xf32>
    %164 = arith.negf %163 : vector<1x32xf32>
    %165 = math.exp %164 : vector<1x32xf32>
    %cst_53 = arith.constant 1.000000e+00 : f32
    %166 = vector.broadcast %cst_53 : f32 to vector<1x32xf32>
    %167 = arith.addf %166, %165 : vector<1x32xf32>
    %168 = arith.divf %166, %167 : vector<1x32xf32>
    %169 = vector.extract_strided_slice %156 {offsets = [0, 64], sizes = [1, 32], strides = [1, 1]} : vector<1x128xf32> to vector<1x32xf32>
    %170 = math.tanh %169 : vector<1x32xf32>
    %171 = vector.extract_strided_slice %156 {offsets = [0, 96], sizes = [1, 32], strides = [1, 1]} : vector<1x128xf32> to vector<1x32xf32>
    %172 = arith.negf %171 : vector<1x32xf32>
    %173 = math.exp %172 : vector<1x32xf32>
    %cst_54 = arith.constant 1.000000e+00 : f32
    %174 = vector.broadcast %cst_54 : f32 to vector<1x32xf32>
    %175 = arith.addf %174, %173 : vector<1x32xf32>
    %176 = arith.divf %174, %175 : vector<1x32xf32>
    %177 = arith.mulf %168, %150 : vector<1x32xf32>
    %178 = arith.mulf %162, %170 : vector<1x32xf32>
    %179 = arith.addf %177, %178 : vector<1x32xf32>
    %180 = math.tanh %179 : vector<1x32xf32>
    %181 = arith.mulf %176, %180 : vector<1x32xf32>
    %cst_55 = arith.constant dense<0.000000e+00> : vector<1x128xf32>
    %182 = tpu.matmul %28, %31, %cst_55 {dimension_numbers = #tpu.dot_dimension_numbers<[1], [0], [0], [1], [0, 0, 1, 1], [], []>} : vector<1x8xf32>, vector<8x128xf32>, vector<1x128xf32> -> vector<1x128xf32>
    %cst_56 = arith.constant dense<0.000000e+00> : vector<1x128xf32>
    %183 = tpu.matmul %181, %33, %cst_56 {dimension_numbers = #tpu.dot_dimension_numbers<[1], [0], [0], [1], [0, 0, 1, 1], [], []>} : vector<1x32xf32>, vector<32x128xf32>, vector<1x128xf32> -> vector<1x128xf32>
    %184 = arith.addf %182, %183 : vector<1x128xf32>
    %185 = arith.addf %184, %34 : vector<1x128xf32>
    %186 = vector.extract_strided_slice %185 {offsets = [0, 0], sizes = [1, 32], strides = [1, 1]} : vector<1x128xf32> to vector<1x32xf32>
    %187 = arith.negf %186 : vector<1x32xf32>
    %188 = math.exp %187 : vector<1x32xf32>
    %cst_57 = arith.constant 1.000000e+00 : f32
    %189 = vector.broadcast %cst_57 : f32 to vector<1x32xf32>
    %190 = arith.addf %189, %188 : vector<1x32xf32>
    %191 = arith.divf %189, %190 : vector<1x32xf32>
    %192 = vector.extract_strided_slice %185 {offsets = [0, 32], sizes = [1, 32], strides = [1, 1]} : vector<1x128xf32> to vector<1x32xf32>
    %193 = arith.negf %192 : vector<1x32xf32>
    %194 = math.exp %193 : vector<1x32xf32>
    %cst_58 = arith.constant 1.000000e+00 : f32
    %195 = vector.broadcast %cst_58 : f32 to vector<1x32xf32>
    %196 = arith.addf %195, %194 : vector<1x32xf32>
    %197 = arith.divf %195, %196 : vector<1x32xf32>
    %198 = vector.extract_strided_slice %185 {offsets = [0, 64], sizes = [1, 32], strides = [1, 1]} : vector<1x128xf32> to vector<1x32xf32>
    %199 = math.tanh %198 : vector<1x32xf32>
    %200 = vector.extract_strided_slice %185 {offsets = [0, 96], sizes = [1, 32], strides = [1, 1]} : vector<1x128xf32> to vector<1x32xf32>
    %201 = arith.negf %200 : vector<1x32xf32>
    %202 = math.exp %201 : vector<1x32xf32>
    %cst_59 = arith.constant 1.000000e+00 : f32
    %203 = vector.broadcast %cst_59 : f32 to vector<1x32xf32>
    %204 = arith.addf %203, %202 : vector<1x32xf32>
    %205 = arith.divf %203, %204 : vector<1x32xf32>
    %206 = arith.mulf %197, %179 : vector<1x32xf32>
    %207 = arith.mulf %191, %199 : vector<1x32xf32>
    %208 = arith.addf %206, %207 : vector<1x32xf32>
    %209 = math.tanh %208 : vector<1x32xf32>
    %210 = arith.mulf %205, %209 : vector<1x32xf32>
    %cst_60 = arith.constant dense<0.000000e+00> : vector<1x128xf32>
    %211 = tpu.matmul %29, %31, %cst_60 {dimension_numbers = #tpu.dot_dimension_numbers<[1], [0], [0], [1], [0, 0, 1, 1], [], []>} : vector<1x8xf32>, vector<8x128xf32>, vector<1x128xf32> -> vector<1x128xf32>
    %cst_61 = arith.constant dense<0.000000e+00> : vector<1x128xf32>
    %212 = tpu.matmul %210, %33, %cst_61 {dimension_numbers = #tpu.dot_dimension_numbers<[1], [0], [0], [1], [0, 0, 1, 1], [], []>} : vector<1x32xf32>, vector<32x128xf32>, vector<1x128xf32> -> vector<1x128xf32>
    %213 = arith.addf %211, %212 : vector<1x128xf32>
    %214 = arith.addf %213, %34 : vector<1x128xf32>
    %215 = vector.extract_strided_slice %214 {offsets = [0, 0], sizes = [1, 32], strides = [1, 1]} : vector<1x128xf32> to vector<1x32xf32>
    %216 = arith.negf %215 : vector<1x32xf32>
    %217 = math.exp %216 : vector<1x32xf32>
    %cst_62 = arith.constant 1.000000e+00 : f32
    %218 = vector.broadcast %cst_62 : f32 to vector<1x32xf32>
    %219 = arith.addf %218, %217 : vector<1x32xf32>
    %220 = arith.divf %218, %219 : vector<1x32xf32>
    %221 = vector.extract_strided_slice %214 {offsets = [0, 32], sizes = [1, 32], strides = [1, 1]} : vector<1x128xf32> to vector<1x32xf32>
    %222 = arith.negf %221 : vector<1x32xf32>
    %223 = math.exp %222 : vector<1x32xf32>
    %cst_63 = arith.constant 1.000000e+00 : f32
    %224 = vector.broadcast %cst_63 : f32 to vector<1x32xf32>
    %225 = arith.addf %224, %223 : vector<1x32xf32>
    %226 = arith.divf %224, %225 : vector<1x32xf32>
    %227 = vector.extract_strided_slice %214 {offsets = [0, 64], sizes = [1, 32], strides = [1, 1]} : vector<1x128xf32> to vector<1x32xf32>
    %228 = math.tanh %227 : vector<1x32xf32>
    %229 = vector.extract_strided_slice %214 {offsets = [0, 96], sizes = [1, 32], strides = [1, 1]} : vector<1x128xf32> to vector<1x32xf32>
    %230 = arith.negf %229 : vector<1x32xf32>
    %231 = math.exp %230 : vector<1x32xf32>
    %cst_64 = arith.constant 1.000000e+00 : f32
    %232 = vector.broadcast %cst_64 : f32 to vector<1x32xf32>
    %233 = arith.addf %232, %231 : vector<1x32xf32>
    %234 = arith.divf %232, %233 : vector<1x32xf32>
    %235 = arith.mulf %226, %208 : vector<1x32xf32>
    %236 = arith.mulf %220, %228 : vector<1x32xf32>
    %237 = arith.addf %235, %236 : vector<1x32xf32>
    %238 = math.tanh %237 : vector<1x32xf32>
    %239 = arith.mulf %234, %238 : vector<1x32xf32>
    %cst_65 = arith.constant dense<0.000000e+00> : vector<1x128xf32>
    %240 = tpu.matmul %30, %31, %cst_65 {dimension_numbers = #tpu.dot_dimension_numbers<[1], [0], [0], [1], [0, 0, 1, 1], [], []>} : vector<1x8xf32>, vector<8x128xf32>, vector<1x128xf32> -> vector<1x128xf32>
    %cst_66 = arith.constant dense<0.000000e+00> : vector<1x128xf32>
    %241 = tpu.matmul %239, %33, %cst_66 {dimension_numbers = #tpu.dot_dimension_numbers<[1], [0], [0], [1], [0, 0, 1, 1], [], []>} : vector<1x32xf32>, vector<32x128xf32>, vector<1x128xf32> -> vector<1x128xf32>
    %242 = arith.addf %240, %241 : vector<1x128xf32>
    %243 = arith.addf %242, %34 : vector<1x128xf32>
    %244 = vector.extract_strided_slice %243 {offsets = [0, 0], sizes = [1, 32], strides = [1, 1]} : vector<1x128xf32> to vector<1x32xf32>
    %245 = arith.negf %244 : vector<1x32xf32>
    %246 = math.exp %245 : vector<1x32xf32>
    %cst_67 = arith.constant 1.000000e+00 : f32
    %247 = vector.broadcast %cst_67 : f32 to vector<1x32xf32>
    %248 = arith.addf %247, %246 : vector<1x32xf32>
    %249 = arith.divf %247, %248 : vector<1x32xf32>
    %250 = vector.extract_strided_slice %243 {offsets = [0, 32], sizes = [1, 32], strides = [1, 1]} : vector<1x128xf32> to vector<1x32xf32>
    %251 = arith.negf %250 : vector<1x32xf32>
    %252 = math.exp %251 : vector<1x32xf32>
    %cst_68 = arith.constant 1.000000e+00 : f32
    %253 = vector.broadcast %cst_68 : f32 to vector<1x32xf32>
    %254 = arith.addf %253, %252 : vector<1x32xf32>
    %255 = arith.divf %253, %254 : vector<1x32xf32>
    %256 = vector.extract_strided_slice %243 {offsets = [0, 64], sizes = [1, 32], strides = [1, 1]} : vector<1x128xf32> to vector<1x32xf32>
    %257 = math.tanh %256 : vector<1x32xf32>
    %258 = vector.extract_strided_slice %243 {offsets = [0, 96], sizes = [1, 32], strides = [1, 1]} : vector<1x128xf32> to vector<1x32xf32>
    %259 = arith.negf %258 : vector<1x32xf32>
    %260 = math.exp %259 : vector<1x32xf32>
    %cst_69 = arith.constant 1.000000e+00 : f32
    %261 = vector.broadcast %cst_69 : f32 to vector<1x32xf32>
    %262 = arith.addf %261, %260 : vector<1x32xf32>
    %263 = arith.divf %261, %262 : vector<1x32xf32>
    %264 = arith.mulf %255, %237 : vector<1x32xf32>
    %265 = arith.mulf %249, %257 : vector<1x32xf32>
    %266 = arith.addf %264, %265 : vector<1x32xf32>
    %267 = math.tanh %266 : vector<1x32xf32>
    %268 = arith.mulf %263, %267 : vector<1x32xf32>
    %c0_70 = arith.constant 0 : index
    %c0_71 = arith.constant 0 : index
    %c0_72 = arith.constant 0 : index
    %269 = vector.load %arg10[%c0_70, %c0_71, %c0_72] : memref<3x32x128xf32, #tpu.memory_space<vmem>>, vector<1x32x128xf32>
    %270 = vector.shape_cast %269 : vector<1x32x128xf32> to vector<32x128xf32>
    %c1 = arith.constant 1 : index
    %c0_73 = arith.constant 0 : index
    %c0_74 = arith.constant 0 : index
    %271 = vector.load %arg11[%c1, %c0_73, %c0_74] : memref<4x32x128xf32, #tpu.memory_space<vmem>>, vector<1x32x128xf32>
    %272 = vector.shape_cast %271 : vector<1x32x128xf32> to vector<32x128xf32>
    %c1_75 = arith.constant 1 : index
    %c0_76 = arith.constant 0 : index
    %273 = vector.load %arg12[%c1_75, %c0_76] : memref<4x128xf32, #tpu.memory_space<vmem>>, vector<1x128xf32>
    %cst_77 = arith.constant 0.000000e+00 : f32
    %274 = vector.broadcast %cst_77 : f32 to vector<1x32xf32>
    %cst_78 = arith.constant 0.000000e+00 : f32
    %275 = vector.broadcast %cst_78 : f32 to vector<1x32xf32>
    %cst_79 = arith.constant dense<0.000000e+00> : vector<1x128xf32>
    %276 = tpu.matmul %65, %270, %cst_79 {dimension_numbers = #tpu.dot_dimension_numbers<[1], [0], [0], [1], [0, 0, 1, 1], [], []>} : vector<1x32xf32>, vector<32x128xf32>, vector<1x128xf32> -> vector<1x128xf32>
    %cst_80 = arith.constant dense<0.000000e+00> : vector<1x128xf32>
    %277 = tpu.matmul %274, %272, %cst_80 {dimension_numbers = #tpu.dot_dimension_numbers<[1], [0], [0], [1], [0, 0, 1, 1], [], []>} : vector<1x32xf32>, vector<32x128xf32>, vector<1x128xf32> -> vector<1x128xf32>
    %278 = arith.addf %276, %277 : vector<1x128xf32>
    %279 = arith.addf %278, %273 : vector<1x128xf32>
    %280 = vector.extract_strided_slice %279 {offsets = [0, 0], sizes = [1, 32], strides = [1, 1]} : vector<1x128xf32> to vector<1x32xf32>
    %281 = arith.negf %280 : vector<1x32xf32>
    %282 = math.exp %281 : vector<1x32xf32>
    %cst_81 = arith.constant 1.000000e+00 : f32
    %283 = vector.broadcast %cst_81 : f32 to vector<1x32xf32>
    %284 = arith.addf %283, %282 : vector<1x32xf32>
    %285 = arith.divf %283, %284 : vector<1x32xf32>
    %286 = vector.extract_strided_slice %279 {offsets = [0, 32], sizes = [1, 32], strides = [1, 1]} : vector<1x128xf32> to vector<1x32xf32>
    %287 = arith.negf %286 : vector<1x32xf32>
    %288 = math.exp %287 : vector<1x32xf32>
    %cst_82 = arith.constant 1.000000e+00 : f32
    %289 = vector.broadcast %cst_82 : f32 to vector<1x32xf32>
    %290 = arith.addf %289, %288 : vector<1x32xf32>
    %291 = arith.divf %289, %290 : vector<1x32xf32>
    %292 = vector.extract_strided_slice %279 {offsets = [0, 64], sizes = [1, 32], strides = [1, 1]} : vector<1x128xf32> to vector<1x32xf32>
    %293 = math.tanh %292 : vector<1x32xf32>
    %294 = vector.extract_strided_slice %279 {offsets = [0, 96], sizes = [1, 32], strides = [1, 1]} : vector<1x128xf32> to vector<1x32xf32>
    %295 = arith.negf %294 : vector<1x32xf32>
    %296 = math.exp %295 : vector<1x32xf32>
    %cst_83 = arith.constant 1.000000e+00 : f32
    %297 = vector.broadcast %cst_83 : f32 to vector<1x32xf32>
    %298 = arith.addf %297, %296 : vector<1x32xf32>
    %299 = arith.divf %297, %298 : vector<1x32xf32>
    %300 = arith.mulf %291, %275 : vector<1x32xf32>
    %301 = arith.mulf %285, %293 : vector<1x32xf32>
    %302 = arith.addf %300, %301 : vector<1x32xf32>
    %303 = math.tanh %302 : vector<1x32xf32>
    %304 = arith.mulf %299, %303 : vector<1x32xf32>
    %cst_84 = arith.constant dense<0.000000e+00> : vector<1x128xf32>
    %305 = tpu.matmul %94, %270, %cst_84 {dimension_numbers = #tpu.dot_dimension_numbers<[1], [0], [0], [1], [0, 0, 1, 1], [], []>} : vector<1x32xf32>, vector<32x128xf32>, vector<1x128xf32> -> vector<1x128xf32>
    %cst_85 = arith.constant dense<0.000000e+00> : vector<1x128xf32>
    %306 = tpu.matmul %304, %272, %cst_85 {dimension_numbers = #tpu.dot_dimension_numbers<[1], [0], [0], [1], [0, 0, 1, 1], [], []>} : vector<1x32xf32>, vector<32x128xf32>, vector<1x128xf32> -> vector<1x128xf32>
    %307 = arith.addf %305, %306 : vector<1x128xf32>
    %308 = arith.addf %307, %273 : vector<1x128xf32>
    %309 = vector.extract_strided_slice %308 {offsets = [0, 0], sizes = [1, 32], strides = [1, 1]} : vector<1x128xf32> to vector<1x32xf32>
    %310 = arith.negf %309 : vector<1x32xf32>
    %311 = math.exp %310 : vector<1x32xf32>
    %cst_86 = arith.constant 1.000000e+00 : f32
    %312 = vector.broadcast %cst_86 : f32 to vector<1x32xf32>
    %313 = arith.addf %312, %311 : vector<1x32xf32>
    %314 = arith.divf %312, %313 : vector<1x32xf32>
    %315 = vector.extract_strided_slice %308 {offsets = [0, 32], sizes = [1, 32], strides = [1, 1]} : vector<1x128xf32> to vector<1x32xf32>
    %316 = arith.negf %315 : vector<1x32xf32>
    %317 = math.exp %316 : vector<1x32xf32>
    %cst_87 = arith.constant 1.000000e+00 : f32
    %318 = vector.broadcast %cst_87 : f32 to vector<1x32xf32>
    %319 = arith.addf %318, %317 : vector<1x32xf32>
    %320 = arith.divf %318, %319 : vector<1x32xf32>
    %321 = vector.extract_strided_slice %308 {offsets = [0, 64], sizes = [1, 32], strides = [1, 1]} : vector<1x128xf32> to vector<1x32xf32>
    %322 = math.tanh %321 : vector<1x32xf32>
    %323 = vector.extract_strided_slice %308 {offsets = [0, 96], sizes = [1, 32], strides = [1, 1]} : vector<1x128xf32> to vector<1x32xf32>
    %324 = arith.negf %323 : vector<1x32xf32>
    %325 = math.exp %324 : vector<1x32xf32>
    %cst_88 = arith.constant 1.000000e+00 : f32
    %326 = vector.broadcast %cst_88 : f32 to vector<1x32xf32>
    %327 = arith.addf %326, %325 : vector<1x32xf32>
    %328 = arith.divf %326, %327 : vector<1x32xf32>
    %329 = arith.mulf %320, %302 : vector<1x32xf32>
    %330 = arith.mulf %314, %322 : vector<1x32xf32>
    %331 = arith.addf %329, %330 : vector<1x32xf32>
    %332 = math.tanh %331 : vector<1x32xf32>
    %333 = arith.mulf %328, %332 : vector<1x32xf32>
    %cst_89 = arith.constant dense<0.000000e+00> : vector<1x128xf32>
    %334 = tpu.matmul %123, %270, %cst_89 {dimension_numbers = #tpu.dot_dimension_numbers<[1], [0], [0], [1], [0, 0, 1, 1], [], []>} : vector<1x32xf32>, vector<32x128xf32>, vector<1x128xf32> -> vector<1x128xf32>
    %cst_90 = arith.constant dense<0.000000e+00> : vector<1x128xf32>
    %335 = tpu.matmul %333, %272, %cst_90 {dimension_numbers = #tpu.dot_dimension_numbers<[1], [0], [0], [1], [0, 0, 1, 1], [], []>} : vector<1x32xf32>, vector<32x128xf32>, vector<1x128xf32> -> vector<1x128xf32>
    %336 = arith.addf %334, %335 : vector<1x128xf32>
    %337 = arith.addf %336, %273 : vector<1x128xf32>
    %338 = vector.extract_strided_slice %337 {offsets = [0, 0], sizes = [1, 32], strides = [1, 1]} : vector<1x128xf32> to vector<1x32xf32>
    %339 = arith.negf %338 : vector<1x32xf32>
    %340 = math.exp %339 : vector<1x32xf32>
    %cst_91 = arith.constant 1.000000e+00 : f32
    %341 = vector.broadcast %cst_91 : f32 to vector<1x32xf32>
    %342 = arith.addf %341, %340 : vector<1x32xf32>
    %343 = arith.divf %341, %342 : vector<1x32xf32>
    %344 = vector.extract_strided_slice %337 {offsets = [0, 32], sizes = [1, 32], strides = [1, 1]} : vector<1x128xf32> to vector<1x32xf32>
    %345 = arith.negf %344 : vector<1x32xf32>
    %346 = math.exp %345 : vector<1x32xf32>
    %cst_92 = arith.constant 1.000000e+00 : f32
    %347 = vector.broadcast %cst_92 : f32 to vector<1x32xf32>
    %348 = arith.addf %347, %346 : vector<1x32xf32>
    %349 = arith.divf %347, %348 : vector<1x32xf32>
    %350 = vector.extract_strided_slice %337 {offsets = [0, 64], sizes = [1, 32], strides = [1, 1]} : vector<1x128xf32> to vector<1x32xf32>
    %351 = math.tanh %350 : vector<1x32xf32>
    %352 = vector.extract_strided_slice %337 {offsets = [0, 96], sizes = [1, 32], strides = [1, 1]} : vector<1x128xf32> to vector<1x32xf32>
    %353 = arith.negf %352 : vector<1x32xf32>
    %354 = math.exp %353 : vector<1x32xf32>
    %cst_93 = arith.constant 1.000000e+00 : f32
    %355 = vector.broadcast %cst_93 : f32 to vector<1x32xf32>
    %356 = arith.addf %355, %354 : vector<1x32xf32>
    %357 = arith.divf %355, %356 : vector<1x32xf32>
    %358 = arith.mulf %349, %331 : vector<1x32xf32>
    %359 = arith.mulf %343, %351 : vector<1x32xf32>
    %360 = arith.addf %358, %359 : vector<1x32xf32>
    %361 = math.tanh %360 : vector<1x32xf32>
    %362 = arith.mulf %357, %361 : vector<1x32xf32>
    %cst_94 = arith.constant dense<0.000000e+00> : vector<1x128xf32>
    %363 = tpu.matmul %152, %270, %cst_94 {dimension_numbers = #tpu.dot_dimension_numbers<[1], [0], [0], [1], [0, 0, 1, 1], [], []>} : vector<1x32xf32>, vector<32x128xf32>, vector<1x128xf32> -> vector<1x128xf32>
    %cst_95 = arith.constant dense<0.000000e+00> : vector<1x128xf32>
    %364 = tpu.matmul %362, %272, %cst_95 {dimension_numbers = #tpu.dot_dimension_numbers<[1], [0], [0], [1], [0, 0, 1, 1], [], []>} : vector<1x32xf32>, vector<32x128xf32>, vector<1x128xf32> -> vector<1x128xf32>
    %365 = arith.addf %363, %364 : vector<1x128xf32>
    %366 = arith.addf %365, %273 : vector<1x128xf32>
    %367 = vector.extract_strided_slice %366 {offsets = [0, 0], sizes = [1, 32], strides = [1, 1]} : vector<1x128xf32> to vector<1x32xf32>
    %368 = arith.negf %367 : vector<1x32xf32>
    %369 = math.exp %368 : vector<1x32xf32>
    %cst_96 = arith.constant 1.000000e+00 : f32
    %370 = vector.broadcast %cst_96 : f32 to vector<1x32xf32>
    %371 = arith.addf %370, %369 : vector<1x32xf32>
    %372 = arith.divf %370, %371 : vector<1x32xf32>
    %373 = vector.extract_strided_slice %366 {offsets = [0, 32], sizes = [1, 32], strides = [1, 1]} : vector<1x128xf32> to vector<1x32xf32>
    %374 = arith.negf %373 : vector<1x32xf32>
    %375 = math.exp %374 : vector<1x32xf32>
    %cst_97 = arith.constant 1.000000e+00 : f32
    %376 = vector.broadcast %cst_97 : f32 to vector<1x32xf32>
    %377 = arith.addf %376, %375 : vector<1x32xf32>
    %378 = arith.divf %376, %377 : vector<1x32xf32>
    %379 = vector.extract_strided_slice %366 {offsets = [0, 64], sizes = [1, 32], strides = [1, 1]} : vector<1x128xf32> to vector<1x32xf32>
    %380 = math.tanh %379 : vector<1x32xf32>
    %381 = vector.extract_strided_slice %366 {offsets = [0, 96], sizes = [1, 32], strides = [1, 1]} : vector<1x128xf32> to vector<1x32xf32>
    %382 = arith.negf %381 : vector<1x32xf32>
    %383 = math.exp %382 : vector<1x32xf32>
    %cst_98 = arith.constant 1.000000e+00 : f32
    %384 = vector.broadcast %cst_98 : f32 to vector<1x32xf32>
    %385 = arith.addf %384, %383 : vector<1x32xf32>
    %386 = arith.divf %384, %385 : vector<1x32xf32>
    %387 = arith.mulf %378, %360 : vector<1x32xf32>
    %388 = arith.mulf %372, %380 : vector<1x32xf32>
    %389 = arith.addf %387, %388 : vector<1x32xf32>
    %390 = math.tanh %389 : vector<1x32xf32>
    %391 = arith.mulf %386, %390 : vector<1x32xf32>
    %cst_99 = arith.constant dense<0.000000e+00> : vector<1x128xf32>
    %392 = tpu.matmul %181, %270, %cst_99 {dimension_numbers = #tpu.dot_dimension_numbers<[1], [0], [0], [1], [0, 0, 1, 1], [], []>} : vector<1x32xf32>, vector<32x128xf32>, vector<1x128xf32> -> vector<1x128xf32>
    %cst_100 = arith.constant dense<0.000000e+00> : vector<1x128xf32>
    %393 = tpu.matmul %391, %272, %cst_100 {dimension_numbers = #tpu.dot_dimension_numbers<[1], [0], [0], [1], [0, 0, 1, 1], [], []>} : vector<1x32xf32>, vector<32x128xf32>, vector<1x128xf32> -> vector<1x128xf32>
    %394 = arith.addf %392, %393 : vector<1x128xf32>
    %395 = arith.addf %394, %273 : vector<1x128xf32>
    %396 = vector.extract_strided_slice %395 {offsets = [0, 0], sizes = [1, 32], strides = [1, 1]} : vector<1x128xf32> to vector<1x32xf32>
    %397 = arith.negf %396 : vector<1x32xf32>
    %398 = math.exp %397 : vector<1x32xf32>
    %cst_101 = arith.constant 1.000000e+00 : f32
    %399 = vector.broadcast %cst_101 : f32 to vector<1x32xf32>
    %400 = arith.addf %399, %398 : vector<1x32xf32>
    %401 = arith.divf %399, %400 : vector<1x32xf32>
    %402 = vector.extract_strided_slice %395 {offsets = [0, 32], sizes = [1, 32], strides = [1, 1]} : vector<1x128xf32> to vector<1x32xf32>
    %403 = arith.negf %402 : vector<1x32xf32>
    %404 = math.exp %403 : vector<1x32xf32>
    %cst_102 = arith.constant 1.000000e+00 : f32
    %405 = vector.broadcast %cst_102 : f32 to vector<1x32xf32>
    %406 = arith.addf %405, %404 : vector<1x32xf32>
    %407 = arith.divf %405, %406 : vector<1x32xf32>
    %408 = vector.extract_strided_slice %395 {offsets = [0, 64], sizes = [1, 32], strides = [1, 1]} : vector<1x128xf32> to vector<1x32xf32>
    %409 = math.tanh %408 : vector<1x32xf32>
    %410 = vector.extract_strided_slice %395 {offsets = [0, 96], sizes = [1, 32], strides = [1, 1]} : vector<1x128xf32> to vector<1x32xf32>
    %411 = arith.negf %410 : vector<1x32xf32>
    %412 = math.exp %411 : vector<1x32xf32>
    %cst_103 = arith.constant 1.000000e+00 : f32
    %413 = vector.broadcast %cst_103 : f32 to vector<1x32xf32>
    %414 = arith.addf %413, %412 : vector<1x32xf32>
    %415 = arith.divf %413, %414 : vector<1x32xf32>
    %416 = arith.mulf %407, %389 : vector<1x32xf32>
    %417 = arith.mulf %401, %409 : vector<1x32xf32>
    %418 = arith.addf %416, %417 : vector<1x32xf32>
    %419 = math.tanh %418 : vector<1x32xf32>
    %420 = arith.mulf %415, %419 : vector<1x32xf32>
    %cst_104 = arith.constant dense<0.000000e+00> : vector<1x128xf32>
    %421 = tpu.matmul %210, %270, %cst_104 {dimension_numbers = #tpu.dot_dimension_numbers<[1], [0], [0], [1], [0, 0, 1, 1], [], []>} : vector<1x32xf32>, vector<32x128xf32>, vector<1x128xf32> -> vector<1x128xf32>
    %cst_105 = arith.constant dense<0.000000e+00> : vector<1x128xf32>
    %422 = tpu.matmul %420, %272, %cst_105 {dimension_numbers = #tpu.dot_dimension_numbers<[1], [0], [0], [1], [0, 0, 1, 1], [], []>} : vector<1x32xf32>, vector<32x128xf32>, vector<1x128xf32> -> vector<1x128xf32>
    %423 = arith.addf %421, %422 : vector<1x128xf32>
    %424 = arith.addf %423, %273 : vector<1x128xf32>
    %425 = vector.extract_strided_slice %424 {offsets = [0, 0], sizes = [1, 32], strides = [1, 1]} : vector<1x128xf32> to vector<1x32xf32>
    %426 = arith.negf %425 : vector<1x32xf32>
    %427 = math.exp %426 : vector<1x32xf32>
    %cst_106 = arith.constant 1.000000e+00 : f32
    %428 = vector.broadcast %cst_106 : f32 to vector<1x32xf32>
    %429 = arith.addf %428, %427 : vector<1x32xf32>
    %430 = arith.divf %428, %429 : vector<1x32xf32>
    %431 = vector.extract_strided_slice %424 {offsets = [0, 32], sizes = [1, 32], strides = [1, 1]} : vector<1x128xf32> to vector<1x32xf32>
    %432 = arith.negf %431 : vector<1x32xf32>
    %433 = math.exp %432 : vector<1x32xf32>
    %cst_107 = arith.constant 1.000000e+00 : f32
    %434 = vector.broadcast %cst_107 : f32 to vector<1x32xf32>
    %435 = arith.addf %434, %433 : vector<1x32xf32>
    %436 = arith.divf %434, %435 : vector<1x32xf32>
    %437 = vector.extract_strided_slice %424 {offsets = [0, 64], sizes = [1, 32], strides = [1, 1]} : vector<1x128xf32> to vector<1x32xf32>
    %438 = math.tanh %437 : vector<1x32xf32>
    %439 = vector.extract_strided_slice %424 {offsets = [0, 96], sizes = [1, 32], strides = [1, 1]} : vector<1x128xf32> to vector<1x32xf32>
    %440 = arith.negf %439 : vector<1x32xf32>
    %441 = math.exp %440 : vector<1x32xf32>
    %cst_108 = arith.constant 1.000000e+00 : f32
    %442 = vector.broadcast %cst_108 : f32 to vector<1x32xf32>
    %443 = arith.addf %442, %441 : vector<1x32xf32>
    %444 = arith.divf %442, %443 : vector<1x32xf32>
    %445 = arith.mulf %436, %418 : vector<1x32xf32>
    %446 = arith.mulf %430, %438 : vector<1x32xf32>
    %447 = arith.addf %445, %446 : vector<1x32xf32>
    %448 = math.tanh %447 : vector<1x32xf32>
    %449 = arith.mulf %444, %448 : vector<1x32xf32>
    %cst_109 = arith.constant dense<0.000000e+00> : vector<1x128xf32>
    %450 = tpu.matmul %239, %270, %cst_109 {dimension_numbers = #tpu.dot_dimension_numbers<[1], [0], [0], [1], [0, 0, 1, 1], [], []>} : vector<1x32xf32>, vector<32x128xf32>, vector<1x128xf32> -> vector<1x128xf32>
    %cst_110 = arith.constant dense<0.000000e+00> : vector<1x128xf32>
    %451 = tpu.matmul %449, %272, %cst_110 {dimension_numbers = #tpu.dot_dimension_numbers<[1], [0], [0], [1], [0, 0, 1, 1], [], []>} : vector<1x32xf32>, vector<32x128xf32>, vector<1x128xf32> -> vector<1x128xf32>
    %452 = arith.addf %450, %451 : vector<1x128xf32>
    %453 = arith.addf %452, %273 : vector<1x128xf32>
    %454 = vector.extract_strided_slice %453 {offsets = [0, 0], sizes = [1, 32], strides = [1, 1]} : vector<1x128xf32> to vector<1x32xf32>
    %455 = arith.negf %454 : vector<1x32xf32>
    %456 = math.exp %455 : vector<1x32xf32>
    %cst_111 = arith.constant 1.000000e+00 : f32
    %457 = vector.broadcast %cst_111 : f32 to vector<1x32xf32>
    %458 = arith.addf %457, %456 : vector<1x32xf32>
    %459 = arith.divf %457, %458 : vector<1x32xf32>
    %460 = vector.extract_strided_slice %453 {offsets = [0, 32], sizes = [1, 32], strides = [1, 1]} : vector<1x128xf32> to vector<1x32xf32>
    %461 = arith.negf %460 : vector<1x32xf32>
    %462 = math.exp %461 : vector<1x32xf32>
    %cst_112 = arith.constant 1.000000e+00 : f32
    %463 = vector.broadcast %cst_112 : f32 to vector<1x32xf32>
    %464 = arith.addf %463, %462 : vector<1x32xf32>
    %465 = arith.divf %463, %464 : vector<1x32xf32>
    %466 = vector.extract_strided_slice %453 {offsets = [0, 64], sizes = [1, 32], strides = [1, 1]} : vector<1x128xf32> to vector<1x32xf32>
    %467 = math.tanh %466 : vector<1x32xf32>
    %468 = vector.extract_strided_slice %453 {offsets = [0, 96], sizes = [1, 32], strides = [1, 1]} : vector<1x128xf32> to vector<1x32xf32>
    %469 = arith.negf %468 : vector<1x32xf32>
    %470 = math.exp %469 : vector<1x32xf32>
    %cst_113 = arith.constant 1.000000e+00 : f32
    %471 = vector.broadcast %cst_113 : f32 to vector<1x32xf32>
    %472 = arith.addf %471, %470 : vector<1x32xf32>
    %473 = arith.divf %471, %472 : vector<1x32xf32>
    %474 = arith.mulf %465, %447 : vector<1x32xf32>
    %475 = arith.mulf %459, %467 : vector<1x32xf32>
    %476 = arith.addf %474, %475 : vector<1x32xf32>
    %477 = math.tanh %476 : vector<1x32xf32>
    %478 = arith.mulf %473, %477 : vector<1x32xf32>
    %cst_114 = arith.constant dense<0.000000e+00> : vector<1x128xf32>
    %479 = tpu.matmul %268, %270, %cst_114 {dimension_numbers = #tpu.dot_dimension_numbers<[1], [0], [0], [1], [0, 0, 1, 1], [], []>} : vector<1x32xf32>, vector<32x128xf32>, vector<1x128xf32> -> vector<1x128xf32>
    %cst_115 = arith.constant dense<0.000000e+00> : vector<1x128xf32>
    %480 = tpu.matmul %478, %272, %cst_115 {dimension_numbers = #tpu.dot_dimension_numbers<[1], [0], [0], [1], [0, 0, 1, 1], [], []>} : vector<1x32xf32>, vector<32x128xf32>, vector<1x128xf32> -> vector<1x128xf32>
    %481 = arith.addf %479, %480 : vector<1x128xf32>
    %482 = arith.addf %481, %273 : vector<1x128xf32>
    %483 = vector.extract_strided_slice %482 {offsets = [0, 0], sizes = [1, 32], strides = [1, 1]} : vector<1x128xf32> to vector<1x32xf32>
    %484 = arith.negf %483 : vector<1x32xf32>
    %485 = math.exp %484 : vector<1x32xf32>
    %cst_116 = arith.constant 1.000000e+00 : f32
    %486 = vector.broadcast %cst_116 : f32 to vector<1x32xf32>
    %487 = arith.addf %486, %485 : vector<1x32xf32>
    %488 = arith.divf %486, %487 : vector<1x32xf32>
    %489 = vector.extract_strided_slice %482 {offsets = [0, 32], sizes = [1, 32], strides = [1, 1]} : vector<1x128xf32> to vector<1x32xf32>
    %490 = arith.negf %489 : vector<1x32xf32>
    %491 = math.exp %490 : vector<1x32xf32>
    %cst_117 = arith.constant 1.000000e+00 : f32
    %492 = vector.broadcast %cst_117 : f32 to vector<1x32xf32>
    %493 = arith.addf %492, %491 : vector<1x32xf32>
    %494 = arith.divf %492, %493 : vector<1x32xf32>
    %495 = vector.extract_strided_slice %482 {offsets = [0, 64], sizes = [1, 32], strides = [1, 1]} : vector<1x128xf32> to vector<1x32xf32>
    %496 = math.tanh %495 : vector<1x32xf32>
    %497 = vector.extract_strided_slice %482 {offsets = [0, 96], sizes = [1, 32], strides = [1, 1]} : vector<1x128xf32> to vector<1x32xf32>
    %498 = arith.negf %497 : vector<1x32xf32>
    %499 = math.exp %498 : vector<1x32xf32>
    %cst_118 = arith.constant 1.000000e+00 : f32
    %500 = vector.broadcast %cst_118 : f32 to vector<1x32xf32>
    %501 = arith.addf %500, %499 : vector<1x32xf32>
    %502 = arith.divf %500, %501 : vector<1x32xf32>
    %503 = arith.mulf %494, %476 : vector<1x32xf32>
    %504 = arith.mulf %488, %496 : vector<1x32xf32>
    %505 = arith.addf %503, %504 : vector<1x32xf32>
    %506 = math.tanh %505 : vector<1x32xf32>
    %507 = arith.mulf %502, %506 : vector<1x32xf32>
    %c1_119 = arith.constant 1 : index
    %c0_120 = arith.constant 0 : index
    %c0_121 = arith.constant 0 : index
    %508 = vector.load %arg10[%c1_119, %c0_120, %c0_121] : memref<3x32x128xf32, #tpu.memory_space<vmem>>, vector<1x32x128xf32>
    %509 = vector.shape_cast %508 : vector<1x32x128xf32> to vector<32x128xf32>
    %c2 = arith.constant 2 : index
    %c0_122 = arith.constant 0 : index
    %c0_123 = arith.constant 0 : index
    %510 = vector.load %arg11[%c2, %c0_122, %c0_123] : memref<4x32x128xf32, #tpu.memory_space<vmem>>, vector<1x32x128xf32>
    %511 = vector.shape_cast %510 : vector<1x32x128xf32> to vector<32x128xf32>
    %c2_124 = arith.constant 2 : index
    %c0_125 = arith.constant 0 : index
    %512 = vector.load %arg12[%c2_124, %c0_125] : memref<4x128xf32, #tpu.memory_space<vmem>>, vector<1x128xf32>
    %cst_126 = arith.constant 0.000000e+00 : f32
    %513 = vector.broadcast %cst_126 : f32 to vector<1x32xf32>
    %cst_127 = arith.constant 0.000000e+00 : f32
    %514 = vector.broadcast %cst_127 : f32 to vector<1x32xf32>
    %cst_128 = arith.constant dense<0.000000e+00> : vector<1x128xf32>
    %515 = tpu.matmul %304, %509, %cst_128 {dimension_numbers = #tpu.dot_dimension_numbers<[1], [0], [0], [1], [0, 0, 1, 1], [], []>} : vector<1x32xf32>, vector<32x128xf32>, vector<1x128xf32> -> vector<1x128xf32>
    %cst_129 = arith.constant dense<0.000000e+00> : vector<1x128xf32>
    %516 = tpu.matmul %513, %511, %cst_129 {dimension_numbers = #tpu.dot_dimension_numbers<[1], [0], [0], [1], [0, 0, 1, 1], [], []>} : vector<1x32xf32>, vector<32x128xf32>, vector<1x128xf32> -> vector<1x128xf32>
    %517 = arith.addf %515, %516 : vector<1x128xf32>
    %518 = arith.addf %517, %512 : vector<1x128xf32>
    %519 = vector.extract_strided_slice %518 {offsets = [0, 0], sizes = [1, 32], strides = [1, 1]} : vector<1x128xf32> to vector<1x32xf32>
    %520 = arith.negf %519 : vector<1x32xf32>
    %521 = math.exp %520 : vector<1x32xf32>
    %cst_130 = arith.constant 1.000000e+00 : f32
    %522 = vector.broadcast %cst_130 : f32 to vector<1x32xf32>
    %523 = arith.addf %522, %521 : vector<1x32xf32>
    %524 = arith.divf %522, %523 : vector<1x32xf32>
    %525 = vector.extract_strided_slice %518 {offsets = [0, 32], sizes = [1, 32], strides = [1, 1]} : vector<1x128xf32> to vector<1x32xf32>
    %526 = arith.negf %525 : vector<1x32xf32>
    %527 = math.exp %526 : vector<1x32xf32>
    %cst_131 = arith.constant 1.000000e+00 : f32
    %528 = vector.broadcast %cst_131 : f32 to vector<1x32xf32>
    %529 = arith.addf %528, %527 : vector<1x32xf32>
    %530 = arith.divf %528, %529 : vector<1x32xf32>
    %531 = vector.extract_strided_slice %518 {offsets = [0, 64], sizes = [1, 32], strides = [1, 1]} : vector<1x128xf32> to vector<1x32xf32>
    %532 = math.tanh %531 : vector<1x32xf32>
    %533 = vector.extract_strided_slice %518 {offsets = [0, 96], sizes = [1, 32], strides = [1, 1]} : vector<1x128xf32> to vector<1x32xf32>
    %534 = arith.negf %533 : vector<1x32xf32>
    %535 = math.exp %534 : vector<1x32xf32>
    %cst_132 = arith.constant 1.000000e+00 : f32
    %536 = vector.broadcast %cst_132 : f32 to vector<1x32xf32>
    %537 = arith.addf %536, %535 : vector<1x32xf32>
    %538 = arith.divf %536, %537 : vector<1x32xf32>
    %539 = arith.mulf %530, %514 : vector<1x32xf32>
    %540 = arith.mulf %524, %532 : vector<1x32xf32>
    %541 = arith.addf %539, %540 : vector<1x32xf32>
    %542 = math.tanh %541 : vector<1x32xf32>
    %543 = arith.mulf %538, %542 : vector<1x32xf32>
    %cst_133 = arith.constant dense<0.000000e+00> : vector<1x128xf32>
    %544 = tpu.matmul %333, %509, %cst_133 {dimension_numbers = #tpu.dot_dimension_numbers<[1], [0], [0], [1], [0, 0, 1, 1], [], []>} : vector<1x32xf32>, vector<32x128xf32>, vector<1x128xf32> -> vector<1x128xf32>
    %cst_134 = arith.constant dense<0.000000e+00> : vector<1x128xf32>
    %545 = tpu.matmul %543, %511, %cst_134 {dimension_numbers = #tpu.dot_dimension_numbers<[1], [0], [0], [1], [0, 0, 1, 1], [], []>} : vector<1x32xf32>, vector<32x128xf32>, vector<1x128xf32> -> vector<1x128xf32>
    %546 = arith.addf %544, %545 : vector<1x128xf32>
    %547 = arith.addf %546, %512 : vector<1x128xf32>
    %548 = vector.extract_strided_slice %547 {offsets = [0, 0], sizes = [1, 32], strides = [1, 1]} : vector<1x128xf32> to vector<1x32xf32>
    %549 = arith.negf %548 : vector<1x32xf32>
    %550 = math.exp %549 : vector<1x32xf32>
    %cst_135 = arith.constant 1.000000e+00 : f32
    %551 = vector.broadcast %cst_135 : f32 to vector<1x32xf32>
    %552 = arith.addf %551, %550 : vector<1x32xf32>
    %553 = arith.divf %551, %552 : vector<1x32xf32>
    %554 = vector.extract_strided_slice %547 {offsets = [0, 32], sizes = [1, 32], strides = [1, 1]} : vector<1x128xf32> to vector<1x32xf32>
    %555 = arith.negf %554 : vector<1x32xf32>
    %556 = math.exp %555 : vector<1x32xf32>
    %cst_136 = arith.constant 1.000000e+00 : f32
    %557 = vector.broadcast %cst_136 : f32 to vector<1x32xf32>
    %558 = arith.addf %557, %556 : vector<1x32xf32>
    %559 = arith.divf %557, %558 : vector<1x32xf32>
    %560 = vector.extract_strided_slice %547 {offsets = [0, 64], sizes = [1, 32], strides = [1, 1]} : vector<1x128xf32> to vector<1x32xf32>
    %561 = math.tanh %560 : vector<1x32xf32>
    %562 = vector.extract_strided_slice %547 {offsets = [0, 96], sizes = [1, 32], strides = [1, 1]} : vector<1x128xf32> to vector<1x32xf32>
    %563 = arith.negf %562 : vector<1x32xf32>
    %564 = math.exp %563 : vector<1x32xf32>
    %cst_137 = arith.constant 1.000000e+00 : f32
    %565 = vector.broadcast %cst_137 : f32 to vector<1x32xf32>
    %566 = arith.addf %565, %564 : vector<1x32xf32>
    %567 = arith.divf %565, %566 : vector<1x32xf32>
    %568 = arith.mulf %559, %541 : vector<1x32xf32>
    %569 = arith.mulf %553, %561 : vector<1x32xf32>
    %570 = arith.addf %568, %569 : vector<1x32xf32>
    %571 = math.tanh %570 : vector<1x32xf32>
    %572 = arith.mulf %567, %571 : vector<1x32xf32>
    %cst_138 = arith.constant dense<0.000000e+00> : vector<1x128xf32>
    %573 = tpu.matmul %362, %509, %cst_138 {dimension_numbers = #tpu.dot_dimension_numbers<[1], [0], [0], [1], [0, 0, 1, 1], [], []>} : vector<1x32xf32>, vector<32x128xf32>, vector<1x128xf32> -> vector<1x128xf32>
    %cst_139 = arith.constant dense<0.000000e+00> : vector<1x128xf32>
    %574 = tpu.matmul %572, %511, %cst_139 {dimension_numbers = #tpu.dot_dimension_numbers<[1], [0], [0], [1], [0, 0, 1, 1], [], []>} : vector<1x32xf32>, vector<32x128xf32>, vector<1x128xf32> -> vector<1x128xf32>
    %575 = arith.addf %573, %574 : vector<1x128xf32>
    %576 = arith.addf %575, %512 : vector<1x128xf32>
    %577 = vector.extract_strided_slice %576 {offsets = [0, 0], sizes = [1, 32], strides = [1, 1]} : vector<1x128xf32> to vector<1x32xf32>
    %578 = arith.negf %577 : vector<1x32xf32>
    %579 = math.exp %578 : vector<1x32xf32>
    %cst_140 = arith.constant 1.000000e+00 : f32
    %580 = vector.broadcast %cst_140 : f32 to vector<1x32xf32>
    %581 = arith.addf %580, %579 : vector<1x32xf32>
    %582 = arith.divf %580, %581 : vector<1x32xf32>
    %583 = vector.extract_strided_slice %576 {offsets = [0, 32], sizes = [1, 32], strides = [1, 1]} : vector<1x128xf32> to vector<1x32xf32>
    %584 = arith.negf %583 : vector<1x32xf32>
    %585 = math.exp %584 : vector<1x32xf32>
    %cst_141 = arith.constant 1.000000e+00 : f32
    %586 = vector.broadcast %cst_141 : f32 to vector<1x32xf32>
    %587 = arith.addf %586, %585 : vector<1x32xf32>
    %588 = arith.divf %586, %587 : vector<1x32xf32>
    %589 = vector.extract_strided_slice %576 {offsets = [0, 64], sizes = [1, 32], strides = [1, 1]} : vector<1x128xf32> to vector<1x32xf32>
    %590 = math.tanh %589 : vector<1x32xf32>
    %591 = vector.extract_strided_slice %576 {offsets = [0, 96], sizes = [1, 32], strides = [1, 1]} : vector<1x128xf32> to vector<1x32xf32>
    %592 = arith.negf %591 : vector<1x32xf32>
    %593 = math.exp %592 : vector<1x32xf32>
    %cst_142 = arith.constant 1.000000e+00 : f32
    %594 = vector.broadcast %cst_142 : f32 to vector<1x32xf32>
    %595 = arith.addf %594, %593 : vector<1x32xf32>
    %596 = arith.divf %594, %595 : vector<1x32xf32>
    %597 = arith.mulf %588, %570 : vector<1x32xf32>
    %598 = arith.mulf %582, %590 : vector<1x32xf32>
    %599 = arith.addf %597, %598 : vector<1x32xf32>
    %600 = math.tanh %599 : vector<1x32xf32>
    %601 = arith.mulf %596, %600 : vector<1x32xf32>
    %cst_143 = arith.constant dense<0.000000e+00> : vector<1x128xf32>
    %602 = tpu.matmul %391, %509, %cst_143 {dimension_numbers = #tpu.dot_dimension_numbers<[1], [0], [0], [1], [0, 0, 1, 1], [], []>} : vector<1x32xf32>, vector<32x128xf32>, vector<1x128xf32> -> vector<1x128xf32>
    %cst_144 = arith.constant dense<0.000000e+00> : vector<1x128xf32>
    %603 = tpu.matmul %601, %511, %cst_144 {dimension_numbers = #tpu.dot_dimension_numbers<[1], [0], [0], [1], [0, 0, 1, 1], [], []>} : vector<1x32xf32>, vector<32x128xf32>, vector<1x128xf32> -> vector<1x128xf32>
    %604 = arith.addf %602, %603 : vector<1x128xf32>
    %605 = arith.addf %604, %512 : vector<1x128xf32>
    %606 = vector.extract_strided_slice %605 {offsets = [0, 0], sizes = [1, 32], strides = [1, 1]} : vector<1x128xf32> to vector<1x32xf32>
    %607 = arith.negf %606 : vector<1x32xf32>
    %608 = math.exp %607 : vector<1x32xf32>
    %cst_145 = arith.constant 1.000000e+00 : f32
    %609 = vector.broadcast %cst_145 : f32 to vector<1x32xf32>
    %610 = arith.addf %609, %608 : vector<1x32xf32>
    %611 = arith.divf %609, %610 : vector<1x32xf32>
    %612 = vector.extract_strided_slice %605 {offsets = [0, 32], sizes = [1, 32], strides = [1, 1]} : vector<1x128xf32> to vector<1x32xf32>
    %613 = arith.negf %612 : vector<1x32xf32>
    %614 = math.exp %613 : vector<1x32xf32>
    %cst_146 = arith.constant 1.000000e+00 : f32
    %615 = vector.broadcast %cst_146 : f32 to vector<1x32xf32>
    %616 = arith.addf %615, %614 : vector<1x32xf32>
    %617 = arith.divf %615, %616 : vector<1x32xf32>
    %618 = vector.extract_strided_slice %605 {offsets = [0, 64], sizes = [1, 32], strides = [1, 1]} : vector<1x128xf32> to vector<1x32xf32>
    %619 = math.tanh %618 : vector<1x32xf32>
    %620 = vector.extract_strided_slice %605 {offsets = [0, 96], sizes = [1, 32], strides = [1, 1]} : vector<1x128xf32> to vector<1x32xf32>
    %621 = arith.negf %620 : vector<1x32xf32>
    %622 = math.exp %621 : vector<1x32xf32>
    %cst_147 = arith.constant 1.000000e+00 : f32
    %623 = vector.broadcast %cst_147 : f32 to vector<1x32xf32>
    %624 = arith.addf %623, %622 : vector<1x32xf32>
    %625 = arith.divf %623, %624 : vector<1x32xf32>
    %626 = arith.mulf %617, %599 : vector<1x32xf32>
    %627 = arith.mulf %611, %619 : vector<1x32xf32>
    %628 = arith.addf %626, %627 : vector<1x32xf32>
    %629 = math.tanh %628 : vector<1x32xf32>
    %630 = arith.mulf %625, %629 : vector<1x32xf32>
    %cst_148 = arith.constant dense<0.000000e+00> : vector<1x128xf32>
    %631 = tpu.matmul %420, %509, %cst_148 {dimension_numbers = #tpu.dot_dimension_numbers<[1], [0], [0], [1], [0, 0, 1, 1], [], []>} : vector<1x32xf32>, vector<32x128xf32>, vector<1x128xf32> -> vector<1x128xf32>
    %cst_149 = arith.constant dense<0.000000e+00> : vector<1x128xf32>
    %632 = tpu.matmul %630, %511, %cst_149 {dimension_numbers = #tpu.dot_dimension_numbers<[1], [0], [0], [1], [0, 0, 1, 1], [], []>} : vector<1x32xf32>, vector<32x128xf32>, vector<1x128xf32> -> vector<1x128xf32>
    %633 = arith.addf %631, %632 : vector<1x128xf32>
    %634 = arith.addf %633, %512 : vector<1x128xf32>
    %635 = vector.extract_strided_slice %634 {offsets = [0, 0], sizes = [1, 32], strides = [1, 1]} : vector<1x128xf32> to vector<1x32xf32>
    %636 = arith.negf %635 : vector<1x32xf32>
    %637 = math.exp %636 : vector<1x32xf32>
    %cst_150 = arith.constant 1.000000e+00 : f32
    %638 = vector.broadcast %cst_150 : f32 to vector<1x32xf32>
    %639 = arith.addf %638, %637 : vector<1x32xf32>
    %640 = arith.divf %638, %639 : vector<1x32xf32>
    %641 = vector.extract_strided_slice %634 {offsets = [0, 32], sizes = [1, 32], strides = [1, 1]} : vector<1x128xf32> to vector<1x32xf32>
    %642 = arith.negf %641 : vector<1x32xf32>
    %643 = math.exp %642 : vector<1x32xf32>
    %cst_151 = arith.constant 1.000000e+00 : f32
    %644 = vector.broadcast %cst_151 : f32 to vector<1x32xf32>
    %645 = arith.addf %644, %643 : vector<1x32xf32>
    %646 = arith.divf %644, %645 : vector<1x32xf32>
    %647 = vector.extract_strided_slice %634 {offsets = [0, 64], sizes = [1, 32], strides = [1, 1]} : vector<1x128xf32> to vector<1x32xf32>
    %648 = math.tanh %647 : vector<1x32xf32>
    %649 = vector.extract_strided_slice %634 {offsets = [0, 96], sizes = [1, 32], strides = [1, 1]} : vector<1x128xf32> to vector<1x32xf32>
    %650 = arith.negf %649 : vector<1x32xf32>
    %651 = math.exp %650 : vector<1x32xf32>
    %cst_152 = arith.constant 1.000000e+00 : f32
    %652 = vector.broadcast %cst_152 : f32 to vector<1x32xf32>
    %653 = arith.addf %652, %651 : vector<1x32xf32>
    %654 = arith.divf %652, %653 : vector<1x32xf32>
    %655 = arith.mulf %646, %628 : vector<1x32xf32>
    %656 = arith.mulf %640, %648 : vector<1x32xf32>
    %657 = arith.addf %655, %656 : vector<1x32xf32>
    %658 = math.tanh %657 : vector<1x32xf32>
    %659 = arith.mulf %654, %658 : vector<1x32xf32>
    %cst_153 = arith.constant dense<0.000000e+00> : vector<1x128xf32>
    %660 = tpu.matmul %449, %509, %cst_153 {dimension_numbers = #tpu.dot_dimension_numbers<[1], [0], [0], [1], [0, 0, 1, 1], [], []>} : vector<1x32xf32>, vector<32x128xf32>, vector<1x128xf32> -> vector<1x128xf32>
    %cst_154 = arith.constant dense<0.000000e+00> : vector<1x128xf32>
    %661 = tpu.matmul %659, %511, %cst_154 {dimension_numbers = #tpu.dot_dimension_numbers<[1], [0], [0], [1], [0, 0, 1, 1], [], []>} : vector<1x32xf32>, vector<32x128xf32>, vector<1x128xf32> -> vector<1x128xf32>
    %662 = arith.addf %660, %661 : vector<1x128xf32>
    %663 = arith.addf %662, %512 : vector<1x128xf32>
    %664 = vector.extract_strided_slice %663 {offsets = [0, 0], sizes = [1, 32], strides = [1, 1]} : vector<1x128xf32> to vector<1x32xf32>
    %665 = arith.negf %664 : vector<1x32xf32>
    %666 = math.exp %665 : vector<1x32xf32>
    %cst_155 = arith.constant 1.000000e+00 : f32
    %667 = vector.broadcast %cst_155 : f32 to vector<1x32xf32>
    %668 = arith.addf %667, %666 : vector<1x32xf32>
    %669 = arith.divf %667, %668 : vector<1x32xf32>
    %670 = vector.extract_strided_slice %663 {offsets = [0, 32], sizes = [1, 32], strides = [1, 1]} : vector<1x128xf32> to vector<1x32xf32>
    %671 = arith.negf %670 : vector<1x32xf32>
    %672 = math.exp %671 : vector<1x32xf32>
    %cst_156 = arith.constant 1.000000e+00 : f32
    %673 = vector.broadcast %cst_156 : f32 to vector<1x32xf32>
    %674 = arith.addf %673, %672 : vector<1x32xf32>
    %675 = arith.divf %673, %674 : vector<1x32xf32>
    %676 = vector.extract_strided_slice %663 {offsets = [0, 64], sizes = [1, 32], strides = [1, 1]} : vector<1x128xf32> to vector<1x32xf32>
    %677 = math.tanh %676 : vector<1x32xf32>
    %678 = vector.extract_strided_slice %663 {offsets = [0, 96], sizes = [1, 32], strides = [1, 1]} : vector<1x128xf32> to vector<1x32xf32>
    %679 = arith.negf %678 : vector<1x32xf32>
    %680 = math.exp %679 : vector<1x32xf32>
    %cst_157 = arith.constant 1.000000e+00 : f32
    %681 = vector.broadcast %cst_157 : f32 to vector<1x32xf32>
    %682 = arith.addf %681, %680 : vector<1x32xf32>
    %683 = arith.divf %681, %682 : vector<1x32xf32>
    %684 = arith.mulf %675, %657 : vector<1x32xf32>
    %685 = arith.mulf %669, %677 : vector<1x32xf32>
    %686 = arith.addf %684, %685 : vector<1x32xf32>
    %687 = math.tanh %686 : vector<1x32xf32>
    %688 = arith.mulf %683, %687 : vector<1x32xf32>
    %cst_158 = arith.constant dense<0.000000e+00> : vector<1x128xf32>
    %689 = tpu.matmul %478, %509, %cst_158 {dimension_numbers = #tpu.dot_dimension_numbers<[1], [0], [0], [1], [0, 0, 1, 1], [], []>} : vector<1x32xf32>, vector<32x128xf32>, vector<1x128xf32> -> vector<1x128xf32>
    %cst_159 = arith.constant dense<0.000000e+00> : vector<1x128xf32>
    %690 = tpu.matmul %688, %511, %cst_159 {dimension_numbers = #tpu.dot_dimension_numbers<[1], [0], [0], [1], [0, 0, 1, 1], [], []>} : vector<1x32xf32>, vector<32x128xf32>, vector<1x128xf32> -> vector<1x128xf32>
    %691 = arith.addf %689, %690 : vector<1x128xf32>
    %692 = arith.addf %691, %512 : vector<1x128xf32>
    %693 = vector.extract_strided_slice %692 {offsets = [0, 0], sizes = [1, 32], strides = [1, 1]} : vector<1x128xf32> to vector<1x32xf32>
    %694 = arith.negf %693 : vector<1x32xf32>
    %695 = math.exp %694 : vector<1x32xf32>
    %cst_160 = arith.constant 1.000000e+00 : f32
    %696 = vector.broadcast %cst_160 : f32 to vector<1x32xf32>
    %697 = arith.addf %696, %695 : vector<1x32xf32>
    %698 = arith.divf %696, %697 : vector<1x32xf32>
    %699 = vector.extract_strided_slice %692 {offsets = [0, 32], sizes = [1, 32], strides = [1, 1]} : vector<1x128xf32> to vector<1x32xf32>
    %700 = arith.negf %699 : vector<1x32xf32>
    %701 = math.exp %700 : vector<1x32xf32>
    %cst_161 = arith.constant 1.000000e+00 : f32
    %702 = vector.broadcast %cst_161 : f32 to vector<1x32xf32>
    %703 = arith.addf %702, %701 : vector<1x32xf32>
    %704 = arith.divf %702, %703 : vector<1x32xf32>
    %705 = vector.extract_strided_slice %692 {offsets = [0, 64], sizes = [1, 32], strides = [1, 1]} : vector<1x128xf32> to vector<1x32xf32>
    %706 = math.tanh %705 : vector<1x32xf32>
    %707 = vector.extract_strided_slice %692 {offsets = [0, 96], sizes = [1, 32], strides = [1, 1]} : vector<1x128xf32> to vector<1x32xf32>
    %708 = arith.negf %707 : vector<1x32xf32>
    %709 = math.exp %708 : vector<1x32xf32>
    %cst_162 = arith.constant 1.000000e+00 : f32
    %710 = vector.broadcast %cst_162 : f32 to vector<1x32xf32>
    %711 = arith.addf %710, %709 : vector<1x32xf32>
    %712 = arith.divf %710, %711 : vector<1x32xf32>
    %713 = arith.mulf %704, %686 : vector<1x32xf32>
    %714 = arith.mulf %698, %706 : vector<1x32xf32>
    %715 = arith.addf %713, %714 : vector<1x32xf32>
    %716 = math.tanh %715 : vector<1x32xf32>
    %717 = arith.mulf %712, %716 : vector<1x32xf32>
    %cst_163 = arith.constant dense<0.000000e+00> : vector<1x128xf32>
    %718 = tpu.matmul %507, %509, %cst_163 {dimension_numbers = #tpu.dot_dimension_numbers<[1], [0], [0], [1], [0, 0, 1, 1], [], []>} : vector<1x32xf32>, vector<32x128xf32>, vector<1x128xf32> -> vector<1x128xf32>
    %cst_164 = arith.constant dense<0.000000e+00> : vector<1x128xf32>
    %719 = tpu.matmul %717, %511, %cst_164 {dimension_numbers = #tpu.dot_dimension_numbers<[1], [0], [0], [1], [0, 0, 1, 1], [], []>} : vector<1x32xf32>, vector<32x128xf32>, vector<1x128xf32> -> vector<1x128xf32>
    %720 = arith.addf %718, %719 : vector<1x128xf32>
    %721 = arith.addf %720, %512 : vector<1x128xf32>
    %722 = vector.extract_strided_slice %721 {offsets = [0, 0], sizes = [1, 32], strides = [1, 1]} : vector<1x128xf32> to vector<1x32xf32>
    %723 = arith.negf %722 : vector<1x32xf32>
    %724 = math.exp %723 : vector<1x32xf32>
    %cst_165 = arith.constant 1.000000e+00 : f32
    %725 = vector.broadcast %cst_165 : f32 to vector<1x32xf32>
    %726 = arith.addf %725, %724 : vector<1x32xf32>
    %727 = arith.divf %725, %726 : vector<1x32xf32>
    %728 = vector.extract_strided_slice %721 {offsets = [0, 32], sizes = [1, 32], strides = [1, 1]} : vector<1x128xf32> to vector<1x32xf32>
    %729 = arith.negf %728 : vector<1x32xf32>
    %730 = math.exp %729 : vector<1x32xf32>
    %cst_166 = arith.constant 1.000000e+00 : f32
    %731 = vector.broadcast %cst_166 : f32 to vector<1x32xf32>
    %732 = arith.addf %731, %730 : vector<1x32xf32>
    %733 = arith.divf %731, %732 : vector<1x32xf32>
    %734 = vector.extract_strided_slice %721 {offsets = [0, 64], sizes = [1, 32], strides = [1, 1]} : vector<1x128xf32> to vector<1x32xf32>
    %735 = math.tanh %734 : vector<1x32xf32>
    %736 = vector.extract_strided_slice %721 {offsets = [0, 96], sizes = [1, 32], strides = [1, 1]} : vector<1x128xf32> to vector<1x32xf32>
    %737 = arith.negf %736 : vector<1x32xf32>
    %738 = math.exp %737 : vector<1x32xf32>
    %cst_167 = arith.constant 1.000000e+00 : f32
    %739 = vector.broadcast %cst_167 : f32 to vector<1x32xf32>
    %740 = arith.addf %739, %738 : vector<1x32xf32>
    %741 = arith.divf %739, %740 : vector<1x32xf32>
    %742 = arith.mulf %733, %715 : vector<1x32xf32>
    %743 = arith.mulf %727, %735 : vector<1x32xf32>
    %744 = arith.addf %742, %743 : vector<1x32xf32>
    %745 = math.tanh %744 : vector<1x32xf32>
    %746 = arith.mulf %741, %745 : vector<1x32xf32>
    %c2_168 = arith.constant 2 : index
    %c0_169 = arith.constant 0 : index
    %c0_170 = arith.constant 0 : index
    %747 = vector.load %arg10[%c2_168, %c0_169, %c0_170] : memref<3x32x128xf32, #tpu.memory_space<vmem>>, vector<1x32x128xf32>
    %748 = vector.shape_cast %747 : vector<1x32x128xf32> to vector<32x128xf32>
    %c3 = arith.constant 3 : index
    %c0_171 = arith.constant 0 : index
    %c0_172 = arith.constant 0 : index
    %749 = vector.load %arg11[%c3, %c0_171, %c0_172] : memref<4x32x128xf32, #tpu.memory_space<vmem>>, vector<1x32x128xf32>
    %750 = vector.shape_cast %749 : vector<1x32x128xf32> to vector<32x128xf32>
    %c3_173 = arith.constant 3 : index
    %c0_174 = arith.constant 0 : index
    %751 = vector.load %arg12[%c3_173, %c0_174] : memref<4x128xf32, #tpu.memory_space<vmem>>, vector<1x128xf32>
    %cst_175 = arith.constant 0.000000e+00 : f32
    %752 = vector.broadcast %cst_175 : f32 to vector<1x32xf32>
    %cst_176 = arith.constant 0.000000e+00 : f32
    %753 = vector.broadcast %cst_176 : f32 to vector<1x32xf32>
    %cst_177 = arith.constant dense<0.000000e+00> : vector<1x128xf32>
    %754 = tpu.matmul %543, %748, %cst_177 {dimension_numbers = #tpu.dot_dimension_numbers<[1], [0], [0], [1], [0, 0, 1, 1], [], []>} : vector<1x32xf32>, vector<32x128xf32>, vector<1x128xf32> -> vector<1x128xf32>
    %cst_178 = arith.constant dense<0.000000e+00> : vector<1x128xf32>
    %755 = tpu.matmul %752, %750, %cst_178 {dimension_numbers = #tpu.dot_dimension_numbers<[1], [0], [0], [1], [0, 0, 1, 1], [], []>} : vector<1x32xf32>, vector<32x128xf32>, vector<1x128xf32> -> vector<1x128xf32>
    %756 = arith.addf %754, %755 : vector<1x128xf32>
    %757 = arith.addf %756, %751 : vector<1x128xf32>
    %758 = vector.extract_strided_slice %757 {offsets = [0, 0], sizes = [1, 32], strides = [1, 1]} : vector<1x128xf32> to vector<1x32xf32>
    %759 = arith.negf %758 : vector<1x32xf32>
    %760 = math.exp %759 : vector<1x32xf32>
    %cst_179 = arith.constant 1.000000e+00 : f32
    %761 = vector.broadcast %cst_179 : f32 to vector<1x32xf32>
    %762 = arith.addf %761, %760 : vector<1x32xf32>
    %763 = arith.divf %761, %762 : vector<1x32xf32>
    %764 = vector.extract_strided_slice %757 {offsets = [0, 32], sizes = [1, 32], strides = [1, 1]} : vector<1x128xf32> to vector<1x32xf32>
    %765 = arith.negf %764 : vector<1x32xf32>
    %766 = math.exp %765 : vector<1x32xf32>
    %cst_180 = arith.constant 1.000000e+00 : f32
    %767 = vector.broadcast %cst_180 : f32 to vector<1x32xf32>
    %768 = arith.addf %767, %766 : vector<1x32xf32>
    %769 = arith.divf %767, %768 : vector<1x32xf32>
    %770 = vector.extract_strided_slice %757 {offsets = [0, 64], sizes = [1, 32], strides = [1, 1]} : vector<1x128xf32> to vector<1x32xf32>
    %771 = math.tanh %770 : vector<1x32xf32>
    %772 = vector.extract_strided_slice %757 {offsets = [0, 96], sizes = [1, 32], strides = [1, 1]} : vector<1x128xf32> to vector<1x32xf32>
    %773 = arith.negf %772 : vector<1x32xf32>
    %774 = math.exp %773 : vector<1x32xf32>
    %cst_181 = arith.constant 1.000000e+00 : f32
    %775 = vector.broadcast %cst_181 : f32 to vector<1x32xf32>
    %776 = arith.addf %775, %774 : vector<1x32xf32>
    %777 = arith.divf %775, %776 : vector<1x32xf32>
    %778 = arith.mulf %769, %753 : vector<1x32xf32>
    %779 = arith.mulf %763, %771 : vector<1x32xf32>
    %780 = arith.addf %778, %779 : vector<1x32xf32>
    %781 = math.tanh %780 : vector<1x32xf32>
    %782 = arith.mulf %777, %781 : vector<1x32xf32>
    %cst_182 = arith.constant dense<0.000000e+00> : vector<1x128xf32>
    %783 = tpu.matmul %572, %748, %cst_182 {dimension_numbers = #tpu.dot_dimension_numbers<[1], [0], [0], [1], [0, 0, 1, 1], [], []>} : vector<1x32xf32>, vector<32x128xf32>, vector<1x128xf32> -> vector<1x128xf32>
    %cst_183 = arith.constant dense<0.000000e+00> : vector<1x128xf32>
    %784 = tpu.matmul %782, %750, %cst_183 {dimension_numbers = #tpu.dot_dimension_numbers<[1], [0], [0], [1], [0, 0, 1, 1], [], []>} : vector<1x32xf32>, vector<32x128xf32>, vector<1x128xf32> -> vector<1x128xf32>
    %785 = arith.addf %783, %784 : vector<1x128xf32>
    %786 = arith.addf %785, %751 : vector<1x128xf32>
    %787 = vector.extract_strided_slice %786 {offsets = [0, 0], sizes = [1, 32], strides = [1, 1]} : vector<1x128xf32> to vector<1x32xf32>
    %788 = arith.negf %787 : vector<1x32xf32>
    %789 = math.exp %788 : vector<1x32xf32>
    %cst_184 = arith.constant 1.000000e+00 : f32
    %790 = vector.broadcast %cst_184 : f32 to vector<1x32xf32>
    %791 = arith.addf %790, %789 : vector<1x32xf32>
    %792 = arith.divf %790, %791 : vector<1x32xf32>
    %793 = vector.extract_strided_slice %786 {offsets = [0, 32], sizes = [1, 32], strides = [1, 1]} : vector<1x128xf32> to vector<1x32xf32>
    %794 = arith.negf %793 : vector<1x32xf32>
    %795 = math.exp %794 : vector<1x32xf32>
    %cst_185 = arith.constant 1.000000e+00 : f32
    %796 = vector.broadcast %cst_185 : f32 to vector<1x32xf32>
    %797 = arith.addf %796, %795 : vector<1x32xf32>
    %798 = arith.divf %796, %797 : vector<1x32xf32>
    %799 = vector.extract_strided_slice %786 {offsets = [0, 64], sizes = [1, 32], strides = [1, 1]} : vector<1x128xf32> to vector<1x32xf32>
    %800 = math.tanh %799 : vector<1x32xf32>
    %801 = vector.extract_strided_slice %786 {offsets = [0, 96], sizes = [1, 32], strides = [1, 1]} : vector<1x128xf32> to vector<1x32xf32>
    %802 = arith.negf %801 : vector<1x32xf32>
    %803 = math.exp %802 : vector<1x32xf32>
    %cst_186 = arith.constant 1.000000e+00 : f32
    %804 = vector.broadcast %cst_186 : f32 to vector<1x32xf32>
    %805 = arith.addf %804, %803 : vector<1x32xf32>
    %806 = arith.divf %804, %805 : vector<1x32xf32>
    %807 = arith.mulf %798, %780 : vector<1x32xf32>
    %808 = arith.mulf %792, %800 : vector<1x32xf32>
    %809 = arith.addf %807, %808 : vector<1x32xf32>
    %810 = math.tanh %809 : vector<1x32xf32>
    %811 = arith.mulf %806, %810 : vector<1x32xf32>
    %cst_187 = arith.constant dense<0.000000e+00> : vector<1x128xf32>
    %812 = tpu.matmul %601, %748, %cst_187 {dimension_numbers = #tpu.dot_dimension_numbers<[1], [0], [0], [1], [0, 0, 1, 1], [], []>} : vector<1x32xf32>, vector<32x128xf32>, vector<1x128xf32> -> vector<1x128xf32>
    %cst_188 = arith.constant dense<0.000000e+00> : vector<1x128xf32>
    %813 = tpu.matmul %811, %750, %cst_188 {dimension_numbers = #tpu.dot_dimension_numbers<[1], [0], [0], [1], [0, 0, 1, 1], [], []>} : vector<1x32xf32>, vector<32x128xf32>, vector<1x128xf32> -> vector<1x128xf32>
    %814 = arith.addf %812, %813 : vector<1x128xf32>
    %815 = arith.addf %814, %751 : vector<1x128xf32>
    %816 = vector.extract_strided_slice %815 {offsets = [0, 0], sizes = [1, 32], strides = [1, 1]} : vector<1x128xf32> to vector<1x32xf32>
    %817 = arith.negf %816 : vector<1x32xf32>
    %818 = math.exp %817 : vector<1x32xf32>
    %cst_189 = arith.constant 1.000000e+00 : f32
    %819 = vector.broadcast %cst_189 : f32 to vector<1x32xf32>
    %820 = arith.addf %819, %818 : vector<1x32xf32>
    %821 = arith.divf %819, %820 : vector<1x32xf32>
    %822 = vector.extract_strided_slice %815 {offsets = [0, 32], sizes = [1, 32], strides = [1, 1]} : vector<1x128xf32> to vector<1x32xf32>
    %823 = arith.negf %822 : vector<1x32xf32>
    %824 = math.exp %823 : vector<1x32xf32>
    %cst_190 = arith.constant 1.000000e+00 : f32
    %825 = vector.broadcast %cst_190 : f32 to vector<1x32xf32>
    %826 = arith.addf %825, %824 : vector<1x32xf32>
    %827 = arith.divf %825, %826 : vector<1x32xf32>
    %828 = vector.extract_strided_slice %815 {offsets = [0, 64], sizes = [1, 32], strides = [1, 1]} : vector<1x128xf32> to vector<1x32xf32>
    %829 = math.tanh %828 : vector<1x32xf32>
    %830 = vector.extract_strided_slice %815 {offsets = [0, 96], sizes = [1, 32], strides = [1, 1]} : vector<1x128xf32> to vector<1x32xf32>
    %831 = arith.negf %830 : vector<1x32xf32>
    %832 = math.exp %831 : vector<1x32xf32>
    %cst_191 = arith.constant 1.000000e+00 : f32
    %833 = vector.broadcast %cst_191 : f32 to vector<1x32xf32>
    %834 = arith.addf %833, %832 : vector<1x32xf32>
    %835 = arith.divf %833, %834 : vector<1x32xf32>
    %836 = arith.mulf %827, %809 : vector<1x32xf32>
    %837 = arith.mulf %821, %829 : vector<1x32xf32>
    %838 = arith.addf %836, %837 : vector<1x32xf32>
    %839 = math.tanh %838 : vector<1x32xf32>
    %840 = arith.mulf %835, %839 : vector<1x32xf32>
    %cst_192 = arith.constant dense<0.000000e+00> : vector<1x128xf32>
    %841 = tpu.matmul %630, %748, %cst_192 {dimension_numbers = #tpu.dot_dimension_numbers<[1], [0], [0], [1], [0, 0, 1, 1], [], []>} : vector<1x32xf32>, vector<32x128xf32>, vector<1x128xf32> -> vector<1x128xf32>
    %cst_193 = arith.constant dense<0.000000e+00> : vector<1x128xf32>
    %842 = tpu.matmul %840, %750, %cst_193 {dimension_numbers = #tpu.dot_dimension_numbers<[1], [0], [0], [1], [0, 0, 1, 1], [], []>} : vector<1x32xf32>, vector<32x128xf32>, vector<1x128xf32> -> vector<1x128xf32>
    %843 = arith.addf %841, %842 : vector<1x128xf32>
    %844 = arith.addf %843, %751 : vector<1x128xf32>
    %845 = vector.extract_strided_slice %844 {offsets = [0, 0], sizes = [1, 32], strides = [1, 1]} : vector<1x128xf32> to vector<1x32xf32>
    %846 = arith.negf %845 : vector<1x32xf32>
    %847 = math.exp %846 : vector<1x32xf32>
    %cst_194 = arith.constant 1.000000e+00 : f32
    %848 = vector.broadcast %cst_194 : f32 to vector<1x32xf32>
    %849 = arith.addf %848, %847 : vector<1x32xf32>
    %850 = arith.divf %848, %849 : vector<1x32xf32>
    %851 = vector.extract_strided_slice %844 {offsets = [0, 32], sizes = [1, 32], strides = [1, 1]} : vector<1x128xf32> to vector<1x32xf32>
    %852 = arith.negf %851 : vector<1x32xf32>
    %853 = math.exp %852 : vector<1x32xf32>
    %cst_195 = arith.constant 1.000000e+00 : f32
    %854 = vector.broadcast %cst_195 : f32 to vector<1x32xf32>
    %855 = arith.addf %854, %853 : vector<1x32xf32>
    %856 = arith.divf %854, %855 : vector<1x32xf32>
    %857 = vector.extract_strided_slice %844 {offsets = [0, 64], sizes = [1, 32], strides = [1, 1]} : vector<1x128xf32> to vector<1x32xf32>
    %858 = math.tanh %857 : vector<1x32xf32>
    %859 = vector.extract_strided_slice %844 {offsets = [0, 96], sizes = [1, 32], strides = [1, 1]} : vector<1x128xf32> to vector<1x32xf32>
    %860 = arith.negf %859 : vector<1x32xf32>
    %861 = math.exp %860 : vector<1x32xf32>
    %cst_196 = arith.constant 1.000000e+00 : f32
    %862 = vector.broadcast %cst_196 : f32 to vector<1x32xf32>
    %863 = arith.addf %862, %861 : vector<1x32xf32>
    %864 = arith.divf %862, %863 : vector<1x32xf32>
    %865 = arith.mulf %856, %838 : vector<1x32xf32>
    %866 = arith.mulf %850, %858 : vector<1x32xf32>
    %867 = arith.addf %865, %866 : vector<1x32xf32>
    %868 = math.tanh %867 : vector<1x32xf32>
    %869 = arith.mulf %864, %868 : vector<1x32xf32>
    %cst_197 = arith.constant dense<0.000000e+00> : vector<1x128xf32>
    %870 = tpu.matmul %659, %748, %cst_197 {dimension_numbers = #tpu.dot_dimension_numbers<[1], [0], [0], [1], [0, 0, 1, 1], [], []>} : vector<1x32xf32>, vector<32x128xf32>, vector<1x128xf32> -> vector<1x128xf32>
    %cst_198 = arith.constant dense<0.000000e+00> : vector<1x128xf32>
    %871 = tpu.matmul %869, %750, %cst_198 {dimension_numbers = #tpu.dot_dimension_numbers<[1], [0], [0], [1], [0, 0, 1, 1], [], []>} : vector<1x32xf32>, vector<32x128xf32>, vector<1x128xf32> -> vector<1x128xf32>
    %872 = arith.addf %870, %871 : vector<1x128xf32>
    %873 = arith.addf %872, %751 : vector<1x128xf32>
    %874 = vector.extract_strided_slice %873 {offsets = [0, 0], sizes = [1, 32], strides = [1, 1]} : vector<1x128xf32> to vector<1x32xf32>
    %875 = arith.negf %874 : vector<1x32xf32>
    %876 = math.exp %875 : vector<1x32xf32>
    %cst_199 = arith.constant 1.000000e+00 : f32
    %877 = vector.broadcast %cst_199 : f32 to vector<1x32xf32>
    %878 = arith.addf %877, %876 : vector<1x32xf32>
    %879 = arith.divf %877, %878 : vector<1x32xf32>
    %880 = vector.extract_strided_slice %873 {offsets = [0, 32], sizes = [1, 32], strides = [1, 1]} : vector<1x128xf32> to vector<1x32xf32>
    %881 = arith.negf %880 : vector<1x32xf32>
    %882 = math.exp %881 : vector<1x32xf32>
    %cst_200 = arith.constant 1.000000e+00 : f32
    %883 = vector.broadcast %cst_200 : f32 to vector<1x32xf32>
    %884 = arith.addf %883, %882 : vector<1x32xf32>
    %885 = arith.divf %883, %884 : vector<1x32xf32>
    %886 = vector.extract_strided_slice %873 {offsets = [0, 64], sizes = [1, 32], strides = [1, 1]} : vector<1x128xf32> to vector<1x32xf32>
    %887 = math.tanh %886 : vector<1x32xf32>
    %888 = vector.extract_strided_slice %873 {offsets = [0, 96], sizes = [1, 32], strides = [1, 1]} : vector<1x128xf32> to vector<1x32xf32>
    %889 = arith.negf %888 : vector<1x32xf32>
    %890 = math.exp %889 : vector<1x32xf32>
    %cst_201 = arith.constant 1.000000e+00 : f32
    %891 = vector.broadcast %cst_201 : f32 to vector<1x32xf32>
    %892 = arith.addf %891, %890 : vector<1x32xf32>
    %893 = arith.divf %891, %892 : vector<1x32xf32>
    %894 = arith.mulf %885, %867 : vector<1x32xf32>
    %895 = arith.mulf %879, %887 : vector<1x32xf32>
    %896 = arith.addf %894, %895 : vector<1x32xf32>
    %897 = math.tanh %896 : vector<1x32xf32>
    %898 = arith.mulf %893, %897 : vector<1x32xf32>
    %cst_202 = arith.constant dense<0.000000e+00> : vector<1x128xf32>
    %899 = tpu.matmul %688, %748, %cst_202 {dimension_numbers = #tpu.dot_dimension_numbers<[1], [0], [0], [1], [0, 0, 1, 1], [], []>} : vector<1x32xf32>, vector<32x128xf32>, vector<1x128xf32> -> vector<1x128xf32>
    %cst_203 = arith.constant dense<0.000000e+00> : vector<1x128xf32>
    %900 = tpu.matmul %898, %750, %cst_203 {dimension_numbers = #tpu.dot_dimension_numbers<[1], [0], [0], [1], [0, 0, 1, 1], [], []>} : vector<1x32xf32>, vector<32x128xf32>, vector<1x128xf32> -> vector<1x128xf32>
    %901 = arith.addf %899, %900 : vector<1x128xf32>
    %902 = arith.addf %901, %751 : vector<1x128xf32>
    %903 = vector.extract_strided_slice %902 {offsets = [0, 0], sizes = [1, 32], strides = [1, 1]} : vector<1x128xf32> to vector<1x32xf32>
    %904 = arith.negf %903 : vector<1x32xf32>
    %905 = math.exp %904 : vector<1x32xf32>
    %cst_204 = arith.constant 1.000000e+00 : f32
    %906 = vector.broadcast %cst_204 : f32 to vector<1x32xf32>
    %907 = arith.addf %906, %905 : vector<1x32xf32>
    %908 = arith.divf %906, %907 : vector<1x32xf32>
    %909 = vector.extract_strided_slice %902 {offsets = [0, 32], sizes = [1, 32], strides = [1, 1]} : vector<1x128xf32> to vector<1x32xf32>
    %910 = arith.negf %909 : vector<1x32xf32>
    %911 = math.exp %910 : vector<1x32xf32>
    %cst_205 = arith.constant 1.000000e+00 : f32
    %912 = vector.broadcast %cst_205 : f32 to vector<1x32xf32>
    %913 = arith.addf %912, %911 : vector<1x32xf32>
    %914 = arith.divf %912, %913 : vector<1x32xf32>
    %915 = vector.extract_strided_slice %902 {offsets = [0, 64], sizes = [1, 32], strides = [1, 1]} : vector<1x128xf32> to vector<1x32xf32>
    %916 = math.tanh %915 : vector<1x32xf32>
    %917 = vector.extract_strided_slice %902 {offsets = [0, 96], sizes = [1, 32], strides = [1, 1]} : vector<1x128xf32> to vector<1x32xf32>
    %918 = arith.negf %917 : vector<1x32xf32>
    %919 = math.exp %918 : vector<1x32xf32>
    %cst_206 = arith.constant 1.000000e+00 : f32
    %920 = vector.broadcast %cst_206 : f32 to vector<1x32xf32>
    %921 = arith.addf %920, %919 : vector<1x32xf32>
    %922 = arith.divf %920, %921 : vector<1x32xf32>
    %923 = arith.mulf %914, %896 : vector<1x32xf32>
    %924 = arith.mulf %908, %916 : vector<1x32xf32>
    %925 = arith.addf %923, %924 : vector<1x32xf32>
    %926 = math.tanh %925 : vector<1x32xf32>
    %927 = arith.mulf %922, %926 : vector<1x32xf32>
    %cst_207 = arith.constant dense<0.000000e+00> : vector<1x128xf32>
    %928 = tpu.matmul %717, %748, %cst_207 {dimension_numbers = #tpu.dot_dimension_numbers<[1], [0], [0], [1], [0, 0, 1, 1], [], []>} : vector<1x32xf32>, vector<32x128xf32>, vector<1x128xf32> -> vector<1x128xf32>
    %cst_208 = arith.constant dense<0.000000e+00> : vector<1x128xf32>
    %929 = tpu.matmul %927, %750, %cst_208 {dimension_numbers = #tpu.dot_dimension_numbers<[1], [0], [0], [1], [0, 0, 1, 1], [], []>} : vector<1x32xf32>, vector<32x128xf32>, vector<1x128xf32> -> vector<1x128xf32>
    %930 = arith.addf %928, %929 : vector<1x128xf32>
    %931 = arith.addf %930, %751 : vector<1x128xf32>
    %932 = vector.extract_strided_slice %931 {offsets = [0, 0], sizes = [1, 32], strides = [1, 1]} : vector<1x128xf32> to vector<1x32xf32>
    %933 = arith.negf %932 : vector<1x32xf32>
    %934 = math.exp %933 : vector<1x32xf32>
    %cst_209 = arith.constant 1.000000e+00 : f32
    %935 = vector.broadcast %cst_209 : f32 to vector<1x32xf32>
    %936 = arith.addf %935, %934 : vector<1x32xf32>
    %937 = arith.divf %935, %936 : vector<1x32xf32>
    %938 = vector.extract_strided_slice %931 {offsets = [0, 32], sizes = [1, 32], strides = [1, 1]} : vector<1x128xf32> to vector<1x32xf32>
    %939 = arith.negf %938 : vector<1x32xf32>
    %940 = math.exp %939 : vector<1x32xf32>
    %cst_210 = arith.constant 1.000000e+00 : f32
    %941 = vector.broadcast %cst_210 : f32 to vector<1x32xf32>
    %942 = arith.addf %941, %940 : vector<1x32xf32>
    %943 = arith.divf %941, %942 : vector<1x32xf32>
    %944 = vector.extract_strided_slice %931 {offsets = [0, 64], sizes = [1, 32], strides = [1, 1]} : vector<1x128xf32> to vector<1x32xf32>
    %945 = math.tanh %944 : vector<1x32xf32>
    %946 = vector.extract_strided_slice %931 {offsets = [0, 96], sizes = [1, 32], strides = [1, 1]} : vector<1x128xf32> to vector<1x32xf32>
    %947 = arith.negf %946 : vector<1x32xf32>
    %948 = math.exp %947 : vector<1x32xf32>
    %cst_211 = arith.constant 1.000000e+00 : f32
    %949 = vector.broadcast %cst_211 : f32 to vector<1x32xf32>
    %950 = arith.addf %949, %948 : vector<1x32xf32>
    %951 = arith.divf %949, %950 : vector<1x32xf32>
    %952 = arith.mulf %943, %925 : vector<1x32xf32>
    %953 = arith.mulf %937, %945 : vector<1x32xf32>
    %954 = arith.addf %952, %953 : vector<1x32xf32>
    %955 = math.tanh %954 : vector<1x32xf32>
    %956 = arith.mulf %951, %955 : vector<1x32xf32>
    %cst_212 = arith.constant dense<0.000000e+00> : vector<1x128xf32>
    %957 = tpu.matmul %746, %748, %cst_212 {dimension_numbers = #tpu.dot_dimension_numbers<[1], [0], [0], [1], [0, 0, 1, 1], [], []>} : vector<1x32xf32>, vector<32x128xf32>, vector<1x128xf32> -> vector<1x128xf32>
    %cst_213 = arith.constant dense<0.000000e+00> : vector<1x128xf32>
    %958 = tpu.matmul %956, %750, %cst_213 {dimension_numbers = #tpu.dot_dimension_numbers<[1], [0], [0], [1], [0, 0, 1, 1], [], []>} : vector<1x32xf32>, vector<32x128xf32>, vector<1x128xf32> -> vector<1x128xf32>
    %959 = arith.addf %957, %958 : vector<1x128xf32>
    %960 = arith.addf %959, %751 : vector<1x128xf32>
    %961 = vector.extract_strided_slice %960 {offsets = [0, 0], sizes = [1, 32], strides = [1, 1]} : vector<1x128xf32> to vector<1x32xf32>
    %962 = arith.negf %961 : vector<1x32xf32>
    %963 = math.exp %962 : vector<1x32xf32>
    %cst_214 = arith.constant 1.000000e+00 : f32
    %964 = vector.broadcast %cst_214 : f32 to vector<1x32xf32>
    %965 = arith.addf %964, %963 : vector<1x32xf32>
    %966 = arith.divf %964, %965 : vector<1x32xf32>
    %967 = vector.extract_strided_slice %960 {offsets = [0, 32], sizes = [1, 32], strides = [1, 1]} : vector<1x128xf32> to vector<1x32xf32>
    %968 = arith.negf %967 : vector<1x32xf32>
    %969 = math.exp %968 : vector<1x32xf32>
    %cst_215 = arith.constant 1.000000e+00 : f32
    %970 = vector.broadcast %cst_215 : f32 to vector<1x32xf32>
    %971 = arith.addf %970, %969 : vector<1x32xf32>
    %972 = arith.divf %970, %971 : vector<1x32xf32>
    %973 = vector.extract_strided_slice %960 {offsets = [0, 64], sizes = [1, 32], strides = [1, 1]} : vector<1x128xf32> to vector<1x32xf32>
    %974 = math.tanh %973 : vector<1x32xf32>
    %975 = vector.extract_strided_slice %960 {offsets = [0, 96], sizes = [1, 32], strides = [1, 1]} : vector<1x128xf32> to vector<1x32xf32>
    %976 = arith.negf %975 : vector<1x32xf32>
    %977 = math.exp %976 : vector<1x32xf32>
    %cst_216 = arith.constant 1.000000e+00 : f32
    %978 = vector.broadcast %cst_216 : f32 to vector<1x32xf32>
    %979 = arith.addf %978, %977 : vector<1x32xf32>
    %980 = arith.divf %978, %979 : vector<1x32xf32>
    %981 = arith.mulf %972, %954 : vector<1x32xf32>
    %982 = arith.mulf %966, %974 : vector<1x32xf32>
    %983 = arith.addf %981, %982 : vector<1x32xf32>
    %984 = math.tanh %983 : vector<1x32xf32>
    %985 = arith.mulf %980, %984 : vector<1x32xf32>
    %986 = tpu.concatenate %268, %507, %746, %985 in 1 : vector<1x32xf32>, vector<1x32xf32>, vector<1x32xf32>, vector<1x32xf32> -> vector<1x128xf32>
    %987 = arith.truncf %986 : vector<1x128xf32> to vector<1x128xbf16>
    %c0_217 = arith.constant 0 : index
    %c0_218 = arith.constant 0 : index
    %988 = vector.load %arg13[%c0_217, %c0_218] : memref<128x512xbf16, #tpu.memory_space<vmem>>, vector<128x512xbf16>
    %cst_219 = arith.constant dense<0.000000e+00> : vector<1x512xf32>
    %989 = tpu.matmul %987, %988, %cst_219 {dimension_numbers = #tpu.dot_dimension_numbers<[1], [0], [0], [1], [0, 0, 1, 1], [], []>} : vector<1x128xbf16>, vector<128x512xbf16>, vector<1x512xf32> -> vector<1x512xf32>
    %c0_220 = arith.constant 0 : index
    %c0_221 = arith.constant 0 : index
    %990 = vector.load %arg14[%c0_220, %c0_221] : memref<1x512xf32, #tpu.memory_space<vmem>>, vector<1x512xf32>
    %991 = arith.addf %989, %990 : vector<1x512xf32>
    %992 = tpu.concatenate %12, %21, %991 in 0 : vector<1x512xf32>, vector<2x512xf32>, vector<1x512xf32> -> vector<4x512xf32>
    %993 = arith.truncf %992 : vector<4x512xf32> to vector<4x512xbf16>
    %c0_222 = arith.constant 0 : index
    %c0_223 = arith.constant 0 : index
    %994 = vector.load %arg15[%c0_222, %c0_223] : memref<512x512xbf16, #tpu.memory_space<vmem>>, vector<512x512xbf16>
    %cst_224 = arith.constant dense<0.000000e+00> : vector<4x512xf32>
    %995 = tpu.matmul %993, %994, %cst_224 {dimension_numbers = #tpu.dot_dimension_numbers<[1], [0], [0], [1], [0, 0, 1, 1], [], []>} : vector<4x512xbf16>, vector<512x512xbf16>, vector<4x512xf32> -> vector<4x512xf32>
    %c0_225 = arith.constant 0 : index
    %c0_226 = arith.constant 0 : index
    %996 = vector.load %arg16[%c0_225, %c0_226] : memref<1x512xf32, #tpu.memory_space<vmem>>, vector<1x512xf32>
    %997 = vector.broadcast %996 : vector<1x512xf32> to vector<4x512xf32>
    %998 = arith.addf %995, %997 : vector<4x512xf32>
    %999 = arith.truncf %998 : vector<4x512xf32> to vector<4x512xbf16>
    %c0_227 = arith.constant 0 : index
    %c0_228 = arith.constant 0 : index
    %1000 = vector.load %arg17[%c0_227, %c0_228] : memref<512x512xbf16, #tpu.memory_space<vmem>>, vector<512x512xbf16>
    %cst_229 = arith.constant dense<0.000000e+00> : vector<4x512xf32>
    %1001 = tpu.matmul %999, %1000, %cst_229 {dimension_numbers = #tpu.dot_dimension_numbers<[1], [0], [0], [1], [0, 0, 1, 1], [], []>} : vector<4x512xbf16>, vector<512x512xbf16>, vector<4x512xf32> -> vector<4x512xf32>
    %c0_230 = arith.constant 0 : index
    %c0_231 = arith.constant 0 : index
    %1002 = vector.load %arg18[%c0_230, %c0_231] : memref<1x512xf32, #tpu.memory_space<vmem>>, vector<1x512xf32>
    %1003 = vector.broadcast %1002 : vector<1x512xf32> to vector<4x512xf32>
    %1004 = arith.addf %1001, %1003 : vector<4x512xf32>
    %c0_232 = arith.constant 0 : index
    %c0_233 = arith.constant 0 : index
    %1005 = vector.load %arg19[%c0_232, %c0_233] : memref<4x512xf32, #tpu.memory_space<vmem>>, vector<4x512xf32>
    %1006 = arith.mulf %1004, %1005 : vector<4x512xf32>
    %cst_234 = arith.constant dense<0.000000e+00> : vector<4xf32>
    %1007 = vector.multi_reduction <add>, %1006, %cst_234 [1] : vector<4x512xf32> to vector<4xf32>
    %1008 = vector.shape_cast %1007 : vector<4xf32> to vector<4x1xf32>
    %cst_235 = arith.constant dense<0.000000e+00> : vector<1xf32>
    %1009 = vector.multi_reduction <add>, %1008, %cst_235 [0] : vector<4x1xf32> to vector<1xf32>
    %1010 = vector.shape_cast %1009 : vector<1xf32> to vector<1x1xf32>
    %c0_236 = arith.constant 0 : index
    %c0_237 = arith.constant 0 : index
    %1011 = vector.load %arg20[%c0_236, %c0_237] : memref<1x1xf32, #tpu.memory_space<vmem>>, vector<1x1xf32>
    %1012 = arith.addf %1010, %1011 : vector<1x1xf32>
    %1013 = arith.negf %1012 : vector<1x1xf32>
    %1014 = math.exp %1013 : vector<1x1xf32>
    %cst_238 = arith.constant 1.000000e+00 : f32
    %1015 = vector.broadcast %cst_238 : f32 to vector<1x1xf32>
    %1016 = arith.addf %1015, %1014 : vector<1x1xf32>
    %1017 = arith.divf %1015, %1016 : vector<1x1xf32>
    %c0_239 = arith.constant 0 : index
    %c0_240 = arith.constant 0 : index
    %1018 = vector.load %arg21[%c0_239, %c0_240] : memref<1x1xf32, #tpu.memory_space<vmem>>, vector<1x1xf32>
    tpu.vector_store %arg21[%c0_239, %c0_240], %1017 {strides = array<i32>} : memref<1x1xf32, #tpu.memory_space<vmem>>, vector<1x1xf32>,
    return
  }
}

</mosaic_0001>

<bundles_post_ra>
// kernel: forward.1
= control target key start
LH: loop header
LB: loop body
LE: loop exit
PB: predicated region body
PF: predicated region fallthrough
CT: control target
= control target key end

     0   :  { %s15129_s0 = inlined_call_operand.vmem [shape: f32[1,64], index: 0, kind: input, shape index: {}]   ;;  %s15130_s1 = inlined_call_operand.hbm [shape: f32[64,64], index: 1, kind: input, shape index: {}]   ;;  %s15131_s2 = inlined_call_operand.hbm [shape: f32[1,64], index: 2, kind: input, shape index: {}]   ;;  %s15132_s3 = inlined_call_operand.hbm [shape: bf16[64,512], index: 3, kind: input, shape index: {}]   ;;  %s15133_s4 = inlined_call_operand.hbm [shape: f32[1,512], index: 4, kind: input, shape index: {}]   ;;  %s15134_s5 = inlined_call_operand.vmem [shape: f32[2,768], index: 5, kind: input, shape index: {}]   ;;  %s15135_s6 = inlined_call_operand.hbm [shape: bf16[768,512], index: 6, kind: input, shape index: {}]   ;;  %s15136_s7 = inlined_call_operand.hbm [shape: f32[1,512], index: 7, kind: input, shape index: {}]   ;;  %s15137_s8 = inlined_call_operand.hbm [shape: f32[8,8], index: 8, kind: input, shape index: {}]   ;;  %s15138_s9 = inlined_call_operand.hbm [shape: f32[8,128], index: 9, kind: input, shape index: {}]   ;;  %s15139_s10 = inlined_call_operand.hbm [shape: f32[3,32,128], index: 10, kind: input, shape index: {}]   ;;  %s15140_s11 = inlined_call_operand.hbm [shape: f32[4,32,128], index: 11, kind: input, shape index: {}]   ;;  %s15141_s12 = inlined_call_operand.vmem [shape: f32[4,128], index: 12, kind: input, shape index: {}]   ;;  %s15142_s13 = inlined_call_operand.hbm [shape: bf16[128,512], index: 13, kind: input, shape index: {}]   ;;  %s15143_s14 = inlined_call_operand.hbm [shape: f32[1,512], index: 14, kind: input, shape index: {}]   ;;  %s15144_s15 = inlined_call_operand.vmem [shape: bf16[512,512], index: 15, kind: input, shape index: {}]   ;;  %s15145_s16 = inlined_call_operand.vmem [shape: f32[1,512], index: 16, kind: input, shape index: {}]   ;;  %s15146_s17 = inlined_call_operand.vmem [shape: bf16[512,512], index: 17, kind: input, shape index: {}]   ;;  %s15147_s18 = inlined_call_operand.hbm [shape: f32[1,512], index: 18, kind: input, shape index: {}]   ;;  %s15148_s19 = inlined_call_operand.vmem [shape: f32[4,512], index: 19, kind: input, shape index: {}]   ;;  %s15149_s20 = inlined_call_operand.<no memory space> [shape: f32[1,1], index: 20, kind: input, shape index: {}]   ;;  %s15150_s21 = inlined_call_operand.hbm [shape: f32[1,1], index: 21, kind: output, shape index: {}]  }
   0x1   :  { %15156 = sst [smem:[#allocation33_spill]] %s15129_s0  ;;  %v26_v0 = vstv %s15149_s20 }
   0x2   :  { %15157 = sst [smem:[#allocation34_spill]] %s15130_s1  ;;  %27 = vst [vmem:[#allocation2] sm:$0x1] %v26_v0 }
   0x3   :  { %15158 = sst [smem:[#allocation35_spill]] %s15131_s2 }
   0x4   :  { %15159 = sst [smem:[#allocation36_spill]] %s15132_s3 }
   0x5   :  { %15160 = sst [smem:[#allocation37_spill]] %s15133_s4 }
   0x6   :  { %15161 = sst [smem:[#allocation38_spill]] %s15134_s5 }
   0x7   :  { %28 = vsyncpa [#allocation4], 0 }
   0x8   :  { %29 = vsyncpa [#allocation7], 0 }
   0x9   :  { %30 = vsyncpa [#allocation10], 0 }
   0xa   :  { %31 = vsyncpa [#allocation13], 0 }
   0xb   :  { %32 = vsyncpa [#allocation16], 0 }
   0xc   :  { %33 = vsyncpa [#allocation19], 0 }
   0xd   :  { %34 = vsyncpa [#allocation22], 0 }
   0xe   :  { %35 = vsyncpa [#allocation5], 0  ;;  %s13140_s26 = smov [#allocation6]   ;;  %s13141_s3 = smov [#allocation9]  }
   0xf   :  { %s56_s27 = sshll.u32 %s13140_s26, 4  ;;  %s78_s28 = sshll.u32 %s13141_s3, 4  ;;  %s57_s27 = int_to_ptr.vmem [resolvable:$true] %s56_s27  ;;  %s79_s28 = int_to_ptr.vmem [resolvable:$true] %s78_s28 }
  0x10   :  { %s15162_s4 = sld [smem:[#allocation35_spill]] }
  0x16   :  { %s12816_s30 = scalar_lea.hbm %s15162_s4, 16 }
  0x17   :  { %p12817_p0 = scmp.ne.s32.totalorder %s15162_s4, %s12816_s30  ;;  %p12820_p1 = scmp.lt.u32.totalorder %s12816_s30, %s15162_s4 }
  0x19   :  { %p12822_p2 = pnand %p12820_p1, %p12817_p0 }
  0x1b   :  { %12825 = shalt.err (!%p12822_p2)
}
  0x1c   :  { %s12826_s1 = scalar_lea.vmem %s57_s27, 16  ;;  %s12830_s24 = scalar_lea.vmem %s57_s27, 32 }
  0x1d   :  { %p12827_p3 = scmp.ne.s32.totalorder %s57_s27, %s12826_s1  ;;  %p12831_p4 = scmp.lt.s32.totalorder %s57_s27, %s57_s27 }
  0x1e   :  { %p12832_p5 = scmp.lt.s32.totalorder %s12830_s24, %s12826_s1 }
  0x20   :  { %p12833_p6 = por %p12832_p5, %p12831_p4 }
  0x22   :  { %p12834_p7 = pnand %p12833_p6, %p12827_p3 }
  0x24   :  { %12837 = shalt.err (!%p12834_p7)
}
  0x25   :  { %59 = dma.hbm_to_vmem [thread:$0]  %s15162_s4, 16, %s57_s27, [#allocation7]  }
  0x26   :  { %s15163_s29 = sld [smem:[#allocation37_spill]] }
  0x2c   :  { %s12838_s0 = scalar_lea.hbm %s15163_s29, 64 }
  0x2d   :  { %p12839_p8 = scmp.ne.s32.totalorder %s15163_s29, %s12838_s0  ;;  %p12842_p9 = scmp.lt.u32.totalorder %s12838_s0, %s15163_s29 }
  0x2f   :  { %p12844_p10 = pnand %p12842_p9, %p12839_p8 }
  0x31   :  { %12847 = shalt.err (!%p12844_p10)
}
  0x32   :  { %s12848_s23 = scalar_lea.vmem %s79_s28, 64  ;;  %p12853_p12 = scmp.lt.s32.totalorder %s79_s28, %s79_s28 }
  0x33   :  { %p12849_p11 = scmp.ne.s32.totalorder %s79_s28, %s12848_s23  ;;  %p12854_p13 = scmp.lt.s32.totalorder %s12848_s23, %s12848_s23 }
  0x35   :  { %p12855_p0 = por %p12854_p13, %p12853_p12 }
  0x37   :  { %p12856_p1 = pnand %p12855_p0, %p12849_p11 }
  0x39   :  { %12859 = shalt.err (!%p12856_p1)
}
  0x3a   :  { %81 = dma.hbm_to_vmem [thread:$0]  %s15163_s29, 64, %s79_s28, [#allocation10]  }
  0x3b   :  { %s13142_s1 = smov [#allocation12]   ;;  %s13143_s2 = smov [#allocation15]  }
  0x3c   :  { %s102_s24 = sshll.u32 %s13142_s1, 4  ;;  %s122_s25 = sshll.u32 %s13143_s2, 4  ;;  %s103_s24 = int_to_ptr.vmem [resolvable:$true] %s102_s24  ;;  %s123_s25 = int_to_ptr.vmem [resolvable:$true] %s122_s25 }
  0x3d   :  { %s12860_s0 = scalar_lea.hbm %s15136_s7, 64 }
  0x3e   :  { %p12861_p2 = scmp.ne.s32.totalorder %s15136_s7, %s12860_s0  ;;  %p12864_p3 = scmp.lt.u32.totalorder %s12860_s0, %s15136_s7 }
  0x40   :  { %p12866_p4 = pnand %p12864_p3, %p12861_p2 }
  0x42   :  { %12869 = shalt.err (!%p12866_p4)
}
  0x43   :  { %s12870_s28 = scalar_lea.vmem %s103_s24, 64  ;;  %p12875_p6 = scmp.lt.s32.totalorder %s103_s24, %s103_s24 }
  0x44   :  { %p12871_p5 = scmp.ne.s32.totalorder %s103_s24, %s12870_s28  ;;  %p12876_p7 = scmp.lt.s32.totalorder %s12870_s28, %s12870_s28 }
  0x46   :  { %p12877_p8 = por %p12876_p7, %p12875_p6 }
  0x48   :  { %p12878_p9 = pnand %p12877_p8, %p12871_p5 }
  0x4a   :  { %12881 = shalt.err (!%p12878_p9)
}
  0x4b   :  { %105 = dma.hbm_to_vmem [thread:$0]  %s15136_s7, 64, %s103_s24, [#allocation13]  }
  0x4c   :  { %s12882_s1 = scalar_lea.hbm %s15138_s9, 128 }
  0x4d   :  { %p12883_p10 = scmp.ne.s32.totalorder %s15138_s9, %s12882_s1  ;;  %p12886_p11 = scmp.lt.u32.totalorder %s12882_s1, %s15138_s9 }
  0x4f   :  { %p12888_p12 = pnand %p12886_p11, %p12883_p10 }
  0x51   :  { %12891 = shalt.err (!%p12888_p12)
}
  0x52   :  { %s12892_s20 = scalar_lea.vmem %s123_s25, 128  ;;  %p12897_p0 = scmp.lt.s32.totalorder %s123_s25, %s123_s25 }
  0x53   :  { %p12893_p13 = scmp.ne.s32.totalorder %s123_s25, %s12892_s20  ;;  %p12898_p1 = scmp.lt.s32.totalorder %s12892_s20, %s12892_s20 }
  0x55   :  { %p12899_p2 = por %p12898_p1, %p12897_p0 }
  0x57   :  { %p12900_p3 = pnand %p12899_p2, %p12893_p13 }
  0x59   :  { %12903 = shalt.err (!%p12900_p3)
}
  0x5a   :  { %125 = dma.hbm_to_vmem [thread:$0]  %s15138_s9, 128, %s123_s25, [#allocation16]  }
  0x5b   :  { %s13144_s30 = smov [#allocation18]   ;;  %s13145_s22 = smov [#allocation21]  }
  0x5c   :  { %s143_s5 = sshll.u32 %s13144_s30, 4  ;;  %s170_s28 = sshll.u32 %s13145_s22, 4  ;;  %s144_s5 = int_to_ptr.vmem [resolvable:$true] %s143_s5  ;;  %s171_s28 = int_to_ptr.vmem [resolvable:$true] %s170_s28 }
  0x5d   :  { %s12904_s27 = scalar_lea.hbm %s15140_s11, 2048 }
  0x5e   :  { %p12905_p4 = scmp.ne.s32.totalorder %s15140_s11, %s12904_s27  ;;  %p12908_p5 = scmp.lt.u32.totalorder %s12904_s27, %s15140_s11 }
  0x60   :  { %p12910_p6 = pnand %p12908_p5, %p12905_p4 }
  0x62   :  { %12913 = shalt.err (!%p12910_p6)
}
  0x63   :  { %s12914_s9 = scalar_lea.vmem %s144_s5, 2048  ;;  %p12919_p8 = scmp.lt.s32.totalorder %s144_s5, %s144_s5 }
  0x64   :  { %p12915_p7 = scmp.ne.s32.totalorder %s144_s5, %s12914_s9  ;;  %p12920_p9 = scmp.lt.s32.totalorder %s12914_s9, %s12914_s9 }
  0x66   :  { %p12921_p10 = por %p12920_p9, %p12919_p8 }
  0x68   :  { %p12922_p11 = pnand %p12921_p10, %p12915_p7 }
  0x6a   :  { %12925 = shalt.err (!%p12922_p11)
}
  0x6b   :  { %s13146_s25 = smov 128   ;;  %s13147_s3 = smov 8  }
  0x6c   :  { %149 = dma.hbm_to_vmem [thread:$0]  %s15140_s11, 2048, %s144_s5, [#allocation19], %s13146_s25, %s13146_s25, %s13147_s3  }
  0x6d   :  { %s12926_s30 = scalar_lea.hbm %s15143_s14, 64 }
  0x6e   :  { %p12927_p12 = scmp.ne.s32.totalorder %s15143_s14, %s12926_s30  ;;  %p12930_p13 = scmp.lt.u32.totalorder %s12926_s30, %s15143_s14 }
  0x70   :  { %p12932_p0 = pnand %p12930_p13, %p12927_p12 }
  0x72   :  { %12935 = shalt.err (!%p12932_p0)
}
  0x73   :  { %s12936_s4 = scalar_lea.vmem %s171_s28, 64  ;;  %p12941_p2 = scmp.lt.s32.totalorder %s171_s28, %s171_s28 }
  0x74   :  { %p12937_p1 = scmp.ne.s32.totalorder %s171_s28, %s12936_s4  ;;  %p12942_p3 = scmp.lt.s32.totalorder %s12936_s4, %s12936_s4 }
  0x76   :  { %p12943_p4 = por %p12942_p3, %p12941_p2 }
  0x78   :  { %p12944_p5 = pnand %p12943_p4, %p12937_p1 }
  0x7a   :  { %12947 = shalt.err (!%p12944_p5)
}
  0x7b   :  { %173 = dma.hbm_to_vmem [thread:$0]  %s15143_s14, 64, %s171_s28, [#allocation22]  }
  0x7c   :  { %s13148_s1 = smov [#allocation3]   ;;  %s13149_s26 = smov [#allocation8]  }
  0x7d   :  { %s43_s2 = sshll.u32 %s13148_s1, 4  ;;  %s65_s9 = sshll.u32 %s13149_s26, 4  ;;  %s44_s2 = int_to_ptr.vmem [resolvable:$true] %s43_s2  ;;  %s13354_s9 = int_to_ptr.vmem [resolvable:$true] %s65_s9 }
  0x7e   :  { %s15164_s7 = sld [smem:[#allocation34_spill]] }
  0x84   :  { %s12948_s24 = scalar_lea.hbm %s15164_s7, 1024 }
  0x85   :  { %p12949_p6 = scmp.ne.s32.totalorder %s15164_s7, %s12948_s24  ;;  %p12952_p7 = scmp.lt.u32.totalorder %s12948_s24, %s15164_s7 }
  0x87   :  { %p12954_p8 = pnand %p12952_p7, %p12949_p6 }
  0x89   :  { %12957 = shalt.err (!%p12954_p8)
}
  0x8a   :  { %s12958_s14 = scalar_lea.vmem %s44_s2, 1024  ;;  %p12963_p10 = scmp.lt.s32.totalorder %s44_s2, %s44_s2 }
  0x8b   :  { %p12959_p9 = scmp.ne.s32.totalorder %s44_s2, %s12958_s14  ;;  %p12964_p11 = scmp.lt.s32.totalorder %s12958_s14, %s12958_s14 }
  0x8d   :  { %p12965_p12 = por %p12964_p11, %p12963_p10 }
  0x8f   :  { %p12966_p13 = pnand %p12965_p12, %p12959_p9 }
  0x91   :  { %12969 = shalt.err (!%p12966_p13)
}
  0x92   :  { %49 = dma.hbm_to_vmem [thread:$0]  %s15164_s7, 1024, %s44_s2, [#allocation4], %s13146_s25, %s13146_s25, %s13147_s3  }
  0x93   :  { %s15165_s5 = sld [smem:[#allocation36_spill]] }
  0x99   :  { %s12970_s1 = scalar_lea.hbm %s15165_s5, 2048 }
  0x9a   :  { %p12971_p0 = scmp.ne.s32.totalorder %s15165_s5, %s12970_s1  ;;  %p12974_p1 = scmp.lt.u32.totalorder %s12970_s1, %s15165_s5 }
  0x9c   :  { %p12976_p2 = pnand %p12974_p1, %p12971_p0 }
  0x9e   :  { %12979 = shalt.err (!%p12976_p2)
}
  0x9f   :  { %s12980_s30 = scalar_lea.vmem %s13354_s9, 2048  ;;  %p12985_p4 = scmp.lt.s32.totalorder %s13354_s9, %s13354_s9 }
  0xa0   :  { %p12981_p3 = scmp.ne.s32.totalorder %s13354_s9, %s12980_s30  ;;  %p12986_p5 = scmp.lt.s32.totalorder %s12980_s30, %s12980_s30 }
  0xa2   :  { %p12987_p6 = por %p12986_p5, %p12985_p4 }
  0xa4   :  { %p12988_p7 = pnand %p12987_p6, %p12981_p3 }
  0xa6   :  { %12991 = shalt.err (!%p12988_p7)
}
  0xa7   :  { %s13150_s2 = smov 256   ;;  %s13151_s7 = smov 16  }
  0xa8   :  { %71 = dma.hbm_to_vmem [thread:$0]  %s15165_s5, 2048, %s13354_s9, [#allocation7], %s13150_s2, %s13150_s2, %s13151_s7  }
  0xa9   :  { %s13152_s23 = smov [#allocation11]   ;;  %s13153_s28 = smov [#allocation14]  }
  0xaa   :  { %s89_s14 = sshll.u32 %s13152_s23, 4  ;;  %s112_s27 = sshll.u32 %s13153_s28, 4  ;;  %s90_s14 = int_to_ptr.vmem [resolvable:$true] %s89_s14  ;;  %s113_s27 = int_to_ptr.vmem [resolvable:$true] %s112_s27 }
  0xab   :  { %s12992_s1 = scalar_lea.hbm %s15135_s6, 24576 }
  0xac   :  { %p12993_p8 = scmp.ne.s32.totalorder %s15135_s6, %s12992_s1  ;;  %p12996_p9 = scmp.lt.u32.totalorder %s12992_s1, %s15135_s6 }
  0xae   :  { %p12998_p10 = pnand %p12996_p9, %p12993_p8 }
  0xb0   :  { %13001 = shalt.err (!%p12998_p10)
}
  0xb1   :  { %s13002_s9 = scalar_lea.vmem %s90_s14, 24576  ;;  %p13007_p12 = scmp.lt.s32.totalorder %s90_s14, %s90_s14 }
  0xb2   :  { %p13003_p11 = scmp.ne.s32.totalorder %s90_s14, %s13002_s9  ;;  %p13008_p13 = scmp.lt.s32.totalorder %s13002_s9, %s13002_s9 }
  0xb4   :  { %p13009_p0 = por %p13008_p13, %p13007_p12 }
  0xb6   :  { %p13010_p1 = pnand %p13009_p0, %p13003_p11 }
  0xb8   :  { %13013 = shalt.err (!%p13010_p1)
}
  0xb9   :  { %95 = dma.hbm_to_vmem [thread:$0]  %s15135_s6, 24576, %s90_s14, [#allocation10], %s13150_s2, %s13150_s2, %s13151_s7  }
  0xba   :  { %s13014_s23 = scalar_lea.hbm %s15137_s8, 128 }
  0xbb   :  { %p13015_p2 = scmp.ne.s32.totalorder %s15137_s8, %s13014_s23  ;;  %p13018_p3 = scmp.lt.u32.totalorder %s13014_s23, %s15137_s8 }
  0xbd   :  { %p13020_p4 = pnand %p13018_p3, %p13015_p2 }
  0xbf   :  { %13023 = shalt.err (!%p13020_p4)
}
  0xc0   :  { %s13024_s26 = scalar_lea.vmem %s113_s27, 128  ;;  %p13029_p6 = scmp.lt.s32.totalorder %s113_s27, %s113_s27 }
  0xc1   :  { %p13025_p5 = scmp.ne.s32.totalorder %s113_s27, %s13024_s26  ;;  %p13030_p7 = scmp.lt.s32.totalorder %s13024_s26, %s13024_s26 }
  0xc3   :  { %p13031_p8 = por %p13030_p7, %p13029_p6 }
  0xc5   :  { %p13032_p9 = pnand %p13031_p8, %p13025_p5 }
  0xc7   :  { %13035 = shalt.err (!%p13032_p9)
}
  0xc8   :  { %115 = dma.hbm_to_vmem [thread:$0]  %s15137_s8, 128, %s113_s27, [#allocation13]  }
  0xc9   :  { %s13154_s0 = smov [#allocation17]   ;;  %s13155_s24 = smov [#allocation20]  }
  0xca   :  { %s131_s20 = sshll.u32 %s13154_s0, 4  ;;  %s157_s9 = sshll.u32 %s13155_s24, 4  ;;  %s132_s20 = int_to_ptr.vmem [resolvable:$true] %s131_s20  ;;  %s13418_s9 = int_to_ptr.vmem [resolvable:$true] %s157_s9 }
  0xcb   :  { %s13036_s22 = scalar_lea.hbm %s15139_s10, 1536 }
  0xcc   :  { %p13037_p10 = scmp.ne.s32.totalorder %s15139_s10, %s13036_s22  ;;  %p13040_p11 = scmp.lt.u32.totalorder %s13036_s22, %s15139_s10 }
  0xce   :  { %p13042_p12 = pnand %p13040_p11, %p13037_p10 }
  0xd0   :  { %13045 = shalt.err (!%p13042_p12)
}
  0xd1   :  { %s13046_s8 = scalar_lea.vmem %s132_s20, 1536  ;;  %p13051_p0 = scmp.lt.s32.totalorder %s132_s20, %s132_s20 }
  0xd2   :  { %p13047_p13 = scmp.ne.s32.totalorder %s132_s20, %s13046_s8  ;;  %p13052_p1 = scmp.lt.s32.totalorder %s13046_s8, %s13046_s8 }
  0xd4   :  { %p13053_p2 = por %p13052_p1, %p13051_p0 }
  0xd6   :  { %p13054_p3 = pnand %p13053_p2, %p13047_p13 }
  0xd8   :  { %13057 = shalt.err (!%p13054_p3)
}
  0xd9   :  { %137 = dma.hbm_to_vmem [thread:$0]  %s15139_s10, 1536, %s132_s20, [#allocation16], %s13146_s25, %s13146_s25, %s13147_s3  }
  0xda   :  { %s13058_s6 = scalar_lea.hbm %s15142_s13, 4096 }
  0xdb   :  { %p13059_p4 = scmp.ne.s32.totalorder %s15142_s13, %s13058_s6  ;;  %p13062_p5 = scmp.lt.u32.totalorder %s13058_s6, %s15142_s13 }
  0xdd   :  { %p13064_p6 = pnand %p13062_p5, %p13059_p4 }
  0xdf   :  { %13067 = shalt.err (!%p13064_p6)
}
  0xe0   :  { %s13068_s30 = scalar_lea.vmem %s13418_s9, 4096  ;;  %p13073_p8 = scmp.lt.s32.totalorder %s13418_s9, %s13418_s9 }
  0xe1   :  { %p13069_p7 = scmp.ne.s32.totalorder %s13418_s9, %s13068_s30  ;;  %p13074_p9 = scmp.lt.s32.totalorder %s13068_s30, %s13068_s30 }
  0xe3   :  { %p13075_p10 = por %p13074_p9, %p13073_p8 }
  0xe5   :  { %p13076_p11 = pnand %p13075_p10, %p13069_p7 }
  0xe7   :  { %13079 = shalt.err (!%p13076_p11)
}
  0xe8   :  { %163 = dma.hbm_to_vmem [thread:$0]  %s15142_s13, 4096, %s13418_s9, [#allocation19], %s13150_s2, %s13150_s2, %s13151_s7  }
  0xe9   :  { %s13156_s3 = smov [#allocation23]   ;;  %s13080_s23 = scalar_lea.hbm %s15147_s18, 64 }
  0xea   :  { %s186_s20 = sshll.u32 %s13156_s3, 4  ;;  %p13081_p12 = scmp.ne.s32.totalorder %s15147_s18, %s13080_s23  ;;  %s187_s20 = int_to_ptr.vmem [resolvable:$true] %s186_s20 }
  0xeb   :  { %p13084_p13 = scmp.lt.u32.totalorder %s13080_s23, %s15147_s18 }
  0xed   :  { %p13086_p0 = pnand %p13084_p13, %p13081_p12 }
  0xef   :  { %13089 = shalt.err (!%p13086_p0)
}
  0xf0   :  { %s13090_s11 = scalar_lea.vmem %s187_s20, 64  ;;  %p13095_p2 = scmp.lt.s32.totalorder %s187_s20, %s187_s20 }
  0xf1   :  { %p13091_p1 = scmp.ne.s32.totalorder %s187_s20, %s13090_s11  ;;  %p13096_p3 = scmp.lt.s32.totalorder %s13090_s11, %s13090_s11 }
  0xf3   :  { %p13097_p4 = por %p13096_p3, %p13095_p2 }
  0xf5   :  { %p13098_p5 = pnand %p13097_p4, %p13091_p1 }
  0xf7   :  { %13101 = shalt.err (!%p13098_p5)
}
  0xf8   :  { %189 = dma.hbm_to_vmem [thread:$0]  %s15147_s18, 64, %s187_s20, [#allocation22]  }
  0xf9   :  { %13124 = dma.done.wait [#allocation4], 1024  }
  0xfa   :  { %13125 = vsyncadd [#allocation4], 4294966272 }
  0xfb   :  { %13126 = dma.done.wait [#allocation7], 2064  }
  0xfc   :  { %13127 = vsyncadd [#allocation7], 4294965232 }
  0xfd   :  { %13128 = dma.done.wait [#allocation10], 24640  }
  0xfe   :  { %13129 = vsyncadd [#allocation10], 4294942656 }
  0xff   :  { %13130 = dma.done.wait [#allocation13], 192  }
 0x100   :  { %13131 = vsyncadd [#allocation13], 4294967104 }
 0x101   :  { %13132 = dma.done.wait [#allocation16], 1664  }
 0x102   :  { %13133 = vsyncadd [#allocation16], 4294965632 }
 0x103   :  { %13134 = dma.done.wait [#allocation19], 6144  }
 0x104   :  { %13135 = vsyncadd [#allocation19], 4294961152 }
 0x105   :  { %13136 = dma.done.wait [#allocation22], 128  }
 0x106   :  { %13137 = vsyncadd [#allocation22], 4294967168  ;;  %v13157_v1 = vmov 0.0|0.0   ;;  %vm13158_vm0 = vmmov 0   ;;  %v13159_v2 = vmov 0.0   ;;  %v235_v3 = vld [vmem:[#allocation3] sm:$0xff]  ;;  %v418_v35 = vlaneseq }
 0x107   :  { %11386 = vmatprep.subr.bf16.mxu0 %v13157_v1  ;;  %10727 = vmatprep.mubr.msk.f32.mxu0 %vm13158_vm0, %v13159_v2  ;;  %v236_v4 = vld [vmem:[#allocation3 + $0x8] sm:$0xff]  ;;  %v237_v5 = vld [vmem:[#allocation3 + $0x10] sm:$0xff]  ;;  %v238_v7 = vld [vmem:[#allocation3 + $0x18] sm:$0xff]  ;;  %s15166_s9 = sld [smem:[#allocation33_spill]]  ;;  %vm244_vm1 = vcmask 523264   ;;  %v13160_v34 = vmov 0  }
 0x108   :  { %v11387_v6 = vpack.c.bf16 %v236_v4, %v235_v3  ;;  %v239_v8 = vld [vmem:[#allocation3 + $0x20] sm:$0xff]  ;;  %v11390_v9 = vpack.c.bf16 %v238_v7, %v237_v5  ;;  %v240_v11 = vld [vmem:[#allocation3 + $0x28] sm:$0xff]  ;;  %v241_v12 = vld [vmem:[#allocation3 + $0x30] sm:$0xff]  ;;  %473 = vmatprep.mubr.bf16.mxu1 %v13160_v34  ;;  %v13161_v36 = vmov 1983009808   ;;  %v13479_v39 = vshrl.u32 %v418_v35, 7 }
 0x109   :  { %v11804_v10 = vld [vmem:[#allocation8 + $0x4] ss:$16 sps:$4 sm:$0xff]   ;;  %v11393_v14 = vpack.c.bf16 %v240_v11, %v239_v8  ;;  %v11808_v15 = vld [vmem:[#allocation8 + $0xc] ss:$16 sps:$4 sm:$0xff]   ;;  %v11806_v18 = vld [vmem:[#allocation8 + $0x8] ss:$16 sps:$4 sm:$0xff]   ;;  %v533_v37 = vunpack.c.l.s4 %v13161_v36 }
 0x10a   :  { %11388 = vmatpush3.bf16.msra.mxu0 %v11387_v6  ;;  %441 = vmatprep.subr.bf16.mxu1 %v11804_v10  ;;  %v242_v13 = vld [vmem:[#allocation3 + $0x38] sm:$0xff]  ;;  %v11809_v19 = vld [vmem:[#allocation8] ss:$16 sps:$4 sm:$0xff]   ;;  %v243_v38 = vld [vmem:[#allocation6] sm:$0x1]  ;;  %s15167_s6 = sld [smem:[#allocation38_spill]] }
 0x10b   :  { %11389 = vmatprep.subr.bf16.mxu0 %v13157_v1  ;;  %v11396_v16 = vpack.c.bf16 %v242_v13, %v241_v12  ;;  %442 = vmatpush1.bf16.msra.mxu1 %v11809_v19  ;;  %v11810_v20 = vld [vmem:[#allocation8 + $0x24] ss:$16 sps:$4 sm:$0xff]   ;;  %v11814_v21 = vld [vmem:[#allocation8 + $0x2c] ss:$16 sps:$4 sm:$0xff]   ;;  %v11812_v22 = vld [vmem:[#allocation8 + $0x28] ss:$16 sps:$4 sm:$0xff]   ;;  %v534_v40 = vunpack.c.0.s8 %v533_v37 }
 0x10c   :  { %v11815_v23 = vld [vmem:[#allocation8 + $0x20] ss:$16 sps:$4 sm:$0xff]   ;;  %443 = vmatprep.subr.bf16.mxu1 %v11810_v20  ;;  %v11816_v24 = vld [vmem:[#allocation8 + $0x44] ss:$16 sps:$4 sm:$0xff]   ;;  %v11820_v25 = vld [vmem:[#allocation8 + $0x4c] ss:$16 sps:$4 sm:$0xff]  }
 0x10d   :  { %v234_v17 = vld [vmem:[%s15166_s9] sm:$0x1]  ;;  %v11818_v26 = vld [vmem:[#allocation8 + $0x48] ss:$16 sps:$4 sm:$0xff]   ;;  %v11821_v27 = vld [vmem:[#allocation8 + $0x40] ss:$16 sps:$4 sm:$0xff]   ;;  %v13482_v44 = vsub.s32 %v534_v40, %v13479_v39 }
 0x10e   :  { %11391 = vmatpush3.bf16.msra.mxu0 %v11390_v9  ;;  %v11822_v28 = vld [vmem:[#allocation8 + $0x64] ss:$16 sps:$4 sm:$0xff]   ;;  %v11826_v29 = vld [vmem:[#allocation8 + $0x6c] ss:$16 sps:$4 sm:$0xff]   ;;  %v11824_v30 = vld [vmem:[#allocation8 + $0x68] ss:$16 sps:$4 sm:$0xff]  }
 0x10f   :  { %11392 = vmatprep.subr.bf16.mxu0 %v13157_v1  ;;  %444 = vmatpush1.bf16.msra.mxu1 %v11815_v23  ;;  %v11827_v31 = vld [vmem:[#allocation8 + $0x60] ss:$16 sps:$4 sm:$0xff]   ;;  %v11830_v32 = vld [vmem:[#allocation11 + $0x4] ss:$16 sps:$4 sm:$0xff]   ;;  %v11828_v49 = vld [vmem:[#allocation11] ss:$16 sps:$4 sm:$0xff]  }
 0x110   :  { %445 = vmatprep.subr.bf16.mxu1 %v11816_v24  ;;  %v11833_v33 = vld [vmem:[#allocation11 + $0xc] ss:$16 sps:$4 sm:$0xff]   ;;  %v11831_v50 = vld [vmem:[#allocation11 + $0x8] ss:$16 sps:$4 sm:$0xff]   ;;  %v11836_v52 = vld [vmem:[#allocation11 + $0x24] ss:$16 sps:$4 sm:$0xff]  }
 0x111   :  { %v13487_v45 = vld [vmem:[%s15167_s6] sm:$0xff]  ;;  %v11842_v57 = vld [vmem:[#allocation11 + $0x44] ss:$16 sps:$4 sm:$0xff]   ;;  %vm2073_vm2 = vcmask 64512   ;;  %vm7827_vm3 = vcmask 1040384   ;;  %s13162_s30 = smov 64  }
 0x112   :  { %11394 = vmatpush3.bf16.msra.mxu0 %v11393_v14  ;;  %v13491_v46 = vrot.slane %v13487_v45, %v13482_v44  ;;  %v11839_v53 = vld [vmem:[#allocation11 + $0x2c] ss:$16 sps:$4 sm:$0xff]   ;;  %v11834_v55 = vld [vmem:[#allocation11 + $0x20] ss:$16 sps:$4 sm:$0xff]   ;;  %v11837_v56 = vld [vmem:[#allocation11 + $0x28] ss:$16 sps:$4 sm:$0xff]  }
 0x113   :  { %11395 = vmatprep.subr.bf16.mxu0 %v13157_v1  ;;  %446 = vmatpush1.bf16.msra.mxu1 %v11821_v27  ;;  %v11845_v58 = vld [vmem:[#allocation11 + $0x4c] ss:$16 sps:$4 sm:$0xff]   ;;  %v11840_v59 = vld [vmem:[#allocation11 + $0x40] ss:$16 sps:$4 sm:$0xff]   ;;  %v11843_v60 = vld [vmem:[#allocation11 + $0x48] ss:$16 sps:$4 sm:$0xff]  }
 0x114   :  { %447 = vmatprep.subr.bf16.mxu1 %v11822_v28  ;;  %v546_v47 = vcombine.high %v13491_v46, %v13491_v46  ;;  %v11848_v61 = vld [vmem:[#allocation11 + $0x64] ss:$16 sps:$4 sm:$0xff]   ;;  %v11851_v62 = vld [vmem:[#allocation11 + $0x6c] ss:$16 sps:$4 sm:$0xff]   ;;  %v11846_v63 = vld [vmem:[#allocation11 + $0x60] ss:$16 sps:$4 sm:$0xff]  }
 0x115   :  { %v11849_v0 = vld [vmem:[#allocation11 + $0x68] ss:$16 sps:$4 sm:$0xff]   ;;  %v11854_v3 = vld [vmem:[#allocation11 + $0x84] ss:$16 sps:$4 sm:$0xff]   ;;  %v11857_v4 = vld [vmem:[#allocation11 + $0x8c] ss:$16 sps:$4 sm:$0xff]  }
 0x116   :  { %11397 = vmatpush3.bf16.msra.mxu0 %v11396_v16  ;;  %v563_v54 = vpack.c.bf16 %v546_v47, %v546_v47  ;;  %v11852_v5 = vld [vmem:[#allocation11 + $0x80] ss:$16 sps:$4 sm:$0xff]   ;;  %v11855_v6 = vld [vmem:[#allocation11 + $0x88] ss:$16 sps:$4 sm:$0xff]   ;;  %v11860_v7 = vld [vmem:[#allocation11 + $0xa4] ss:$16 sps:$4 sm:$0xff]  }
 0x117   :  { %482 = vmatprep.subr.bf16.mxu0 %v11808_v15  ;;  %448 = vmatpush1.bf16.msra.mxu1 %v11827_v31  ;;  %v11863_v8 = vld [vmem:[#allocation11 + $0xac] ss:$16 sps:$4 sm:$0xff]   ;;  %v11858_v9 = vld [vmem:[#allocation11 + $0xa0] ss:$16 sps:$4 sm:$0xff]   ;;  %v11861_v10 = vld [vmem:[#allocation11 + $0xa8] ss:$16 sps:$4 sm:$0xff]  }
 0x118   :  { %1742 = vmatprep.subr.bf16.mxu1 %v11830_v32  ;;  %v11866_v11 = vld [vmem:[#allocation11 + $0xc4] ss:$16 sps:$4 sm:$0xff]   ;;  %v11869_v12 = vld [vmem:[#allocation11 + $0xcc] ss:$16 sps:$4 sm:$0xff]   ;;  %v11864_v13 = vld [vmem:[#allocation11 + $0xc0] ss:$16 sps:$4 sm:$0xff]  }
 0x119   :  { %10728 = vmatmul.mubr.msk.f32.vlgmr.msra.gmra.mrb[0].mxu0 %vm244_vm1, %v234_v17  ;;  %v11867_v14 = vld [vmem:[#allocation11 + $0xc8] ss:$16 sps:$4 sm:$0xff]   ;;  %v11872_v15 = vld [vmem:[#allocation11 + $0xe4] ss:$16 sps:$4 sm:$0xff]   ;;  %v11875_v16 = vld [vmem:[#allocation11 + $0xec] ss:$16 sps:$4 sm:$0xff]  }
 0x11a   :  { %483 = vmatpush1.bf16.msra.mxu0 %v11806_v18  ;;  %514 = vmatprep.mubr.bf16.mxu0 %v13160_v34  ;;  %v11870_v17 = vld [vmem:[#allocation11 + $0xe0] ss:$16 sps:$4 sm:$0xff]   ;;  %v11873_v18 = vld [vmem:[#allocation11 + $0xe8] ss:$16 sps:$4 sm:$0xff]   ;;  %v11878_v19 = vld [vmem:[#allocation11 + $0x104] ss:$16 sps:$4 sm:$0xff]  }
 0x11b   :  { %484 = vmatprep.subr.bf16.mxu0 %v11814_v21  ;;  %v11881_v20 = vld [vmem:[#allocation11 + $0x10c] ss:$16 sps:$4 sm:$0xff]   ;;  %v11876_v21 = vld [vmem:[#allocation11 + $0x100] ss:$16 sps:$4 sm:$0xff]   ;;  %v11884_v23 = vld [vmem:[#allocation11 + $0x124] ss:$16 sps:$4 sm:$0xff]  }
 0x11c   :  { %v11887_v24 = vld [vmem:[#allocation11 + $0x12c] ss:$16 sps:$4 sm:$0xff]   ;;  %v11890_v27 = vld [vmem:[#allocation11 + $0x144] ss:$16 sps:$4 sm:$0xff]   ;;  %v11897_v35 = vld [vmem:[#allocation11 + $0x168] ss:$16 sps:$4 sm:$0xff]  }
 0x11d   :  { %v11893_v28 = vld [vmem:[#allocation11 + $0x14c] ss:$16 sps:$4 sm:$0xff]   ;;  %v11896_v31 = vld [vmem:[#allocation11 + $0x164] ss:$16 sps:$4 sm:$0xff]   ;;  %v11903_v40 = vld [vmem:[#allocation11 + $0x188] ss:$16 sps:$4 sm:$0xff]  }
 0x11e   :  { %485 = vmatpush1.bf16.msra.mxu0 %v11812_v22  ;;  %v11879_v22 = vld [vmem:[#allocation11 + $0x108] ss:$16 sps:$4 sm:$0xff]   ;;  %v11899_v32 = vld [vmem:[#allocation11 + $0x16c] ss:$16 sps:$4 sm:$0xff]   ;;  %v11902_v36 = vld [vmem:[#allocation11 + $0x184] ss:$16 sps:$4 sm:$0xff]  }
 0x11f   :  { %486 = vmatprep.subr.bf16.mxu0 %v11820_v25  ;;  %v11882_v25 = vld [vmem:[#allocation11 + $0x120] ss:$16 sps:$4 sm:$0xff]   ;;  %v11905_v37 = vld [vmem:[#allocation11 + $0x18c] ss:$16 sps:$4 sm:$0xff]   ;;  %v11909_v47 = vld [vmem:[#allocation11 + $0x1a8] ss:$16 sps:$4 sm:$0xff]  }
 0x120   :  { %s13163_s10 = smov 32   ;;  %vm1999_vm4 = vcmask 261120   ;;  %s13164_s9 = smov 96   ;;  %vm7504_vm5 = vcmask 785408   ;;  %vm7832_vm6 = vcmask 1042432   ;;  %vm9765_vm7 = vcmask 1043456  }
 0x121   :  { %vm9790_vm8 = vcmask 0  }
 0x122   :  { %487 = vmatpush1.bf16.msra.mxu0 %v11818_v26  ;;  %v11885_v26 = vld [vmem:[#allocation11 + $0x128] ss:$16 sps:$4 sm:$0xff]  }
 0x123   :  { %488 = vmatprep.subr.bf16.mxu0 %v11826_v29  ;;  %v11888_v29 = vld [vmem:[#allocation11 + $0x140] ss:$16 sps:$4 sm:$0xff]  }
 0x126   :  { %489 = vmatpush1.bf16.msra.mxu0 %v11824_v30  ;;  %v11891_v30 = vld [vmem:[#allocation11 + $0x148] ss:$16 sps:$4 sm:$0xff]  }
 0x127   :  { %1865 = vmatprep.subr.bf16.mxu0 %v11833_v33  ;;  %v11894_v33 = vld [vmem:[#allocation11 + $0x160] ss:$16 sps:$4 sm:$0xff]  }
 0x1ec   :  { %v314_v41 = vpop.f32.mrb[0].mxu0 }
 0x1ed   :  { %v315_v42 = vadd.f32 %v314_v41, %v243_v38  ;;  %v10729_v43 = vpop.f32.mrb[1].mxu0  ;;  %v11900_v38 = vld [vmem:[#allocation11 + $0x180] ss:$16 sps:$4 sm:$0xff]   ;;  %v11908_v41 = vld [vmem:[#allocation11 + $0x1a4] ss:$16 sps:$4 sm:$0xff]  }
 0x1ee   :  { %v11906_v43 = vld [vmem:[#allocation11 + $0x1a0] ss:$16 sps:$4 sm:$0xff]  }
 0x1ef   :  { %12551 = vtanh.f32 %v315_v42  ;;  %v11911_v42 = vld [vmem:[#allocation11 + $0x1ac] ss:$16 sps:$4 sm:$0xff]  }
 0x1f9   :  { %v12552_v48 = vpop.eup %12551 }
 0x1fa   :  { %v319_v51 = vpack.c.bf16 %v12552_v48, %v12552_v48  ;;  %v11914_v48 = vld [vmem:[#allocation11 + $0x1c4] ss:$16 sps:$4 sm:$0xff]  }
 0x1fc   :  { %9830 = vmatmul.mubr.msk.bf16.vlgmr.msra.gmra.mrb[0].mxu1 %vm244_vm1, %v319_v51  ;;  %9831 = vmatmul.mubr.msk.bf16.vlgmr.msra.gmra.mrb[4].mxu0 %vm244_vm1, %v319_v51  ;;  %v11912_v51 = vld [vmem:[#allocation11 + $0x1c0] ss:$16 sps:$4 sm:$0xff]  }
 0x1fd   :  { %1743 = vmatpush1.bf16.msra.mxu1 %v11828_v49  ;;  %1866 = vmatpush1.bf16.msra.mxu0 %v11831_v50  ;;  %v11917_v49 = vld [vmem:[#allocation11 + $0x1cc] ss:$16 sps:$4 sm:$0xff]   ;;  %v531_v50 = vcombine.high %v13487_v45, %v13487_v45 }
 0x1fe   :  { %1744 = vmatprep.subr.bf16.mxu1 %v11836_v52  ;;  %1867 = vmatprep.subr.bf16.mxu0 %v11839_v53  ;;  %v11915_v52 = vld [vmem:[#allocation11 + $0x1c8] ss:$16 sps:$4 sm:$0xff]   ;;  %v11920_v53 = vld [vmem:[#allocation11 + $0x1e4] ss:$16 sps:$4 sm:$0xff]  }
 0x1ff   :  { %1774 = vmatprep.mubr.bf16.mxu1 %v563_v54  ;;  %1897 = vmatprep.mubr.bf16.mxu0 %v563_v54  ;;  %v11923_v54 = vld [vmem:[#allocation11 + $0x1ec] ss:$16 sps:$4 sm:$0xff]  }
 0x201   :  { %1745 = vmatpush1.bf16.msra.mxu1 %v11834_v55  ;;  %1868 = vmatpush1.bf16.msra.mxu0 %v11837_v56  ;;  %v13500_v55 = vrot.slane %v531_v50, %v13482_v44  ;;  %v11918_v56 = vld [vmem:[#allocation11 + $0x1e0] ss:$16 sps:$4 sm:$0xff]   ;;  %v11932_v44 = vld [vmem:[#allocation11 + $0x224] ss:$16 sps:$4 sm:$0xff]   ;;  %v12001_v50 = vld [vmem:[#allocation11 + $0x38c] ss:$16 sps:$4 sm:$0xff]  }
 0x202   :  { %1746 = vmatprep.subr.bf16.mxu1 %v11842_v57  ;;  %1869 = vmatprep.subr.bf16.mxu0 %v11845_v58  ;;  %v11921_v57 = vld [vmem:[#allocation11 + $0x1e8] ss:$16 sps:$4 sm:$0xff]   ;;  %v11926_v58 = vld [vmem:[#allocation11 + $0x204] ss:$16 sps:$4 sm:$0xff]  }
 0x203   :  { %v547_v45 = vcombine.high %v13500_v55, %v13500_v55 }
 0x205   :  { %1747 = vmatpush1.bf16.msra.mxu1 %v11840_v59  ;;  %1870 = vmatpush1.bf16.msra.mxu0 %v11843_v60  ;;  %v11929_v59 = vld [vmem:[#allocation11 + $0x20c] ss:$16 sps:$4 sm:$0xff]   ;;  %v562_v60 = vpack.c.bf16 %v13491_v46, %v13491_v46  ;;  %v11936_v46 = vld [vmem:[#allocation11 + $0x240] ss:$16 sps:$4 sm:$0xff]  }
 0x206   :  { %1748 = vmatprep.subr.bf16.mxu1 %v11848_v61  ;;  %1871 = vmatprep.subr.bf16.mxu0 %v11851_v62  ;;  %v11924_v61 = vld [vmem:[#allocation11 + $0x200] ss:$16 sps:$4 sm:$0xff]   ;;  %v11927_v62 = vld [vmem:[#allocation11 + $0x208] ss:$16 sps:$4 sm:$0xff]  }
 0x209   :  { %1749 = vmatpush1.bf16.msra.mxu1 %v11846_v63  ;;  %1872 = vmatpush1.bf16.msra.mxu0 %v11849_v0  ;;  %v11935_v63 = vld [vmem:[#allocation11 + $0x22c] ss:$16 sps:$4 sm:$0xff]   ;;  %v565_v0 = vpack.c.bf16 %v547_v45, %v547_v45  ;;  %v12008_v45 = vld [vmem:[#allocation11 + $0x3c0] ss:$16 sps:$4 sm:$0xff]  }
 0x20a   :  { %1750 = vmatprep.subr.bf16.mxu1 %v11854_v3  ;;  %1873 = vmatprep.subr.bf16.mxu0 %v11857_v4  ;;  %v11930_v3 = vld [vmem:[#allocation11 + $0x220] ss:$16 sps:$4 sm:$0xff]   ;;  %v11933_v4 = vld [vmem:[#allocation11 + $0x228] ss:$16 sps:$4 sm:$0xff]  }
 0x20d   :  { %1751 = vmatpush1.bf16.msra.mxu1 %v11852_v5  ;;  %1874 = vmatpush1.bf16.msra.mxu0 %v11855_v6  ;;  %v11938_v5 = vld [vmem:[#allocation11 + $0x244] ss:$16 sps:$4 sm:$0xff]   ;;  %v11941_v6 = vld [vmem:[#allocation11 + $0x24c] ss:$16 sps:$4 sm:$0xff]  }
 0x20e   :  { %1752 = vmatprep.subr.bf16.mxu1 %v11860_v7  ;;  %1875 = vmatprep.subr.bf16.mxu0 %v11863_v8  ;;  %v11939_v7 = vld [vmem:[#allocation11 + $0x248] ss:$16 sps:$4 sm:$0xff]   ;;  %v11944_v8 = vld [vmem:[#allocation11 + $0x264] ss:$16 sps:$4 sm:$0xff]  }
 0x211   :  { %1753 = vmatpush1.bf16.msra.mxu1 %v11858_v9  ;;  %1876 = vmatpush1.bf16.msra.mxu0 %v11861_v10  ;;  %v11947_v9 = vld [vmem:[#allocation11 + $0x26c] ss:$16 sps:$4 sm:$0xff]   ;;  %v11942_v10 = vld [vmem:[#allocation11 + $0x260] ss:$16 sps:$4 sm:$0xff]  }
 0x212   :  { %1754 = vmatprep.subr.bf16.mxu1 %v11866_v11  ;;  %1877 = vmatprep.subr.bf16.mxu0 %v11869_v12  ;;  %v11945_v11 = vld [vmem:[#allocation11 + $0x268] ss:$16 sps:$4 sm:$0xff]   ;;  %v11950_v12 = vld [vmem:[#allocation11 + $0x284] ss:$16 sps:$4 sm:$0xff]  }
 0x215   :  { %1755 = vmatpush1.bf16.msra.mxu1 %v11864_v13  ;;  %1878 = vmatpush1.bf16.msra.mxu0 %v11867_v14  ;;  %v11953_v13 = vld [vmem:[#allocation11 + $0x28c] ss:$16 sps:$4 sm:$0xff]   ;;  %v11948_v14 = vld [vmem:[#allocation11 + $0x280] ss:$16 sps:$4 sm:$0xff]  }
 0x216   :  { %1756 = vmatprep.subr.bf16.mxu1 %v11872_v15  ;;  %1879 = vmatprep.subr.bf16.mxu0 %v11875_v16  ;;  %v11951_v15 = vld [vmem:[#allocation11 + $0x288] ss:$16 sps:$4 sm:$0xff]   ;;  %v11956_v16 = vld [vmem:[#allocation11 + $0x2a4] ss:$16 sps:$4 sm:$0xff]  }
 0x219   :  { %1757 = vmatpush1.bf16.msra.mxu1 %v11870_v17  ;;  %1880 = vmatpush1.bf16.msra.mxu0 %v11873_v18  ;;  %v11959_v17 = vld [vmem:[#allocation11 + $0x2ac] ss:$16 sps:$4 sm:$0xff]   ;;  %v11954_v18 = vld [vmem:[#allocation11 + $0x2a0] ss:$16 sps:$4 sm:$0xff]  }
 0x21a   :  { %1758 = vmatprep.subr.bf16.mxu1 %v11878_v19  ;;  %1881 = vmatprep.subr.bf16.mxu0 %v11881_v20  ;;  %v11957_v19 = vld [vmem:[#allocation11 + $0x2a8] ss:$16 sps:$4 sm:$0xff]   ;;  %v11962_v20 = vld [vmem:[#allocation11 + $0x2c4] ss:$16 sps:$4 sm:$0xff]  }
 0x21d   :  { %1759 = vmatpush1.bf16.msra.mxu1 %v11876_v21  ;;  %1882 = vmatpush1.bf16.msra.mxu0 %v11879_v22  ;;  %v11965_v21 = vld [vmem:[#allocation11 + $0x2cc] ss:$16 sps:$4 sm:$0xff]   ;;  %v11960_v22 = vld [vmem:[#allocation11 + $0x2c0] ss:$16 sps:$4 sm:$0xff]  }
 0x21e   :  { %1760 = vmatprep.subr.bf16.mxu1 %v11884_v23  ;;  %1883 = vmatprep.subr.bf16.mxu0 %v11887_v24  ;;  %v11963_v23 = vld [vmem:[#allocation11 + $0x2c8] ss:$16 sps:$4 sm:$0xff]   ;;  %v11968_v24 = vld [vmem:[#allocation11 + $0x2e4] ss:$16 sps:$4 sm:$0xff]  }
 0x221   :  { %1761 = vmatpush1.bf16.msra.mxu1 %v11882_v25  ;;  %1884 = vmatpush1.bf16.msra.mxu0 %v11885_v26  ;;  %v11971_v25 = vld [vmem:[#allocation11 + $0x2ec] ss:$16 sps:$4 sm:$0xff]   ;;  %v11966_v26 = vld [vmem:[#allocation11 + $0x2e0] ss:$16 sps:$4 sm:$0xff]  }
 0x222   :  { %1762 = vmatprep.subr.bf16.mxu1 %v11890_v27  ;;  %1885 = vmatprep.subr.bf16.mxu0 %v11893_v28  ;;  %v11969_v27 = vld [vmem:[#allocation11 + $0x2e8] ss:$16 sps:$4 sm:$0xff]   ;;  %v11974_v28 = vld [vmem:[#allocation11 + $0x304] ss:$16 sps:$4 sm:$0xff]  }
 0x225   :  { %1763 = vmatpush1.bf16.msra.mxu1 %v11888_v29  ;;  %1886 = vmatpush1.bf16.msra.mxu0 %v11891_v30  ;;  %v11977_v29 = vld [vmem:[#allocation11 + $0x30c] ss:$16 sps:$4 sm:$0xff]   ;;  %v11972_v30 = vld [vmem:[#allocation11 + $0x300] ss:$16 sps:$4 sm:$0xff]  }
 0x226   :  { %1764 = vmatprep.subr.bf16.mxu1 %v11896_v31  ;;  %1887 = vmatprep.subr.bf16.mxu0 %v11899_v32  ;;  %v11975_v31 = vld [vmem:[#allocation11 + $0x308] ss:$16 sps:$4 sm:$0xff]   ;;  %v11980_v32 = vld [vmem:[#allocation11 + $0x324] ss:$16 sps:$4 sm:$0xff]  }
 0x229   :  { %1765 = vmatpush1.bf16.msra.mxu1 %v11894_v33  ;;  %1888 = vmatpush1.bf16.msra.mxu0 %v11897_v35  ;;  %v11983_v33 = vld [vmem:[#allocation11 + $0x32c] ss:$16 sps:$4 sm:$0xff]   ;;  %v11978_v35 = vld [vmem:[#allocation11 + $0x320] ss:$16 sps:$4 sm:$0xff]  }
 0x22a   :  { %1766 = vmatprep.subr.bf16.mxu1 %v11902_v36  ;;  %1889 = vmatprep.subr.bf16.mxu0 %v11905_v37  ;;  %v11981_v36 = vld [vmem:[#allocation11 + $0x328] ss:$16 sps:$4 sm:$0xff]   ;;  %v11986_v37 = vld [vmem:[#allocation11 + $0x344] ss:$16 sps:$4 sm:$0xff]  }
 0x22d   :  { %1767 = vmatpush1.bf16.msra.mxu1 %v11900_v38  ;;  %1890 = vmatpush1.bf16.msra.mxu0 %v11903_v40  ;;  %v11989_v38 = vld [vmem:[#allocation11 + $0x34c] ss:$16 sps:$4 sm:$0xff]   ;;  %v11984_v40 = vld [vmem:[#allocation11 + $0x340] ss:$16 sps:$4 sm:$0xff]  }
 0x22e   :  { %1768 = vmatprep.subr.bf16.mxu1 %v11908_v41  ;;  %1891 = vmatprep.subr.bf16.mxu0 %v11911_v42  ;;  %v11987_v41 = vld [vmem:[#allocation11 + $0x348] ss:$16 sps:$4 sm:$0xff]   ;;  %v11992_v42 = vld [vmem:[#allocation11 + $0x364] ss:$16 sps:$4 sm:$0xff]  }
 0x231   :  { %1769 = vmatpush1.bf16.msra.mxu1 %v11906_v43  ;;  %1892 = vmatpush1.bf16.msra.mxu0 %v11909_v47  ;;  %v11995_v43 = vld [vmem:[#allocation11 + $0x36c] ss:$16 sps:$4 sm:$0xff]   ;;  %v11990_v47 = vld [vmem:[#allocation11 + $0x360] ss:$16 sps:$4 sm:$0xff]  }
 0x232   :  { %1770 = vmatprep.subr.bf16.mxu1 %v11914_v48  ;;  %1893 = vmatprep.subr.bf16.mxu0 %v11917_v49  ;;  %v11993_v48 = vld [vmem:[#allocation11 + $0x368] ss:$16 sps:$4 sm:$0xff]   ;;  %v11998_v49 = vld [vmem:[#allocation11 + $0x384] ss:$16 sps:$4 sm:$0xff]  }
 0x235   :  { %1771 = vmatpush1.bf16.msra.mxu1 %v11912_v51  ;;  %1894 = vmatpush1.bf16.msra.mxu0 %v11915_v52  ;;  %v11996_v51 = vld [vmem:[#allocation11 + $0x380] ss:$16 sps:$4 sm:$0xff]   ;;  %v11999_v52 = vld [vmem:[#allocation11 + $0x388] ss:$16 sps:$4 sm:$0xff]  }
 0x236   :  { %1772 = vmatprep.subr.bf16.mxu1 %v11920_v53  ;;  %1895 = vmatprep.subr.bf16.mxu0 %v11923_v54  ;;  %v12004_v53 = vld [vmem:[#allocation11 + $0x3a4] ss:$16 sps:$4 sm:$0xff]   ;;  %v12007_v54 = vld [vmem:[#allocation11 + $0x3ac] ss:$16 sps:$4 sm:$0xff]  }
 0x239   :  { %1773 = vmatpush1.bf16.msra.mxu1 %v11918_v56  ;;  %1896 = vmatpush1.bf16.msra.mxu0 %v11921_v57  ;;  %v12002_v56 = vld [vmem:[#allocation11 + $0x3a0] ss:$16 sps:$4 sm:$0xff]   ;;  %v12005_v57 = vld [vmem:[#allocation11 + $0x3a8] ss:$16 sps:$4 sm:$0xff]  }
 0x23a   :  { %1783 = vmatprep.subr.bf16.mxu1 %v11926_v58  ;;  %1906 = vmatprep.subr.bf16.mxu0 %v11929_v59  ;;  %v12010_v58 = vld [vmem:[#allocation11 + $0x3c4] ss:$16 sps:$4 sm:$0xff]   ;;  %v12013_v59 = vld [vmem:[#allocation11 + $0x3cc] ss:$16 sps:$4 sm:$0xff]  }
 0x23c   :  { %1775 = vmatmul.mubr.bf16.vlgmr.msra.gmra.mrb[4].mxu1 %v562_v60  ;;  %1898 = vmatmul.mubr.bf16.vlgmr.msra.gmra.mrb[8].mxu0 %v562_v60  ;;  %v12011_v60 = vld [vmem:[#allocation11 + $0x3c8] ss:$16 sps:$4 sm:$0xff]  }
 0x23d   :  { %1784 = vmatpush1.bf16.msra.mxu1 %v11924_v61  ;;  %1907 = vmatpush1.bf16.msra.mxu0 %v11927_v62  ;;  %v12016_v61 = vld [vmem:[#allocation11 + $0x3e4] ss:$16 sps:$4 sm:$0xff]   ;;  %v12019_v62 = vld [vmem:[#allocation11 + $0x3ec] ss:$16 sps:$4 sm:$0xff]  }
 0x23e   :  { %1785 = vmatprep.subr.bf16.mxu1 %v11932_v44  ;;  %1908 = vmatprep.subr.bf16.mxu0 %v11935_v63  ;;  %v13509_v44 = vld.sshfl [vmem:[%s15167_s6 + $0x8] sm:$0x33 pattern:$0x76325410] }
 0x23f   :  { %1815 = vmatprep.mubr.bf16.mxu1 %v565_v0  ;;  %1938 = vmatprep.mubr.bf16.mxu0 %v565_v0  ;;  %v12014_v63 = vld [vmem:[#allocation11 + $0x3e0] ss:$16 sps:$4 sm:$0xff]   ;;  %v12017_v0 = vld [vmem:[#allocation11 + $0x3e8] ss:$16 sps:$4 sm:$0xff]  }
 0x241   :  { %1786 = vmatpush1.bf16.msra.mxu1 %v11930_v3  ;;  %1909 = vmatpush1.bf16.msra.mxu0 %v11933_v4  ;;  %v12023_v3 = vld [vmem:[#allocation11 + $0x404] ss:$16 sps:$4 sm:$0xff]   ;;  %v12026_v4 = vld [vmem:[#allocation11 + $0x40c] ss:$16 sps:$4 sm:$0xff]  }
 0x242   :  { %1787 = vmatprep.subr.bf16.mxu1 %v11938_v5  ;;  %1910 = vmatprep.subr.bf16.mxu0 %v11941_v6  ;;  %v555_v5 = vcombine.high %v13509_v44, %v13509_v44  ;;  %v564_v6 = vpack.c.bf16 %v13500_v55, %v13500_v55  ;;  %v12033_v55 = vld [vmem:[#allocation11 + $0x440] ss:$16 sps:$4 sm:$0xff]  }
 0x245   :  { %1788 = vmatpush1.bf16.msra.mxu1 %v11936_v46  ;;  %1911 = vmatpush1.bf16.msra.mxu0 %v11939_v7  ;;  %v12021_v46 = vld [vmem:[#allocation11 + $0x400] ss:$16 sps:$4 sm:$0xff]   ;;  %v12024_v7 = vld [vmem:[#allocation11 + $0x408] ss:$16 sps:$4 sm:$0xff]  }
 0x246   :  { %1789 = vmatprep.subr.bf16.mxu1 %v11944_v8  ;;  %1912 = vmatprep.subr.bf16.mxu0 %v11947_v9  ;;  %v12029_v8 = vld [vmem:[#allocation11 + $0x424] ss:$16 sps:$4 sm:$0xff]   ;;  %v12032_v9 = vld [vmem:[#allocation11 + $0x42c] ss:$16 sps:$4 sm:$0xff]  }
 0x249   :  { %1790 = vmatpush1.bf16.msra.mxu1 %v11942_v10  ;;  %1913 = vmatpush1.bf16.msra.mxu0 %v11945_v11  ;;  %v567_v10 = vpack.c.bf16 %v555_v5, %v555_v5  ;;  %v12027_v11 = vld [vmem:[#allocation11 + $0x420] ss:$16 sps:$4 sm:$0xff]  }
 0x24a   :  { %1791 = vmatprep.subr.bf16.mxu1 %v11950_v12  ;;  %1914 = vmatprep.subr.bf16.mxu0 %v11953_v13  ;;  %v12030_v12 = vld [vmem:[#allocation11 + $0x428] ss:$16 sps:$4 sm:$0xff]   ;;  %v12035_v13 = vld [vmem:[#allocation11 + $0x444] ss:$16 sps:$4 sm:$0xff]   ;;  %v12105_v5 = vld [vmem:[#allocation11 + $0x5c0] ss:$16 sps:$4 sm:$0xff]  }
 0x24d   :  { %1792 = vmatpush1.bf16.msra.mxu1 %v11948_v14  ;;  %1915 = vmatpush1.bf16.msra.mxu0 %v11951_v15  ;;  %v12038_v14 = vld [vmem:[#allocation11 + $0x44c] ss:$16 sps:$4 sm:$0xff]   ;;  %v12036_v15 = vld [vmem:[#allocation11 + $0x448] ss:$16 sps:$4 sm:$0xff]  }
 0x24e   :  { %1793 = vmatprep.subr.bf16.mxu1 %v11956_v16  ;;  %1916 = vmatprep.subr.bf16.mxu0 %v11959_v17  ;;  %v12041_v16 = vld [vmem:[#allocation11 + $0x464] ss:$16 sps:$4 sm:$0xff]   ;;  %v12044_v17 = vld [vmem:[#allocation11 + $0x46c] ss:$16 sps:$4 sm:$0xff]  }
 0x251   :  { %1794 = vmatpush1.bf16.msra.mxu1 %v11954_v18  ;;  %1917 = vmatpush1.bf16.msra.mxu0 %v11957_v19  ;;  %v12039_v18 = vld [vmem:[#allocation11 + $0x460] ss:$16 sps:$4 sm:$0xff]   ;;  %v12042_v19 = vld [vmem:[#allocation11 + $0x468] ss:$16 sps:$4 sm:$0xff]  }
 0x252   :  { %1795 = vmatprep.subr.bf16.mxu1 %v11962_v20  ;;  %1918 = vmatprep.subr.bf16.mxu0 %v11965_v21  ;;  %v12047_v20 = vld [vmem:[#allocation11 + $0x484] ss:$16 sps:$4 sm:$0xff]   ;;  %v12050_v21 = vld [vmem:[#allocation11 + $0x48c] ss:$16 sps:$4 sm:$0xff]  }
 0x255   :  { %1796 = vmatpush1.bf16.msra.mxu1 %v11960_v22  ;;  %1919 = vmatpush1.bf16.msra.mxu0 %v11963_v23  ;;  %v12045_v22 = vld [vmem:[#allocation11 + $0x480] ss:$16 sps:$4 sm:$0xff]   ;;  %v12048_v23 = vld [vmem:[#allocation11 + $0x488] ss:$16 sps:$4 sm:$0xff]  }
 0x256   :  { %1797 = vmatprep.subr.bf16.mxu1 %v11968_v24  ;;  %1920 = vmatprep.subr.bf16.mxu0 %v11971_v25  ;;  %v12053_v24 = vld [vmem:[#allocation11 + $0x4a4] ss:$16 sps:$4 sm:$0xff]   ;;  %v12056_v25 = vld [vmem:[#allocation11 + $0x4ac] ss:$16 sps:$4 sm:$0xff]  }
 0x259   :  { %1798 = vmatpush1.bf16.msra.mxu1 %v11966_v26  ;;  %1921 = vmatpush1.bf16.msra.mxu0 %v11969_v27  ;;  %v12051_v26 = vld [vmem:[#allocation11 + $0x4a0] ss:$16 sps:$4 sm:$0xff]   ;;  %v12054_v27 = vld [vmem:[#allocation11 + $0x4a8] ss:$16 sps:$4 sm:$0xff]  }
 0x25a   :  { %1799 = vmatprep.subr.bf16.mxu1 %v11974_v28  ;;  %1922 = vmatprep.subr.bf16.mxu0 %v11977_v29  ;;  %v12059_v28 = vld [vmem:[#allocation11 + $0x4c4] ss:$16 sps:$4 sm:$0xff]   ;;  %v12062_v29 = vld [vmem:[#allocation11 + $0x4cc] ss:$16 sps:$4 sm:$0xff]  }
 0x25d   :  { %1800 = vmatpush1.bf16.msra.mxu1 %v11972_v30  ;;  %1923 = vmatpush1.bf16.msra.mxu0 %v11975_v31  ;;  %v12057_v30 = vld [vmem:[#allocation11 + $0x4c0] ss:$16 sps:$4 sm:$0xff]   ;;  %v12060_v31 = vld [vmem:[#allocation11 + $0x4c8] ss:$16 sps:$4 sm:$0xff]  }
 0x25e   :  { %1801 = vmatprep.subr.bf16.mxu1 %v11980_v32  ;;  %1924 = vmatprep.subr.bf16.mxu0 %v11983_v33  ;;  %v12065_v32 = vld [vmem:[#allocation11 + $0x4e4] ss:$16 sps:$4 sm:$0xff]   ;;  %v12068_v33 = vld [vmem:[#allocation11 + $0x4ec] ss:$16 sps:$4 sm:$0xff]  }
 0x261   :  { %1802 = vmatpush1.bf16.msra.mxu1 %v11978_v35  ;;  %1925 = vmatpush1.bf16.msra.mxu0 %v11981_v36  ;;  %v12063_v35 = vld [vmem:[#allocation11 + $0x4e0] ss:$16 sps:$4 sm:$0xff]   ;;  %v12066_v36 = vld [vmem:[#allocation11 + $0x4e8] ss:$16 sps:$4 sm:$0xff]  }
 0x262   :  { %1803 = vmatprep.subr.bf16.mxu1 %v11986_v37  ;;  %1926 = vmatprep.subr.bf16.mxu0 %v11989_v38  ;;  %v12071_v37 = vld [vmem:[#allocation11 + $0x504] ss:$16 sps:$4 sm:$0xff]   ;;  %v12074_v38 = vld [vmem:[#allocation11 + $0x50c] ss:$16 sps:$4 sm:$0xff]  }
 0x265   :  { %1804 = vmatpush1.bf16.msra.mxu1 %v11984_v40  ;;  %1927 = vmatpush1.bf16.msra.mxu0 %v11987_v41  ;;  %v12069_v40 = vld [vmem:[#allocation11 + $0x500] ss:$16 sps:$4 sm:$0xff]   ;;  %v12072_v41 = vld [vmem:[#allocation11 + $0x508] ss:$16 sps:$4 sm:$0xff]  }
 0x266   :  { %1805 = vmatprep.subr.bf16.mxu1 %v11992_v42  ;;  %1928 = vmatprep.subr.bf16.mxu0 %v11995_v43  ;;  %v12077_v42 = vld [vmem:[#allocation11 + $0x524] ss:$16 sps:$4 sm:$0xff]   ;;  %v12080_v43 = vld [vmem:[#allocation11 + $0x52c] ss:$16 sps:$4 sm:$0xff]  }
 0x269   :  { %1806 = vmatpush1.bf16.msra.mxu1 %v11990_v47  ;;  %1929 = vmatpush1.bf16.msra.mxu0 %v11993_v48  ;;  %v12075_v47 = vld [vmem:[#allocation11 + $0x520] ss:$16 sps:$4 sm:$0xff]   ;;  %v12078_v48 = vld [vmem:[#allocation11 + $0x528] ss:$16 sps:$4 sm:$0xff]  }
 0x26a   :  { %1807 = vmatprep.subr.bf16.mxu1 %v11998_v49  ;;  %1930 = vmatprep.subr.bf16.mxu0 %v12001_v50  ;;  %v12083_v49 = vld [vmem:[#allocation11 + $0x544] ss:$16 sps:$4 sm:$0xff]   ;;  %v12086_v50 = vld [vmem:[#allocation11 + $0x54c] ss:$16 sps:$4 sm:$0xff]  }
 0x26d   :  { %1808 = vmatpush1.bf16.msra.mxu1 %v11996_v51  ;;  %1931 = vmatpush1.bf16.msra.mxu0 %v11999_v52  ;;  %v12081_v51 = vld [vmem:[#allocation11 + $0x540] ss:$16 sps:$4 sm:$0xff]   ;;  %v12084_v52 = vld [vmem:[#allocation11 + $0x548] ss:$16 sps:$4 sm:$0xff]  }
 0x26e   :  { %1809 = vmatprep.subr.bf16.mxu1 %v12004_v53  ;;  %1932 = vmatprep.subr.bf16.mxu0 %v12007_v54  ;;  %v12089_v53 = vld [vmem:[#allocation11 + $0x564] ss:$16 sps:$4 sm:$0xff]   ;;  %v12092_v54 = vld [vmem:[#allocation11 + $0x56c] ss:$16 sps:$4 sm:$0xff]  }
 0x271   :  { %1810 = vmatpush1.bf16.msra.mxu1 %v12002_v56  ;;  %1933 = vmatpush1.bf16.msra.mxu0 %v12005_v57  ;;  %v12087_v56 = vld [vmem:[#allocation11 + $0x560] ss:$16 sps:$4 sm:$0xff]   ;;  %v12090_v57 = vld [vmem:[#allocation11 + $0x568] ss:$16 sps:$4 sm:$0xff]  }
 0x272   :  { %1811 = vmatprep.subr.bf16.mxu1 %v12010_v58  ;;  %1934 = vmatprep.subr.bf16.mxu0 %v12013_v59  ;;  %v12095_v58 = vld [vmem:[#allocation11 + $0x584] ss:$16 sps:$4 sm:$0xff]   ;;  %v12098_v59 = vld [vmem:[#allocation11 + $0x58c] ss:$16 sps:$4 sm:$0xff]  }
 0x275   :  { %1812 = vmatpush1.bf16.msra.mxu1 %v12008_v45  ;;  %1935 = vmatpush1.bf16.msra.mxu0 %v12011_v60  ;;  %v12093_v45 = vld [vmem:[#allocation11 + $0x580] ss:$16 sps:$4 sm:$0xff]   ;;  %v12096_v60 = vld [vmem:[#allocation11 + $0x588] ss:$16 sps:$4 sm:$0xff]  }
 0x276   :  { %1813 = vmatprep.subr.bf16.mxu1 %v12016_v61  ;;  %1936 = vmatprep.subr.bf16.mxu0 %v12019_v62  ;;  %v12101_v61 = vld [vmem:[#allocation11 + $0x5a4] ss:$16 sps:$4 sm:$0xff]   ;;  %v12104_v62 = vld [vmem:[#allocation11 + $0x5ac] ss:$16 sps:$4 sm:$0xff]  }
 0x279   :  { %1814 = vmatpush1.bf16.msra.mxu1 %v12014_v63  ;;  %1937 = vmatpush1.bf16.msra.mxu0 %v12017_v0  ;;  %v12099_v63 = vld [vmem:[#allocation11 + $0x5a0] ss:$16 sps:$4 sm:$0xff]   ;;  %v12102_v0 = vld [vmem:[#allocation11 + $0x5a8] ss:$16 sps:$4 sm:$0xff]  }
 0x27a   :  { %1824 = vmatprep.subr.bf16.mxu1 %v12023_v3  ;;  %1947 = vmatprep.subr.bf16.mxu0 %v12026_v4  ;;  %v12107_v3 = vld [vmem:[#allocation11 + $0x5c4] ss:$16 sps:$4 sm:$0xff]   ;;  %v12110_v4 = vld [vmem:[#allocation11 + $0x5cc] ss:$16 sps:$4 sm:$0xff]  }
 0x27c   :  { %1816 = vmatmul.mubr.bf16.vlgmr.msra.gmra.mrb[4].mxu1 %v564_v6  ;;  %1939 = vmatmul.mubr.bf16.vlgmr.msra.gmra.mrb[8].mxu0 %v564_v6  ;;  %v12108_v6 = vld [vmem:[#allocation11 + $0x5c8] ss:$16 sps:$4 sm:$0xff]  }
 0x27d   :  { %1825 = vmatpush1.bf16.msra.mxu1 %v12021_v46  ;;  %1948 = vmatpush1.bf16.msra.mxu0 %v12024_v7  ;;  %v12113_v46 = vld [vmem:[#allocation11 + $0x5e4] ss:$16 sps:$4 sm:$0xff]   ;;  %v12116_v7 = vld [vmem:[#allocation11 + $0x5ec] ss:$16 sps:$4 sm:$0xff]  }
 0x27e   :  { %1826 = vmatprep.subr.bf16.mxu1 %v12029_v8  ;;  %1949 = vmatprep.subr.bf16.mxu0 %v12032_v9  ;;  %v12111_v8 = vld [vmem:[#allocation11 + $0x5e0] ss:$16 sps:$4 sm:$0xff]   ;;  %v12114_v9 = vld [vmem:[#allocation11 + $0x5e8] ss:$16 sps:$4 sm:$0xff]  }
 0x27f   :  { %1856 = vmatprep.mubr.bf16.mxu1 %v567_v10  ;;  %1979 = vmatprep.mubr.bf16.mxu0 %v567_v10  ;;  %v1994_v10 = vld [vmem:[#allocation18] sm:$0xff] }
 0x281   :  { %1827 = vmatpush1.bf16.msra.mxu1 %v12027_v11  ;;  %1950 = vmatpush1.bf16.msra.mxu0 %v12030_v12  ;;  %v1995_v11 = vld [vmem:[#allocation18 + $0x8] sm:$0xff]  ;;  %v566_v12 = vpack.c.bf16 %v13509_v44, %v13509_v44  ;;  %v13526_v44 = vld [vmem:[#allocation15] sm:$0xff] }
 0x282   :  { %1828 = vmatprep.subr.bf16.mxu1 %v12035_v13  ;;  %1951 = vmatprep.subr.bf16.mxu0 %v12038_v14  ;;  %v13517_v13 = vpack.c.bf16 %v1995_v11, %v1994_v10  ;;  %v1996_v14 = vld [vmem:[#allocation18 + $0x10] sm:$0xff] }
 0x285   :  { %1829 = vmatpush1.bf16.msra.mxu1 %v12033_v55  ;;  %1952 = vmatpush1.bf16.msra.mxu0 %v12036_v15  ;;  %v1997_v55 = vld [vmem:[#allocation18 + $0x18] sm:$0xff] }
 0x286   :  { %1830 = vmatprep.subr.bf16.mxu1 %v12041_v16  ;;  %1953 = vmatprep.subr.bf16.mxu0 %v12044_v17  ;;  %v13522_v15 = vpack.c.bf16 %v1997_v55, %v1996_v14  ;;  %v13539_v16 = vld [vmem:[#allocation14] sm:$0xff]  ;;  %v13545_v17 = vsub.s32 2, %v13479_v39  ;;  %v13581_v55 = vld [vmem:[%s15141_s12] sm:$0x1] }
 0x289   :  { %1831 = vmatpush1.bf16.msra.mxu1 %v12039_v18  ;;  %1954 = vmatpush1.bf16.msra.mxu0 %v12042_v19  ;;  %v336_v18 = vld [vmem:[#allocation9] sm:$0xf] }
 0x28a   :  { %1832 = vmatprep.subr.bf16.mxu1 %v12047_v20  ;;  %1955 = vmatprep.subr.bf16.mxu0 %v12050_v21  ;;  %v429_v19 = vrot.slane %v336_v18, %v13545_v17 }
 0x28d   :  { %1833 = vmatpush1.bf16.msra.mxu1 %v12045_v22  ;;  %1956 = vmatpush1.bf16.msra.mxu0 %v12048_v23 }
 0x28e   :  { %1834 = vmatprep.subr.bf16.mxu1 %v12053_v24  ;;  %1957 = vmatprep.subr.bf16.mxu0 %v12056_v25 }
 0x291   :  { %1835 = vmatpush1.bf16.msra.mxu1 %v12051_v26  ;;  %1958 = vmatpush1.bf16.msra.mxu0 %v12054_v27 }
 0x292   :  { %1836 = vmatprep.subr.bf16.mxu1 %v12059_v28  ;;  %1959 = vmatprep.subr.bf16.mxu0 %v12062_v29  ;;  %v13555_v29 = vsub.s32 0, %v13479_v39 }
 0x295   :  { %1837 = vmatpush1.bf16.msra.mxu1 %v12057_v30  ;;  %1960 = vmatpush1.bf16.msra.mxu0 %v12060_v31  ;;  %v13558_v30 = vsub.s32 1, %v13479_v39  ;;  %v13561_v31 = vsub.s32 3, %v13479_v39 }
 0x296   :  { %1838 = vmatprep.subr.bf16.mxu1 %v12065_v32  ;;  %1961 = vmatprep.subr.bf16.mxu0 %v12068_v33  ;;  %v760_v32 = vld [vmem:[#allocation12] sm:$0xf]  ;;  %v421_v33 = vrot.slane %v336_v18, %v13555_v29 }
 0x299   :  { %1839 = vmatpush1.bf16.msra.mxu1 %v12063_v35  ;;  %1962 = vmatpush1.bf16.msra.mxu0 %v12066_v36  ;;  %v765_v35 = vrot.slane %v760_v32, %v13555_v29  ;;  %v773_v36 = vrot.slane %v760_v32, %v13545_v17 }
 0x29a   :  { %1840 = vmatprep.subr.bf16.mxu1 %v12071_v37  ;;  %1963 = vmatprep.subr.bf16.mxu0 %v12074_v38  ;;  %v425_v37 = vrot.slane %v336_v18, %v13558_v30  ;;  %v433_v38 = vrot.slane %v336_v18, %v13561_v31 }
 0x29d   :  { %1841 = vmatpush1.bf16.msra.mxu1 %v12069_v40  ;;  %1964 = vmatpush1.bf16.msra.mxu0 %v12072_v41  ;;  %v769_v40 = vrot.slane %v760_v32, %v13558_v30  ;;  %v777_v41 = vrot.slane %v760_v32, %v13561_v31 }
 0x29e   :  { %1842 = vmatprep.subr.bf16.mxu1 %v12077_v42  ;;  %1965 = vmatprep.subr.bf16.mxu0 %v12080_v43 }
 0x2a1   :  { %1843 = vmatpush1.bf16.msra.mxu1 %v12075_v47  ;;  %1966 = vmatpush1.bf16.msra.mxu0 %v12078_v48 }
 0x2a2   :  { %1844 = vmatprep.subr.bf16.mxu1 %v12083_v49  ;;  %1967 = vmatprep.subr.bf16.mxu0 %v12086_v50 }
 0x2a5   :  { %1845 = vmatpush1.bf16.msra.mxu1 %v12081_v51  ;;  %1968 = vmatpush1.bf16.msra.mxu0 %v12084_v52 }
 0x2a6   :  { %1846 = vmatprep.subr.bf16.mxu1 %v12089_v53  ;;  %1969 = vmatprep.subr.bf16.mxu0 %v12092_v54 }
 0x2a9   :  { %1847 = vmatpush1.bf16.msra.mxu1 %v12087_v56  ;;  %1970 = vmatpush1.bf16.msra.mxu0 %v12090_v57 }
 0x2aa   :  { %1848 = vmatprep.subr.bf16.mxu1 %v12095_v58  ;;  %1971 = vmatprep.subr.bf16.mxu0 %v12098_v59 }
 0x2ad   :  { %1849 = vmatpush1.bf16.msra.mxu1 %v12093_v45  ;;  %1972 = vmatpush1.bf16.msra.mxu0 %v12096_v60 }
 0x2ae   :  { %1850 = vmatprep.subr.bf16.mxu1 %v12101_v61  ;;  %1973 = vmatprep.subr.bf16.mxu0 %v12104_v62 }
 0x2b1   :  { %1851 = vmatpush1.bf16.msra.mxu1 %v12099_v63  ;;  %1974 = vmatpush1.bf16.msra.mxu0 %v12102_v0 }
 0x2b2   :  { %1852 = vmatprep.subr.bf16.mxu1 %v12107_v3  ;;  %1975 = vmatprep.subr.bf16.mxu0 %v12110_v4 }
 0x2b5   :  { %1853 = vmatpush1.bf16.msra.mxu1 %v12105_v5  ;;  %1976 = vmatpush1.bf16.msra.mxu0 %v12108_v6 }
 0x2b6   :  { %1854 = vmatprep.subr.bf16.mxu1 %v12113_v46  ;;  %1977 = vmatprep.subr.bf16.mxu0 %v12116_v7 }
 0x2b9   :  { %1855 = vmatpush1.bf16.msra.mxu1 %v12111_v8  ;;  %1978 = vmatpush1.bf16.msra.mxu0 %v12114_v9 }
 0x2ba   :  { %11398 = vmatprep.subr.bf16.mxu1 %v13157_v1  ;;  %10757 = vmatprep.subr.mxu0 %v13159_v2 }
 0x2bc   :  { %1857 = vmatmul.mubr.bf16.vlgmr.msra.gmra.mrb[4].mxu1 %v566_v12  ;;  %1980 = vmatmul.mubr.bf16.vlgmr.msra.gmra.mrb[8].mxu0 %v566_v12 }
 0x2bd   :  { %11400 = vmatpush3.bf16.msra.mxu1 %v13517_v13  ;;  %10738 = vmatprep.mubr.msk.f32.mxu1 %vm13158_vm0, %v13159_v2 }
 0x2be   :  { %11401 = vmatprep.subr.bf16.mxu1 %v13157_v1  ;;  %10758 = vmatpush3.msra.mxu0 %v13526_v44 }
 0x2bf   :  { %10759 = vmatprep.mubr.msk.f32.mxu0 %vm13158_vm0, %v13159_v2  ;;  %10773 = vmatprep.subr.mxu0 %v13159_v2 }
 0x2c1   :  { %11403 = vmatpush3.bf16.msra.mxu1 %v13522_v15 }
 0x2c2   :  { %10741 = vmatprep.subr.mxu1 %v13159_v2 }
 0x2c4   :  { %10739 = vmatmul.mubr.f32.vlgmr.msra.gmra.mrb[8].mxu1 %v13159_v2 }
 0x2c5   :  { %10742 = vmatpush3.msra.mxu1 %v13526_v44  ;;  %10743 = vmatprep.mubr.msk.f32.mxu1 %vm13158_vm0, %v13159_v2 }
 0x2c6   :  { %11404 = vmatprep.subr.bf16.mxu1 %v13157_v1 }
 0x2c8   :  { %10744 = vmatmul.mubr.msk.f32.vlgmr.msra.gmra.mrb[10].mxu1 %vm2073_vm2, %v13539_v16 }
 0x2c9   :  { %11406 = vmatpush3.bf16.msra.mxu1 %v13517_v13  ;;  %10754 = vmatprep.mubr.msk.f32.mxu1 %vm13158_vm0, %v13159_v2 }
 0x2ca   :  { %11407 = vmatprep.subr.bf16.mxu1 %v13157_v1 }
 0x2cd   :  { %11409 = vmatpush3.bf16.msra.mxu1 %v13522_v15 }
 0x2ce   :  { %11410 = vmatprep.subr.bf16.mxu1 %v13157_v1 }
 0x2cf   :  { %v475_v20 = vpop.f32.mrb[0].mxu1  ;;  %v516_v21 = vpop.f32.mrb[4].mxu0 }
 0x2d0   :  { %v517_v22 = vadd.f32 %v516_v21, %v429_v19  ;;  %v477_v23 = vpop.f32.mrb[1].mxu1  ;;  %v518_v24 = vpop.f32.mrb[5].mxu0  ;;  %v476_v47 = vadd.f32 %v475_v20, %v421_v33 }
 0x2d1   :  { %v479_v25 = vpop.f32.mrb[2].mxu1  ;;  %v520_v26 = vpop.f32.mrb[6].mxu0  ;;  %v478_v51 = vadd.f32 %v477_v23, %v425_v37  ;;  %v519_v52 = vadd.f32 %v518_v24, %v433_v38  ;;  %v2247_v37 = vrot.slane %v13539_v16, 1 }
 0x2d2   :  { %v480_v27 = vpop.f32.mrb[3].mxu1  ;;  %v521_v28 = vpop.f32.mrb[7].mxu0  ;;  %v523_v63 = vmax.f32 %v476_v47, 0.0  ;;  %v525_v0 = vmax.f32 %v517_v22, 0.0 }
 0x2d3   :  { %v524_v5 = vmax.f32 %v478_v51, 0.0  ;;  %v526_v6 = vmax.f32 %v519_v52, 0.0  ;;  %10760 = vmatmul.mubr.msk.f32.vlgmr.msra.gmra.mrb[2].mxu0 %vm2073_vm2, %v2247_v37 }
 0x2d4   :  { %10774 = vmatpush3.msra.mxu0 %v13526_v44  ;;  %10775 = vmatprep.mubr.msk.f32.mxu0 %vm13158_vm0, %v13159_v2 }
 0x2d5   :  { %11416 = vmatprep.subr.bf16.mxu0 %v13157_v1 }
 0x38f   :  { %v1858_v42 = vpop.f32.mrb[4].mxu1  ;;  %v1981_v43 = vpop.f32.mrb[8].mxu0 }
 0x390   :  { %v11734_v39 = vadd.f32 %v1858_v42, %v765_v35  ;;  %v11736_v48 = vadd.f32 %v1981_v43, %v773_v36  ;;  %v1860_v49 = vpop.f32.mrb[5].mxu1  ;;  %v1983_v50 = vpop.f32.mrb[9].mxu0 }
 0x391   :  { %v11735_v53 = vadd.f32 %v1860_v49, %v769_v40  ;;  %v11737_v54 = vadd.f32 %v1983_v50, %v777_v41  ;;  %v1862_v56 = vpop.f32.mrb[6].mxu1  ;;  %v1985_v57 = vpop.f32.mrb[10].mxu0 }
 0x392   :  { %v1988_v58 = vmax.f32 %v11734_v39, 0.0  ;;  %v1990_v59 = vmax.f32 %v11736_v48, 0.0  ;;  %v1863_v45 = vpop.f32.mrb[7].mxu1  ;;  %v1986_v60 = vpop.f32.mrb[11].mxu0 }
 0x393   :  { %v1989_v61 = vmax.f32 %v11735_v53, 0.0  ;;  %v1991_v62 = vmax.f32 %v11737_v54, 0.0 }
 0x394   :  { %v7807_v3 = vrot.slane %v1988_v58, 7  ;;  %v7809_v4 = vrot.slane %v1990_v59, 7 }
 0x395   :  { %v7808_v46 = vrot.slane %v1989_v61, 7  ;;  %v7810_v7 = vrot.slane %v1991_v62, 7  ;;  %v2420_v61 = vrot.slane %v13539_v16, 2 }
 0x396   :  { %v13570_v8 = vsel %vm7827_vm3, %v523_v63, %v7807_v3  ;;  %v13572_v9 = vsel %vm7827_vm3, %v525_v0, %v7809_v4 }
 0x397   :  { %v13574_v10 = vsel %vm7827_vm3, %v524_v5, %v7808_v46  ;;  %v13576_v11 = vsel %vm7827_vm3, %v526_v6, %v7810_v7  ;;  %v2069_v12 = vpop.f32.mrb[8].mxu1  ;;  %10776 = vmatmul.mubr.msk.f32.vlgmr.msra.gmra.mrb[12].mxu0 %vm2073_vm2, %v2420_v61 }
 0x398   :  { %v10740_v14 = vpop.f32.mrb[9].mxu1  ;;  %11418 = vmatpush3.bf16.msra.mxu0 %v13517_v13  ;;  %10786 = vmatprep.mubr.msk.f32.mxu0 %vm13158_vm0, %v13159_v2 }
 0x399   :  { %11419 = vmatprep.subr.bf16.mxu0 %v13157_v1 }
 0x39b   :  { %v2143_v18 = vpop.f32.mrb[10].mxu1 }
 0x39c   :  { %v2144_v19 = vadd.f32 %v2143_v18, %v2069_v12  ;;  %v10745_v20 = vpop.f32.mrb[11].mxu1  ;;  %11421 = vmatpush3.bf16.msra.mxu0 %v13522_v15 }
 0x39d   :  { %10805 = vmatprep.subr.mxu0 %v13159_v2 }
 0x39e   :  { %v2147_v21 = vadd.f32 %v2144_v19, %v13581_v55 }
 0x3a0   :  { %12553 = vtanh.f32 %v2147_v21  ;;  %v10026_v23 = vmul.f32 -1.442695, %v2147_v21 }
 0x3a2   :  { %12555 = vpow2.f32 %v10026_v23 }
 0x3a6   :  { %v2316_v42 = vpop.f32.mrb[2].mxu0 }
 0x3a7   :  { %v10761_v43 = vpop.f32.mrb[3].mxu0 }
 0x3aa   :  { %v12554_v22 = vpop.eup %12553 }
 0x3ab   :  { %2157 = vrot.lane.b32.xlu0 %v12554_v22, %s13162_s30 }
 0x3ac   :  { %v12556_v24 = vpop.eup %12555 }
 0x3ad   :  { %v2151_v25 = vadd.f32 1.0, %v12556_v24 }
 0x3af   :  { %12557 = vrcp.f32 %v2151_v25 }
 0x3b9   :  { %v12558_v26 = vpop.eup %12557 }
 0x3ba   :  { %v2155_v32 = vmul.f32 0.0, %v12558_v26 }
 0x41d   :  { %v2158_v27 = vpop.permute.xlu0 %2157 }
 0x41e   :  { %v2160_v28 = vmul.f32 %v12558_v26, %v2158_v27  ;;  %v2593_v27 = vrot.slane %v13539_v16, 3 }
 0x420   :  { %2162 = vrot.lane.b32.xlu0 %v2160_v28, %s13163_s10 }
 0x46a   :  { %v2489_v3 = vpop.f32.mrb[12].mxu0 }
 0x46b   :  { %v10777_v4 = vpop.f32.mrb[13].mxu0 }
 0x492   :  { %v2163_v33 = vpop.permute.xlu0 %2162 }
 0x493   :  { %v2165_v35 = vadd.f32 %v2163_v33, %v2155_v32 }
 0x495   :  { %12559 = vtanh.f32 %v2165_v35 }
 0x49f   :  { %v12560_v36 = vpop.eup %12559 }
 0x4a0   :  { %2168 = vrot.lane.b32.xlu1 %v12560_v36, %s13162_s30 }
 0x512   :  { %v2169_v38 = vpop.permute.xlu1 %2168 }
 0x513   :  { %v2171_v40 = vmul.f32 %v12558_v26, %v2169_v38 }
 0x515   :  { %2173 = vrot.lane.b32.xlu1 %v2171_v40, %s13163_s10 }
 0x587   :  { %v13594_v41 = vpop.permute.xlu1 %2173 }
 0x588   :  { %10755 = vmatmul.mubr.msk.f32.vlgmr.msra.gmra.mrb[12].mxu1 %vm1999_vm4, %v13594_v41 }
 0x589   :  { %11412 = vmatpush3.bf16.msra.mxu1 %v13517_v13  ;;  %10770 = vmatprep.mubr.msk.f32.mxu1 %vm13158_vm0, %v13159_v2 }
 0x58a   :  { %11413 = vmatprep.subr.bf16.mxu1 %v13157_v1 }
 0x58d   :  { %11415 = vmatpush3.bf16.msra.mxu1 %v13522_v15 }
 0x58e   :  { %10789 = vmatprep.subr.mxu1 %v13159_v2 }
 0x65b   :  { %v2243_v47 = vpop.f32.mrb[12].mxu1 }
 0x65c   :  { %v2317_v39 = vadd.f32 %v2316_v42, %v2243_v47  ;;  %v10756_v48 = vpop.f32.mrb[13].mxu1 }
 0x65e   :  { %v2320_v49 = vadd.f32 %v2317_v39, %v13581_v55 }
 0x660   :  { %12561 = vtanh.f32 %v2320_v49  ;;  %v10029_v51 = vmul.f32 -1.442695, %v2320_v49 }
 0x662   :  { %12563 = vpow2.f32 %v10029_v51 }
 0x66a   :  { %v12562_v50 = vpop.eup %12561 }
 0x66b   :  { %2330 = vrot.lane.b32.xlu0 %v12562_v50, %s13162_s30 }
 0x66c   :  { %v12564_v52 = vpop.eup %12563 }
 0x66d   :  { %v2324_v53 = vadd.f32 1.0, %v12564_v52 }
 0x66f   :  { %12565 = vrcp.f32 %v2324_v53 }
 0x679   :  { %v12566_v54 = vpop.eup %12565 }
 0x67a   :  { %v2328_v58 = vmul.f32 %v12566_v54, %v2165_v35 }
 0x6dd   :  { %v2331_v56 = vpop.permute.xlu0 %2330 }
 0x6de   :  { %v2333_v57 = vmul.f32 %v12566_v54, %v2331_v56 }
 0x6e0   :  { %2335 = vrot.lane.b32.xlu1 %v2333_v57, %s13163_s10  ;;  %v2766_v57 = vrot.slane %v13539_v16, 4 }
 0x752   :  { %v2336_v59 = vpop.permute.xlu1 %2335 }
 0x753   :  { %v2338_v45 = vadd.f32 %v2336_v59, %v2328_v58 }
 0x755   :  { %12567 = vtanh.f32 %v2338_v45 }
 0x75f   :  { %v12568_v60 = vpop.eup %12567 }
 0x760   :  { %2341 = vrot.lane.b32.xlu0 %v12568_v60, %s13162_s30 }
 0x7d2   :  { %v2342_v62 = vpop.permute.xlu0 %2341 }
 0x7d3   :  { %v2344_v63 = vmul.f32 %v12566_v54, %v2342_v62 }
 0x7d5   :  { %2346 = vrot.lane.b32.xlu1 %v2344_v63, %s13163_s10 }
 0x847   :  { %v13617_v0 = vpop.permute.xlu1 %2346 }
 0x848   :  { %10771 = vmatmul.mubr.msk.f32.vlgmr.msra.gmra.mrb[14].mxu1 %vm1999_vm4, %v13617_v0 }
 0x849   :  { %10790 = vmatpush3.msra.mxu1 %v13526_v44  ;;  %10791 = vmatprep.mubr.msk.f32.mxu1 %vm13158_vm0, %v13159_v2 }
 0x84a   :  { %11422 = vmatprep.subr.bf16.mxu1 %v13157_v1 }
 0x84c   :  { %10792 = vmatmul.mubr.msk.f32.vlgmr.msra.gmra.mrb[16].mxu1 %vm2073_vm2, %v2593_v27 }
 0x84d   :  { %11424 = vmatpush3.bf16.msra.mxu1 %v13517_v13  ;;  %10802 = vmatprep.mubr.msk.f32.mxu1 %vm13158_vm0, %v13159_v2 }
 0x84e   :  { %11425 = vmatprep.subr.bf16.mxu1 %v13157_v1 }
 0x851   :  { %11427 = vmatpush3.bf16.msra.mxu1 %v13522_v15 }
 0x852   :  { %10821 = vmatprep.subr.mxu1 %v13159_v2 }
 0x91b   :  { %v2416_v5 = vpop.f32.mrb[14].mxu1 }
 0x91c   :  { %v2490_v6 = vadd.f32 %v2489_v3, %v2416_v5  ;;  %v10772_v46 = vpop.f32.mrb[15].mxu1 }
 0x91e   :  { %v2493_v7 = vadd.f32 %v2490_v6, %v13581_v55 }
 0x91f   :  { %v2662_v35 = vpop.f32.mrb[16].mxu1 }
 0x920   :  { %12569 = vtanh.f32 %v2493_v7  ;;  %v10032_v14 = vmul.f32 -1.442695, %v2493_v7  ;;  %v10793_v36 = vpop.f32.mrb[17].mxu1 }
 0x922   :  { %12571 = vpow2.f32 %v10032_v14 }
 0x92a   :  { %v12570_v12 = vpop.eup %12569 }
 0x92b   :  { %2503 = vrot.lane.b32.xlu0 %v12570_v12, %s13162_s30 }
 0x92c   :  { %v12572_v18 = vpop.eup %12571 }
 0x92d   :  { %v2497_v19 = vadd.f32 1.0, %v12572_v18 }
 0x92f   :  { %12573 = vrcp.f32 %v2497_v19 }
 0x939   :  { %v12574_v20 = vpop.eup %12573 }
 0x93a   :  { %v2501_v23 = vmul.f32 %v12574_v20, %v2338_v45 }
 0x99d   :  { %v2504_v21 = vpop.permute.xlu0 %2503 }
 0x99e   :  { %v2506_v22 = vmul.f32 %v12574_v20, %v2504_v21 }
 0x9a0   :  { %2508 = vrot.lane.b32.xlu1 %v2506_v22, %s13163_s10 }
 0xa12   :  { %v2509_v24 = vpop.permute.xlu1 %2508 }
 0xa13   :  { %v2511_v25 = vadd.f32 %v2509_v24, %v2501_v23  ;;  %v2939_v23 = vrot.slane %v13539_v16, 5 }
 0xa15   :  { %12575 = vtanh.f32 %v2511_v25 }
 0xa1f   :  { %v12576_v26 = vpop.eup %12575 }
 0xa20   :  { %2514 = vrot.lane.b32.xlu0 %v12576_v26, %s13162_s30 }
 0xa92   :  { %v2515_v28 = vpop.permute.xlu0 %2514 }
 0xa93   :  { %v2517_v32 = vmul.f32 %v12574_v20, %v2515_v28 }
 0xa95   :  { %2519 = vrot.lane.b32.xlu1 %v2517_v32, %s13163_s10 }
 0xb07   :  { %v13638_v33 = vpop.permute.xlu1 %2519 }
 0xb08   :  { %10787 = vmatmul.mubr.msk.f32.vlgmr.msra.gmra.mrb[14].mxu0 %vm1999_vm4, %v13638_v33 }
 0xb09   :  { %10806 = vmatpush3.msra.mxu0 %v13526_v44  ;;  %10807 = vmatprep.mubr.msk.f32.mxu0 %vm13158_vm0, %v13159_v2 }
 0xb0a   :  { %11428 = vmatprep.subr.bf16.mxu0 %v13157_v1 }
 0xb0c   :  { %10808 = vmatmul.mubr.msk.f32.vlgmr.msra.gmra.mrb[16].mxu0 %vm2073_vm2, %v2766_v57 }
 0xb0d   :  { %11430 = vmatpush3.bf16.msra.mxu0 %v13517_v13  ;;  %10818 = vmatprep.mubr.msk.f32.mxu0 %vm13158_vm0, %v13159_v2 }
 0xb0e   :  { %11431 = vmatprep.subr.bf16.mxu0 %v13157_v1 }
 0xb11   :  { %11433 = vmatpush3.bf16.msra.mxu0 %v13522_v15 }
 0xb12   :  { %10837 = vmatprep.subr.mxu0 %v13159_v2 }
 0xbdb   :  { %v2589_v37 = vpop.f32.mrb[14].mxu0 }
 0xbdc   :  { %v2663_v38 = vadd.f32 %v2662_v35, %v2589_v37  ;;  %v10788_v40 = vpop.f32.mrb[15].mxu0 }
 0xbde   :  { %v2666_v42 = vadd.f32 %v2663_v38, %v13581_v55 }
 0xbdf   :  { %v2835_v60 = vpop.f32.mrb[16].mxu0 }
 0xbe0   :  { %12577 = vtanh.f32 %v2666_v42  ;;  %v10035_v47 = vmul.f32 -1.442695, %v2666_v42  ;;  %v10809_v61 = vpop.f32.mrb[17].mxu0 }
 0xbe2   :  { %12579 = vpow2.f32 %v10035_v47 }
 0xbea   :  { %v12578_v43 = vpop.eup %12577 }
 0xbeb   :  { %2676 = vrot.lane.b32.xlu0 %v12578_v43, %s13162_s30 }
 0xbec   :  { %v12580_v39 = vpop.eup %12579 }
 0xbed   :  { %v2670_v48 = vadd.f32 1.0, %v12580_v39 }
 0xbef   :  { %12581 = vrcp.f32 %v2670_v48 }
 0xbf9   :  { %v12582_v49 = vpop.eup %12581 }
 0xbfa   :  { %v2674_v52 = vmul.f32 %v12582_v49, %v2511_v25 }
 0xc5d   :  { %v2677_v50 = vpop.permute.xlu0 %2676 }
 0xc5e   :  { %v2679_v51 = vmul.f32 %v12582_v49, %v2677_v50 }
 0xc60   :  { %2681 = vrot.lane.b32.xlu1 %v2679_v51, %s13163_s10 }
 0xcd2   :  { %v2682_v53 = vpop.permute.xlu1 %2681 }
 0xcd3   :  { %v2684_v54 = vadd.f32 %v2682_v53, %v2674_v52  ;;  %v3112_v53 = vrot.slane %v13539_v16, 6 }
 0xcd5   :  { %12583 = vtanh.f32 %v2684_v54 }
 0xcdf   :  { %v12584_v56 = vpop.eup %12583 }
 0xce0   :  { %2687 = vrot.lane.b32.xlu0 %v12584_v56, %s13162_s30 }
 0xd52   :  { %v2688_v58 = vpop.permute.xlu0 %2687 }
 0xd53   :  { %v2690_v59 = vmul.f32 %v12582_v49, %v2688_v58 }
 0xd55   :  { %2692 = vrot.lane.b32.xlu1 %v2690_v59, %s13163_s10 }
 0xdc7   :  { %v13659_v45 = vpop.permute.xlu1 %2692 }
 0xdc8   :  { %10803 = vmatmul.mubr.msk.f32.vlgmr.msra.gmra.mrb[18].mxu1 %vm1999_vm4, %v13659_v45 }
 0xdc9   :  { %10822 = vmatpush3.msra.mxu1 %v13526_v44  ;;  %10823 = vmatprep.mubr.msk.f32.mxu1 %vm13158_vm0, %v13159_v2 }
 0xdca   :  { %11434 = vmatprep.subr.bf16.mxu1 %v13157_v1 }
 0xdcc   :  { %10824 = vmatmul.mubr.msk.f32.vlgmr.msra.gmra.mrb[20].mxu1 %vm2073_vm2, %v2939_v23 }
 0xdcd   :  { %11436 = vmatpush3.bf16.msra.mxu1 %v13517_v13  ;;  %10834 = vmatprep.mubr.msk.f32.mxu1 %vm13158_vm0, %v13159_v2 }
 0xdce   :  { %11437 = vmatprep.subr.bf16.mxu1 %v13157_v1 }
 0xdd1   :  { %11439 = vmatpush3.bf16.msra.mxu1 %v13522_v15 }
 0xdd2   :  { %10853 = vmatprep.subr.mxu1 %v13159_v2 }
 0xe9b   :  { %v2762_v62 = vpop.f32.mrb[18].mxu1 }
 0xe9c   :  { %v2836_v63 = vadd.f32 %v2835_v60, %v2762_v62  ;;  %v10804_v3 = vpop.f32.mrb[19].mxu1 }
 0xe9e   :  { %v2839_v4 = vadd.f32 %v2836_v63, %v13581_v55 }
 0xe9f   :  { %v3008_v27 = vpop.f32.mrb[20].mxu1 }
 0xea0   :  { %12585 = vtanh.f32 %v2839_v4  ;;  %v10038_v6 = vmul.f32 -1.442695, %v2839_v4  ;;  %v10825_v28 = vpop.f32.mrb[21].mxu1 }
 0xea2   :  { %12587 = vpow2.f32 %v10038_v6 }
 0xeaa   :  { %v12586_v5 = vpop.eup %12585 }
 0xeab   :  { %2849 = vrot.lane.b32.xlu0 %v12586_v5, %s13162_s30 }
 0xeac   :  { %v12588_v46 = vpop.eup %12587 }
 0xead   :  { %v2843_v7 = vadd.f32 1.0, %v12588_v46 }
 0xeaf   :  { %12589 = vrcp.f32 %v2843_v7 }
 0xeb9   :  { %v12590_v12 = vpop.eup %12589 }
 0xeba   :  { %v2847_v19 = vmul.f32 %v12590_v12, %v2684_v54 }
 0xf1d   :  { %v2850_v14 = vpop.permute.xlu0 %2849 }
 0xf1e   :  { %v2852_v18 = vmul.f32 %v12590_v12, %v2850_v14  ;;  %v3388_v14 = vld [vmem:[#allocation18 + $0x20] sm:$0xff] }
 0xf20   :  { %2854 = vrot.lane.b32.xlu1 %v2852_v18, %s13163_s10  ;;  %v3389_v18 = vld [vmem:[#allocation18 + $0x28] sm:$0xff] }
 0xf92   :  { %v2855_v20 = vpop.permute.xlu1 %2854 }
 0xf93   :  { %v2857_v21 = vadd.f32 %v2855_v20, %v2847_v19  ;;  %v3285_v19 = vrot.slane %v13539_v16, 7  ;;  %v13717_v20 = vpack.c.bf16 %v3389_v18, %v3388_v14 }
 0xf95   :  { %12591 = vtanh.f32 %v2857_v21 }
 0xf9f   :  { %v12592_v22 = vpop.eup %12591 }
 0xfa0   :  { %2860 = vrot.lane.b32.xlu0 %v12592_v22, %s13162_s30  ;;  %v3391_v22 = vld [vmem:[#allocation18 + $0x38] sm:$0xff] }
0x1012   :  { %v2861_v24 = vpop.permute.xlu0 %2860 }
0x1013   :  { %v2863_v25 = vmul.f32 %v12590_v12, %v2861_v24 }
0x1015   :  { %2865 = vrot.lane.b32.xlu1 %v2863_v25, %s13163_s10  ;;  %v3383_v25 = vld [vmem:[#allocation17] sm:$0xff] }
0x1087   :  { %v13680_v26 = vpop.permute.xlu1 %2865 }
0x1088   :  { %10819 = vmatmul.mubr.msk.f32.vlgmr.msra.gmra.mrb[18].mxu0 %vm1999_vm4, %v13680_v26 }
0x1089   :  { %10838 = vmatpush3.msra.mxu0 %v13526_v44  ;;  %10839 = vmatprep.mubr.msk.f32.mxu0 %vm13158_vm0, %v13159_v2 }
0x108a   :  { %11440 = vmatprep.subr.bf16.mxu0 %v13157_v1 }
0x108c   :  { %10840 = vmatmul.mubr.msk.f32.vlgmr.msra.gmra.mrb[20].mxu0 %vm2073_vm2, %v3112_v53 }
0x108d   :  { %11442 = vmatpush3.bf16.msra.mxu0 %v13517_v13  ;;  %10850 = vmatprep.mubr.msk.f32.mxu0 %vm13158_vm0, %v13159_v2 }
0x108e   :  { %11443 = vmatprep.subr.bf16.mxu0 %v13157_v1 }
0x1091   :  { %11445 = vmatpush3.bf16.msra.mxu0 %v13522_v15 }
0x1092   :  { %11452 = vmatprep.subr.bf16.mxu0 %v13157_v1 }
0x115b   :  { %v2935_v32 = vpop.f32.mrb[18].mxu0 }
0x115c   :  { %v3009_v35 = vadd.f32 %v3008_v27, %v2935_v32  ;;  %v10820_v36 = vpop.f32.mrb[19].mxu0  ;;  %v3384_v27 = vld [vmem:[#allocation17 + $0x8] sm:$0xff]  ;;  %v3385_v32 = vld [vmem:[#allocation17 + $0x10] sm:$0xff] }
0x115d   :  { %v11453_v28 = vpack.c.bf16 %v3384_v27, %v3383_v25 }
0x115e   :  { %v3012_v37 = vadd.f32 %v3009_v35, %v13581_v55  ;;  %v3386_v35 = vld [vmem:[#allocation17 + $0x18] sm:$0xff] }
0x115f   :  { %v3181_v13 = vpop.f32.mrb[20].mxu0 }
0x1160   :  { %12593 = vtanh.f32 %v3012_v37  ;;  %v10041_v40 = vmul.f32 -1.442695, %v3012_v37  ;;  %v10841_v15 = vpop.f32.mrb[21].mxu0  ;;  %v11456_v37 = vpack.c.bf16 %v3386_v35, %v3385_v32 }
0x1162   :  { %12595 = vpow2.f32 %v10041_v40 }
0x116a   :  { %v12594_v38 = vpop.eup %12593 }
0x116b   :  { %3022 = vrot.lane.b32.xlu0 %v12594_v38, %s13162_s30 }
0x116c   :  { %v12596_v42 = vpop.eup %12595 }
0x116d   :  { %v3016_v43 = vadd.f32 1.0, %v12596_v42  ;;  %v13787_v42 = vld [vmem:[%s15141_s12 + $0x1] sm:$0x1] }
0x116f   :  { %12597 = vrcp.f32 %v3016_v43 }
0x1179   :  { %v12598_v47 = vpop.eup %12597 }
0x117a   :  { %v3020_v49 = vmul.f32 %v12598_v47, %v2857_v21  ;;  %v3390_v21 = vld [vmem:[#allocation18 + $0x30] sm:$0xff] }
0x117b   :  { %v13724_v23 = vpack.c.bf16 %v3391_v22, %v3390_v21 }
0x11dd   :  { %v3023_v39 = vpop.permute.xlu0 %3022 }
0x11de   :  { %v3025_v48 = vmul.f32 %v12598_v47, %v3023_v39 }
0x11e0   :  { %3027 = vrot.lane.b32.xlu1 %v3025_v48, %s13163_s10 }
0x1252   :  { %v3028_v50 = vpop.permute.xlu1 %3027 }
0x1253   :  { %v3030_v51 = vadd.f32 %v3028_v50, %v3020_v49 }
0x1255   :  { %12599 = vtanh.f32 %v3030_v51 }
0x125f   :  { %v12600_v52 = vpop.eup %12599 }
0x1260   :  { %3033 = vrot.lane.b32.xlu0 %v12600_v52, %s13162_s30 }
0x12d2   :  { %v3034_v54 = vpop.permute.xlu0 %3033 }
0x12d3   :  { %v3036_v56 = vmul.f32 %v12598_v47, %v3034_v54 }
0x12d5   :  { %3038 = vrot.lane.b32.xlu1 %v3036_v56, %s13163_s10 }
0x1347   :  { %v13701_v57 = vpop.permute.xlu1 %3038 }
0x1348   :  { %10835 = vmatmul.mubr.msk.f32.vlgmr.msra.gmra.mrb[22].mxu1 %vm1999_vm4, %v13701_v57 }
0x1349   :  { %10854 = vmatpush3.msra.mxu1 %v13526_v44  ;;  %10855 = vmatprep.mubr.msk.f32.mxu1 %vm13158_vm0, %v13159_v2 }
0x134a   :  { %11446 = vmatprep.subr.bf16.mxu1 %v13157_v1 }
0x134c   :  { %10856 = vmatmul.mubr.msk.f32.vlgmr.msra.gmra.mrb[24].mxu1 %vm2073_vm2, %v3285_v19 }
0x134d   :  { %11448 = vmatpush3.bf16.msra.mxu1 %v13717_v20  ;;  %10866 = vmatprep.mubr.msk.f32.mxu1 %vm13158_vm0, %v13159_v2 }
0x134e   :  { %11449 = vmatprep.subr.bf16.mxu1 %v13157_v1 }
0x1351   :  { %11451 = vmatpush3.bf16.msra.mxu1 %v13724_v23 }
0x1352   :  { %11458 = vmatprep.subr.bf16.mxu1 %v13157_v1 }
0x1354   :  { %10867 = vmatmul.mubr.f32.vlgmr.msra.gmra.mrb[26].mxu1 %v13159_v2 }
0x1355   :  { %11460 = vmatpush3.bf16.msra.mxu1 %v13717_v20  ;;  %10888 = vmatprep.mubr.msk.f32.mxu1 %vm13158_vm0, %v13159_v2 }
0x1356   :  { %11461 = vmatprep.subr.bf16.mxu1 %v13157_v1 }
0x1359   :  { %11463 = vmatpush3.bf16.msra.mxu1 %v13724_v23 }
0x135a   :  { %11470 = vmatprep.subr.bf16.mxu1 %v13157_v1 }
0x141b   :  { %v3108_v58 = vpop.f32.mrb[22].mxu1 }
0x141c   :  { %v3182_v59 = vadd.f32 %v3181_v13, %v3108_v58  ;;  %v10836_v60 = vpop.f32.mrb[23].mxu1 }
0x141e   :  { %v3185_v61 = vadd.f32 %v3182_v59, %v13581_v55 }
0x1420   :  { %12601 = vtanh.f32 %v3185_v61  ;;  %v10044_v63 = vmul.f32 -1.442695, %v3185_v61 }
0x1422   :  { %12603 = vpow2.f32 %v10044_v63 }
0x142a   :  { %v12602_v62 = vpop.eup %12601 }
0x142b   :  { %3195 = vrot.lane.b32.xlu0 %v12602_v62, %s13162_s30 }
0x142c   :  { %v12604_v3 = vpop.eup %12603 }
0x142d   :  { %v3189_v44 = vadd.f32 1.0, %v12604_v3 }
0x142f   :  { %12605 = vrcp.f32 %v3189_v44 }
0x1439   :  { %v12606_v4 = vpop.eup %12605 }
0x143a   :  { %v3193_v46 = vmul.f32 %v12606_v4, %v3030_v51 }
0x149d   :  { %v3196_v5 = vpop.permute.xlu0 %3195 }
0x149e   :  { %v3198_v6 = vmul.f32 %v12606_v4, %v3196_v5 }
0x14a0   :  { %3200 = vrot.lane.b32.xlu1 %v3198_v6, %s13163_s10 }
0x1512   :  { %v3201_v7 = vpop.permute.xlu1 %3200 }
0x1513   :  { %v13712_v12 = vadd.f32 %v3201_v7, %v3193_v46 }
0x1515   :  { %12607 = vtanh.f32 %v13712_v12 }
0x151f   :  { %v12608_v55 = vpop.eup %12607 }
0x1520   :  { %3206 = vrot.lane.b32.xlu0 %v12608_v55, %s13162_s30 }
0x1592   :  { %v3207_v16 = vpop.permute.xlu0 %3206 }
0x1593   :  { %v3209_v24 = vmul.f32 %v12606_v4, %v3207_v16 }
0x1595   :  { %3211 = vrot.lane.b32.xlu1 %v3209_v24, %s13163_s10 }
0x1607   :  { %v3212_v36 = vpop.permute.xlu1 %3211 }
0x1608   :  { %10851 = vmatmul.mubr.msk.f32.vlgmr.msra.gmra.mrb[22].mxu0 %vm1999_vm4, %v3212_v36 }
0x1609   :  { %11454 = vmatpush3.bf16.msra.mxu0 %v11453_v28  ;;  %10877 = vmatprep.mubr.msk.f32.mxu0 %vm13158_vm0, %v13159_v2 }
0x160a   :  { %11455 = vmatprep.subr.bf16.mxu0 %v13157_v1 }
0x160d   :  { %11457 = vmatpush3.bf16.msra.mxu0 %v11456_v37 }
0x160e   :  { %11464 = vmatprep.subr.bf16.mxu0 %v13157_v1 }
0x1610   :  { %10878 = vmatmul.mubr.msk.f32.vlgmr.msra.gmra.mrb[24].mxu0 %vm1999_vm4, %v13594_v41  ;;  %v3354_v41 = vpop.f32.mrb[24].mxu1 }
0x1611   :  { %11466 = vmatpush3.bf16.msra.mxu0 %v11453_v28  ;;  %10899 = vmatprep.mubr.msk.f32.mxu0 %vm13158_vm0, %v13159_v2 }
0x1612   :  { %11467 = vmatprep.subr.bf16.mxu0 %v13157_v1 }
0x1615   :  { %11469 = vmatpush3.bf16.msra.mxu0 %v11456_v37 }
0x1616   :  { %11476 = vmatprep.subr.bf16.mxu0 %v13157_v1 }
0x1618   :  { %10900 = vmatmul.mubr.msk.f32.vlgmr.msra.gmra.mrb[26].mxu0 %vm1999_vm4, %v13617_v0  ;;  %v10857_v0 = vpop.f32.mrb[25].mxu1 }
0x1619   :  { %11478 = vmatpush3.bf16.msra.mxu0 %v11453_v28  ;;  %10921 = vmatprep.mubr.msk.f32.mxu0 %vm13158_vm0, %v13159_v2 }
0x161a   :  { %11479 = vmatprep.subr.bf16.mxu0 %v13157_v1 }
0x161d   :  { %11481 = vmatpush3.bf16.msra.mxu0 %v11456_v37 }
0x161e   :  { %11488 = vmatprep.subr.bf16.mxu0 %v13157_v1 }
0x1620   :  { %10922 = vmatmul.mubr.msk.f32.vlgmr.msra.gmra.mrb[28].mxu0 %vm1999_vm4, %v13638_v33  ;;  %v3459_v33 = vpop.f32.mrb[26].mxu1 }
0x1621   :  { %11490 = vmatpush3.bf16.msra.mxu0 %v11453_v28  ;;  %10943 = vmatprep.mubr.msk.f32.mxu0 %vm13158_vm0, %v13159_v2 }
0x1622   :  { %11491 = vmatprep.subr.bf16.mxu0 %v13157_v1 }
0x1625   :  { %11493 = vmatpush3.bf16.msra.mxu0 %v11456_v37 }
0x1626   :  { %11500 = vmatprep.subr.bf16.mxu0 %v13157_v1 }
0x1628   :  { %10944 = vmatmul.mubr.msk.f32.vlgmr.msra.gmra.mrb[30].mxu0 %vm1999_vm4, %v13659_v45  ;;  %v10868_v45 = vpop.f32.mrb[27].mxu1 }
0x1629   :  { %11502 = vmatpush3.bf16.msra.mxu0 %v11453_v28  ;;  %10965 = vmatprep.mubr.msk.f32.mxu0 %vm13158_vm0, %v13159_v2 }
0x162a   :  { %11503 = vmatprep.subr.bf16.mxu0 %v13157_v1 }
0x162d   :  { %11505 = vmatpush3.bf16.msra.mxu0 %v11456_v37 }
0x162e   :  { %11512 = vmatprep.subr.bf16.mxu0 %v13157_v1 }
0x1630   :  { %10966 = vmatmul.mubr.msk.f32.vlgmr.msra.gmra.mrb[32].mxu0 %vm1999_vm4, %v13680_v26 }
0x1631   :  { %11514 = vmatpush3.bf16.msra.mxu0 %v11453_v28  ;;  %10987 = vmatprep.mubr.msk.f32.mxu0 %vm13158_vm0, %v13159_v2 }
0x1632   :  { %11515 = vmatprep.subr.bf16.mxu0 %v13157_v1 }
0x1635   :  { %11517 = vmatpush3.bf16.msra.mxu0 %v11456_v37 }
0x1636   :  { %11524 = vmatprep.subr.bf16.mxu0 %v13157_v1 }
0x1638   :  { %10988 = vmatmul.mubr.msk.f32.vlgmr.msra.gmra.mrb[34].mxu0 %vm1999_vm4, %v13701_v57 }
0x1639   :  { %11526 = vmatpush3.bf16.msra.mxu0 %v11453_v28  ;;  %11009 = vmatprep.mubr.msk.f32.mxu0 %vm13158_vm0, %v13159_v2 }
0x163a   :  { %11527 = vmatprep.subr.bf16.mxu0 %v13157_v1 }
0x163d   :  { %11529 = vmatpush3.bf16.msra.mxu0 %v11456_v37 }
0x163e   :  { %11536 = vmatprep.subr.bf16.mxu0 %v13157_v1 }
0x1640   :  { %11010 = vmatmul.mubr.msk.f32.vlgmr.msra.gmra.mrb[36].mxu0 %vm1999_vm4, %v3212_v36 }
0x1641   :  { %11538 = vmatpush3.bf16.msra.mxu0 %v11453_v28  ;;  %11031 = vmatprep.mubr.msk.f32.mxu0 %vm13158_vm0, %v13159_v2 }
0x1642   :  { %11539 = vmatprep.subr.bf16.mxu0 %v13157_v1 }
0x1645   :  { %11541 = vmatpush3.bf16.msra.mxu0 %v11456_v37 }
0x1646   :  { %11548 = vmatprep.subr.bf16.mxu0 %v13157_v1 }
0x16db   :  { %v3281_v26 = vpop.f32.mrb[22].mxu0 }
0x16dc   :  { %v13782_v38 = vadd.f32 %v3354_v41, %v3281_v26  ;;  %v10852_v40 = vpop.f32.mrb[23].mxu0 }
0x16e3   :  { %v3529_v43 = vpop.f32.mrb[24].mxu0 }
0x16e4   :  { %v3530_v47 = vadd.f32 %v3529_v43, %v3459_v33  ;;  %v10879_v39 = vpop.f32.mrb[25].mxu0 }
0x16e6   :  { %v3533_v48 = vadd.f32 %v3530_v47, %v13787_v42 }
0x16e8   :  { %12609 = vtanh.f32 %v3533_v48  ;;  %v10049_v61 = vmul.f32 -1.442695, %v3533_v48 }
0x16ea   :  { %12611 = vpow2.f32 %v10049_v61 }
0x16eb   :  { %v3699_v49 = vpop.f32.mrb[26].mxu0 }
0x16ec   :  { %v10901_v50 = vpop.f32.mrb[27].mxu0 }
0x16f2   :  { %v12610_v51 = vpop.eup %12609 }
0x16f3   :  { %3543 = vrot.lane.b32.xlu0 %v12610_v51, %s13162_s30  ;;  %v13791_v52 = vpop.f32.mrb[28].mxu0 }
0x16f4   :  { %v10923_v53 = vpop.f32.mrb[29].mxu0  ;;  %v12612_v62 = vpop.eup %12611 }
0x16f5   :  { %v3537_v63 = vadd.f32 1.0, %v12612_v62 }
0x16f7   :  { %12613 = vrcp.f32 %v3537_v63 }
0x16fb   :  { %v13793_v54 = vpop.f32.mrb[30].mxu0 }
0x16fc   :  { %v10945_v56 = vpop.f32.mrb[31].mxu0 }
0x1701   :  { %v12614_v3 = vpop.eup %12613 }
0x1702   :  { %v3541_v5 = vmul.f32 0.0, %v12614_v3 }
0x1703   :  { %v13795_v57 = vpop.f32.mrb[32].mxu0 }
0x1704   :  { %v10967_v13 = vpop.f32.mrb[33].mxu0 }
0x170b   :  { %v13797_v15 = vpop.f32.mrb[34].mxu0 }
0x170c   :  { %v10989_v58 = vpop.f32.mrb[35].mxu0 }
0x1713   :  { %v13799_v59 = vpop.f32.mrb[36].mxu0 }
0x1714   :  { %v11011_v60 = vpop.f32.mrb[37].mxu0 }
0x1765   :  { %v3544_v44 = vpop.permute.xlu0 %3543 }
0x1766   :  { %v3546_v4 = vmul.f32 %v12614_v3, %v3544_v44 }
0x1768   :  { %3548 = vrot.lane.b32.xlu1 %v3546_v4, %s13163_s10 }
0x17da   :  { %v3549_v6 = vpop.permute.xlu1 %3548 }
0x17db   :  { %v3551_v46 = vadd.f32 %v3549_v6, %v3541_v5 }
0x17dd   :  { %12615 = vtanh.f32 %v3551_v46 }
0x17e7   :  { %v12616_v7 = vpop.eup %12615 }
0x17e8   :  { %3554 = vrot.lane.b32.xlu0 %v12616_v7, %s13162_s30 }
0x185a   :  { %v3555_v55 = vpop.permute.xlu0 %3554 }
0x185b   :  { %v3557_v14 = vmul.f32 %v12614_v3, %v3555_v55 }
0x185d   :  { %3559 = vrot.lane.b32.xlu1 %v3557_v14, %s13163_s10 }
0x18cf   :  { %v13804_v18 = vpop.permute.xlu1 %3559 }
0x18d0   :  { %10889 = vmatmul.mubr.msk.f32.vlgmr.msra.gmra.mrb[28].mxu1 %vm1999_vm4, %v13804_v18 }
0x18d1   :  { %11472 = vmatpush3.bf16.msra.mxu1 %v13717_v20  ;;  %10910 = vmatprep.mubr.msk.f32.mxu1 %vm13158_vm0, %v13159_v2 }
0x18d2   :  { %11473 = vmatprep.subr.bf16.mxu1 %v13157_v1 }
0x18d5   :  { %11475 = vmatpush3.bf16.msra.mxu1 %v13724_v23 }
0x18d6   :  { %11482 = vmatprep.subr.bf16.mxu1 %v13157_v1 }
0x19a3   :  { %v3629_v19 = vpop.f32.mrb[28].mxu1 }
0x19a4   :  { %v3700_v21 = vadd.f32 %v3699_v49, %v3629_v19  ;;  %v10890_v22 = vpop.f32.mrb[29].mxu1 }
0x19a6   :  { %v3703_v16 = vadd.f32 %v3700_v21, %v13787_v42 }
0x19a8   :  { %12617 = vtanh.f32 %v3703_v16  ;;  %v10052_v25 = vmul.f32 -1.442695, %v3703_v16 }
0x19aa   :  { %12619 = vpow2.f32 %v10052_v25 }
0x19b2   :  { %v12618_v24 = vpop.eup %12617 }
0x19b3   :  { %3713 = vrot.lane.b32.xlu0 %v12618_v24, %s13162_s30 }
0x19b4   :  { %v12620_v27 = vpop.eup %12619 }
0x19b5   :  { %v3707_v28 = vadd.f32 1.0, %v12620_v27 }
0x19b7   :  { %12621 = vrcp.f32 %v3707_v28 }
0x19c1   :  { %v12622_v32 = vpop.eup %12621 }
0x19c2   :  { %v3711_v37 = vmul.f32 %v12622_v32, %v3551_v46 }
0x1a25   :  { %v3714_v35 = vpop.permute.xlu0 %3713 }
0x1a26   :  { %v3716_v36 = vmul.f32 %v12622_v32, %v3714_v35 }
0x1a28   :  { %3718 = vrot.lane.b32.xlu1 %v3716_v36, %s13163_s10 }
0x1a9a   :  { %v3719_v41 = vpop.permute.xlu1 %3718 }
0x1a9b   :  { %v3721_v0 = vadd.f32 %v3719_v41, %v3711_v37 }
0x1a9d   :  { %12623 = vtanh.f32 %v3721_v0 }
0x1aa7   :  { %v12624_v33 = vpop.eup %12623 }
0x1aa8   :  { %3724 = vrot.lane.b32.xlu0 %v12624_v33, %s13162_s30 }
0x1b1a   :  { %v3725_v45 = vpop.permute.xlu0 %3724 }
0x1b1b   :  { %v3727_v26 = vmul.f32 %v12622_v32, %v3725_v45 }
0x1b1d   :  { %3729 = vrot.lane.b32.xlu1 %v3727_v26, %s13163_s10 }
0x1b8f   :  { %v13819_v40 = vpop.permute.xlu1 %3729 }
0x1b90   :  { %10911 = vmatmul.mubr.msk.f32.vlgmr.msra.gmra.mrb[30].mxu1 %vm1999_vm4, %v13819_v40 }
0x1b91   :  { %11484 = vmatpush3.bf16.msra.mxu1 %v13717_v20  ;;  %10932 = vmatprep.mubr.msk.f32.mxu1 %vm13158_vm0, %v13159_v2 }
0x1b92   :  { %11485 = vmatprep.subr.bf16.mxu1 %v13157_v1 }
0x1b95   :  { %11487 = vmatpush3.bf16.msra.mxu1 %v13724_v23 }
0x1b96   :  { %11494 = vmatprep.subr.bf16.mxu1 %v13157_v1 }
0x1c63   :  { %v3799_v43 = vpop.f32.mrb[30].mxu1 }
0x1c64   :  { %v3870_v47 = vadd.f32 %v13791_v52, %v3799_v43  ;;  %v10912_v39 = vpop.f32.mrb[31].mxu1 }
0x1c66   :  { %v3873_v48 = vadd.f32 %v3870_v47, %v13787_v42 }
0x1c68   :  { %12625 = vtanh.f32 %v3873_v48  ;;  %v10055_v50 = vmul.f32 -1.442695, %v3873_v48 }
0x1c6a   :  { %12627 = vpow2.f32 %v10055_v50 }
0x1c72   :  { %v12626_v49 = vpop.eup %12625 }
0x1c73   :  { %3883 = vrot.lane.b32.xlu0 %v12626_v49, %s13162_s30 }
0x1c74   :  { %v12628_v51 = vpop.eup %12627 }
0x1c75   :  { %v3877_v53 = vadd.f32 1.0, %v12628_v51 }
0x1c77   :  { %12629 = vrcp.f32 %v3877_v53 }
0x1c81   :  { %v12630_v56 = vpop.eup %12629 }
0x1c82   :  { %v3881_v60 = vmul.f32 %v12630_v56, %v3721_v0 }
0x1ce5   :  { %v3884_v13 = vpop.permute.xlu0 %3883 }
0x1ce6   :  { %v3886_v58 = vmul.f32 %v12630_v56, %v3884_v13 }
0x1ce8   :  { %3888 = vrot.lane.b32.xlu1 %v3886_v58, %s13163_s10 }
0x1d5a   :  { %v3889_v61 = vpop.permute.xlu1 %3888 }
0x1d5b   :  { %v3891_v52 = vadd.f32 %v3889_v61, %v3881_v60 }
0x1d5d   :  { %12631 = vtanh.f32 %v3891_v52 }
0x1d67   :  { %v12632_v62 = vpop.eup %12631 }
0x1d68   :  { %3894 = vrot.lane.b32.xlu0 %v12632_v62, %s13162_s30 }
0x1dda   :  { %v3895_v63 = vpop.permute.xlu0 %3894 }
0x1ddb   :  { %v3897_v3 = vmul.f32 %v12630_v56, %v3895_v63 }
0x1ddd   :  { %3899 = vrot.lane.b32.xlu1 %v3897_v3, %s13163_s10 }
0x1e4f   :  { %v13835_v44 = vpop.permute.xlu1 %3899 }
0x1e50   :  { %10933 = vmatmul.mubr.msk.f32.vlgmr.msra.gmra.mrb[32].mxu1 %vm1999_vm4, %v13835_v44 }
0x1e51   :  { %11496 = vmatpush3.bf16.msra.mxu1 %v13717_v20  ;;  %10954 = vmatprep.mubr.msk.f32.mxu1 %vm13158_vm0, %v13159_v2 }
0x1e52   :  { %11497 = vmatprep.subr.bf16.mxu1 %v13157_v1 }
0x1e55   :  { %11499 = vmatpush3.bf16.msra.mxu1 %v13724_v23 }
0x1e56   :  { %11506 = vmatprep.subr.bf16.mxu1 %v13157_v1 }
0x1f23   :  { %v3969_v4 = vpop.f32.mrb[32].mxu1 }
0x1f24   :  { %v4040_v5 = vadd.f32 %v13793_v54, %v3969_v4  ;;  %v10934_v6 = vpop.f32.mrb[33].mxu1 }
0x1f26   :  { %v4043_v46 = vadd.f32 %v4040_v5, %v13787_v42 }
0x1f28   :  { %12633 = vtanh.f32 %v4043_v46  ;;  %v10058_v55 = vmul.f32 -1.442695, %v4043_v46 }
0x1f2a   :  { %12635 = vpow2.f32 %v10058_v55 }
0x1f32   :  { %v12634_v7 = vpop.eup %12633 }
0x1f33   :  { %4053 = vrot.lane.b32.xlu0 %v12634_v7, %s13162_s30 }
0x1f34   :  { %v12636_v14 = vpop.eup %12635 }
0x1f35   :  { %v4047_v19 = vadd.f32 1.0, %v12636_v14  ;;  %v12813_v14 = vld [vmem:[%s15141_s12] sm:$0x1] }
0x1f37   :  { %12637 = vrcp.f32 %v4047_v19  ;;  %v3358_v19 = vadd.f32 %v12813_v14, %v13782_v38 }
0x1f41   :  { %v12638_v21 = vpop.eup %12637 }
0x1f42   :  { %v4051_v24 = vmul.f32 %v12638_v21, %v3891_v52 }
0x1fa5   :  { %v4054_v22 = vpop.permute.xlu0 %4053 }
0x1fa6   :  { %v4056_v16 = vmul.f32 %v12638_v21, %v4054_v22 }
0x1fa8   :  { %4058 = vrot.lane.b32.xlu1 %v4056_v16, %s13163_s10  ;;  %v10047_v16 = vmul.f32 -1.442695, %v3358_v19 }
0x201a   :  { %v4059_v25 = vpop.permute.xlu1 %4058 }
0x201b   :  { %v4061_v54 = vadd.f32 %v4059_v25, %v4051_v24 }
0x201d   :  { %12639 = vtanh.f32 %v4061_v54 }
0x2027   :  { %v12640_v27 = vpop.eup %12639 }
0x2028   :  { %4064 = vrot.lane.b32.xlu0 %v12640_v27, %s13162_s30 }
0x209a   :  { %v4065_v28 = vpop.permute.xlu0 %4064 }
0x209b   :  { %v4067_v32 = vmul.f32 %v12638_v21, %v4065_v28 }
0x209d   :  { %4069 = vrot.lane.b32.xlu1 %v4067_v32, %s13163_s10 }
0x210f   :  { %v13851_v35 = vpop.permute.xlu1 %4069 }
0x2110   :  { %10955 = vmatmul.mubr.msk.f32.vlgmr.msra.gmra.mrb[34].mxu1 %vm1999_vm4, %v13851_v35 }
0x2111   :  { %11508 = vmatpush3.bf16.msra.mxu1 %v13717_v20  ;;  %10976 = vmatprep.mubr.msk.f32.mxu1 %vm13158_vm0, %v13159_v2 }
0x2112   :  { %11509 = vmatprep.subr.bf16.mxu1 %v13157_v1 }
0x2115   :  { %11511 = vmatpush3.bf16.msra.mxu1 %v13724_v23 }
0x2116   :  { %11518 = vmatprep.subr.bf16.mxu1 %v13157_v1 }
0x21e3   :  { %v4139_v36 = vpop.f32.mrb[34].mxu1 }
0x21e4   :  { %v4210_v37 = vadd.f32 %v13795_v57, %v4139_v36  ;;  %v10956_v41 = vpop.f32.mrb[35].mxu1 }
0x21e6   :  { %v4213_v0 = vadd.f32 %v4210_v37, %v13787_v42 }
0x21e8   :  { %12641 = vtanh.f32 %v4213_v0  ;;  %v10061_v45 = vmul.f32 -1.442695, %v4213_v0 }
0x21ea   :  { %12643 = vpow2.f32 %v10061_v45 }
0x21f2   :  { %v12642_v33 = vpop.eup %12641 }
0x21f3   :  { %4223 = vrot.lane.b32.xlu0 %v12642_v33, %s13162_s30 }
0x21f4   :  { %v12644_v26 = vpop.eup %12643 }
0x21f5   :  { %v4217_v43 = vadd.f32 1.0, %v12644_v26 }
0x21f7   :  { %12645 = vrcp.f32 %v4217_v43 }
0x2201   :  { %v12646_v47 = vpop.eup %12645 }
0x2202   :  { %v4221_v49 = vmul.f32 %v12646_v47, %v4061_v54 }
0x2265   :  { %v4224_v39 = vpop.permute.xlu0 %4223 }
0x2266   :  { %v4226_v48 = vmul.f32 %v12646_v47, %v4224_v39 }
0x2268   :  { %4228 = vrot.lane.b32.xlu1 %v4226_v48, %s13163_s10 }
0x22da   :  { %v4229_v50 = vpop.permute.xlu1 %4228 }
0x22db   :  { %v4231_v57 = vadd.f32 %v4229_v50, %v4221_v49 }
0x22dd   :  { %12647 = vtanh.f32 %v4231_v57 }
0x22e7   :  { %v12648_v51 = vpop.eup %12647 }
0x22e8   :  { %4234 = vrot.lane.b32.xlu0 %v12648_v51, %s13162_s30 }
0x235a   :  { %v4235_v53 = vpop.permute.xlu0 %4234 }
0x235b   :  { %v4237_v56 = vmul.f32 %v12646_v47, %v4235_v53 }
0x235d   :  { %4239 = vrot.lane.b32.xlu1 %v4237_v56, %s13163_s10 }
0x23cf   :  { %v13867_v13 = vpop.permute.xlu1 %4239 }
0x23d0   :  { %10977 = vmatmul.mubr.msk.f32.vlgmr.msra.gmra.mrb[36].mxu1 %vm1999_vm4, %v13867_v13 }
0x23d1   :  { %11520 = vmatpush3.bf16.msra.mxu1 %v13717_v20  ;;  %10998 = vmatprep.mubr.msk.f32.mxu1 %vm13158_vm0, %v13159_v2 }
0x23d2   :  { %11521 = vmatprep.subr.bf16.mxu1 %v13157_v1 }
0x23d5   :  { %11523 = vmatpush3.bf16.msra.mxu1 %v13724_v23 }
0x23d6   :  { %11530 = vmatprep.subr.bf16.mxu1 %v13157_v1 }
0x24a3   :  { %v4309_v58 = vpop.f32.mrb[36].mxu1 }
0x24a4   :  { %v4380_v60 = vadd.f32 %v13797_v15, %v4309_v58  ;;  %v10978_v61 = vpop.f32.mrb[37].mxu1  ;;  %v4754_v58 = vld [vmem:[#allocation17 + $0x20] sm:$0xff] }
0x24a6   :  { %v4383_v52 = vadd.f32 %v4380_v60, %v13787_v42  ;;  %v4755_v60 = vld [vmem:[#allocation17 + $0x28] sm:$0xff] }
0x24a8   :  { %12649 = vtanh.f32 %v4383_v52  ;;  %v10064_v63 = vmul.f32 -1.442695, %v4383_v52 }
0x24aa   :  { %12651 = vpow2.f32 %v10064_v63  ;;  %v4756_v63 = vld [vmem:[#allocation17 + $0x30] sm:$0xff] }
0x24b2   :  { %v12650_v62 = vpop.eup %12649 }
0x24b3   :  { %4393 = vrot.lane.b32.xlu0 %v12650_v62, %s13162_s30  ;;  %v11549_v62 = vpack.c.bf16 %v4755_v60, %v4754_v58 }
0x24b4   :  { %v12652_v3 = vpop.eup %12651 }
0x24b5   :  { %v4387_v4 = vadd.f32 1.0, %v12652_v3  ;;  %v4757_v3 = vld [vmem:[#allocation17 + $0x38] sm:$0xff] }
0x24b7   :  { %12653 = vrcp.f32 %v4387_v4 }
0x24c1   :  { %v12654_v5 = vpop.eup %12653 }
0x24c2   :  { %v4391_v7 = vmul.f32 %v12654_v5, %v4231_v57 }
0x2525   :  { %v4394_v6 = vpop.permute.xlu0 %4393 }
0x2526   :  { %v4396_v46 = vmul.f32 %v12654_v5, %v4394_v6 }
0x2528   :  { %4398 = vrot.lane.b32.xlu1 %v4396_v46, %s13163_s10 }
0x259a   :  { %v4399_v55 = vpop.permute.xlu1 %4398 }
0x259b   :  { %v4401_v15 = vadd.f32 %v4399_v55, %v4391_v7 }
0x259d   :  { %12655 = vtanh.f32 %v4401_v15 }
0x259e   :  { %12657 = vtanh.f32 %v3358_v19 }
0x259f   :  { %12659 = vpow2.f32 %v10047_v16 }
0x25a7   :  { %v12656_v21 = vpop.eup %12655 }
0x25a8   :  { %4404 = vrot.lane.b32.xlu0 %v12656_v21, %s13162_s30  ;;  %v12658_v22 = vpop.eup %12657 }
0x25a9   :  { %v12660_v24 = vpop.eup %12659 }
0x25aa   :  { %v3362_v25 = vadd.f32 1.0, %v12660_v24 }
0x25ac   :  { %3368 = vrot.lane.b32.xlu0 %v12658_v22, %s13162_s30  ;;  %12661 = vrcp.f32 %v3362_v25 }
0x25b6   :  { %v12662_v28 = vpop.eup %12661 }
0x25b7   :  { %v3366_v37 = vmul.f32 %v12662_v28, %v13712_v12 }
0x261a   :  { %v4405_v54 = vpop.permute.xlu0 %4404 }
0x261b   :  { %v4407_v27 = vmul.f32 %v12654_v5, %v4405_v54  ;;  %v11552_v5 = vpack.c.bf16 %v4757_v3, %v4756_v63 }
0x261d   :  { %4409 = vrot.lane.b32.xlu1 %v4407_v27, %s13163_s10 }
0x261e   :  { %v3369_v32 = vpop.permute.xlu0 %3368 }
0x261f   :  { %v3371_v38 = vmul.f32 %v12662_v28, %v3369_v32 }
0x2621   :  { %3373 = vrot.lane.b32.xlu0 %v3371_v38, %s13163_s10 }
0x268f   :  { %v13889_v36 = vpop.permute.xlu1 %4409 }
0x2690   :  { %10999 = vmatmul.mubr.msk.f32.vlgmr.msra.gmra.mrb[38].mxu1 %vm1999_vm4, %v13889_v36 }
0x2691   :  { %11532 = vmatpush3.bf16.msra.mxu1 %v13717_v20  ;;  %11020 = vmatprep.mubr.msk.f32.mxu1 %vm13158_vm0, %v13159_v2 }
0x2692   :  { %11533 = vmatprep.subr.bf16.mxu1 %v13157_v1 }
0x2693   :  { %v3374_v41 = vpop.permute.xlu0 %3373 }
0x2694   :  { %v3376_v0 = vadd.f32 %v3374_v41, %v3366_v37 }
0x2695   :  { %11535 = vmatpush3.bf16.msra.mxu1 %v13724_v23 }
0x2696   :  { %12663 = vtanh.f32 %v3376_v0  ;;  %11542 = vmatprep.subr.bf16.mxu1 %v13157_v1 }
0x26a0   :  { %v12664_v33 = vpop.eup %12663 }
0x26a1   :  { %3379 = vrot.lane.b32.xlu0 %v12664_v33, %s13162_s30  ;;  %v13993_v33 = vld [vmem:[%s15141_s12 + $0x2] sm:$0x1] }
0x2713   :  { %v3380_v53 = vpop.permute.xlu0 %3379 }
0x2714   :  { %v3382_v56 = vmul.f32 %v12662_v28, %v3380_v53 }
0x2763   :  { %v4479_v45 = vpop.f32.mrb[38].mxu1 }
0x2764   :  { %v4550_v20 = vadd.f32 %v13799_v59, %v4479_v45  ;;  %v11000_v26 = vpop.f32.mrb[39].mxu1 }
0x2766   :  { %v4553_v43 = vadd.f32 %v4550_v20, %v13787_v42 }
0x2768   :  { %12665 = vtanh.f32 %v4553_v43  ;;  %v10067_v47 = vmul.f32 -1.442695, %v4553_v43 }
0x276a   :  { %12667 = vpow2.f32 %v10067_v47 }
0x2772   :  { %v12666_v12 = vpop.eup %12665 }
0x2773   :  { %4563 = vrot.lane.b32.xlu1 %v12666_v12, %s13162_s30 }
0x2774   :  { %v12668_v39 = vpop.eup %12667 }
0x2775   :  { %v4557_v23 = vadd.f32 1.0, %v12668_v39 }
0x2777   :  { %12669 = vrcp.f32 %v4557_v23 }
0x2781   :  { %v12670_v48 = vpop.eup %12669 }
0x2782   :  { %v4561_v57 = vmul.f32 %v12670_v48, %v4401_v15 }
0x27e5   :  { %v4564_v49 = vpop.permute.xlu1 %4563 }
0x27e6   :  { %v4566_v50 = vmul.f32 %v12670_v48, %v4564_v49 }
0x27e8   :  { %4568 = vrot.lane.b32.xlu1 %v4566_v50, %s13163_s10 }
0x285a   :  { %v4569_v51 = vpop.permute.xlu1 %4568 }
0x285b   :  { %v13905_v59 = vadd.f32 %v4569_v51, %v4561_v57 }
0x285d   :  { %12671 = vtanh.f32 %v13905_v59 }
0x2867   :  { %v12672_v42 = vpop.eup %12671 }
0x2868   :  { %4574 = vrot.lane.b32.xlu1 %v12672_v42, %s13162_s30 }
0x286c   :  { %4654 = vrot.lane.b32.xlu1 %v3382_v56, %s13163_s10 }
0x28da   :  { %v4575_v61 = vpop.permute.xlu1 %4574 }
0x28db   :  { %v4577_v52 = vmul.f32 %v12670_v48, %v4575_v61 }
0x28dd   :  { %4579 = vrot.lane.b32.xlu0 %v4577_v52, %s13163_s10 }
0x28de   :  { %v13911_v4 = vpop.permute.xlu1 %4654 }
0x28df   :  { %11032 = vmatmul.mubr.msk.f32.vlgmr.msra.gmra.mrb[38].mxu0 %vm1999_vm4, %v13911_v4 }
0x28e0   :  { %11550 = vmatpush3.bf16.msra.mxu0 %v11549_v62  ;;  %11053 = vmatprep.mubr.msk.f32.mxu0 %vm13158_vm0, %v13159_v2 }
0x28e1   :  { %11551 = vmatprep.subr.bf16.mxu0 %v13157_v1 }
0x28e4   :  { %11553 = vmatpush3.bf16.msra.mxu0 %v11552_v5 }
0x28e5   :  { %11560 = vmatprep.subr.bf16.mxu0 %v13157_v1 }
0x28e7   :  { %11054 = vmatmul.mubr.msk.f32.vlgmr.msra.gmra.mrb[40].mxu0 %vm1999_vm4, %v13804_v18  ;;  %v4759_v18 = vld [vmem:[#allocation18 + $0x40] sm:$0xff] }
0x28e8   :  { %11562 = vmatpush3.bf16.msra.mxu0 %v11549_v62  ;;  %11075 = vmatprep.mubr.msk.f32.mxu0 %vm13158_vm0, %v13159_v2 }
0x28e9   :  { %11563 = vmatprep.subr.bf16.mxu0 %v13157_v1 }
0x28ec   :  { %11565 = vmatpush3.bf16.msra.mxu0 %v11552_v5 }
0x28ed   :  { %11572 = vmatprep.subr.bf16.mxu0 %v13157_v1 }
0x28ef   :  { %11076 = vmatmul.mubr.msk.f32.vlgmr.msra.gmra.mrb[42].mxu0 %vm1999_vm4, %v13819_v40  ;;  %v4760_v40 = vld [vmem:[#allocation18 + $0x48] sm:$0xff] }
0x28f0   :  { %11574 = vmatpush3.bf16.msra.mxu0 %v11549_v62  ;;  %11097 = vmatprep.mubr.msk.f32.mxu0 %vm13158_vm0, %v13159_v2 }
0x28f1   :  { %11575 = vmatprep.subr.bf16.mxu0 %v13157_v1 }
0x28f4   :  { %11577 = vmatpush3.bf16.msra.mxu0 %v11552_v5 }
0x28f5   :  { %11584 = vmatprep.subr.bf16.mxu0 %v13157_v1 }
0x28f7   :  { %11098 = vmatmul.mubr.msk.f32.vlgmr.msra.gmra.mrb[44].mxu0 %vm1999_vm4, %v13835_v44  ;;  %v13955_v44 = vpack.c.bf16 %v4760_v40, %v4759_v18 }
0x28f8   :  { %11586 = vmatpush3.bf16.msra.mxu0 %v11549_v62  ;;  %11119 = vmatprep.mubr.msk.f32.mxu0 %vm13158_vm0, %v13159_v2 }
0x28f9   :  { %11587 = vmatprep.subr.bf16.mxu0 %v13157_v1 }
0x28fc   :  { %11589 = vmatpush3.bf16.msra.mxu0 %v11552_v5 }
0x28fd   :  { %11596 = vmatprep.subr.bf16.mxu0 %v13157_v1 }
0x28ff   :  { %11120 = vmatmul.mubr.msk.f32.vlgmr.msra.gmra.mrb[46].mxu0 %vm1999_vm4, %v13851_v35  ;;  %v4761_v35 = vld [vmem:[#allocation18 + $0x50] sm:$0xff] }
0x2900   :  { %11598 = vmatpush3.bf16.msra.mxu0 %v11549_v62  ;;  %11141 = vmatprep.mubr.msk.f32.mxu0 %vm13158_vm0, %v13159_v2 }
0x2901   :  { %11599 = vmatprep.subr.bf16.mxu0 %v13157_v1 }
0x2904   :  { %11601 = vmatpush3.bf16.msra.mxu0 %v11552_v5 }
0x2905   :  { %11608 = vmatprep.subr.bf16.mxu0 %v13157_v1 }
0x2907   :  { %11142 = vmatmul.mubr.msk.f32.vlgmr.msra.gmra.mrb[48].mxu0 %vm1999_vm4, %v13867_v13  ;;  %v4762_v13 = vld [vmem:[#allocation18 + $0x58] sm:$0xff] }
0x2908   :  { %11610 = vmatpush3.bf16.msra.mxu0 %v11549_v62  ;;  %11163 = vmatprep.mubr.msk.f32.mxu0 %vm13158_vm0, %v13159_v2  ;;  %v13960_v46 = vpack.c.bf16 %v4762_v13, %v4761_v35 }
0x2909   :  { %11611 = vmatprep.subr.bf16.mxu0 %v13157_v1 }
0x290c   :  { %11613 = vmatpush3.bf16.msra.mxu0 %v11552_v5 }
0x290d   :  { %11620 = vmatprep.subr.bf16.mxu0 %v13157_v1 }
0x290f   :  { %11164 = vmatmul.mubr.msk.f32.vlgmr.msra.gmra.mrb[50].mxu0 %vm1999_vm4, %v13889_v36 }
0x2910   :  { %11622 = vmatpush3.bf16.msra.mxu0 %v11549_v62  ;;  %11185 = vmatprep.mubr.msk.f32.mxu0 %vm13158_vm0, %v13159_v2 }
0x2911   :  { %11623 = vmatprep.subr.bf16.mxu0 %v13157_v1 }
0x2914   :  { %11625 = vmatpush3.bf16.msra.mxu0 %v11552_v5 }
0x2915   :  { %11632 = vmatprep.subr.bf16.mxu0 %v13157_v1 }
0x294f   :  { %v4580_v6 = vpop.permute.xlu0 %4579 }
0x2950   :  { %11021 = vmatmul.mubr.msk.f32.vlgmr.msra.gmra.mrb[40].mxu1 %vm1999_vm4, %v4580_v6  ;;  %11186 = vmatmul.mubr.msk.f32.vlgmr.msra.gmra.mrb[52].mxu0 %vm1999_vm4, %v4580_v6 }
0x2951   :  { %11544 = vmatpush3.bf16.msra.mxu1 %v13955_v44  ;;  %11042 = vmatprep.mubr.msk.f32.mxu1 %vm13158_vm0, %v13159_v2 }
0x2952   :  { %11545 = vmatprep.subr.bf16.mxu1 %v13157_v1  ;;  %11634 = vmatpush3.bf16.msra.mxu0 %v11549_v62 }
0x2953   :  { %11635 = vmatprep.subr.bf16.mxu0 %v13157_v1  ;;  %11207 = vmatprep.mubr.msk.f32.mxu0 %vm13158_vm0, %v13159_v2 }
0x2955   :  { %11547 = vmatpush3.bf16.msra.mxu1 %v13960_v46 }
0x2956   :  { %11554 = vmatprep.subr.bf16.mxu1 %v13157_v1  ;;  %11637 = vmatpush3.bf16.msra.mxu0 %v11552_v5 }
0x2957   :  { %11644 = vmatprep.subr.bf16.mxu0 %v13157_v1 }
0x2958   :  { %11043 = vmatmul.mubr.f32.vlgmr.msra.gmra.mrb[42].mxu1 %v13159_v2 }
0x2959   :  { %11556 = vmatpush3.bf16.msra.mxu1 %v13955_v44  ;;  %11064 = vmatprep.mubr.msk.f32.mxu1 %vm13158_vm0, %v13159_v2 }
0x295a   :  { %11557 = vmatprep.subr.bf16.mxu1 %v13157_v1 }
0x295d   :  { %11559 = vmatpush3.bf16.msra.mxu1 %v13960_v46 }
0x295e   :  { %11566 = vmatprep.subr.bf16.mxu1 %v13157_v1 }
0x29b2   :  { %v4724_v7 = vpop.f32.mrb[38].mxu0 }
0x29b3   :  { %v11033_v55 = vpop.f32.mrb[39].mxu0 }
0x29ba   :  { %v4900_v15 = vpop.f32.mrb[40].mxu0 }
0x29bb   :  { %v11055_v14 = vpop.f32.mrb[41].mxu0 }
0x29c2   :  { %v5070_v19 = vpop.f32.mrb[42].mxu0 }
0x29c3   :  { %v11077_v21 = vpop.f32.mrb[43].mxu0 }
0x29ca   :  { %v13978_v22 = vpop.f32.mrb[44].mxu0 }
0x29cb   :  { %v11099_v16 = vpop.f32.mrb[45].mxu0 }
0x29d2   :  { %v13980_v24 = vpop.f32.mrb[46].mxu0 }
0x29d3   :  { %v11121_v25 = vpop.f32.mrb[47].mxu0 }
0x29da   :  { %v13982_v54 = vpop.f32.mrb[48].mxu0 }
0x29db   :  { %v11143_v27 = vpop.f32.mrb[49].mxu0 }
0x29e2   :  { %v13984_v28 = vpop.f32.mrb[50].mxu0 }
0x29e3   :  { %v11165_v32 = vpop.f32.mrb[51].mxu0 }
0x2a23   :  { %v4649_v38 = vpop.f32.mrb[40].mxu1  ;;  %v13986_v36 = vpop.f32.mrb[52].mxu0 }
0x2a24   :  { %v13988_v37 = vadd.f32 %v4724_v7, %v4649_v38  ;;  %v11022_v41 = vpop.f32.mrb[41].mxu1  ;;  %v11187_v0 = vpop.f32.mrb[53].mxu0 }
0x2a2b   :  { %v4830_v45 = vpop.f32.mrb[42].mxu1 }
0x2a2c   :  { %v4901_v20 = vadd.f32 %v4900_v15, %v4830_v45  ;;  %v11044_v26 = vpop.f32.mrb[43].mxu1 }
0x2a2e   :  { %v4904_v43 = vadd.f32 %v4901_v20, %v13993_v33 }
0x2a30   :  { %12673 = vtanh.f32 %v4904_v43  ;;  %v10072_v47 = vmul.f32 -1.442695, %v4904_v43 }
0x2a32   :  { %12675 = vpow2.f32 %v10072_v47 }
0x2a3a   :  { %v12674_v12 = vpop.eup %12673 }
0x2a3b   :  { %4914 = vrot.lane.b32.xlu0 %v12674_v12, %s13162_s30 }
0x2a3c   :  { %v12676_v39 = vpop.eup %12675 }
0x2a3d   :  { %v4908_v23 = vadd.f32 1.0, %v12676_v39 }
0x2a3f   :  { %12677 = vrcp.f32 %v4908_v23 }
0x2a49   :  { %v12678_v48 = vpop.eup %12677 }
0x2a4a   :  { %v4912_v57 = vmul.f32 0.0, %v12678_v48 }
0x2aad   :  { %v4915_v49 = vpop.permute.xlu0 %4914 }
0x2aae   :  { %v4917_v50 = vmul.f32 %v12678_v48, %v4915_v49 }
0x2ab0   :  { %4919 = vrot.lane.b32.xlu1 %v4917_v50, %s13163_s10 }
0x2b22   :  { %v4920_v51 = vpop.permute.xlu1 %4919 }
0x2b23   :  { %v4922_v42 = vadd.f32 %v4920_v51, %v4912_v57 }
0x2b25   :  { %12679 = vtanh.f32 %v4922_v42 }
0x2b2f   :  { %v12680_v53 = vpop.eup %12679 }
0x2b30   :  { %4925 = vrot.lane.b32.xlu0 %v12680_v53, %s13162_s30 }
0x2ba2   :  { %v4926_v56 = vpop.permute.xlu0 %4925 }
0x2ba3   :  { %v4928_v58 = vmul.f32 %v12678_v48, %v4926_v56 }
0x2ba5   :  { %4930 = vrot.lane.b32.xlu1 %v4928_v58, %s13163_s10 }
0x2c17   :  { %v14000_v60 = vpop.permute.xlu1 %4930 }
0x2c18   :  { %11065 = vmatmul.mubr.msk.f32.vlgmr.msra.gmra.mrb[44].mxu1 %vm1999_vm4, %v14000_v60 }
0x2c19   :  { %11568 = vmatpush3.bf16.msra.mxu1 %v13955_v44  ;;  %11086 = vmatprep.mubr.msk.f32.mxu1 %vm13158_vm0, %v13159_v2 }
0x2c1a   :  { %11569 = vmatprep.subr.bf16.mxu1 %v13157_v1 }
0x2c1d   :  { %11571 = vmatpush3.bf16.msra.mxu1 %v13960_v46 }
0x2c1e   :  { %11578 = vmatprep.subr.bf16.mxu1 %v13157_v1 }
0x2ceb   :  { %v5000_v61 = vpop.f32.mrb[44].mxu1 }
0x2cec   :  { %v5071_v52 = vadd.f32 %v5070_v19, %v5000_v61  ;;  %v11066_v62 = vpop.f32.mrb[45].mxu1 }
0x2cee   :  { %v5074_v63 = vadd.f32 %v5071_v52, %v13993_v33 }
0x2cf0   :  { %12681 = vtanh.f32 %v5074_v63  ;;  %v10075_v5 = vmul.f32 -1.442695, %v5074_v63 }
0x2cf2   :  { %12683 = vpow2.f32 %v10075_v5 }
0x2cfa   :  { %v12682_v3 = vpop.eup %12681 }
0x2cfb   :  { %5084 = vrot.lane.b32.xlu0 %v12682_v3, %s13162_s30 }
0x2cfc   :  { %v12684_v18 = vpop.eup %12683 }
0x2cfd   :  { %v5078_v40 = vadd.f32 1.0, %v12684_v18 }
0x2cff   :  { %12685 = vrcp.f32 %v5078_v40 }
0x2d09   :  { %v12686_v35 = vpop.eup %12685 }
0x2d0a   :  { %v5082_v7 = vmul.f32 %v12686_v35, %v4922_v42 }
0x2d6d   :  { %v5085_v13 = vpop.permute.xlu0 %5084 }
0x2d6e   :  { %v5087_v6 = vmul.f32 %v12686_v35, %v5085_v13 }
0x2d70   :  { %5089 = vrot.lane.b32.xlu1 %v5087_v6, %s13163_s10 }
0x2de2   :  { %v5090_v55 = vpop.permute.xlu1 %5089 }
0x2de3   :  { %v5092_v15 = vadd.f32 %v5090_v55, %v5082_v7 }
0x2de5   :  { %12687 = vtanh.f32 %v5092_v15 }
0x2def   :  { %v12688_v14 = vpop.eup %12687 }
0x2df0   :  { %5095 = vrot.lane.b32.xlu0 %v12688_v14, %s13162_s30 }
0x2e62   :  { %v5096_v19 = vpop.permute.xlu0 %5095 }
0x2e63   :  { %v5098_v21 = vmul.f32 %v12686_v35, %v5096_v19 }
0x2e65   :  { %5100 = vrot.lane.b32.xlu1 %v5098_v21, %s13163_s10 }
0x2ed7   :  { %v14015_v16 = vpop.permute.xlu1 %5100 }
0x2ed8   :  { %11087 = vmatmul.mubr.msk.f32.vlgmr.msra.gmra.mrb[46].mxu1 %vm1999_vm4, %v14015_v16 }
0x2ed9   :  { %11580 = vmatpush3.bf16.msra.mxu1 %v13955_v44  ;;  %11108 = vmatprep.mubr.msk.f32.mxu1 %vm13158_vm0, %v13159_v2 }
0x2eda   :  { %11581 = vmatprep.subr.bf16.mxu1 %v13157_v1 }
0x2edd   :  { %11583 = vmatpush3.bf16.msra.mxu1 %v13960_v46 }
0x2ede   :  { %11590 = vmatprep.subr.bf16.mxu1 %v13157_v1 }
0x2fab   :  { %v5170_v25 = vpop.f32.mrb[46].mxu1 }
0x2fac   :  { %v5241_v27 = vadd.f32 %v13978_v22, %v5170_v25  ;;  %v11088_v32 = vpop.f32.mrb[47].mxu1 }
0x2fae   :  { %v5244_v38 = vadd.f32 %v5241_v27, %v13993_v33 }
0x2fb0   :  { %12689 = vtanh.f32 %v5244_v38  ;;  %v10078_v0 = vmul.f32 -1.442695, %v5244_v38 }
0x2fb2   :  { %12691 = vpow2.f32 %v10078_v0 }
0x2fba   :  { %v12690_v41 = vpop.eup %12689 }
0x2fbb   :  { %5254 = vrot.lane.b32.xlu0 %v12690_v41, %s13162_s30 }
0x2fbc   :  { %v12692_v45 = vpop.eup %12691 }
0x2fbd   :  { %v5248_v20 = vadd.f32 1.0, %v12692_v45 }
0x2fbf   :  { %12693 = vrcp.f32 %v5248_v20 }
0x2fc9   :  { %v12694_v26 = vpop.eup %12693 }
0x2fca   :  { %v5252_v47 = vmul.f32 %v12694_v26, %v5092_v15 }
0x302d   :  { %v5255_v43 = vpop.permute.xlu0 %5254 }
0x302e   :  { %v5257_v12 = vmul.f32 %v12694_v26, %v5255_v43 }
0x3030   :  { %5259 = vrot.lane.b32.xlu1 %v5257_v12, %s13163_s10 }
0x30a2   :  { %v5260_v39 = vpop.permute.xlu1 %5259 }
0x30a3   :  { %v5262_v22 = vadd.f32 %v5260_v39, %v5252_v47 }
0x30a5   :  { %12695 = vtanh.f32 %v5262_v22 }
0x30af   :  { %v12696_v23 = vpop.eup %12695 }
0x30b0   :  { %5265 = vrot.lane.b32.xlu0 %v12696_v23, %s13162_s30 }
0x3122   :  { %v5266_v48 = vpop.permute.xlu0 %5265 }
0x3123   :  { %v5268_v49 = vmul.f32 %v12694_v26, %v5266_v48 }
0x3125   :  { %5270 = vrot.lane.b32.xlu1 %v5268_v49, %s13163_s10 }
0x3197   :  { %v14031_v50 = vpop.permute.xlu1 %5270 }
0x3198   :  { %11109 = vmatmul.mubr.msk.f32.vlgmr.msra.gmra.mrb[48].mxu1 %vm1999_vm4, %v14031_v50 }
0x3199   :  { %11592 = vmatpush3.bf16.msra.mxu1 %v13955_v44  ;;  %11130 = vmatprep.mubr.msk.f32.mxu1 %vm13158_vm0, %v13159_v2 }
0x319a   :  { %11593 = vmatprep.subr.bf16.mxu1 %v13157_v1 }
0x319d   :  { %11595 = vmatpush3.bf16.msra.mxu1 %v13960_v46 }
0x319e   :  { %11602 = vmatprep.subr.bf16.mxu1 %v13157_v1 }
0x326b   :  { %v5340_v57 = vpop.f32.mrb[48].mxu1 }
0x326c   :  { %v5411_v51 = vadd.f32 %v13980_v24, %v5340_v57  ;;  %v11110_v42 = vpop.f32.mrb[49].mxu1 }
0x326e   :  { %v5414_v53 = vadd.f32 %v5411_v51, %v13993_v33 }
0x3270   :  { %12697 = vtanh.f32 %v5414_v53  ;;  %v10081_v58 = vmul.f32 -1.442695, %v5414_v53 }
0x3272   :  { %12699 = vpow2.f32 %v10081_v58 }
0x327a   :  { %v12698_v56 = vpop.eup %12697 }
0x327b   :  { %5424 = vrot.lane.b32.xlu0 %v12698_v56, %s13162_s30 }
0x327c   :  { %v12700_v61 = vpop.eup %12699 }
0x327d   :  { %v5418_v52 = vadd.f32 1.0, %v12700_v61 }
0x327f   :  { %12701 = vrcp.f32 %v5418_v52  ;;  %v12814_v52 = vld [vmem:[%s15141_s12 + $0x1] sm:$0x1] }
0x3289   :  { %v12702_v62 = vpop.eup %12701 }
0x328a   :  { %v5422_v5 = vmul.f32 %v12702_v62, %v5262_v22 }
0x32ed   :  { %v5425_v63 = vpop.permute.xlu0 %5424 }
0x32ee   :  { %v5427_v3 = vmul.f32 %v12702_v62, %v5425_v63 }
0x32f0   :  { %5429 = vrot.lane.b32.xlu1 %v5427_v3, %s13163_s10 }
0x3362   :  { %v5430_v18 = vpop.permute.xlu1 %5429 }
0x3363   :  { %v5432_v24 = vadd.f32 %v5430_v18, %v5422_v5 }
0x3365   :  { %12703 = vtanh.f32 %v5432_v24 }
0x336f   :  { %v12704_v40 = vpop.eup %12703 }
0x3370   :  { %5435 = vrot.lane.b32.xlu0 %v12704_v40, %s13162_s30 }
0x33e2   :  { %v5436_v35 = vpop.permute.xlu0 %5435 }
0x33e3   :  { %v5438_v13 = vmul.f32 %v12702_v62, %v5436_v35  ;;  %v4728_v62 = vadd.f32 %v12814_v52, %v13988_v37 }
0x33e5   :  { %5440 = vrot.lane.b32.xlu1 %v5438_v13, %s13163_s10  ;;  %v10070_v5 = vmul.f32 -1.442695, %v4728_v62 }
0x3457   :  { %v14047_v6 = vpop.permute.xlu1 %5440 }
0x3458   :  { %11131 = vmatmul.mubr.msk.f32.vlgmr.msra.gmra.mrb[50].mxu1 %vm1999_vm4, %v14047_v6 }
0x3459   :  { %11604 = vmatpush3.bf16.msra.mxu1 %v13955_v44  ;;  %11152 = vmatprep.mubr.msk.f32.mxu1 %vm13158_vm0, %v13159_v2 }
0x345a   :  { %11605 = vmatprep.subr.bf16.mxu1 %v13157_v1 }
0x345d   :  { %11607 = vmatpush3.bf16.msra.mxu1 %v13960_v46 }
0x345e   :  { %11614 = vmatprep.subr.bf16.mxu1 %v13157_v1 }
0x352b   :  { %v5510_v7 = vpop.f32.mrb[50].mxu1 }
0x352c   :  { %v5581_v55 = vadd.f32 %v13982_v54, %v5510_v7  ;;  %v11132_v15 = vpop.f32.mrb[51].mxu1 }
0x352e   :  { %v5584_v14 = vadd.f32 %v5581_v55, %v13993_v33 }
0x3530   :  { %12705 = vtanh.f32 %v5584_v14  ;;  %v10084_v21 = vmul.f32 -1.442695, %v5584_v14 }
0x3532   :  { %12707 = vpow2.f32 %v10084_v21 }
0x353a   :  { %v12706_v19 = vpop.eup %12705 }
0x353b   :  { %5594 = vrot.lane.b32.xlu0 %v12706_v19, %s13162_s30 }
0x353c   :  { %v12708_v25 = vpop.eup %12707 }
0x353d   :  { %v5588_v27 = vadd.f32 1.0, %v12708_v25 }
0x353f   :  { %12709 = vrcp.f32 %v5588_v27 }
0x3549   :  { %v12710_v32 = vpop.eup %12709 }
0x354a   :  { %v5592_v0 = vmul.f32 %v12710_v32, %v5432_v24 }
0x35ad   :  { %v5595_v38 = vpop.permute.xlu0 %5594 }
0x35ae   :  { %v5597_v41 = vmul.f32 %v12710_v32, %v5595_v38 }
0x35b0   :  { %5599 = vrot.lane.b32.xlu1 %v5597_v41, %s13163_s10 }
0x3622   :  { %v5600_v45 = vpop.permute.xlu1 %5599 }
0x3623   :  { %v5602_v54 = vadd.f32 %v5600_v45, %v5592_v0 }
0x3625   :  { %12711 = vtanh.f32 %v5602_v54 }
0x362f   :  { %v12712_v20 = vpop.eup %12711 }
0x3630   :  { %5605 = vrot.lane.b32.xlu0 %v12712_v20, %s13162_s30 }
0x36a2   :  { %v5606_v26 = vpop.permute.xlu0 %5605 }
0x36a3   :  { %v5608_v43 = vmul.f32 %v12710_v32, %v5606_v26 }
0x36a5   :  { %5610 = vrot.lane.b32.xlu1 %v5608_v43, %s13163_s10 }
0x3717   :  { %v14063_v12 = vpop.permute.xlu1 %5610 }
0x3718   :  { %11153 = vmatmul.mubr.msk.f32.vlgmr.msra.gmra.mrb[52].mxu1 %vm1999_vm4, %v14063_v12 }
0x3719   :  { %11616 = vmatpush3.bf16.msra.mxu1 %v13955_v44  ;;  %11174 = vmatprep.mubr.msk.f32.mxu1 %vm13158_vm0, %v13159_v2 }
0x371a   :  { %11617 = vmatprep.subr.bf16.mxu1 %v13157_v1 }
0x371d   :  { %11619 = vmatpush3.bf16.msra.mxu1 %v13960_v46 }
0x371e   :  { %11626 = vmatprep.subr.bf16.mxu1 %v13157_v1 }
0x37eb   :  { %v5680_v47 = vpop.f32.mrb[52].mxu1 }
0x37ec   :  { %v5751_v39 = vadd.f32 %v13984_v28, %v5680_v47  ;;  %v11154_v22 = vpop.f32.mrb[53].mxu1 }
0x37ed   :  { %v6126_v22 = vld [vmem:[#allocation17 + $0x48] sm:$0xff] }
0x37ee   :  { %v5754_v23 = vadd.f32 %v5751_v39, %v13993_v33  ;;  %v6125_v39 = vld [vmem:[#allocation17 + $0x40] sm:$0xff] }
0x37f0   :  { %12713 = vtanh.f32 %v5754_v23  ;;  %v10087_v49 = vmul.f32 -1.442695, %v5754_v23 }
0x37f2   :  { %12715 = vpow2.f32 %v10087_v49  ;;  %v11645_v49 = vpack.c.bf16 %v6126_v22, %v6125_v39 }
0x37fa   :  { %v12714_v48 = vpop.eup %12713 }
0x37fb   :  { %5764 = vrot.lane.b32.xlu0 %v12714_v48, %s13162_s30 }
0x37fc   :  { %v12716_v57 = vpop.eup %12715 }
0x37fd   :  { %v5758_v51 = vadd.f32 1.0, %v12716_v57  ;;  %v6127_v57 = vld [vmem:[#allocation17 + $0x50] sm:$0xff] }
0x37ff   :  { %12717 = vrcp.f32 %v5758_v51  ;;  %v6128_v51 = vld [vmem:[#allocation17 + $0x58] sm:$0xff] }
0x3809   :  { %v12718_v42 = vpop.eup %12717 }
0x380a   :  { %v5762_v58 = vmul.f32 %v12718_v42, %v5602_v54 }
0x386d   :  { %v5765_v53 = vpop.permute.xlu0 %5764 }
0x386e   :  { %v5767_v56 = vmul.f32 %v12718_v42, %v5765_v53  ;;  %v11648_v53 = vpack.c.bf16 %v6128_v51, %v6127_v57 }
0x3870   :  { %5769 = vrot.lane.b32.xlu1 %v5767_v56, %s13163_s10 }
0x38e2   :  { %v5770_v61 = vpop.permute.xlu1 %5769 }
0x38e3   :  { %v5772_v28 = vadd.f32 %v5770_v61, %v5762_v58 }
0x38e5   :  { %12719 = vtanh.f32 %v5772_v28 }
0x38e6   :  { %12721 = vtanh.f32 %v4728_v62 }
0x38e7   :  { %12723 = vpow2.f32 %v10070_v5 }
0x38ef   :  { %v12720_v63 = vpop.eup %12719 }
0x38f0   :  { %5775 = vrot.lane.b32.xlu0 %v12720_v63, %s13162_s30  ;;  %v12722_v3 = vpop.eup %12721 }
0x38f1   :  { %v12724_v18 = vpop.eup %12723 }
0x38f2   :  { %v4732_v24 = vadd.f32 1.0, %v12724_v18 }
0x38f4   :  { %4738 = vrot.lane.b32.xlu0 %v12722_v3, %s13162_s30  ;;  %12725 = vrcp.f32 %v4732_v24 }
0x38fe   :  { %v12726_v13 = vpop.eup %12725 }
0x38ff   :  { %v4736_v15 = vmul.f32 %v12726_v13, %v13905_v59 }
0x3962   :  { %v5776_v40 = vpop.permute.xlu0 %5775 }
0x3963   :  { %v5778_v35 = vmul.f32 %v12718_v42, %v5776_v40 }
0x3965   :  { %5780 = vrot.lane.b32.xlu1 %v5778_v35, %s13163_s10 }
0x3966   :  { %v4739_v7 = vpop.permute.xlu0 %4738 }
0x3967   :  { %v4741_v37 = vmul.f32 %v12726_v13, %v4739_v7 }
0x3969   :  { %4743 = vrot.lane.b32.xlu0 %v4741_v37, %s13163_s10 }
0x39d7   :  { %v14085_v55 = vpop.permute.xlu1 %5780 }
0x39d8   :  { %11175 = vmatmul.mubr.msk.f32.vlgmr.msra.gmra.mrb[54].mxu1 %vm1999_vm4, %v14085_v55 }
0x39d9   :  { %11628 = vmatpush3.bf16.msra.mxu1 %v13955_v44  ;;  %11196 = vmatprep.mubr.msk.f32.mxu1 %vm13158_vm0, %v13159_v2 }
0x39da   :  { %11629 = vmatprep.subr.bf16.mxu1 %v13157_v1 }
0x39db   :  { %v4744_v14 = vpop.permute.xlu0 %4743 }
0x39dc   :  { %v4746_v19 = vadd.f32 %v4744_v14, %v4736_v15 }
0x39dd   :  { %11631 = vmatpush3.bf16.msra.mxu1 %v13960_v46 }
0x39de   :  { %12727 = vtanh.f32 %v4746_v19  ;;  %11638 = vmatprep.subr.bf16.mxu1 %v13157_v1 }
0x39e8   :  { %v12728_v21 = vpop.eup %12727 }
0x39e9   :  { %4749 = vrot.lane.b32.xlu0 %v12728_v21, %s13162_s30 }
0x3a5b   :  { %v4750_v43 = vpop.permute.xlu0 %4749 }
0x3a5c   :  { %v14105_v47 = vmul.f32 %v12726_v13, %v4750_v43 }
0x3aab   :  { %v5850_v25 = vpop.f32.mrb[54].mxu1 }
0x3aac   :  { %v5921_v44 = vadd.f32 %v13986_v36, %v5850_v25  ;;  %v11176_v27 = vpop.f32.mrb[55].mxu1  ;;  %v14188_v25 = vld [vmem:[%s15141_s12 + $0x3] sm:$0x1] }
0x3aae   :  { %v5924_v32 = vadd.f32 %v5921_v44, %v13993_v33 }
0x3ab0   :  { %12729 = vtanh.f32 %v5924_v32  ;;  %v10090_v38 = vmul.f32 -1.442695, %v5924_v32 }
0x3ab2   :  { %12731 = vpow2.f32 %v10090_v38 }
0x3aba   :  { %v12730_v59 = vpop.eup %12729 }
0x3abb   :  { %5934 = vrot.lane.b32.xlu1 %v12730_v59, %s13162_s30 }
0x3abc   :  { %v12732_v41 = vpop.eup %12731 }
0x3abd   :  { %v5928_v46 = vadd.f32 1.0, %v12732_v41 }
0x3abf   :  { %12733 = vrcp.f32 %v5928_v46 }
0x3ac9   :  { %v12734_v0 = vpop.eup %12733 }
0x3aca   :  { %v5932_v20 = vmul.f32 %v12734_v0, %v5772_v28 }
0x3b2d   :  { %v5935_v45 = vpop.permute.xlu1 %5934 }
0x3b2e   :  { %v5937_v54 = vmul.f32 %v12734_v0, %v5935_v45 }
0x3b30   :  { %5939 = vrot.lane.b32.xlu1 %v5937_v54, %s13163_s10 }
0x3ba2   :  { %v5940_v26 = vpop.permute.xlu1 %5939 }
0x3ba3   :  { %v14101_v36 = vadd.f32 %v5940_v26, %v5932_v20 }
0x3ba5   :  { %12735 = vtanh.f32 %v14101_v36 }
0x3baf   :  { %v12736_v33 = vpop.eup %12735 }
0x3bb0   :  { %5945 = vrot.lane.b32.xlu1 %v12736_v33, %s13162_s30 }
0x3bb4   :  { %6025 = vrot.lane.b32.xlu1 %v14105_v47, %s13163_s10 }
0x3c22   :  { %v5946_v23 = vpop.permute.xlu1 %5945 }
0x3c23   :  { %v5948_v48 = vmul.f32 %v12734_v0, %v5946_v23 }
0x3c25   :  { %5950 = vrot.lane.b32.xlu0 %v5948_v48, %s13163_s10 }
0x3c26   :  { %v6026_v42 = vpop.permute.xlu1 %6025 }
0x3c27   :  { %11208 = vmatmul.mubr.msk.f32.vlgmr.msra.gmra.mrb[54].mxu0 %vm1999_vm4, %v6026_v42 }
0x3c28   :  { %11646 = vmatpush3.bf16.msra.mxu0 %v11645_v49  ;;  %11229 = vmatprep.mubr.msk.f32.mxu0 %vm13158_vm0, %v13159_v2 }
0x3c29   :  { %11647 = vmatprep.subr.bf16.mxu0 %v13157_v1 }
0x3c2c   :  { %11649 = vmatpush3.bf16.msra.mxu0 %v11648_v53 }
0x3c2d   :  { %11656 = vmatprep.subr.bf16.mxu0 %v13157_v1 }
0x3c2f   :  { %11230 = vmatmul.mubr.msk.f32.vlgmr.msra.gmra.mrb[56].mxu0 %vm1999_vm4, %v14000_v60  ;;  %v6130_v60 = vld [vmem:[#allocation18 + $0x60] sm:$0xff] }
0x3c30   :  { %11658 = vmatpush3.bf16.msra.mxu0 %v11645_v49  ;;  %11251 = vmatprep.mubr.msk.f32.mxu0 %vm13158_vm0, %v13159_v2 }
0x3c31   :  { %11659 = vmatprep.subr.bf16.mxu0 %v13157_v1 }
0x3c34   :  { %11661 = vmatpush3.bf16.msra.mxu0 %v11648_v53 }
0x3c35   :  { %11668 = vmatprep.subr.bf16.mxu0 %v13157_v1 }
0x3c37   :  { %11252 = vmatmul.mubr.msk.f32.vlgmr.msra.gmra.mrb[58].mxu0 %vm1999_vm4, %v14015_v16  ;;  %v6131_v16 = vld [vmem:[#allocation18 + $0x68] sm:$0xff] }
0x3c38   :  { %11670 = vmatpush3.bf16.msra.mxu0 %v11645_v49  ;;  %11273 = vmatprep.mubr.msk.f32.mxu0 %vm13158_vm0, %v13159_v2 }
0x3c39   :  { %11671 = vmatprep.subr.bf16.mxu0 %v13157_v1 }
0x3c3c   :  { %11673 = vmatpush3.bf16.msra.mxu0 %v11648_v53 }
0x3c3d   :  { %11680 = vmatprep.subr.bf16.mxu0 %v13157_v1 }
0x3c3f   :  { %11274 = vmatmul.mubr.msk.f32.vlgmr.msra.gmra.mrb[60].mxu0 %vm1999_vm4, %v14031_v50  ;;  %v14151_v50 = vpack.c.bf16 %v6131_v16, %v6130_v60 }
0x3c40   :  { %11682 = vmatpush3.bf16.msra.mxu0 %v11645_v49  ;;  %11295 = vmatprep.mubr.msk.f32.mxu0 %vm13158_vm0, %v13159_v2 }
0x3c41   :  { %11683 = vmatprep.subr.bf16.mxu0 %v13157_v1 }
0x3c44   :  { %11685 = vmatpush3.bf16.msra.mxu0 %v11648_v53 }
0x3c45   :  { %11692 = vmatprep.subr.bf16.mxu0 %v13157_v1 }
0x3c47   :  { %11296 = vmatmul.mubr.msk.f32.vlgmr.msra.gmra.mrb[62].mxu0 %vm1999_vm4, %v14047_v6  ;;  %v6132_v6 = vld [vmem:[#allocation18 + $0x70] sm:$0xff] }
0x3c48   :  { %11694 = vmatpush3.bf16.msra.mxu0 %v11645_v49  ;;  %11317 = vmatprep.mubr.msk.f32.mxu0 %vm13158_vm0, %v13159_v2 }
0x3c49   :  { %11695 = vmatprep.subr.bf16.mxu0 %v13157_v1 }
0x3c4c   :  { %11697 = vmatpush3.bf16.msra.mxu0 %v11648_v53 }
0x3c4d   :  { %11704 = vmatprep.subr.bf16.mxu0 %v13157_v1 }
0x3c4f   :  { %11318 = vmatmul.mubr.msk.f32.vlgmr.msra.gmra.mrb[64].mxu0 %vm1999_vm4, %v14063_v12  ;;  %v6133_v12 = vld [vmem:[#allocation18 + $0x78] sm:$0xff] }
0x3c50   :  { %11706 = vmatpush3.bf16.msra.mxu0 %v11645_v49  ;;  %11339 = vmatprep.mubr.msk.f32.mxu0 %vm13158_vm0, %v13159_v2  ;;  %v14156_v58 = vpack.c.bf16 %v6133_v12, %v6132_v6 }
0x3c51   :  { %11707 = vmatprep.subr.bf16.mxu0 %v13157_v1 }
0x3c54   :  { %11709 = vmatpush3.bf16.msra.mxu0 %v11648_v53 }
0x3c55   :  { %11716 = vmatprep.subr.bf16.mxu0 %v13157_v1 }
0x3c57   :  { %11340 = vmatmul.mubr.msk.f32.vlgmr.msra.gmra.mrb[66].mxu0 %vm1999_vm4, %v14085_v55 }
0x3c58   :  { %11718 = vmatpush3.bf16.msra.mxu0 %v11645_v49  ;;  %11361 = vmatprep.mubr.msk.f32.mxu0 %vm13158_vm0, %v13159_v2 }
0x3c59   :  { %11719 = vmatprep.subr.bf16.mxu0 %v13157_v1 }
0x3c5c   :  { %11721 = vmatpush3.bf16.msra.mxu0 %v11648_v53 }
0x3c5d   :  { %11728 = vmatprep.subr.bf16.mxu0 %v13157_v1 }
0x3c97   :  { %v5951_v56 = vpop.permute.xlu0 %5950 }
0x3c98   :  { %11197 = vmatmul.mubr.msk.f32.vlgmr.msra.gmra.mrb[56].mxu1 %vm1999_vm4, %v5951_v56  ;;  %11362 = vmatmul.mubr.msk.f32.vlgmr.msra.gmra.mrb[68].mxu0 %vm1999_vm4, %v5951_v56 }
0x3c99   :  { %11640 = vmatpush3.bf16.msra.mxu1 %v14151_v50  ;;  %11218 = vmatprep.mubr.msk.f32.mxu1 %vm13158_vm0, %v13159_v2 }
0x3c9a   :  { %11641 = vmatprep.subr.bf16.mxu1 %v13157_v1  ;;  %11730 = vmatpush3.bf16.msra.mxu0 %v11645_v49 }
0x3c9b   :  { %11731 = vmatprep.subr.bf16.mxu0 %v13157_v1  ;;  %11383 = vmatprep.mubr.msk.f32.mxu0 %vm13158_vm0, %v13159_v2 }
0x3c9d   :  { %11643 = vmatpush3.bf16.msra.mxu1 %v14156_v58 }
0x3c9e   :  { %11650 = vmatprep.subr.bf16.mxu1 %v13157_v1  ;;  %11733 = vmatpush3.bf16.msra.mxu0 %v11648_v53 }
0x3ca0   :  { %11219 = vmatmul.mubr.f32.vlgmr.msra.gmra.mrb[58].mxu1 %v13159_v2 }
0x3ca1   :  { %11652 = vmatpush3.bf16.msra.mxu1 %v14151_v50  ;;  %11240 = vmatprep.mubr.msk.f32.mxu1 %vm13158_vm0, %v13159_v2 }
0x3ca2   :  { %11653 = vmatprep.subr.bf16.mxu1 %v13157_v1 }
0x3ca5   :  { %11655 = vmatpush3.bf16.msra.mxu1 %v14156_v58 }
0x3ca6   :  { %11662 = vmatprep.subr.bf16.mxu1 %v13157_v1 }
0x3cfa   :  { %v6095_v61 = vpop.f32.mrb[54].mxu0 }
0x3cfb   :  { %v11209_v28 = vpop.f32.mrb[55].mxu0 }
0x3d02   :  { %v6271_v52 = vpop.f32.mrb[56].mxu0 }
0x3d03   :  { %v11231_v62 = vpop.f32.mrb[57].mxu0 }
0x3d0a   :  { %v6441_v63 = vpop.f32.mrb[58].mxu0 }
0x3d0b   :  { %v11253_v3 = vpop.f32.mrb[59].mxu0 }
0x3d12   :  { %v14173_v5 = vpop.f32.mrb[60].mxu0 }
0x3d13   :  { %v11275_v18 = vpop.f32.mrb[61].mxu0 }
0x3d1a   :  { %v14175_v24 = vpop.f32.mrb[62].mxu0 }
0x3d1b   :  { %v11297_v40 = vpop.f32.mrb[63].mxu0 }
0x3d22   :  { %v14177_v35 = vpop.f32.mrb[64].mxu0 }
0x3d23   :  { %v11319_v13 = vpop.f32.mrb[65].mxu0 }
0x3d2a   :  { %v14179_v7 = vpop.f32.mrb[66].mxu0 }
0x3d2b   :  { %v11341_v37 = vpop.f32.mrb[67].mxu0 }
0x3d6b   :  { %v6020_v55 = vpop.f32.mrb[56].mxu1  ;;  %v14181_v15 = vpop.f32.mrb[68].mxu0 }
0x3d6c   :  { %v14183_v14 = vadd.f32 %v6095_v61, %v6020_v55  ;;  %v11198_v19 = vpop.f32.mrb[57].mxu1  ;;  %v11363_v21 = vpop.f32.mrb[69].mxu0 }
0x3d73   :  { %v6201_v44 = vpop.f32.mrb[58].mxu1 }
0x3d74   :  { %v6272_v27 = vadd.f32 %v6271_v52, %v6201_v44  ;;  %v11220_v32 = vpop.f32.mrb[59].mxu1 }
0x3d76   :  { %v6275_v59 = vadd.f32 %v6272_v27, %v14188_v25 }
0x3d78   :  { %12737 = vtanh.f32 %v6275_v59  ;;  %v10095_v41 = vmul.f32 -1.442695, %v6275_v59 }
0x3d7a   :  { %12739 = vpow2.f32 %v10095_v41 }
0x3d82   :  { %v12738_v38 = vpop.eup %12737 }
0x3d83   :  { %6285 = vrot.lane.b32.xlu0 %v12738_v38, %s13162_s30 }
0x3d84   :  { %v12740_v46 = vpop.eup %12739 }
0x3d85   :  { %v6279_v0 = vadd.f32 1.0, %v12740_v46 }
0x3d87   :  { %12741 = vrcp.f32 %v6279_v0 }
0x3d91   :  { %v12742_v45 = vpop.eup %12741 }
0x3d92   :  { %v6283_v26 = vmul.f32 0.0, %v12742_v45 }
0x3df5   :  { %v6286_v54 = vpop.permute.xlu0 %6285 }
0x3df6   :  { %v6288_v20 = vmul.f32 %v12742_v45, %v6286_v54 }
0x3df8   :  { %6290 = vrot.lane.b32.xlu1 %v6288_v20, %s13163_s10 }
0x3e6a   :  { %v6291_v33 = vpop.permute.xlu1 %6290 }
0x3e6b   :  { %v6293_v43 = vadd.f32 %v6291_v33, %v6283_v26 }
0x3e6d   :  { %12743 = vtanh.f32 %v6293_v43 }
0x3e77   :  { %v12744_v39 = vpop.eup %12743 }
0x3e78   :  { %6296 = vrot.lane.b32.xlu0 %v12744_v39, %s13162_s30 }
0x3eea   :  { %v6297_v22 = vpop.permute.xlu0 %6296 }
0x3eeb   :  { %v6299_v23 = vmul.f32 %v12742_v45, %v6297_v22 }
0x3eed   :  { %6301 = vrot.lane.b32.xlu1 %v6299_v23, %s13163_s10 }
0x3f5f   :  { %v6302_v48 = vpop.permute.xlu1 %6301 }
0x3f60   :  { %11241 = vmatmul.mubr.msk.f32.vlgmr.msra.gmra.mrb[60].mxu1 %vm1999_vm4, %v6302_v48 }
0x3f61   :  { %11664 = vmatpush3.bf16.msra.mxu1 %v14151_v50  ;;  %11262 = vmatprep.mubr.msk.f32.mxu1 %vm13158_vm0, %v13159_v2 }
0x3f62   :  { %11665 = vmatprep.subr.bf16.mxu1 %v13157_v1 }
0x3f65   :  { %11667 = vmatpush3.bf16.msra.mxu1 %v14156_v58 }
0x3f66   :  { %11674 = vmatprep.subr.bf16.mxu1 %v13157_v1 }
0x4033   :  { %v6371_v49 = vpop.f32.mrb[60].mxu1 }
0x4034   :  { %v6442_v57 = vadd.f32 %v6441_v63, %v6371_v49  ;;  %v11242_v51 = vpop.f32.mrb[61].mxu1 }
0x4036   :  { %v6445_v42 = vadd.f32 %v6442_v57, %v14188_v25 }
0x4038   :  { %12745 = vtanh.f32 %v6445_v42  ;;  %v10098_v60 = vmul.f32 -1.442695, %v6445_v42 }
0x403a   :  { %12747 = vpow2.f32 %v10098_v60 }
0x4042   :  { %v12746_v53 = vpop.eup %12745 }
0x4043   :  { %6455 = vrot.lane.b32.xlu0 %v12746_v53, %s13162_s30 }
0x4044   :  { %v12748_v16 = vpop.eup %12747 }
0x4045   :  { %v6449_v6 = vadd.f32 1.0, %v12748_v16 }
0x4047   :  { %12749 = vrcp.f32 %v6449_v6 }
0x4051   :  { %v12750_v12 = vpop.eup %12749 }
0x4052   :  { %v6453_v28 = vmul.f32 %v12750_v12, %v6293_v43 }
0x40b5   :  { %v6456_v56 = vpop.permute.xlu0 %6455 }
0x40b6   :  { %v6458_v61 = vmul.f32 %v12750_v12, %v6456_v56 }
0x40b8   :  { %6460 = vrot.lane.b32.xlu1 %v6458_v61, %s13163_s10 }
0x412a   :  { %v6461_v52 = vpop.permute.xlu1 %6460 }
0x412b   :  { %v6463_v62 = vadd.f32 %v6461_v52, %v6453_v28 }
0x412d   :  { %12751 = vtanh.f32 %v6463_v62 }
0x4137   :  { %v12752_v63 = vpop.eup %12751 }
0x4138   :  { %6466 = vrot.lane.b32.xlu0 %v12752_v63, %s13162_s30 }
0x41aa   :  { %v6467_v3 = vpop.permute.xlu0 %6466 }
0x41ab   :  { %v6469_v18 = vmul.f32 %v12750_v12, %v6467_v3 }
0x41ad   :  { %6471 = vrot.lane.b32.xlu1 %v6469_v18, %s13163_s10 }
0x421f   :  { %v6472_v40 = vpop.permute.xlu1 %6471 }
0x4220   :  { %11263 = vmatmul.mubr.msk.f32.vlgmr.msra.gmra.mrb[62].mxu1 %vm1999_vm4, %v6472_v40 }
0x4221   :  { %11676 = vmatpush3.bf16.msra.mxu1 %v14151_v50  ;;  %11284 = vmatprep.mubr.msk.f32.mxu1 %vm13158_vm0, %v13159_v2 }
0x4222   :  { %11677 = vmatprep.subr.bf16.mxu1 %v13157_v1 }
0x4225   :  { %11679 = vmatpush3.bf16.msra.mxu1 %v14156_v58 }
0x4226   :  { %11686 = vmatprep.subr.bf16.mxu1 %v13157_v1 }
0x42f3   :  { %v6541_v13 = vpop.f32.mrb[62].mxu1 }
0x42f4   :  { %v6612_v37 = vadd.f32 %v14173_v5, %v6541_v13  ;;  %v11264_v55 = vpop.f32.mrb[63].mxu1 }
0x42f6   :  { %v6615_v19 = vadd.f32 %v6612_v37, %v14188_v25 }
0x42f8   :  { %12753 = vtanh.f32 %v6615_v19  ;;  %v10101_v44 = vmul.f32 -1.442695, %v6615_v19 }
0x42fa   :  { %12755 = vpow2.f32 %v10101_v44 }
0x4302   :  { %v12754_v21 = vpop.eup %12753 }
0x4303   :  { %6625 = vrot.lane.b32.xlu0 %v12754_v21, %s13162_s30 }
0x4304   :  { %v12756_v27 = vpop.eup %12755 }
0x4305   :  { %v6619_v32 = vadd.f32 1.0, %v12756_v27 }
0x4307   :  { %12757 = vrcp.f32 %v6619_v32 }
0x4311   :  { %v12758_v59 = vpop.eup %12757 }
0x4312   :  { %v6623_v46 = vmul.f32 %v12758_v59, %v6463_v62 }
0x4375   :  { %v6626_v38 = vpop.permute.xlu0 %6625 }
0x4376   :  { %v6628_v41 = vmul.f32 %v12758_v59, %v6626_v38 }
0x4378   :  { %6630 = vrot.lane.b32.xlu1 %v6628_v41, %s13163_s10 }
0x43ea   :  { %v6631_v0 = vpop.permute.xlu1 %6630 }
0x43eb   :  { %v6633_v5 = vadd.f32 %v6631_v0, %v6623_v46 }
0x43ed   :  { %12759 = vtanh.f32 %v6633_v5 }
0x43f7   :  { %v12760_v45 = vpop.eup %12759 }
0x43f8   :  { %6636 = vrot.lane.b32.xlu0 %v12760_v45, %s13162_s30 }
0x446a   :  { %v6637_v54 = vpop.permute.xlu0 %6636 }
0x446b   :  { %v6639_v20 = vmul.f32 %v12758_v59, %v6637_v54 }
0x446d   :  { %6641 = vrot.lane.b32.xlu1 %v6639_v20, %s13163_s10 }
0x44df   :  { %v6642_v26 = vpop.permute.xlu1 %6641 }
0x44e0   :  { %11285 = vmatmul.mubr.msk.f32.vlgmr.msra.gmra.mrb[64].mxu1 %vm1999_vm4, %v6642_v26 }
0x44e1   :  { %11688 = vmatpush3.bf16.msra.mxu1 %v14151_v50  ;;  %11306 = vmatprep.mubr.msk.f32.mxu1 %vm13158_vm0, %v13159_v2 }
0x44e2   :  { %11689 = vmatprep.subr.bf16.mxu1 %v13157_v1 }
0x44e5   :  { %11691 = vmatpush3.bf16.msra.mxu1 %v14156_v58 }
0x44e6   :  { %11698 = vmatprep.subr.bf16.mxu1 %v13157_v1 }
0x45b3   :  { %v6711_v33 = vpop.f32.mrb[64].mxu1 }
0x45b4   :  { %v6782_v43 = vadd.f32 %v14175_v24, %v6711_v33  ;;  %v11286_v39 = vpop.f32.mrb[65].mxu1 }
0x45b6   :  { %v6785_v22 = vadd.f32 %v6782_v43, %v14188_v25 }
0x45b8   :  { %12761 = vtanh.f32 %v6785_v22  ;;  %v10104_v48 = vmul.f32 -1.442695, %v6785_v22 }
0x45ba   :  { %12763 = vpow2.f32 %v10104_v48  ;;  %v12815_v48 = vld [vmem:[%s15141_s12 + $0x2] sm:$0x1] }
0x45c2   :  { %v12762_v23 = vpop.eup %12761 }
0x45c3   :  { %6795 = vrot.lane.b32.xlu0 %v12762_v23, %s13162_s30 }
0x45c4   :  { %v12764_v49 = vpop.eup %12763 }
0x45c5   :  { %v6789_v57 = vadd.f32 1.0, %v12764_v49  ;;  %v6099_v49 = vadd.f32 %v12815_v48, %v14183_v14  ;;  %v12122_v48 = vld [vmem:[#allocation20 + $0xc] ss:$16 sps:$4 sm:$0xff]  }
0x45c6   :  { %7762 = vmatprep.subr.bf16.mxu0 %v12122_v48  ;;  %v12186_v48 = vld [vmem:[%s15144_s15 + $0x68] ss:$16 sps:$4 sm:$0xff]  }
0x45c7   :  { %12765 = vrcp.f32 %v6789_v57 }
0x45d1   :  { %v12766_v51 = vpop.eup %12765 }
0x45d2   :  { %v6793_v60 = vmul.f32 %v12766_v51, %v6633_v5 }
0x4635   :  { %v6796_v42 = vpop.permute.xlu0 %6795 }
0x4636   :  { %v6798_v53 = vmul.f32 %v12766_v51, %v6796_v42  ;;  %v10093_v42 = vmul.f32 -1.442695, %v6099_v49 }
0x4638   :  { %6800 = vrot.lane.b32.xlu1 %v6798_v53, %s13163_s10 }
0x46aa   :  { %v6801_v16 = vpop.permute.xlu1 %6800 }
0x46ab   :  { %v6803_v24 = vadd.f32 %v6801_v16, %v6793_v60 }
0x46ad   :  { %12767 = vtanh.f32 %v6803_v24 }
0x46b7   :  { %v12768_v6 = vpop.eup %12767 }
0x46b8   :  { %6806 = vrot.lane.b32.xlu0 %v12768_v6, %s13162_s30 }
0x472a   :  { %v6807_v12 = vpop.permute.xlu0 %6806 }
0x472b   :  { %v6809_v56 = vmul.f32 %v12766_v51, %v6807_v12 }
0x472d   :  { %6811 = vrot.lane.b32.xlu1 %v6809_v56, %s13163_s10 }
0x479f   :  { %v6812_v61 = vpop.permute.xlu1 %6811 }
0x47a0   :  { %11307 = vmatmul.mubr.msk.f32.vlgmr.msra.gmra.mrb[66].mxu1 %vm1999_vm4, %v6812_v61 }
0x47a1   :  { %11700 = vmatpush3.bf16.msra.mxu1 %v14151_v50  ;;  %11328 = vmatprep.mubr.msk.f32.mxu1 %vm13158_vm0, %v13159_v2 }
0x47a2   :  { %11701 = vmatprep.subr.bf16.mxu1 %v13157_v1 }
0x47a5   :  { %11703 = vmatpush3.bf16.msra.mxu1 %v14156_v58 }
0x47a6   :  { %11710 = vmatprep.subr.bf16.mxu1 %v13157_v1 }
0x4873   :  { %v6881_v28 = vpop.f32.mrb[66].mxu1 }
0x4874   :  { %v6952_v52 = vadd.f32 %v14177_v35, %v6881_v28  ;;  %v11308_v62 = vpop.f32.mrb[67].mxu1 }
0x4876   :  { %v6955_v63 = vadd.f32 %v6952_v52, %v14188_v25 }
0x4878   :  { %12769 = vtanh.f32 %v6955_v63  ;;  %v10107_v18 = vmul.f32 -1.442695, %v6955_v63 }
0x487a   :  { %12771 = vpow2.f32 %v10107_v18 }
0x4882   :  { %v12770_v3 = vpop.eup %12769 }
0x4883   :  { %6965 = vrot.lane.b32.xlu0 %v12770_v3, %s13162_s30 }
0x4884   :  { %v12772_v40 = vpop.eup %12771 }
0x4885   :  { %v6959_v13 = vadd.f32 1.0, %v12772_v40 }
0x4887   :  { %12773 = vrcp.f32 %v6959_v13 }
0x4891   :  { %v12774_v37 = vpop.eup %12773 }
0x4892   :  { %v6963_v21 = vmul.f32 %v12774_v37, %v6803_v24 }
0x48f5   :  { %v6966_v55 = vpop.permute.xlu0 %6965 }
0x48f6   :  { %v6968_v19 = vmul.f32 %v12774_v37, %v6966_v55 }
0x48f8   :  { %6970 = vrot.lane.b32.xlu1 %v6968_v19, %s13163_s10 }
0x496a   :  { %v6971_v44 = vpop.permute.xlu1 %6970 }
0x496b   :  { %v6973_v35 = vadd.f32 %v6971_v44, %v6963_v21 }
0x496d   :  { %12775 = vtanh.f32 %v6973_v35 }
0x4977   :  { %v12776_v27 = vpop.eup %12775 }
0x4978   :  { %6976 = vrot.lane.b32.xlu0 %v12776_v27, %s13162_s30 }
0x49ea   :  { %v6977_v32 = vpop.permute.xlu0 %6976 }
0x49eb   :  { %v6979_v59 = vmul.f32 %v12774_v37, %v6977_v32 }
0x49ed   :  { %6981 = vrot.lane.b32.xlu1 %v6979_v59, %s13163_s10 }
0x4a5f   :  { %v6982_v38 = vpop.permute.xlu1 %6981 }
0x4a60   :  { %11329 = vmatmul.mubr.msk.f32.vlgmr.msra.gmra.mrb[68].mxu1 %vm1999_vm4, %v6982_v38 }
0x4a61   :  { %11712 = vmatpush3.bf16.msra.mxu1 %v14151_v50  ;;  %11350 = vmatprep.mubr.msk.f32.mxu1 %vm13158_vm0, %v13159_v2 }
0x4a62   :  { %11713 = vmatprep.subr.bf16.mxu1 %v13157_v1 }
0x4a65   :  { %11715 = vmatpush3.bf16.msra.mxu1 %v14156_v58 }
0x4a66   :  { %11722 = vmatprep.subr.bf16.mxu1 %v13157_v1 }
0x4b33   :  { %v7051_v41 = vpop.f32.mrb[68].mxu1 }
0x4b34   :  { %v7122_v46 = vadd.f32 %v14179_v7, %v7051_v41  ;;  %v11330_v0 = vpop.f32.mrb[69].mxu1 }
0x4b36   :  { %v7125_v5 = vadd.f32 %v7122_v46, %v14188_v25 }
0x4b38   :  { %12777 = vtanh.f32 %v7125_v5  ;;  %v10110_v54 = vmul.f32 -1.442695, %v7125_v5 }
0x4b3a   :  { %12779 = vpow2.f32 %v10110_v54 }
0x4b42   :  { %v12778_v45 = vpop.eup %12777 }
0x4b43   :  { %7135 = vrot.lane.b32.xlu0 %v12778_v45, %s13162_s30 }
0x4b44   :  { %v12780_v20 = vpop.eup %12779 }
0x4b45   :  { %v7129_v26 = vadd.f32 1.0, %v12780_v20 }
0x4b47   :  { %12781 = vrcp.f32 %v7129_v26 }
0x4b51   :  { %v12782_v33 = vpop.eup %12781 }
0x4b52   :  { %v7133_v22 = vmul.f32 %v12782_v33, %v6973_v35 }
0x4bb5   :  { %v7136_v43 = vpop.permute.xlu0 %7135 }
0x4bb6   :  { %v7138_v39 = vmul.f32 %v12782_v33, %v7136_v43 }
0x4bb8   :  { %7140 = vrot.lane.b32.xlu1 %v7138_v39, %s13163_s10 }
0x4c2a   :  { %v7141_v23 = vpop.permute.xlu1 %7140 }
0x4c2b   :  { %v7143_v7 = vadd.f32 %v7141_v23, %v7133_v22  ;;  %v12119_v23 = vld [vmem:[#allocation20 + $0x4] ss:$16 sps:$4 sm:$0xff]  }
0x4c2d   :  { %12783 = vtanh.f32 %v7143_v7 }
0x4c2e   :  { %12785 = vtanh.f32 %v6099_v49  ;;  %v12125_v49 = vld [vmem:[#allocation20 + $0x24] ss:$16 sps:$4 sm:$0xff]  }
0x4c2f   :  { %12787 = vpow2.f32 %v10093_v42  ;;  %v12126_v42 = vld [vmem:[#allocation20 + $0x28] ss:$16 sps:$4 sm:$0xff]  }
0x4c37   :  { %v12784_v57 = vpop.eup %12783 }
0x4c38   :  { %7146 = vrot.lane.b32.xlu0 %v12784_v57, %s13162_s30  ;;  %v12786_v51 = vpop.eup %12785  ;;  %v12128_v57 = vld [vmem:[#allocation20 + $0x2c] ss:$16 sps:$4 sm:$0xff]  }
0x4c39   :  { %v12788_v53 = vpop.eup %12787 }
0x4c3a   :  { %v6103_v60 = vadd.f32 1.0, %v12788_v53  ;;  %v12131_v53 = vld [vmem:[#allocation20 + $0x44] ss:$16 sps:$4 sm:$0xff]  }
0x4c3c   :  { %6109 = vrot.lane.b32.xlu0 %v12786_v51, %s13162_s30  ;;  %12789 = vrcp.f32 %v6103_v60  ;;  %v12123_v51 = vld [vmem:[#allocation20 + $0x20] ss:$16 sps:$4 sm:$0xff]   ;;  %v12134_v60 = vld [vmem:[#allocation20 + $0x4c] ss:$16 sps:$4 sm:$0xff]  }
0x4c46   :  { %v12790_v6 = vpop.eup %12789 }
0x4c47   :  { %v6107_v61 = vmul.f32 %v12790_v6, %v14101_v36 }
0x4caa   :  { %v7147_v16 = vpop.permute.xlu0 %7146 }
0x4cab   :  { %v7149_v24 = vmul.f32 %v12782_v33, %v7147_v16  ;;  %v12129_v16 = vld [vmem:[#allocation20 + $0x40] ss:$16 sps:$4 sm:$0xff]  }
0x4cad   :  { %7151 = vrot.lane.b32.xlu1 %v7149_v24, %s13163_s10  ;;  %v12137_v24 = vld [vmem:[#allocation20 + $0x64] ss:$16 sps:$4 sm:$0xff]  }
0x4cae   :  { %v6110_v12 = vpop.permute.xlu0 %6109 }
0x4caf   :  { %v6112_v14 = vmul.f32 %v12790_v6, %v6110_v12  ;;  %v12135_v12 = vld [vmem:[#allocation20 + $0x60] ss:$16 sps:$4 sm:$0xff]  }
0x4cb1   :  { %6114 = vrot.lane.b32.xlu0 %v6112_v14, %s13163_s10  ;;  %v12138_v14 = vld [vmem:[#allocation20 + $0x68] ss:$16 sps:$4 sm:$0xff]  }
0x4d1f   :  { %v7152_v56 = vpop.permute.xlu1 %7151 }
0x4d20   :  { %11351 = vmatmul.mubr.msk.f32.vlgmr.msra.gmra.mrb[70].mxu1 %vm1999_vm4, %v7152_v56  ;;  %v12143_v56 = vld [vmem:[#allocation20 + $0x84] ss:$16 sps:$4 sm:$0xff]  }
0x4d21   :  { %11724 = vmatpush3.bf16.msra.mxu1 %v14151_v50  ;;  %11372 = vmatprep.mubr.msk.f32.mxu1 %vm13158_vm0, %v13159_v2 }
0x4d22   :  { %11725 = vmatprep.subr.bf16.mxu1 %v13157_v1 }
0x4d23   :  { %v6115_v28 = vpop.permute.xlu0 %6114 }
0x4d24   :  { %v6117_v52 = vadd.f32 %v6115_v28, %v6107_v61  ;;  %v12146_v61 = vld [vmem:[#allocation20 + $0x8c] ss:$16 sps:$4 sm:$0xff]   ;;  %v12141_v28 = vld [vmem:[#allocation20 + $0x80] ss:$16 sps:$4 sm:$0xff]  }
0x4d25   :  { %11727 = vmatpush3.bf16.msra.mxu1 %v14156_v58 }
0x4d26   :  { %12791 = vtanh.f32 %v6117_v52  ;;  %7721 = vmatprep.subr.bf16.mxu1 %v12119_v23  ;;  %v12144_v52 = vld [vmem:[#allocation20 + $0x88] ss:$16 sps:$4 sm:$0xff]   ;;  %v12188_v23 = vld [vmem:[%s15144_s15 + $0x6c] ss:$16 sps:$4 sm:$0xff]  }
0x4d30   :  { %v12792_v62 = vpop.eup %12791 }
0x4d31   :  { %6120 = vrot.lane.b32.xlu0 %v12792_v62, %s13162_s30  ;;  %v12149_v62 = vld [vmem:[#allocation20 + $0xa4] ss:$16 sps:$4 sm:$0xff]  }
0x4da3   :  { %v6121_v44 = vpop.permute.xlu0 %6120 }
0x4da4   :  { %v14281_v35 = vmul.f32 %v12790_v6, %v6121_v44  ;;  %v12140_v6 = vld [vmem:[#allocation20 + $0x6c] ss:$16 sps:$4 sm:$0xff]   ;;  %v12170_v44 = vld [vmem:[%s15144_s15 + $0xc] ss:$16 sps:$4 sm:$0xff]  }
0x4df3   :  { %v7221_v63 = vpop.f32.mrb[70].mxu1 }
0x4df4   :  { %v7292_v3 = vadd.f32 %v14181_v15, %v7221_v63  ;;  %v11352_v18 = vpop.f32.mrb[71].mxu1  ;;  %v12152_v63 = vld [vmem:[#allocation20 + $0xac] ss:$16 sps:$4 sm:$0xff]  }
0x4df5   :  { %v12150_v18 = vld [vmem:[#allocation20 + $0xa8] ss:$16 sps:$4 sm:$0xff]  }
0x4df6   :  { %v7295_v50 = vadd.f32 %v7292_v3, %v14188_v25  ;;  %v12147_v3 = vld [vmem:[#allocation20 + $0xa0] ss:$16 sps:$4 sm:$0xff]  }
0x4df8   :  { %12793 = vtanh.f32 %v7295_v50  ;;  %v10113_v36 = vmul.f32 -1.442695, %v7295_v50 }
0x4dfa   :  { %12795 = vpow2.f32 %v10113_v36  ;;  %v12158_v36 = vld [vmem:[#allocation20 + $0xcc] ss:$16 sps:$4 sm:$0xff]  }
0x4e02   :  { %v12794_v2 = vpop.eup %12793 }
0x4e03   :  { %7305 = vrot.lane.b32.xlu1 %v12794_v2, %s13162_s30  ;;  %v12155_v2 = vld [vmem:[#allocation20 + $0xc4] ss:$16 sps:$4 sm:$0xff]  }
0x4e04   :  { %v12796_v1 = vpop.eup %12795 }
0x4e05   :  { %v7299_v40 = vadd.f32 1.0, %v12796_v1 }
0x4e07   :  { %12797 = vrcp.f32 %v7299_v40  ;;  %v12153_v40 = vld [vmem:[#allocation20 + $0xc0] ss:$16 sps:$4 sm:$0xff]  }
0x4e11   :  { %v12798_v58 = vpop.eup %12797 }
0x4e12   :  { %v7303_v55 = vmul.f32 %v12798_v58, %v7143_v7  ;;  %v12120_v7 = vld [vmem:[#allocation20 + $0x8] ss:$16 sps:$4 sm:$0xff]  }
0x4e75   :  { %v7306_v13 = vpop.permute.xlu1 %7305 }
0x4e76   :  { %v7308_v37 = vmul.f32 %v12798_v58, %v7306_v13 }
0x4e78   :  { %7310 = vrot.lane.b32.xlu1 %v7308_v37, %s13163_s10  ;;  %v12161_v37 = vld [vmem:[#allocation20 + $0xe4] ss:$16 sps:$4 sm:$0xff]  }
0x4eea   :  { %v7311_v19 = vpop.permute.xlu1 %7310 }
0x4eeb   :  { %v14277_v15 = vadd.f32 %v7311_v19, %v7303_v55  ;;  %v12164_v55 = vld [vmem:[#allocation20 + $0xec] ss:$16 sps:$4 sm:$0xff]   ;;  %v12159_v19 = vld [vmem:[#allocation20 + $0xe0] ss:$16 sps:$4 sm:$0xff]  }
0x4eed   :  { %12799 = vtanh.f32 %v14277_v15 }
0x4ef7   :  { %v12800_v21 = vpop.eup %12799 }
0x4ef8   :  { %7316 = vrot.lane.b32.xlu1 %v12800_v21, %s13162_s30  ;;  %v12162_v21 = vld [vmem:[#allocation20 + $0xe8] ss:$16 sps:$4 sm:$0xff]  }
0x4efc   :  { %7396 = vrot.lane.b32.xlu1 %v14281_v35, %s13163_s10 }
0x4f6a   :  { %v7317_v27 = vpop.permute.xlu1 %7316 }
0x4f6b   :  { %v7319_v32 = vmul.f32 %v12798_v58, %v7317_v27  ;;  %v12156_v58 = vld [vmem:[#allocation20 + $0xc8] ss:$16 sps:$4 sm:$0xff]  }
0x4f6d   :  { %7321 = vrot.lane.b32.xlu0 %v7319_v32, %s13163_s10 }
0x4f6e   :  { %v7397_v59 = vpop.permute.xlu1 %7396 }
0x4f6f   :  { %11384 = vmatmul.mubr.msk.f32.vlgmr.msra.gmra.mrb[70].mxu0 %vm1999_vm4, %v7397_v59 }
0x4f70   :  { %7794 = vmatprep.mubr.bf16.mxu0 %v13160_v34  ;;  %7763 = vmatpush1.bf16.msra.mxu0 %v12120_v7  ;;  %v12183_v7 = vld [vmem:[%s15144_s15 + $0x60] ss:$16 sps:$4 sm:$0xff]  }
0x4f71   :  { %7764 = vmatprep.subr.bf16.mxu0 %v12128_v57  ;;  %v12194_v57 = vld [vmem:[%s15144_s15 + $0x8c] ss:$16 sps:$4 sm:$0xff]  }
0x4f74   :  { %7765 = vmatpush1.bf16.msra.mxu0 %v12126_v42  ;;  %v12192_v42 = vld [vmem:[%s15144_s15 + $0x88] ss:$16 sps:$4 sm:$0xff]  }
0x4f75   :  { %7766 = vmatprep.subr.bf16.mxu0 %v12134_v60  ;;  %v12200_v60 = vld [vmem:[%s15144_s15 + $0xac] ss:$16 sps:$4 sm:$0xff]  }
0x4fdf   :  { %v7322_v38 = vpop.permute.xlu0 %7321 }
0x4fe0   :  { %11373 = vmatmul.mubr.msk.f32.vlgmr.msra.gmra.mrb[72].mxu1 %vm1999_vm4, %v7322_v38 }
0x4fe1   :  { %7753 = vmatprep.mubr.bf16.mxu1 %v13160_v34 }
0x5042   :  { %v7466_v41 = vpop.f32.mrb[70].mxu0 }
0x5043   :  { %v11385_v46 = vpop.f32.mrb[71].mxu0 }
0x50b3   :  { %v7391_v0 = vpop.f32.mrb[72].mxu1 }
0x50b4   :  { %v7467_v5 = vadd.f32 %v7466_v41, %v7391_v0  ;;  %v11374_v45 = vpop.f32.mrb[73].mxu1 }
0x50b5   :  { %v12165_v45 = vld [vmem:[%s15144_s15] ss:$16 sps:$4 sm:$0xff]  }
0x50b6   :  { %v7470_v54 = vadd.f32 %v7467_v5, %v14188_v25  ;;  %v12117_v25 = vld [vmem:[#allocation20] ss:$16 sps:$4 sm:$0xff]  }
0x50b7   :  { %7722 = vmatpush1.bf16.msra.mxu1 %v12117_v25  ;;  %v12185_v25 = vld [vmem:[%s15144_s15 + $0x64] ss:$16 sps:$4 sm:$0xff]  }
0x50b8   :  { %12801 = vtanh.f32 %v7470_v54  ;;  %v10116_v26 = vmul.f32 -1.442695, %v7470_v54  ;;  %7723 = vmatprep.subr.bf16.mxu1 %v12125_v49  ;;  %v12191_v49 = vld [vmem:[%s15144_s15 + $0x84] ss:$16 sps:$4 sm:$0xff]  }
0x50ba   :  { %12803 = vpow2.f32 %v10116_v26  ;;  %v12171_v26 = vld [vmem:[%s15144_s15 + $0x20] ss:$16 sps:$4 sm:$0xff]  }
0x50bb   :  { %7724 = vmatpush1.bf16.msra.mxu1 %v12123_v51  ;;  %v12189_v51 = vld [vmem:[%s15144_s15 + $0x80] ss:$16 sps:$4 sm:$0xff]  }
0x50bc   :  { %7725 = vmatprep.subr.bf16.mxu1 %v12131_v53  ;;  %v12197_v53 = vld [vmem:[%s15144_s15 + $0xa4] ss:$16 sps:$4 sm:$0xff]  }
0x50bf   :  { %7726 = vmatpush1.bf16.msra.mxu1 %v12129_v16  ;;  %v12195_v16 = vld [vmem:[%s15144_s15 + $0xa0] ss:$16 sps:$4 sm:$0xff]  }
0x50c0   :  { %7727 = vmatprep.subr.bf16.mxu1 %v12137_v24  ;;  %v12203_v24 = vld [vmem:[%s15144_s15 + $0xc4] ss:$16 sps:$4 sm:$0xff]  }
0x50c2   :  { %v12802_v20 = vpop.eup %12801 }
0x50c3   :  { %7480 = vrot.lane.b32.xlu0 %v12802_v20, %s13162_s30  ;;  %7728 = vmatpush1.bf16.msra.mxu1 %v12135_v12  ;;  %v12173_v20 = vld [vmem:[%s15144_s15 + $0x24] ss:$16 sps:$4 sm:$0xff]   ;;  %v12201_v12 = vld [vmem:[%s15144_s15 + $0xc0] ss:$16 sps:$4 sm:$0xff]  }
0x50c4   :  { %v12804_v33 = vpop.eup %12803  ;;  %7729 = vmatprep.subr.bf16.mxu1 %v12143_v56  ;;  %v12209_v56 = vld [vmem:[%s15144_s15 + $0xe4] ss:$16 sps:$4 sm:$0xff]  }
0x50c5   :  { %v7474_v43 = vadd.f32 1.0, %v12804_v33  ;;  %v12174_v33 = vld [vmem:[%s15144_s15 + $0x28] ss:$16 sps:$4 sm:$0xff]  }
0x50c7   :  { %12805 = vrcp.f32 %v7474_v43  ;;  %7730 = vmatpush1.bf16.msra.mxu1 %v12141_v28  ;;  %v12179_v43 = vld [vmem:[%s15144_s15 + $0x44] ss:$16 sps:$4 sm:$0xff]   ;;  %v12207_v28 = vld [vmem:[%s15144_s15 + $0xe0] ss:$16 sps:$4 sm:$0xff]  }
0x50c8   :  { %7731 = vmatprep.subr.bf16.mxu1 %v12149_v62  ;;  %v12215_v62 = vld [vmem:[%s15144_s15 + $0x104] ss:$16 sps:$4 sm:$0xff]  }
0x50cb   :  { %7732 = vmatpush1.bf16.msra.mxu1 %v12147_v3  ;;  %v12213_v3 = vld [vmem:[%s15144_s15 + $0x100] ss:$16 sps:$4 sm:$0xff]  }
0x50cc   :  { %7733 = vmatprep.subr.bf16.mxu1 %v12155_v2  ;;  %v12224_v2 = vld [vmem:[%s15144_s15 + $0x12c] ss:$16 sps:$4 sm:$0xff]  }
0x50cf   :  { %7734 = vmatpush1.bf16.msra.mxu1 %v12153_v40  ;;  %v12227_v40 = vld [vmem:[%s15144_s15 + $0x144] ss:$16 sps:$4 sm:$0xff]  }
0x50d0   :  { %7735 = vmatprep.subr.bf16.mxu1 %v12161_v37  ;;  %v12228_v37 = vld [vmem:[%s15144_s15 + $0x148] ss:$16 sps:$4 sm:$0xff]  }
0x50d1   :  { %v14292_v39 = vpop.eup %12805 }
0x50d2   :  { %v7478_v50 = vmul.f32 %v14292_v39, %v14277_v15  ;;  %v12167_v15 = vld [vmem:[%s15144_s15 + $0x4] ss:$16 sps:$4 sm:$0xff]  }
0x50d3   :  { %7736 = vmatpush1.bf16.msra.mxu1 %v12159_v19  ;;  %v12236_v19 = vld [vmem:[%s15144_s15 + $0x16c] ss:$16 sps:$4 sm:$0xff]  }
0x50d4   :  { %8631 = vmatprep.subr.bf16.mxu1 %v12167_v15  ;;  %v12234_v15 = vld [vmem:[%s15144_s15 + $0x168] ss:$16 sps:$4 sm:$0xff]  }
0x5135   :  { %v7481_v22 = vpop.permute.xlu0 %7480 }
0x5136   :  { %v7483_v34 = vmul.f32 %v14292_v39, %v7481_v22  ;;  %v12177_v22 = vld [vmem:[%s15144_s15 + $0x40] ss:$16 sps:$4 sm:$0xff]  }
0x5138   :  { %7485 = vrot.lane.b32.xlu1 %v7483_v34, %s13163_s10  ;;  %v12180_v34 = vld [vmem:[%s15144_s15 + $0x48] ss:$16 sps:$4 sm:$0xff]  }
0x513c   :  { %7496 = vrot.lane.b32.xlu1 %v14105_v47, %s13162_s30  ;;  %v12132_v47 = vld [vmem:[#allocation20 + $0x48] ss:$16 sps:$4 sm:$0xff]  }
0x513d   :  { %7767 = vmatpush1.bf16.msra.mxu0 %v12132_v47  ;;  %v12198_v47 = vld [vmem:[%s15144_s15 + $0xa8] ss:$16 sps:$4 sm:$0xff]  }
0x513e   :  { %7768 = vmatprep.subr.bf16.mxu0 %v12140_v6  ;;  %v12206_v6 = vld [vmem:[%s15144_s15 + $0xcc] ss:$16 sps:$4 sm:$0xff]  }
0x5141   :  { %7769 = vmatpush1.bf16.msra.mxu0 %v12138_v14  ;;  %v12204_v14 = vld [vmem:[%s15144_s15 + $0xc8] ss:$16 sps:$4 sm:$0xff]  }
0x5142   :  { %7770 = vmatprep.subr.bf16.mxu0 %v12146_v61  ;;  %v12212_v61 = vld [vmem:[%s15144_s15 + $0xec] ss:$16 sps:$4 sm:$0xff]  }
0x5145   :  { %7771 = vmatpush1.bf16.msra.mxu0 %v12144_v52  ;;  %v12210_v52 = vld [vmem:[%s15144_s15 + $0xe8] ss:$16 sps:$4 sm:$0xff]  }
0x5146   :  { %7772 = vmatprep.subr.bf16.mxu0 %v12152_v63  ;;  %v12218_v63 = vld [vmem:[%s15144_s15 + $0x10c] ss:$16 sps:$4 sm:$0xff]  }
0x5149   :  { %7773 = vmatpush1.bf16.msra.mxu0 %v12150_v18  ;;  %v12216_v18 = vld [vmem:[%s15144_s15 + $0x108] ss:$16 sps:$4 sm:$0xff]  }
0x514a   :  { %7774 = vmatprep.subr.bf16.mxu0 %v12158_v36  ;;  %v12219_v36 = vld [vmem:[%s15144_s15 + $0x120] ss:$16 sps:$4 sm:$0xff]  }
0x514d   :  { %7775 = vmatpush1.bf16.msra.mxu0 %v12156_v58  ;;  %v12230_v58 = vld [vmem:[%s15144_s15 + $0x14c] ss:$16 sps:$4 sm:$0xff]  }
0x514e   :  { %7776 = vmatprep.subr.bf16.mxu0 %v12164_v55  ;;  %v12233_v55 = vld [vmem:[%s15144_s15 + $0x164] ss:$16 sps:$4 sm:$0xff]  }
0x5151   :  { %7777 = vmatpush1.bf16.msra.mxu0 %v12162_v21  ;;  %v12231_v21 = vld [vmem:[%s15144_s15 + $0x160] ss:$16 sps:$4 sm:$0xff]  }
0x5152   :  { %8713 = vmatprep.subr.bf16.mxu0 %v12170_v44  ;;  %v12239_v44 = vld [vmem:[%s15144_s15 + $0x184] ss:$16 sps:$4 sm:$0xff]  }
0x51aa   :  { %v7486_v1 = vpop.permute.xlu1 %7485 }
0x51ab   :  { %v7488_v13 = vadd.f32 %v7486_v1, %v7478_v50  ;;  %v12221_v50 = vld [vmem:[%s15144_s15 + $0x124] ss:$16 sps:$4 sm:$0xff]   ;;  %v12222_v1 = vld [vmem:[%s15144_s15 + $0x128] ss:$16 sps:$4 sm:$0xff]  }
0x51ad   :  { %12807 = vtanh.f32 %v7488_v13  ;;  %v12225_v13 = vld [vmem:[%s15144_s15 + $0x140] ss:$16 sps:$4 sm:$0xff]  }
0x51ae   :  { %v7497_v59 = vpop.permute.xlu1 %7496 }
0x51af   :  { %v7502_v38 = vsel %vm1999_vm4, %v13911_v4, %v7497_v59  ;;  %v12176_v4 = vld [vmem:[%s15144_s15 + $0x2c] ss:$16 sps:$4 sm:$0xff]   ;;  %v12240_v59 = vld [vmem:[%s15144_s15 + $0x188] ss:$16 sps:$4 sm:$0xff]  }
0x51b7   :  { %v12808_v27 = vpop.eup %12807 }
0x51b8   :  { %7491 = vrot.lane.b32.xlu0 %v12808_v27, %s13162_s30  ;;  %v12242_v27 = vld [vmem:[%s15144_s15 + $0x18c] ss:$16 sps:$4 sm:$0xff]  }
0x51bc   :  { %7499 = vrot.lane.b32.xlu0 %v14281_v35, %s13164_s9  ;;  %v12168_v35 = vld [vmem:[%s15144_s15 + $0x8] ss:$16 sps:$4 sm:$0xff]  }
0x522a   :  { %v7492_v32 = vpop.permute.xlu0 %7491 }
0x522b   :  { %v7494_v41 = vmul.f32 %v14292_v39, %v7492_v32  ;;  %v12182_v39 = vld [vmem:[%s15144_s15 + $0x4c] ss:$16 sps:$4 sm:$0xff]   ;;  %v12237_v32 = vld [vmem:[%s15144_s15 + $0x180] ss:$16 sps:$4 sm:$0xff]  }
0x522e   :  { %v7500_v46 = vpop.permute.xlu0 %7499 }
0x522f   :  { %v7503_v0 = vsel %vm244_vm1, %v7502_v38, %v7500_v46  ;;  %v12245_v38 = vld [vmem:[%s15144_s15 + $0x1a4] ss:$16 sps:$4 sm:$0xff]   ;;  %v12243_v46 = vld [vmem:[%s15144_s15 + $0x1a0] ss:$16 sps:$4 sm:$0xff]  }
0x5230   :  { %v7505_v5 = vsel %vm7504_vm5, %v7503_v0, %v7494_v41  ;;  %v12248_v41 = vld [vmem:[%s15144_s15 + $0x1ac] ss:$16 sps:$4 sm:$0xff]   ;;  %v12246_v0 = vld [vmem:[%s15144_s15 + $0x1a8] ss:$16 sps:$4 sm:$0xff]  }
0x5231   :  { %v7506_v54 = vpack.c.bf16 %v7505_v5, %v7505_v5  ;;  %v12251_v5 = vld [vmem:[%s15144_s15 + $0x1c4] ss:$16 sps:$4 sm:$0xff]  }
0x5233   :  { %7754 = vmatmul.mubr.bf16.vlgmr.msra.gmra.mrb[76].mxu1 %v7506_v54  ;;  %7795 = vmatmul.mubr.bf16.vlgmr.msra.gmra.mrb[72].mxu0 %v7506_v54  ;;  %v12252_v54 = vld [vmem:[%s15144_s15 + $0x1c8] ss:$16 sps:$4 sm:$0xff]  }
0x5234   :  { %8632 = vmatpush1.bf16.msra.mxu1 %v12165_v45  ;;  %8714 = vmatpush1.bf16.msra.mxu0 %v12168_v35  ;;  %v12254_v45 = vld [vmem:[%s15144_s15 + $0x1cc] ss:$16 sps:$4 sm:$0xff]   ;;  %v12249_v35 = vld [vmem:[%s15144_s15 + $0x1c0] ss:$16 sps:$4 sm:$0xff]  }
0x5235   :  { %8633 = vmatprep.subr.bf16.mxu1 %v12173_v20  ;;  %8715 = vmatprep.subr.bf16.mxu0 %v12176_v4  ;;  %v12257_v20 = vld [vmem:[%s15144_s15 + $0x1e4] ss:$16 sps:$4 sm:$0xff]   ;;  %v12260_v4 = vld [vmem:[%s15144_s15 + $0x1ec] ss:$16 sps:$4 sm:$0xff]  }
0x5238   :  { %8634 = vmatpush1.bf16.msra.mxu1 %v12171_v26  ;;  %8716 = vmatpush1.bf16.msra.mxu0 %v12174_v33  ;;  %v12255_v26 = vld [vmem:[%s15144_s15 + $0x1e0] ss:$16 sps:$4 sm:$0xff]   ;;  %v12258_v33 = vld [vmem:[%s15144_s15 + $0x1e8] ss:$16 sps:$4 sm:$0xff]  }
0x5239   :  { %8635 = vmatprep.subr.bf16.mxu1 %v12179_v43  ;;  %8717 = vmatprep.subr.bf16.mxu0 %v12182_v39  ;;  %v12263_v43 = vld [vmem:[%s15144_s15 + $0x204] ss:$16 sps:$4 sm:$0xff]   ;;  %v12266_v39 = vld [vmem:[%s15144_s15 + $0x20c] ss:$16 sps:$4 sm:$0xff]  }
0x523c   :  { %8636 = vmatpush1.bf16.msra.mxu1 %v12177_v22  ;;  %8718 = vmatpush1.bf16.msra.mxu0 %v12180_v34  ;;  %v7539_v22 = vld [vmem:[#allocation21] sm:$0xf] }
0x523d   :  { %8637 = vmatprep.subr.bf16.mxu1 %v12185_v25  ;;  %8719 = vmatprep.subr.bf16.mxu0 %v12188_v23  ;;  %v7704_v34 = vrot.slane %v7539_v22, %v13555_v29  ;;  %v7712_v25 = vrot.slane %v7539_v22, %v13545_v17  ;;  %v7708_v23 = vrot.slane %v7539_v22, %v13558_v30 }
0x5240   :  { %8638 = vmatpush1.bf16.msra.mxu1 %v12183_v7  ;;  %8720 = vmatpush1.bf16.msra.mxu0 %v12186_v48  ;;  %v7716_v7 = vrot.slane %v7539_v22, %v13561_v31  ;;  %v12309_v22 = vld [vmem:[%s15144_s15 + $0x300] ss:$16 sps:$4 sm:$0xff]  }
0x5241   :  { %8639 = vmatprep.subr.bf16.mxu1 %v12191_v49  ;;  %8721 = vmatprep.subr.bf16.mxu0 %v12194_v57 }
0x5244   :  { %8640 = vmatpush1.bf16.msra.mxu1 %v12189_v51  ;;  %8722 = vmatpush1.bf16.msra.mxu0 %v12192_v42 }
0x5245   :  { %8641 = vmatprep.subr.bf16.mxu1 %v12197_v53  ;;  %8723 = vmatprep.subr.bf16.mxu0 %v12200_v60 }
0x5248   :  { %8642 = vmatpush1.bf16.msra.mxu1 %v12195_v16  ;;  %8724 = vmatpush1.bf16.msra.mxu0 %v12198_v47 }
0x5249   :  { %8643 = vmatprep.subr.bf16.mxu1 %v12203_v24  ;;  %8725 = vmatprep.subr.bf16.mxu0 %v12206_v6 }
0x524c   :  { %8644 = vmatpush1.bf16.msra.mxu1 %v12201_v12  ;;  %8726 = vmatpush1.bf16.msra.mxu0 %v12204_v14 }
0x524d   :  { %8645 = vmatprep.subr.bf16.mxu1 %v12209_v56  ;;  %8727 = vmatprep.subr.bf16.mxu0 %v12212_v61 }
0x5250   :  { %8646 = vmatpush1.bf16.msra.mxu1 %v12207_v28  ;;  %8728 = vmatpush1.bf16.msra.mxu0 %v12210_v52 }
0x5251   :  { %8647 = vmatprep.subr.bf16.mxu1 %v12215_v62  ;;  %8729 = vmatprep.subr.bf16.mxu0 %v12218_v63 }
0x5254   :  { %8648 = vmatpush1.bf16.msra.mxu1 %v12213_v3  ;;  %8730 = vmatpush1.bf16.msra.mxu0 %v12216_v18 }
0x5255   :  { %8649 = vmatprep.subr.bf16.mxu1 %v12221_v50  ;;  %8731 = vmatprep.subr.bf16.mxu0 %v12224_v2  ;;  %v12261_v50 = vld [vmem:[%s15144_s15 + $0x200] ss:$16 sps:$4 sm:$0xff]   ;;  %v12264_v2 = vld [vmem:[%s15144_s15 + $0x208] ss:$16 sps:$4 sm:$0xff]  }
0x5258   :  { %8650 = vmatpush1.bf16.msra.mxu1 %v12219_v36  ;;  %8732 = vmatpush1.bf16.msra.mxu0 %v12222_v1  ;;  %v12270_v1 = vld [vmem:[%s15144_s15 + $0x228] ss:$16 sps:$4 sm:$0xff]  }
0x5259   :  { %8651 = vmatprep.subr.bf16.mxu1 %v12227_v40  ;;  %8733 = vmatprep.subr.bf16.mxu0 %v12230_v58  ;;  %v12275_v40 = vld [vmem:[%s15144_s15 + $0x244] ss:$16 sps:$4 sm:$0xff]   ;;  %v12278_v58 = vld [vmem:[%s15144_s15 + $0x24c] ss:$16 sps:$4 sm:$0xff]  }
0x525c   :  { %8652 = vmatpush1.bf16.msra.mxu1 %v12225_v13  ;;  %8734 = vmatpush1.bf16.msra.mxu0 %v12228_v37  ;;  %v12273_v13 = vld [vmem:[%s15144_s15 + $0x240] ss:$16 sps:$4 sm:$0xff]   ;;  %v12276_v37 = vld [vmem:[%s15144_s15 + $0x248] ss:$16 sps:$4 sm:$0xff]  }
0x525d   :  { %8653 = vmatprep.subr.bf16.mxu1 %v12233_v55  ;;  %8735 = vmatprep.subr.bf16.mxu0 %v12236_v19  ;;  %v12281_v55 = vld [vmem:[%s15144_s15 + $0x264] ss:$16 sps:$4 sm:$0xff]   ;;  %v12284_v19 = vld [vmem:[%s15144_s15 + $0x26c] ss:$16 sps:$4 sm:$0xff]  }
0x5260   :  { %8654 = vmatpush1.bf16.msra.mxu1 %v12231_v21  ;;  %8736 = vmatpush1.bf16.msra.mxu0 %v12234_v15  ;;  %v12279_v21 = vld [vmem:[%s15144_s15 + $0x260] ss:$16 sps:$4 sm:$0xff]   ;;  %v12282_v15 = vld [vmem:[%s15144_s15 + $0x268] ss:$16 sps:$4 sm:$0xff]  }
0x5261   :  { %8655 = vmatprep.subr.bf16.mxu1 %v12239_v44  ;;  %8737 = vmatprep.subr.bf16.mxu0 %v12242_v27  ;;  %v12287_v44 = vld [vmem:[%s15144_s15 + $0x284] ss:$16 sps:$4 sm:$0xff]   ;;  %v12290_v27 = vld [vmem:[%s15144_s15 + $0x28c] ss:$16 sps:$4 sm:$0xff]  }
0x5264   :  { %8656 = vmatpush1.bf16.msra.mxu1 %v12237_v32  ;;  %8738 = vmatpush1.bf16.msra.mxu0 %v12240_v59  ;;  %v12285_v32 = vld [vmem:[%s15144_s15 + $0x280] ss:$16 sps:$4 sm:$0xff]   ;;  %v12288_v59 = vld [vmem:[%s15144_s15 + $0x288] ss:$16 sps:$4 sm:$0xff]  }
0x5265   :  { %8657 = vmatprep.subr.bf16.mxu1 %v12245_v38  ;;  %8739 = vmatprep.subr.bf16.mxu0 %v12248_v41  ;;  %v12293_v38 = vld [vmem:[%s15144_s15 + $0x2a4] ss:$16 sps:$4 sm:$0xff]   ;;  %v12296_v41 = vld [vmem:[%s15144_s15 + $0x2ac] ss:$16 sps:$4 sm:$0xff]  }
0x5268   :  { %8658 = vmatpush1.bf16.msra.mxu1 %v12243_v46  ;;  %8740 = vmatpush1.bf16.msra.mxu0 %v12246_v0  ;;  %v12291_v46 = vld [vmem:[%s15144_s15 + $0x2a0] ss:$16 sps:$4 sm:$0xff]   ;;  %v12294_v0 = vld [vmem:[%s15144_s15 + $0x2a8] ss:$16 sps:$4 sm:$0xff]  }
0x5269   :  { %8659 = vmatprep.subr.bf16.mxu1 %v12251_v5  ;;  %8741 = vmatprep.subr.bf16.mxu0 %v12254_v45  ;;  %v12299_v5 = vld [vmem:[%s15144_s15 + $0x2c4] ss:$16 sps:$4 sm:$0xff]   ;;  %v12302_v45 = vld [vmem:[%s15144_s15 + $0x2cc] ss:$16 sps:$4 sm:$0xff]  }
0x526c   :  { %8660 = vmatpush1.bf16.msra.mxu1 %v12249_v35  ;;  %8742 = vmatpush1.bf16.msra.mxu0 %v12252_v54  ;;  %v12297_v35 = vld [vmem:[%s15144_s15 + $0x2c0] ss:$16 sps:$4 sm:$0xff]   ;;  %v12300_v54 = vld [vmem:[%s15144_s15 + $0x2c8] ss:$16 sps:$4 sm:$0xff]  }
0x526d   :  { %8661 = vmatprep.subr.bf16.mxu1 %v12257_v20  ;;  %8743 = vmatprep.subr.bf16.mxu0 %v12260_v4  ;;  %v12305_v20 = vld [vmem:[%s15144_s15 + $0x2e4] ss:$16 sps:$4 sm:$0xff]   ;;  %v12308_v4 = vld [vmem:[%s15144_s15 + $0x2ec] ss:$16 sps:$4 sm:$0xff]  }
0x5270   :  { %8662 = vmatpush1.bf16.msra.mxu1 %v12255_v26  ;;  %8744 = vmatpush1.bf16.msra.mxu0 %v12258_v33  ;;  %v12303_v26 = vld [vmem:[%s15144_s15 + $0x2e0] ss:$16 sps:$4 sm:$0xff]   ;;  %v12306_v33 = vld [vmem:[%s15144_s15 + $0x2e8] ss:$16 sps:$4 sm:$0xff]  }
0x5271   :  { %8672 = vmatprep.subr.bf16.mxu1 %v12263_v43  ;;  %8754 = vmatprep.subr.bf16.mxu0 %v12266_v39  ;;  %v12311_v43 = vld [vmem:[%s15144_s15 + $0x304] ss:$16 sps:$4 sm:$0xff]   ;;  %v12314_v39 = vld [vmem:[%s15144_s15 + $0x30c] ss:$16 sps:$4 sm:$0xff]  }
0x5306   :  { %v7755_v48 = vpop.f32.mrb[76].mxu1  ;;  %v7796_v49 = vpop.f32.mrb[72].mxu0 }
0x5307   :  { %v7756_v57 = vadd.f32 %v7755_v48, %v7704_v34  ;;  %v7797_v51 = vadd.f32 %v7796_v49, %v7712_v25  ;;  %v7757_v42 = vpop.f32.mrb[77].mxu1  ;;  %v7798_v53 = vpop.f32.mrb[73].mxu0  ;;  %v12312_v34 = vld [vmem:[%s15144_s15 + $0x308] ss:$16 sps:$4 sm:$0xff]   ;;  %v12317_v25 = vld [vmem:[%s15144_s15 + $0x324] ss:$16 sps:$4 sm:$0xff]  }
0x5308   :  { %v7758_v60 = vadd.f32 %v7757_v42, %v7708_v23  ;;  %v7799_v16 = vadd.f32 %v7798_v53, %v7716_v7  ;;  %v7759_v47 = vpop.f32.mrb[78].mxu1  ;;  %v7800_v24 = vpop.f32.mrb[74].mxu0  ;;  %v12320_v23 = vld [vmem:[%s15144_s15 + $0x32c] ss:$16 sps:$4 sm:$0xff]   ;;  %v12315_v7 = vld [vmem:[%s15144_s15 + $0x320] ss:$16 sps:$4 sm:$0xff]  }
0x5309   :  { %v7819_v6 = vrot.slane %v7756_v57, 5  ;;  %v7821_v12 = vrot.slane %v7797_v51, 5  ;;  %v7760_v14 = vpop.f32.mrb[79].mxu1  ;;  %v7801_v56 = vpop.f32.mrb[75].mxu0  ;;  %v12318_v48 = vld [vmem:[%s15144_s15 + $0x328] ss:$16 sps:$4 sm:$0xff]  }
0x530a   :  { %v7820_v61 = vrot.slane %v7758_v60, 5  ;;  %v7822_v28 = vrot.slane %v7799_v16, 5  ;;  %v12323_v49 = vld [vmem:[%s15144_s15 + $0x344] ss:$16 sps:$4 sm:$0xff]   ;;  %v12326_v57 = vld [vmem:[%s15144_s15 + $0x34c] ss:$16 sps:$4 sm:$0xff]  }
0x530b   :  { %v7833_v52 = vsel %vm7832_vm6, %v13570_v8, %v7819_v6  ;;  %v14510_v62 = vsel %vm7832_vm6, %v13572_v9, %v7821_v12  ;;  %v12269_v8 = vld [vmem:[%s15144_s15 + $0x224] ss:$16 sps:$4 sm:$0xff]   ;;  %v12272_v9 = vld [vmem:[%s15144_s15 + $0x22c] ss:$16 sps:$4 sm:$0xff]   ;;  %v12321_v51 = vld [vmem:[%s15144_s15 + $0x340] ss:$16 sps:$4 sm:$0xff]  }
0x530c   :  { %v7834_v63 = vsel %vm7832_vm6, %v13574_v10, %v7820_v61  ;;  %v7836_v3 = vsel %vm7832_vm6, %v13576_v11, %v7822_v28  ;;  %v7837_v36 = vpack.c.bf16 %v7833_v52, %v7833_v52  ;;  %v12267_v11 = vld [vmem:[%s15144_s15 + $0x220] ss:$16 sps:$4 sm:$0xff]   ;;  %v12324_v42 = vld [vmem:[%s15144_s15 + $0x348] ss:$16 sps:$4 sm:$0xff]   ;;  %v12329_v53 = vld [vmem:[%s15144_s15 + $0x364] ss:$16 sps:$4 sm:$0xff]  }
0x530d   :  { %v7838_v18 = vpack.c.bf16 %v7834_v63, %v7834_v63  ;;  %v7840_v10 = vpack.c.bf16 %v7836_v3, %v7836_v3  ;;  %v12332_v60 = vld [vmem:[%s15144_s15 + $0x36c] ss:$16 sps:$4 sm:$0xff]   ;;  %v12327_v16 = vld [vmem:[%s15144_s15 + $0x360] ss:$16 sps:$4 sm:$0xff]   ;;  %v12330_v47 = vld [vmem:[%s15144_s15 + $0x368] ss:$16 sps:$4 sm:$0xff]  }
0x530e   :  { %v12335_v24 = vld [vmem:[%s15144_s15 + $0x384] ss:$16 sps:$4 sm:$0xff]   ;;  %v12338_v6 = vld [vmem:[%s15144_s15 + $0x38c] ss:$16 sps:$4 sm:$0xff]   ;;  %v12333_v12 = vld [vmem:[%s15144_s15 + $0x380] ss:$16 sps:$4 sm:$0xff]  }
0x530f   :  { %8663 = vmatprep.mubr.bf16.mxu1 %v7838_v18  ;;  %8745 = vmatprep.mubr.bf16.mxu0 %v7838_v18  ;;  %v12336_v14 = vld [vmem:[%s15144_s15 + $0x388] ss:$16 sps:$4 sm:$0xff]   ;;  %v12341_v56 = vld [vmem:[%s15144_s15 + $0x3a4] ss:$16 sps:$4 sm:$0xff]   ;;  %v12344_v61 = vld [vmem:[%s15144_s15 + $0x3ac] ss:$16 sps:$4 sm:$0xff]  }
0x5310   :  { %8664 = vmatmul.mubr.bf16.vlgmr.msra.gmra.mrb[80].mxu1 %v7837_v36  ;;  %8746 = vmatmul.mubr.bf16.vlgmr.msra.gmra.mrb[76].mxu0 %v7837_v36  ;;  %v12339_v28 = vld [vmem:[%s15144_s15 + $0x3a0] ss:$16 sps:$4 sm:$0xff]   ;;  %v12342_v52 = vld [vmem:[%s15144_s15 + $0x3a8] ss:$16 sps:$4 sm:$0xff]   ;;  %v12347_v63 = vld [vmem:[%s15144_s15 + $0x3c4] ss:$16 sps:$4 sm:$0xff]  }
0x5311   :  { %8673 = vmatpush1.bf16.msra.mxu1 %v12261_v50  ;;  %8755 = vmatpush1.bf16.msra.mxu0 %v12264_v2  ;;  %v12350_v3 = vld [vmem:[%s15144_s15 + $0x3cc] ss:$16 sps:$4 sm:$0xff]   ;;  %v12345_v18 = vld [vmem:[%s15144_s15 + $0x3c0] ss:$16 sps:$4 sm:$0xff]   ;;  %v12348_v50 = vld [vmem:[%s15144_s15 + $0x3c8] ss:$16 sps:$4 sm:$0xff]  }
0x5312   :  { %8704 = vmatprep.mubr.bf16.mxu1 %v7840_v10  ;;  %8786 = vmatprep.mubr.bf16.mxu0 %v7840_v10  ;;  %v12353_v2 = vld [vmem:[%s15144_s15 + $0x3e4] ss:$16 sps:$4 sm:$0xff]   ;;  %v12356_v36 = vld [vmem:[%s15144_s15 + $0x3ec] ss:$16 sps:$4 sm:$0xff]  }
0x5313   :  { %8674 = vmatprep.subr.bf16.mxu1 %v12269_v8  ;;  %8756 = vmatprep.subr.bf16.mxu0 %v12272_v9  ;;  %v12351_v8 = vld [vmem:[%s15144_s15 + $0x3e0] ss:$16 sps:$4 sm:$0xff]   ;;  %v12354_v9 = vld [vmem:[%s15144_s15 + $0x3e8] ss:$16 sps:$4 sm:$0xff]   ;;  %v12359_v10 = vld [vmem:[%s15146_s17 + $0x4] ss:$16 sps:$4 sm:$0xff]  }
0x5315   :  { %8675 = vmatpush1.bf16.msra.mxu1 %v12267_v11  ;;  %8757 = vmatpush1.bf16.msra.mxu0 %v12270_v1  ;;  %v12362_v11 = vld [vmem:[%s15146_s17 + $0xc] ss:$16 sps:$4 sm:$0xff]   ;;  %v12357_v1 = vld [vmem:[%s15146_s17] ss:$16 sps:$4 sm:$0xff]  }
0x5316   :  { %8676 = vmatprep.subr.bf16.mxu1 %v12275_v40  ;;  %8758 = vmatprep.subr.bf16.mxu0 %v12278_v58  ;;  %v12360_v40 = vld [vmem:[%s15146_s17 + $0x8] ss:$16 sps:$4 sm:$0xff]   ;;  %v7839_v58 = vpack.c.bf16 %v14510_v62, %v14510_v62 }
0x5317   :  { %v12366_v62 = vld [vmem:[%s15146_s17 + $0x28] ss:$16 sps:$4 sm:$0xff]  }
0x5319   :  { %8677 = vmatpush1.bf16.msra.mxu1 %v12273_v13  ;;  %8759 = vmatpush1.bf16.msra.mxu0 %v12276_v37  ;;  %v12365_v13 = vld [vmem:[%s15146_s17 + $0x24] ss:$16 sps:$4 sm:$0xff]   ;;  %v12368_v37 = vld [vmem:[%s15146_s17 + $0x2c] ss:$16 sps:$4 sm:$0xff]  }
0x531a   :  { %8678 = vmatprep.subr.bf16.mxu1 %v12281_v55  ;;  %8760 = vmatprep.subr.bf16.mxu0 %v12284_v19  ;;  %v12363_v55 = vld [vmem:[%s15146_s17 + $0x20] ss:$16 sps:$4 sm:$0xff]   ;;  %v12371_v19 = vld [vmem:[%s15146_s17 + $0x44] ss:$16 sps:$4 sm:$0xff]  }
0x531d   :  { %8679 = vmatpush1.bf16.msra.mxu1 %v12279_v21  ;;  %8761 = vmatpush1.bf16.msra.mxu0 %v12282_v15  ;;  %v12374_v21 = vld [vmem:[%s15146_s17 + $0x4c] ss:$16 sps:$4 sm:$0xff]   ;;  %v12369_v15 = vld [vmem:[%s15146_s17 + $0x40] ss:$16 sps:$4 sm:$0xff]  }
0x531e   :  { %8680 = vmatprep.subr.bf16.mxu1 %v12287_v44  ;;  %8762 = vmatprep.subr.bf16.mxu0 %v12290_v27  ;;  %v12372_v44 = vld [vmem:[%s15146_s17 + $0x48] ss:$16 sps:$4 sm:$0xff]   ;;  %v12377_v27 = vld [vmem:[%s15146_s17 + $0x64] ss:$16 sps:$4 sm:$0xff]  }
0x5321   :  { %8681 = vmatpush1.bf16.msra.mxu1 %v12285_v32  ;;  %8763 = vmatpush1.bf16.msra.mxu0 %v12288_v59  ;;  %v12380_v32 = vld [vmem:[%s15146_s17 + $0x6c] ss:$16 sps:$4 sm:$0xff]   ;;  %v12375_v59 = vld [vmem:[%s15146_s17 + $0x60] ss:$16 sps:$4 sm:$0xff]  }
0x5322   :  { %8682 = vmatprep.subr.bf16.mxu1 %v12293_v38  ;;  %8764 = vmatprep.subr.bf16.mxu0 %v12296_v41  ;;  %v12378_v38 = vld [vmem:[%s15146_s17 + $0x68] ss:$16 sps:$4 sm:$0xff]   ;;  %v12383_v41 = vld [vmem:[%s15146_s17 + $0x84] ss:$16 sps:$4 sm:$0xff]  }
0x5325   :  { %8683 = vmatpush1.bf16.msra.mxu1 %v12291_v46  ;;  %8765 = vmatpush1.bf16.msra.mxu0 %v12294_v0  ;;  %v12386_v46 = vld [vmem:[%s15146_s17 + $0x8c] ss:$16 sps:$4 sm:$0xff]   ;;  %v12381_v0 = vld [vmem:[%s15146_s17 + $0x80] ss:$16 sps:$4 sm:$0xff]  }
0x5326   :  { %8684 = vmatprep.subr.bf16.mxu1 %v12299_v5  ;;  %8766 = vmatprep.subr.bf16.mxu0 %v12302_v45  ;;  %v12384_v5 = vld [vmem:[%s15146_s17 + $0x88] ss:$16 sps:$4 sm:$0xff]   ;;  %v12389_v45 = vld [vmem:[%s15146_s17 + $0xa4] ss:$16 sps:$4 sm:$0xff]  }
0x5329   :  { %8685 = vmatpush1.bf16.msra.mxu1 %v12297_v35  ;;  %8767 = vmatpush1.bf16.msra.mxu0 %v12300_v54  ;;  %v12392_v35 = vld [vmem:[%s15146_s17 + $0xac] ss:$16 sps:$4 sm:$0xff]   ;;  %v12387_v54 = vld [vmem:[%s15146_s17 + $0xa0] ss:$16 sps:$4 sm:$0xff]  }
0x532a   :  { %8686 = vmatprep.subr.bf16.mxu1 %v12305_v20  ;;  %8768 = vmatprep.subr.bf16.mxu0 %v12308_v4  ;;  %v12390_v20 = vld [vmem:[%s15146_s17 + $0xa8] ss:$16 sps:$4 sm:$0xff]   ;;  %v12395_v4 = vld [vmem:[%s15146_s17 + $0xc4] ss:$16 sps:$4 sm:$0xff]  }
0x532d   :  { %8687 = vmatpush1.bf16.msra.mxu1 %v12303_v26  ;;  %8769 = vmatpush1.bf16.msra.mxu0 %v12306_v33  ;;  %v12398_v26 = vld [vmem:[%s15146_s17 + $0xcc] ss:$16 sps:$4 sm:$0xff]   ;;  %v12393_v33 = vld [vmem:[%s15146_s17 + $0xc0] ss:$16 sps:$4 sm:$0xff]  }
0x532e   :  { %8688 = vmatprep.subr.bf16.mxu1 %v12311_v43  ;;  %8770 = vmatprep.subr.bf16.mxu0 %v12314_v39  ;;  %v12396_v43 = vld [vmem:[%s15146_s17 + $0xc8] ss:$16 sps:$4 sm:$0xff]   ;;  %v12401_v39 = vld [vmem:[%s15146_s17 + $0xe4] ss:$16 sps:$4 sm:$0xff]  }
0x5331   :  { %8689 = vmatpush1.bf16.msra.mxu1 %v12309_v22  ;;  %8771 = vmatpush1.bf16.msra.mxu0 %v12312_v34  ;;  %v12404_v22 = vld [vmem:[%s15146_s17 + $0xec] ss:$16 sps:$4 sm:$0xff]   ;;  %v12399_v34 = vld [vmem:[%s15146_s17 + $0xe0] ss:$16 sps:$4 sm:$0xff]  }
0x5332   :  { %8690 = vmatprep.subr.bf16.mxu1 %v12317_v25  ;;  %8772 = vmatprep.subr.bf16.mxu0 %v12320_v23  ;;  %v12402_v25 = vld [vmem:[%s15146_s17 + $0xe8] ss:$16 sps:$4 sm:$0xff]   ;;  %v12407_v23 = vld [vmem:[%s15146_s17 + $0x104] ss:$16 sps:$4 sm:$0xff]  }
0x5335   :  { %8691 = vmatpush1.bf16.msra.mxu1 %v12315_v7  ;;  %8773 = vmatpush1.bf16.msra.mxu0 %v12318_v48  ;;  %v12410_v7 = vld [vmem:[%s15146_s17 + $0x10c] ss:$16 sps:$4 sm:$0xff]   ;;  %v12405_v48 = vld [vmem:[%s15146_s17 + $0x100] ss:$16 sps:$4 sm:$0xff]  }
0x5336   :  { %8692 = vmatprep.subr.bf16.mxu1 %v12323_v49  ;;  %8774 = vmatprep.subr.bf16.mxu0 %v12326_v57  ;;  %v12408_v49 = vld [vmem:[%s15146_s17 + $0x108] ss:$16 sps:$4 sm:$0xff]   ;;  %v12413_v57 = vld [vmem:[%s15146_s17 + $0x124] ss:$16 sps:$4 sm:$0xff]  }
0x5339   :  { %8693 = vmatpush1.bf16.msra.mxu1 %v12321_v51  ;;  %8775 = vmatpush1.bf16.msra.mxu0 %v12324_v42  ;;  %v12416_v51 = vld [vmem:[%s15146_s17 + $0x12c] ss:$16 sps:$4 sm:$0xff]   ;;  %v12411_v42 = vld [vmem:[%s15146_s17 + $0x120] ss:$16 sps:$4 sm:$0xff]  }
0x533a   :  { %8694 = vmatprep.subr.bf16.mxu1 %v12329_v53  ;;  %8776 = vmatprep.subr.bf16.mxu0 %v12332_v60  ;;  %v12414_v53 = vld [vmem:[%s15146_s17 + $0x128] ss:$16 sps:$4 sm:$0xff]   ;;  %v12419_v60 = vld [vmem:[%s15146_s17 + $0x144] ss:$16 sps:$4 sm:$0xff]  }
0x533d   :  { %8695 = vmatpush1.bf16.msra.mxu1 %v12327_v16  ;;  %8777 = vmatpush1.bf16.msra.mxu0 %v12330_v47  ;;  %v12422_v16 = vld [vmem:[%s15146_s17 + $0x14c] ss:$16 sps:$4 sm:$0xff]   ;;  %v12417_v47 = vld [vmem:[%s15146_s17 + $0x140] ss:$16 sps:$4 sm:$0xff]  }
0x533e   :  { %8696 = vmatprep.subr.bf16.mxu1 %v12335_v24  ;;  %8778 = vmatprep.subr.bf16.mxu0 %v12338_v6  ;;  %v12420_v24 = vld [vmem:[%s15146_s17 + $0x148] ss:$16 sps:$4 sm:$0xff]   ;;  %v12425_v6 = vld [vmem:[%s15146_s17 + $0x164] ss:$16 sps:$4 sm:$0xff]  }
0x5341   :  { %8697 = vmatpush1.bf16.msra.mxu1 %v12333_v12  ;;  %8779 = vmatpush1.bf16.msra.mxu0 %v12336_v14  ;;  %v12428_v12 = vld [vmem:[%s15146_s17 + $0x16c] ss:$16 sps:$4 sm:$0xff]   ;;  %v12423_v14 = vld [vmem:[%s15146_s17 + $0x160] ss:$16 sps:$4 sm:$0xff]  }
0x5342   :  { %8698 = vmatprep.subr.bf16.mxu1 %v12341_v56  ;;  %8780 = vmatprep.subr.bf16.mxu0 %v12344_v61  ;;  %v12426_v56 = vld [vmem:[%s15146_s17 + $0x168] ss:$16 sps:$4 sm:$0xff]   ;;  %v12431_v61 = vld [vmem:[%s15146_s17 + $0x184] ss:$16 sps:$4 sm:$0xff]  }
0x5345   :  { %8699 = vmatpush1.bf16.msra.mxu1 %v12339_v28  ;;  %8781 = vmatpush1.bf16.msra.mxu0 %v12342_v52  ;;  %v12434_v28 = vld [vmem:[%s15146_s17 + $0x18c] ss:$16 sps:$4 sm:$0xff]   ;;  %v12429_v52 = vld [vmem:[%s15146_s17 + $0x180] ss:$16 sps:$4 sm:$0xff]  }
0x5346   :  { %8700 = vmatprep.subr.bf16.mxu1 %v12347_v63  ;;  %8782 = vmatprep.subr.bf16.mxu0 %v12350_v3  ;;  %v12432_v63 = vld [vmem:[%s15146_s17 + $0x188] ss:$16 sps:$4 sm:$0xff]   ;;  %v12437_v3 = vld [vmem:[%s15146_s17 + $0x1a4] ss:$16 sps:$4 sm:$0xff]  }
0x5349   :  { %8701 = vmatpush1.bf16.msra.mxu1 %v12345_v18  ;;  %8783 = vmatpush1.bf16.msra.mxu0 %v12348_v50  ;;  %v12440_v18 = vld [vmem:[%s15146_s17 + $0x1ac] ss:$16 sps:$4 sm:$0xff]   ;;  %v12435_v50 = vld [vmem:[%s15146_s17 + $0x1a0] ss:$16 sps:$4 sm:$0xff]  }
0x534a   :  { %8702 = vmatprep.subr.bf16.mxu1 %v12353_v2  ;;  %8784 = vmatprep.subr.bf16.mxu0 %v12356_v36  ;;  %v12438_v2 = vld [vmem:[%s15146_s17 + $0x1a8] ss:$16 sps:$4 sm:$0xff]   ;;  %v12443_v36 = vld [vmem:[%s15146_s17 + $0x1c4] ss:$16 sps:$4 sm:$0xff]  }
0x534d   :  { %8703 = vmatpush1.bf16.msra.mxu1 %v12351_v8  ;;  %8785 = vmatpush1.bf16.msra.mxu0 %v12354_v9  ;;  %v12446_v8 = vld [vmem:[%s15146_s17 + $0x1cc] ss:$16 sps:$4 sm:$0xff]   ;;  %v12441_v9 = vld [vmem:[%s15146_s17 + $0x1c0] ss:$16 sps:$4 sm:$0xff]  }
0x534e   :  { %9589 = vmatprep.subr.bf16.mxu1 %v12359_v10  ;;  %9671 = vmatprep.subr.bf16.mxu0 %v12362_v11  ;;  %v12444_v10 = vld [vmem:[%s15146_s17 + $0x1c8] ss:$16 sps:$4 sm:$0xff]   ;;  %v12449_v11 = vld [vmem:[%s15146_s17 + $0x1e4] ss:$16 sps:$4 sm:$0xff]  }
0x5350   :  { %8705 = vmatmul.mubr.bf16.vlgmr.msra.gmra.mrb[80].mxu1 %v7839_v58  ;;  %8787 = vmatmul.mubr.bf16.vlgmr.msra.gmra.mrb[76].mxu0 %v7839_v58  ;;  %v12450_v58 = vld [vmem:[%s15146_s17 + $0x1e8] ss:$16 sps:$4 sm:$0xff]  }
0x5351   :  { %9590 = vmatpush1.bf16.msra.mxu1 %v12357_v1  ;;  %9672 = vmatpush1.bf16.msra.mxu0 %v12360_v40  ;;  %v12452_v1 = vld [vmem:[%s15146_s17 + $0x1ec] ss:$16 sps:$4 sm:$0xff]   ;;  %v12447_v40 = vld [vmem:[%s15146_s17 + $0x1e0] ss:$16 sps:$4 sm:$0xff]  }
0x5352   :  { %9591 = vmatprep.subr.bf16.mxu1 %v12365_v13  ;;  %9673 = vmatprep.subr.bf16.mxu0 %v12368_v37  ;;  %v12455_v13 = vld [vmem:[%s15146_s17 + $0x204] ss:$16 sps:$4 sm:$0xff]   ;;  %v12458_v37 = vld [vmem:[%s15146_s17 + $0x20c] ss:$16 sps:$4 sm:$0xff]  }
0x5355   :  { %9592 = vmatpush1.bf16.msra.mxu1 %v12363_v55  ;;  %9674 = vmatpush1.bf16.msra.mxu0 %v12366_v62  ;;  %v14903_v55 = vld [vmem:[%s15145_s16] sm:$0xf] }
0x5356   :  { %9593 = vmatprep.subr.bf16.mxu1 %v12371_v19  ;;  %9675 = vmatprep.subr.bf16.mxu0 %v12374_v21  ;;  %v7974_v62 = vrot.slane %v14903_v55, %v13555_v29  ;;  %v7978_v19 = vrot.slane %v14903_v55, %v13558_v30  ;;  %v7986_v21 = vrot.slane %v14903_v55, %v13561_v31 }
0x5359   :  { %9594 = vmatpush1.bf16.msra.mxu1 %v12369_v15  ;;  %9676 = vmatpush1.bf16.msra.mxu0 %v12372_v44 }
0x535a   :  { %9595 = vmatprep.subr.bf16.mxu1 %v12377_v27  ;;  %9677 = vmatprep.subr.bf16.mxu0 %v12380_v32 }
0x535d   :  { %9596 = vmatpush1.bf16.msra.mxu1 %v12375_v59  ;;  %9678 = vmatpush1.bf16.msra.mxu0 %v12378_v38 }
0x535e   :  { %9597 = vmatprep.subr.bf16.mxu1 %v12383_v41  ;;  %9679 = vmatprep.subr.bf16.mxu0 %v12386_v46 }
0x5361   :  { %9598 = vmatpush1.bf16.msra.mxu1 %v12381_v0  ;;  %9680 = vmatpush1.bf16.msra.mxu0 %v12384_v5 }
0x5362   :  { %9599 = vmatprep.subr.bf16.mxu1 %v12389_v45  ;;  %9681 = vmatprep.subr.bf16.mxu0 %v12392_v35 }
0x5365   :  { %9600 = vmatpush1.bf16.msra.mxu1 %v12387_v54  ;;  %9682 = vmatpush1.bf16.msra.mxu0 %v12390_v20  ;;  %v12453_v54 = vld [vmem:[%s15146_s17 + $0x200] ss:$16 sps:$4 sm:$0xff]   ;;  %v12456_v20 = vld [vmem:[%s15146_s17 + $0x208] ss:$16 sps:$4 sm:$0xff]  }
0x5366   :  { %9601 = vmatprep.subr.bf16.mxu1 %v12395_v4  ;;  %9683 = vmatprep.subr.bf16.mxu0 %v12398_v26  ;;  %v12461_v26 = vld [vmem:[%s15146_s17 + $0x224] ss:$16 sps:$4 sm:$0xff]  }
0x5369   :  { %9602 = vmatpush1.bf16.msra.mxu1 %v12393_v33  ;;  %9684 = vmatpush1.bf16.msra.mxu0 %v12396_v43  ;;  %v12464_v33 = vld [vmem:[%s15146_s17 + $0x22c] ss:$16 sps:$4 sm:$0xff]  }
0x536a   :  { %9603 = vmatprep.subr.bf16.mxu1 %v12401_v39  ;;  %9685 = vmatprep.subr.bf16.mxu0 %v12404_v22  ;;  %v12459_v39 = vld [vmem:[%s15146_s17 + $0x220] ss:$16 sps:$4 sm:$0xff]   ;;  %v12462_v22 = vld [vmem:[%s15146_s17 + $0x228] ss:$16 sps:$4 sm:$0xff]  }
0x536d   :  { %9604 = vmatpush1.bf16.msra.mxu1 %v12399_v34  ;;  %9686 = vmatpush1.bf16.msra.mxu0 %v12402_v25  ;;  %v12467_v34 = vld [vmem:[%s15146_s17 + $0x244] ss:$16 sps:$4 sm:$0xff]   ;;  %v12470_v25 = vld [vmem:[%s15146_s17 + $0x24c] ss:$16 sps:$4 sm:$0xff]  }
0x536e   :  { %9605 = vmatprep.subr.bf16.mxu1 %v12407_v23  ;;  %9687 = vmatprep.subr.bf16.mxu0 %v12410_v7  ;;  %v12465_v23 = vld [vmem:[%s15146_s17 + $0x240] ss:$16 sps:$4 sm:$0xff]   ;;  %v12468_v7 = vld [vmem:[%s15146_s17 + $0x248] ss:$16 sps:$4 sm:$0xff]  }
0x5371   :  { %9606 = vmatpush1.bf16.msra.mxu1 %v12405_v48  ;;  %9688 = vmatpush1.bf16.msra.mxu0 %v12408_v49  ;;  %v12473_v48 = vld [vmem:[%s15146_s17 + $0x264] ss:$16 sps:$4 sm:$0xff]   ;;  %v12476_v49 = vld [vmem:[%s15146_s17 + $0x26c] ss:$16 sps:$4 sm:$0xff]  }
0x5372   :  { %9607 = vmatprep.subr.bf16.mxu1 %v12413_v57  ;;  %9689 = vmatprep.subr.bf16.mxu0 %v12416_v51  ;;  %v12471_v57 = vld [vmem:[%s15146_s17 + $0x260] ss:$16 sps:$4 sm:$0xff]   ;;  %v12474_v51 = vld [vmem:[%s15146_s17 + $0x268] ss:$16 sps:$4 sm:$0xff]  }
0x5375   :  { %9608 = vmatpush1.bf16.msra.mxu1 %v12411_v42  ;;  %9690 = vmatpush1.bf16.msra.mxu0 %v12414_v53  ;;  %v12479_v42 = vld [vmem:[%s15146_s17 + $0x284] ss:$16 sps:$4 sm:$0xff]   ;;  %v12482_v53 = vld [vmem:[%s15146_s17 + $0x28c] ss:$16 sps:$4 sm:$0xff]  }
0x5376   :  { %9609 = vmatprep.subr.bf16.mxu1 %v12419_v60  ;;  %9691 = vmatprep.subr.bf16.mxu0 %v12422_v16  ;;  %v12477_v60 = vld [vmem:[%s15146_s17 + $0x280] ss:$16 sps:$4 sm:$0xff]   ;;  %v12480_v16 = vld [vmem:[%s15146_s17 + $0x288] ss:$16 sps:$4 sm:$0xff]  }
0x5379   :  { %9610 = vmatpush1.bf16.msra.mxu1 %v12417_v47  ;;  %9692 = vmatpush1.bf16.msra.mxu0 %v12420_v24  ;;  %v12485_v47 = vld [vmem:[%s15146_s17 + $0x2a4] ss:$16 sps:$4 sm:$0xff]   ;;  %v12488_v24 = vld [vmem:[%s15146_s17 + $0x2ac] ss:$16 sps:$4 sm:$0xff]  }
0x537a   :  { %9611 = vmatprep.subr.bf16.mxu1 %v12425_v6  ;;  %9693 = vmatprep.subr.bf16.mxu0 %v12428_v12  ;;  %v12483_v6 = vld [vmem:[%s15146_s17 + $0x2a0] ss:$16 sps:$4 sm:$0xff]   ;;  %v12486_v12 = vld [vmem:[%s15146_s17 + $0x2a8] ss:$16 sps:$4 sm:$0xff]  }
0x537d   :  { %9612 = vmatpush1.bf16.msra.mxu1 %v12423_v14  ;;  %9694 = vmatpush1.bf16.msra.mxu0 %v12426_v56  ;;  %v12491_v14 = vld [vmem:[%s15146_s17 + $0x2c4] ss:$16 sps:$4 sm:$0xff]   ;;  %v12494_v56 = vld [vmem:[%s15146_s17 + $0x2cc] ss:$16 sps:$4 sm:$0xff]  }
0x537e   :  { %9613 = vmatprep.subr.bf16.mxu1 %v12431_v61  ;;  %9695 = vmatprep.subr.bf16.mxu0 %v12434_v28  ;;  %v12489_v61 = vld [vmem:[%s15146_s17 + $0x2c0] ss:$16 sps:$4 sm:$0xff]   ;;  %v12492_v28 = vld [vmem:[%s15146_s17 + $0x2c8] ss:$16 sps:$4 sm:$0xff]  }
0x5381   :  { %9614 = vmatpush1.bf16.msra.mxu1 %v12429_v52  ;;  %9696 = vmatpush1.bf16.msra.mxu0 %v12432_v63  ;;  %v12497_v52 = vld [vmem:[%s15146_s17 + $0x2e4] ss:$16 sps:$4 sm:$0xff]   ;;  %v12500_v63 = vld [vmem:[%s15146_s17 + $0x2ec] ss:$16 sps:$4 sm:$0xff]  }
0x5382   :  { %9615 = vmatprep.subr.bf16.mxu1 %v12437_v3  ;;  %9697 = vmatprep.subr.bf16.mxu0 %v12440_v18  ;;  %v12495_v3 = vld [vmem:[%s15146_s17 + $0x2e0] ss:$16 sps:$4 sm:$0xff]   ;;  %v12498_v18 = vld [vmem:[%s15146_s17 + $0x2e8] ss:$16 sps:$4 sm:$0xff]  }
0x5385   :  { %9616 = vmatpush1.bf16.msra.mxu1 %v12435_v50  ;;  %9698 = vmatpush1.bf16.msra.mxu0 %v12438_v2  ;;  %v12503_v50 = vld [vmem:[%s15146_s17 + $0x304] ss:$16 sps:$4 sm:$0xff]   ;;  %v12506_v2 = vld [vmem:[%s15146_s17 + $0x30c] ss:$16 sps:$4 sm:$0xff]  }
0x5386   :  { %9617 = vmatprep.subr.bf16.mxu1 %v12443_v36  ;;  %9699 = vmatprep.subr.bf16.mxu0 %v12446_v8  ;;  %v12501_v36 = vld [vmem:[%s15146_s17 + $0x300] ss:$16 sps:$4 sm:$0xff]   ;;  %v12504_v8 = vld [vmem:[%s15146_s17 + $0x308] ss:$16 sps:$4 sm:$0xff]  }
0x5389   :  { %9618 = vmatpush1.bf16.msra.mxu1 %v12441_v9  ;;  %9700 = vmatpush1.bf16.msra.mxu0 %v12444_v10  ;;  %v12509_v9 = vld [vmem:[%s15146_s17 + $0x324] ss:$16 sps:$4 sm:$0xff]   ;;  %v12512_v10 = vld [vmem:[%s15146_s17 + $0x32c] ss:$16 sps:$4 sm:$0xff]  }
0x538a   :  { %9619 = vmatprep.subr.bf16.mxu1 %v12449_v11  ;;  %9701 = vmatprep.subr.bf16.mxu0 %v12452_v1  ;;  %v12507_v11 = vld [vmem:[%s15146_s17 + $0x320] ss:$16 sps:$4 sm:$0xff]   ;;  %v12510_v1 = vld [vmem:[%s15146_s17 + $0x328] ss:$16 sps:$4 sm:$0xff]  }
0x538d   :  { %9620 = vmatpush1.bf16.msra.mxu1 %v12447_v40  ;;  %9702 = vmatpush1.bf16.msra.mxu0 %v12450_v58  ;;  %v12515_v40 = vld [vmem:[%s15146_s17 + $0x344] ss:$16 sps:$4 sm:$0xff]   ;;  %v12518_v58 = vld [vmem:[%s15146_s17 + $0x34c] ss:$16 sps:$4 sm:$0xff]  }
0x538e   :  { %9630 = vmatprep.subr.bf16.mxu1 %v12455_v13  ;;  %9712 = vmatprep.subr.bf16.mxu0 %v12458_v37  ;;  %v12513_v13 = vld [vmem:[%s15146_s17 + $0x340] ss:$16 sps:$4 sm:$0xff]   ;;  %v12516_v37 = vld [vmem:[%s15146_s17 + $0x348] ss:$16 sps:$4 sm:$0xff]  }
0x5423   :  { %v8706_v15 = vpop.f32.mrb[80].mxu1  ;;  %v14911_v44 = vpop.f32.mrb[76].mxu0 }
0x5424   :  { %v11738_v27 = vadd.f32 %v8706_v15, %v7974_v62  ;;  %v8708_v32 = vpop.f32.mrb[81].mxu1  ;;  %v8790_v59 = vpop.f32.mrb[77].mxu0  ;;  %v12521_v62 = vld [vmem:[%s15146_s17 + $0x364] ss:$16 sps:$4 sm:$0xff]   ;;  %v12522_v15 = vld [vmem:[%s15146_s17 + $0x368] ss:$16 sps:$4 sm:$0xff]  }
0x5425   :  { %v11739_v38 = vadd.f32 %v8708_v32, %v7978_v19  ;;  %v8710_v41 = vpop.f32.mrb[82].mxu1  ;;  %v8792_v46 = vpop.f32.mrb[78].mxu0  ;;  %v11741_v0 = vadd.f32 %v8790_v59, %v7986_v21  ;;  %v12524_v19 = vld [vmem:[%s15146_s17 + $0x36c] ss:$16 sps:$4 sm:$0xff]   ;;  %v12519_v21 = vld [vmem:[%s15146_s17 + $0x360] ss:$16 sps:$4 sm:$0xff]  }
0x5426   :  { %v8711_v5 = vpop.f32.mrb[83].mxu1  ;;  %v8793_v45 = vpop.f32.mrb[79].mxu0  ;;  %v8795_v4 = vpack.c.bf16 %v11738_v27, %v11738_v27  ;;  %v12527_v27 = vld [vmem:[%s15146_s17 + $0x384] ss:$16 sps:$4 sm:$0xff]   ;;  %v12530_v32 = vld [vmem:[%s15146_s17 + $0x38c] ss:$16 sps:$4 sm:$0xff]  }
0x5427   :  { %v8796_v35 = vpack.c.bf16 %v11739_v38, %v11739_v38  ;;  %v8798_v43 = vpack.c.bf16 %v11741_v0, %v11741_v0  ;;  %v12525_v59 = vld [vmem:[%s15146_s17 + $0x380] ss:$16 sps:$4 sm:$0xff]   ;;  %v12528_v38 = vld [vmem:[%s15146_s17 + $0x388] ss:$16 sps:$4 sm:$0xff]   ;;  %v12533_v41 = vld [vmem:[%s15146_s17 + $0x3a4] ss:$16 sps:$4 sm:$0xff]  }
0x5428   :  { %v12536_v46 = vld [vmem:[%s15146_s17 + $0x3ac] ss:$16 sps:$4 sm:$0xff]   ;;  %v12531_v0 = vld [vmem:[%s15146_s17 + $0x3a0] ss:$16 sps:$4 sm:$0xff]   ;;  %v12534_v5 = vld [vmem:[%s15146_s17 + $0x3a8] ss:$16 sps:$4 sm:$0xff]  }
0x5429   :  { %9621 = vmatprep.mubr.bf16.mxu1 %v8796_v35  ;;  %9703 = vmatprep.mubr.bf16.mxu0 %v8796_v35  ;;  %v12539_v45 = vld [vmem:[%s15146_s17 + $0x3c4] ss:$16 sps:$4 sm:$0xff]   ;;  %v12542_v35 = vld [vmem:[%s15146_s17 + $0x3cc] ss:$16 sps:$4 sm:$0xff]  }
0x542a   :  { %9622 = vmatmul.mubr.bf16.vlgmr.msra.gmra.mrb[84].mxu1 %v8795_v4  ;;  %9704 = vmatmul.mubr.bf16.vlgmr.msra.gmra.mrb[80].mxu0 %v8795_v4  ;;  %v7982_v4 = vrot.slane %v14903_v55, %v13545_v17  ;;  %v12546_v55 = vld [vmem:[%s15146_s17 + $0x3e8] ss:$16 sps:$4 sm:$0xff]  }
0x542b   :  { %9631 = vmatpush1.bf16.msra.mxu1 %v12453_v54  ;;  %9713 = vmatpush1.bf16.msra.mxu0 %v12456_v20  ;;  %v12537_v54 = vld [vmem:[%s15146_s17 + $0x3c0] ss:$16 sps:$4 sm:$0xff]   ;;  %v12540_v20 = vld [vmem:[%s15146_s17 + $0x3c8] ss:$16 sps:$4 sm:$0xff]  }
0x542c   :  { %9662 = vmatprep.mubr.bf16.mxu1 %v8798_v43  ;;  %9744 = vmatprep.mubr.bf16.mxu0 %v8798_v43  ;;  %v12543_v43 = vld [vmem:[%s15146_s17 + $0x3e0] ss:$16 sps:$4 sm:$0xff]  }
0x542d   :  { %9632 = vmatprep.subr.bf16.mxu1 %v12461_v26  ;;  %9714 = vmatprep.subr.bf16.mxu0 %v12464_v33  ;;  %v12545_v26 = vld [vmem:[%s15146_s17 + $0x3e4] ss:$16 sps:$4 sm:$0xff]   ;;  %v12548_v33 = vld [vmem:[%s15146_s17 + $0x3ec] ss:$16 sps:$4 sm:$0xff]  }
0x542f   :  { %9633 = vmatpush1.bf16.msra.mxu1 %v12459_v39  ;;  %9715 = vmatpush1.bf16.msra.mxu0 %v12462_v22  ;;  %v11740_v39 = vadd.f32 %v14911_v44, %v7982_v4 }
0x5430   :  { %9634 = vmatprep.subr.bf16.mxu1 %v12467_v34  ;;  %9716 = vmatprep.subr.bf16.mxu0 %v12470_v25  ;;  %v8927_v34 = vld [vmem:[#allocation23] sm:$0xf] }
0x5431   :  { %v8797_v22 = vpack.c.bf16 %v11740_v39, %v11740_v39  ;;  %v8932_v25 = vrot.slane %v8927_v34, %v13555_v29  ;;  %v8944_v44 = vrot.slane %v8927_v34, %v13561_v31 }
0x5433   :  { %9635 = vmatpush1.bf16.msra.mxu1 %v12465_v23  ;;  %9717 = vmatpush1.bf16.msra.mxu0 %v12468_v7  ;;  %v9753_v23 = vld [vmem:[%s15148_s19] sm:$0xff]  ;;  %v8940_v7 = vrot.slane %v8927_v34, %v13545_v17 }
0x5434   :  { %9636 = vmatprep.subr.bf16.mxu1 %v12473_v48  ;;  %9718 = vmatprep.subr.bf16.mxu0 %v12476_v49  ;;  %v8936_v48 = vrot.slane %v8927_v34, %v13558_v30  ;;  %v9754_v49 = vld [vmem:[%s15148_s19 + $0x8] sm:$0xff]  ;;  %s13165_s19 = smov [#allocation24]  }
0x5435   :  { %s9798_s0 = sshll.u32 %s13165_s19, 4  ;;  %s9799_s0 = int_to_ptr.vmem [resolvable:$true] %s9798_s0 }
0x5436   :  { %s13102_s24 = scalar_lea.vmem %s9799_s0, 16  ;;  %s13106_s5 = scalar_lea.vmem %s9799_s0, 32 }
0x5437   :  { %9637 = vmatpush1.bf16.msra.mxu1 %v12471_v57  ;;  %9719 = vmatpush1.bf16.msra.mxu0 %v12474_v51  ;;  %p13103_p6 = scmp.ne.s32.totalorder %s9799_s0, %s13102_s24  ;;  %p13107_p7 = scmp.lt.s32.totalorder %s9799_s0, %s9799_s0 }
0x5438   :  { %9638 = vmatprep.subr.bf16.mxu1 %v12479_v42  ;;  %9720 = vmatprep.subr.bf16.mxu0 %v12482_v53  ;;  %v9757_v42 = vcombine.high %v9753_v23, %v9753_v23  ;;  %p13108_p8 = scmp.lt.s32.totalorder %s13106_s5, %s13102_s24 }
0x543a   :  { %p13109_p9 = por %p13108_p8, %p13107_p7 }
0x543b   :  { %9639 = vmatpush1.bf16.msra.mxu1 %v12477_v60  ;;  %9721 = vmatpush1.bf16.msra.mxu0 %v12480_v16 }
0x543c   :  { %9640 = vmatprep.subr.bf16.mxu1 %v12485_v47  ;;  %9722 = vmatprep.subr.bf16.mxu0 %v12488_v24  ;;  %p13110_p10 = pnand %p13109_p9, %p13103_p6 }
0x543f   :  { %9641 = vmatpush1.bf16.msra.mxu1 %v12483_v6  ;;  %9723 = vmatpush1.bf16.msra.mxu0 %v12486_v12  ;;  %v9758_v6 = vcombine.high %v9754_v49, %v9754_v49 }
0x5440   :  { %9642 = vmatprep.subr.bf16.mxu1 %v12491_v14  ;;  %9724 = vmatprep.subr.bf16.mxu0 %v12494_v56 }
0x5443   :  { %9643 = vmatpush1.bf16.msra.mxu1 %v12489_v61  ;;  %9725 = vmatpush1.bf16.msra.mxu0 %v12492_v28 }
0x5444   :  { %9644 = vmatprep.subr.bf16.mxu1 %v12497_v52  ;;  %9726 = vmatprep.subr.bf16.mxu0 %v12500_v63 }
0x5447   :  { %9645 = vmatpush1.bf16.msra.mxu1 %v12495_v3  ;;  %9727 = vmatpush1.bf16.msra.mxu0 %v12498_v18 }
0x5448   :  { %9646 = vmatprep.subr.bf16.mxu1 %v12503_v50  ;;  %9728 = vmatprep.subr.bf16.mxu0 %v12506_v2 }
0x544b   :  { %9647 = vmatpush1.bf16.msra.mxu1 %v12501_v36  ;;  %9729 = vmatpush1.bf16.msra.mxu0 %v12504_v8 }
0x544c   :  { %9648 = vmatprep.subr.bf16.mxu1 %v12509_v9  ;;  %9730 = vmatprep.subr.bf16.mxu0 %v12512_v10 }
0x544f   :  { %9649 = vmatpush1.bf16.msra.mxu1 %v12507_v11  ;;  %9731 = vmatpush1.bf16.msra.mxu0 %v12510_v1 }
0x5450   :  { %9650 = vmatprep.subr.bf16.mxu1 %v12515_v40  ;;  %9732 = vmatprep.subr.bf16.mxu0 %v12518_v58 }
0x5453   :  { %9651 = vmatpush1.bf16.msra.mxu1 %v12513_v13  ;;  %9733 = vmatpush1.bf16.msra.mxu0 %v12516_v37  ;;  %v9782_v13 = vld [vmem:[#allocation2] sm:$0x1] }
0x5454   :  { %9652 = vmatprep.subr.bf16.mxu1 %v12521_v62  ;;  %9734 = vmatprep.subr.bf16.mxu0 %v12524_v19 }
0x5457   :  { %9653 = vmatpush1.bf16.msra.mxu1 %v12519_v21  ;;  %9735 = vmatpush1.bf16.msra.mxu0 %v12522_v15 }
0x5458   :  { %9654 = vmatprep.subr.bf16.mxu1 %v12527_v27  ;;  %9736 = vmatprep.subr.bf16.mxu0 %v12530_v32 }
0x545b   :  { %9655 = vmatpush1.bf16.msra.mxu1 %v12525_v59  ;;  %9737 = vmatpush1.bf16.msra.mxu0 %v12528_v38 }
0x545c   :  { %9656 = vmatprep.subr.bf16.mxu1 %v12533_v41  ;;  %9738 = vmatprep.subr.bf16.mxu0 %v12536_v46 }
0x545f   :  { %9657 = vmatpush1.bf16.msra.mxu1 %v12531_v0  ;;  %9739 = vmatpush1.bf16.msra.mxu0 %v12534_v5 }
0x5460   :  { %9658 = vmatprep.subr.bf16.mxu1 %v12539_v45  ;;  %9740 = vmatprep.subr.bf16.mxu0 %v12542_v35 }
0x5463   :  { %9659 = vmatpush1.bf16.msra.mxu1 %v12537_v54  ;;  %9741 = vmatpush1.bf16.msra.mxu0 %v12540_v20 }
0x5464   :  { %9660 = vmatprep.subr.bf16.mxu1 %v12545_v26  ;;  %9742 = vmatprep.subr.bf16.mxu0 %v12548_v33 }
0x5467   :  { %9661 = vmatpush1.bf16.msra.mxu1 %v12543_v43  ;;  %9743 = vmatpush1.bf16.msra.mxu0 %v12546_v55 }
0x546a   :  { %9663 = vmatmul.mubr.bf16.vlgmr.msra.gmra.mrb[84].mxu1 %v8797_v22  ;;  %9745 = vmatmul.mubr.bf16.vlgmr.msra.gmra.mrb[80].mxu0 %v8797_v22 }
0x553d   :  { %v9664_v57 = vpop.f32.mrb[84].mxu1  ;;  %v9746_v51 = vpop.f32.mrb[80].mxu0 }
0x553e   :  { %v11742_v53 = vadd.f32 %v9664_v57, %v8932_v25  ;;  %v11744_v60 = vadd.f32 %v9746_v51, %v8940_v7  ;;  %v9666_v29 = vpop.f32.mrb[85].mxu1  ;;  %v9748_v16 = vpop.f32.mrb[81].mxu0 }
0x553f   :  { %v11743_v47 = vadd.f32 %v9666_v29, %v8936_v48  ;;  %v11745_v24 = vadd.f32 %v9748_v16, %v8944_v44  ;;  %v9668_v17 = vpop.f32.mrb[86].mxu1  ;;  %v9750_v12 = vpop.f32.mrb[82].mxu0 }
0x5540   :  { %v9761_v30 = vmul.f32 %v11742_v53, %v9753_v23  ;;  %v9669_v14 = vpop.f32.mrb[87].mxu1  ;;  %v9751_v31 = vpop.f32.mrb[83].mxu0  ;;  %v9763_v56 = vmul.f32 %v11744_v60, %v9754_v49 }
0x5541   :  { %v9762_v61 = vmul.f32 %v11743_v47, %v9757_v42  ;;  %v9764_v63 = vmul.f32 %v11745_v24, %v9758_v6 }
0x5542   :  { %v9766_v28 = vsel %vm9765_vm7, %v9761_v30, 0.0  ;;  %v9769_v18 = vsel %vm9765_vm7, %v9763_v56, 0.0 }
0x5543   :  { %v9767_v52 = vsel %vm9765_vm7, %v9762_v61, 0.0  ;;  %v9771_v2 = vsel %vm9765_vm7, %v9764_v63, 0.0 }
0x5544   :  { %v9768_v3 = vadd.f32 %v9767_v52, %v9766_v28 }
0x5546   :  { %v9770_v50 = vadd.f32 %v9769_v18, %v9768_v3 }
0x5548   :  { %v9772_v36 = vadd.f32 %v9771_v2, %v9770_v50 }
0x554a   :  { %9773 = vadd.xlane.f32.xlu1 %v9772_v36 }
0x55d7   :  { %v9774_v8 = vpop.xlane.xlu1 %9773 }
0x55d8   :  { %v9775_v9 = vsel %vm9765_vm7, %v9774_v8, 0.0 }
0x55d9   :  { %v9776_v10 = vrot.slane %v9775_v9, 4 }
0x55db   :  { %v9777_v11 = vadd.f32 %v9776_v10, %v9775_v9 }
0x55dd   :  { %v9778_v1 = vrot.slane %v9777_v11, 2 }
0x55df   :  { %v9779_v40 = vadd.f32 %v9778_v1, %v9777_v11 }
0x55e1   :  { %v9780_v58 = vrot.slane %v9779_v40, 1 }
0x55e3   :  { %v9781_v37 = vadd.f32 %v9780_v58, %v9779_v40 }
0x55e5   :  { %v9783_v62 = vadd.f32 %v9782_v13, %v9781_v37 }
0x55e7   :  { %v10405_v19 = vmul.f32 -1.442695, %v9783_v62 }
0x55e9   :  { %12809 = vpow2.f32 %v10405_v19 }
0x55f3   :  { %v12810_v21 = vpop.eup %12809 }
0x55f4   :  { %v9787_v15 = vadd.f32 1.0, %v12810_v21 }
0x55f6   :  { %12811 = vrcp.f32 %v9787_v15 }
0x5600   :  { %v12812_v27 = vpop.eup %12811 }
0x5601   :  { %9791 = vst.msk [vmem:[#allocation24] sm:$0x1] %vm9790_vm8, %v12812_v27 }
0x5602   :  { %13113 = shalt.err (!%p13110_p10)
}
0x5603   :  { %s13114_s25 = scalar_lea.hbm %s15150_s21, 16 }
0x5604   :  { %p13115_p11 = scmp.ne.s32.totalorder %s15150_s21, %s13114_s25  ;;  %p13118_p12 = scmp.lt.u32.totalorder %s13114_s25, %s15150_s21 }
0x5606   :  { %p13120_p13 = pnand %p13118_p12, %p13115_p11 }
0x5608   :  { %13123 = shalt.err (!%p13120_p13)
}
0x5609   :  { %9801 = dma.vmem_to_hbm [thread:$0]  %s9799_s0, 16, %s15150_s21, [#allocation5]  }
0x560a   :  { %13138 = dma.done.wait [#allocation5], 16  }
0x560b   :  { %13139 = vsyncadd [#allocation5], 4294967280 }
0x560c   :  { %9805 = vsyncpa [#allocation4], 1 }
0x560d   :  { %9806 = vsyncpa [#allocation7], 1 }
0x560e   :  { %9807 = vsyncpa [#allocation10], 1 }
0x560f   :  { %9808 = vsyncpa [#allocation13], 1 }
0x5610   :  { %9809 = vsyncpa [#allocation16], 1 }
0x5611   :  { %9810 = vsyncpa [#allocation19], 1 }
0x5612   :  { %9811 = vsyncpa [#allocation22], 1 }
0x5613   :  { %9812 = vsyncpa [#allocation5], 1 }

</bundles_post_ra>
